<compile_context>
chip_gen: v7x
topology: tpu7x:2x2x1
jax: 0.10.0
libtpu: 0.0.40
codegen_flags: <defaults>
</compile_context>

<pallas_src>
import functools

import jax
import jax.numpy as jnp
from jax.experimental import pallas as pl
from jax.experimental.pallas import tpu as pltpu

K5 = 5  # conv kernel size used by all three conv layers


# ---------------------------------------------------------------------------
# Kernel A: 4-phase matmul + max-pool + bias + ReLU    (conv1 and conv3)
#   p??_ref : (1, M, K)   bf16   per-pooling-phase im2col patches
#   w_ref   : (K, Cout)   bf16   weights flattened in (kh, kw, cin) order
#   b_ref   : (1, Cout)   f32
#   o_ref   : (1, M, Cout)
# ---------------------------------------------------------------------------
def _phase_matmul_pool_kernel(p00_ref, p01_ref, p10_ref, p11_ref,
                              w_ref, b_ref, o_ref):
    w = w_ref[...]
    best = None
    for p_ref in (p00_ref, p01_ref, p10_ref, p11_ref):
        s = jnp.dot(p_ref[0], w, preferred_element_type=jnp.float32)
        best = s if best is None else jnp.maximum(best, s)
    res = jnp.maximum(best + b_ref[...], 0.0)            # bias + ReLU in f32
    o_ref[...] = res[None].astype(o_ref.dtype)


# ---------------------------------------------------------------------------
# Kernel B: direct conv + max-pool + bias + ReLU from stride-2 phase planes
#           (conv2: lane-aligned Cin=32 contraction, 25 unrolled MXU dots/phase)
#   x??_ref : (1, Hp, Wp, Cin) f32   phase plane  x[:, a::2, b::2, :]
#   w_ref   : (k*k, Cin, Cout) bf16
#   b_ref   : (1, Cout)        f32
#   o_ref   : (1, Po*Qo, Cout) bf16
# ---------------------------------------------------------------------------
def _direct_conv_pool_kernel(x00_ref, x01_ref, x10_ref, x11_ref,
                             w_ref, b_ref, o_ref, *, k, Po, Qo):
    planes = ((x00_ref, x01_ref), (x10_ref, x11_ref))
    cin = x00_ref.shape[-1]
    cout = w_ref.shape[-1]
    best = None
    for dy in (0, 1):                                    # pooling phase rows
        for dx in (0, 1):                                # pooling phase cols
            acc = jnp.zeros((Po * Qo, cout), jnp.float32)
            for kh in range(k):
                a, u = (dy + kh) % 2, (dy + kh) // 2
                for kw in range(k):
                    bb, v = (dx + kw) % 2, (dx + kw) // 2
                    piece = planes[a][bb][0, u:u + Po, v:v + Qo, :]
                    piece = piece.reshape(Po * Qo, cin).astype(jnp.bfloat16)
                    acc = acc + jnp.dot(piece, w_ref[kh * k + kw],
                                        preferred_element_type=jnp.float32)
            best = acc if best is None else jnp.maximum(best, acc)
    res = jnp.maximum(best + b_ref[...], 0.0)            # bias + ReLU in f32
    o_ref[...] = res[None].astype(o_ref.dtype)


# ---------------------------------------------------------------------------
# Kernel C: fused MLP head: softmax(ReLU(x@W1+b1) @ W2 + b2)
# ---------------------------------------------------------------------------
def _mlp_head_kernel(x_ref, w1_ref, b1_ref, w2_ref, b2_ref, o_ref):
    h = jnp.dot(x_ref[...], w1_ref[...], preferred_element_type=jnp.float32)
    h = jnp.maximum(h + b1_ref[...], 0.0).astype(jnp.bfloat16)       # fc1 + ReLU
    logits = jnp.dot(h, w2_ref[...], preferred_element_type=jnp.float32)
    logits = logits + b2_ref[...]                                    # fc2
    m = jnp.max(logits, axis=-1, keepdims=True)                      # softmax (f32)
    e = jnp.exp(logits - m)
    denom = jnp.sum(e, axis=-1, keepdims=True)
    o_ref[...] = (e * pl.reciprocal(denom, approx=True)).astype(o_ref.dtype)


# ---------------------------------------------------------------------------
# pallas_call wrappers
# ---------------------------------------------------------------------------
def _conv_compiler_params():
    return pltpu.CompilerParams(
        dimension_semantics=("parallel",),      # batch across TCs on v7x megacore
        vmem_limit_bytes=32 * 1024 * 1024)


def conv_pool_prepatched(patches, w_flat, bias, *, out_dtype):
    """relu(maxpool2x2(conv(x))) from 4 pre-built per-phase patch matrices."""
    n, m, kk = patches[0].shape
    cout = w_flat.shape[-1]
    bytes_acc = (sum(p.size * p.dtype.itemsize for p in patches)
                 + w_flat.size * w_flat.dtype.itemsize + bias.size * 4
                 + n * m * cout * jnp.dtype(out_dtype).itemsize)
    return pl.pallas_call(
        _phase_matmul_pool_kernel,
        out_shape=jax.ShapeDtypeStruct((n, m, cout), out_dtype),
        grid=(n,),
        in_specs=[pl.BlockSpec((1, m, kk), lambda i: (i, 0, 0)) for _ in range(4)]
        + [pl.BlockSpec((kk, cout), lambda i: (0, 0)),
           pl.BlockSpec((1, cout), lambda i: (0, 0))],
        out_specs=pl.BlockSpec((1, m, cout), lambda i: (i, 0, 0)),
        compiler_params=_conv_compiler_params(),
        cost_estimate=pl.CostEstimate(flops=2 * 4 * n * m * kk * cout,
                                      transcendentals=0,
                                      bytes_accessed=bytes_acc),
    )(*patches, w_flat, bias)


def conv_pool_direct(planes, w_taps, bias, *, k=K5):
    """relu(maxpool2x2(conv(x))) computed directly from stride-2 phase planes."""
    n, hp, wp, cin = planes[0].shape
    cout = w_taps.shape[-1]
    po, qo = hp - k // 2, wp - k // 2
    bytes_acc = (sum(p.size * p.dtype.itemsize for p in planes)
                 + w_taps.size * w_taps.dtype.itemsize + bias.size * 4
                 + n * po * qo * cout * 2)
    return pl.pallas_call(
        functools.partial(_direct_conv_pool_kernel, k=k, Po=po, Qo=qo),
        out_shape=jax.ShapeDtypeStruct((n, po * qo, cout), jnp.bfloat16),
        grid=(n,),
        in_specs=[pl.BlockSpec((1, hp, wp, cin), lambda i: (i, 0, 0, 0))
                  for _ in range(4)]
        + [pl.BlockSpec(tuple(w_taps.shape), lambda i: (0, 0, 0)),
           pl.BlockSpec((1, cout), lambda i: (0, 0))],
        out_specs=pl.BlockSpec((1, po * qo, cout), lambda i: (i, 0, 0)),
        compiler_params=_conv_compiler_params(),
        cost_estimate=pl.CostEstimate(
            flops=2 * 4 * k * k * n * po * qo * cin * cout,
            transcendentals=0, bytes_accessed=bytes_acc),
    )(*planes, w_taps, bias)


def mlp_head(x, w1, b1, w2, b2):
    n, d = x.shape
    h = w1.shape[-1]
    c = w2.shape[-1]
    bytes_acc = (x.size + w1.size + w2.size) * 2 + (b1.size + b2.size) * 4 + n * c * 4
    return pl.pallas_call(
        _mlp_head_kernel,
        out_shape=jax.ShapeDtypeStruct((n, c), jnp.float32),
        grid=(1,),
        in_specs=[pl.BlockSpec((n, d), lambda i: (0, 0)),
                  pl.BlockSpec((d, h), lambda i: (0, 0)),
                  pl.BlockSpec((1, h), lambda i: (0, 0)),
                  pl.BlockSpec((h, c), lambda i: (0, 0)),
                  pl.BlockSpec((1, c), lambda i: (0, 0))],
        out_specs=pl.BlockSpec((n, c), lambda i: (0, 0)),
        compiler_params=pltpu.CompilerParams(
            dimension_semantics=("arbitrary",),
            vmem_limit_bytes=32 * 1024 * 1024),
        cost_estimate=pl.CostEstimate(flops=2 * n * d * h + 2 * n * h * c,
                                      transcendentals=n * c,
                                      bytes_accessed=bytes_acc),
    )(x, w1, b1, w2, b2)


# ---------------------------------------------------------------------------
# Tiny XLA glue (operates on <= ~200 KB tensors)
# ---------------------------------------------------------------------------
def _phase_planes(x):
    """The four stride-2 phase planes x[:, a::2, b::2, :]."""
    return tuple(x[:, a::2, b::2, :] for a in (0, 1) for b in (0, 1))


def _phase_im2col(x, k):
    """Per-pooling-phase im2col; patch columns ordered (kh, kw, cin)."""
    n, hgt, wid, c = x.shape
    po, qo = (hgt - k + 1) // 2, (wid - k + 1) // 2
    patches = []
    for dy in (0, 1):
        for dx in (0, 1):
            cols = [x[:, dy + kh:dy + kh + 2 * po:2,
                        dx + kw:dx + kw + 2 * qo:2, :]
                    for kh in range(k) for kw in range(k)]
            patches.append(
                jnp.concatenate(cols, axis=-1).reshape(n, po * qo, k * k * c))
    return patches, po, qo


# ---------------------------------------------------------------------------
# Parameters (deterministic init, PyTorch-like 1/sqrt(fan_in) uniform bounds),
# stored once in the kernel-ready layout: flattened bf16 weights, (1, C) f32 bias.
# ---------------------------------------------------------------------------
def init_params(key):
    ks = jax.random.split(key, 10)

    def u(k, shape, fan_in):
        bound = 1.0 / jnp.sqrt(jnp.float32(fan_in))
        return jax.random.uniform(k, shape, jnp.float32, -bound, bound)

    c1 = u(ks[0], (5, 5, 1, 32), 25)
    c2 = u(ks[2], (5, 5, 32, 64), 25 * 32)
    c3 = u(ks[4], (5, 5, 64, 128), 25 * 64)
    return {
        "conv1_w": c1.reshape(25, 32).astype(jnp.bfloat16),        # (kh*kw*cin, cout)
        "conv1_b": u(ks[1], (1, 32), 25),
        "conv2_w": c2.reshape(25, 32, 64).astype(jnp.bfloat16),    # (tap, cin, cout)
        "conv2_b": u(ks[3], (1, 64), 25 * 32),
        "conv3_w": c3.reshape(25 * 64, 128).astype(jnp.bfloat16),
        "conv3_b": u(ks[5], (1, 128), 25 * 64),
        "fc1_w": u(ks[6], (512, 512), 512).astype(jnp.bfloat16),
        "fc1_b": u(ks[7], (1, 512), 512),
        "fc2_w": u(ks[8], (512, 2), 512).astype(jnp.bfloat16),
        "fc2_b": u(ks[9], (1, 2), 512),
    }


# ---------------------------------------------------------------------------
# Forward pass (matches PyTorch Net.forward semantics)
# ---------------------------------------------------------------------------
def net_forward(params, x_nchw):
    n = x_nchw.shape[0]
    x = jnp.transpose(x_nchw, (0, 2, 3, 1)).astype(jnp.bfloat16)   # NCHW -> NHWC

    # stage 1: conv1(1->32)+ReLU+pool.  Cin=1 -> tiny prebuilt (M,25) phase patches.
    # Output kept in f32 so stage 2's in-kernel (8,8,32)->(64,32) reshape stays
    # on 8-sublane-aligned f32 tiles (traffic difference is ~100 KB).
    p1, po1, qo1 = _phase_im2col(x, K5)                            # 4 x (n, 400, 25)
    y1 = conv_pool_prepatched(p1, params["conv1_w"], params["conv1_b"],
                              out_dtype=jnp.float32)               # (n, 400, 32)
    y1 = y1.reshape(n, po1, qo1, 32)                               # (n, 20, 20, 32)

    # stage 2: conv2(32->64)+ReLU+pool, direct in-kernel conv from phase planes.
    planes2 = _phase_planes(y1)                                    # 4 x (n, 10, 10, 32)
    po2 = planes2[0].shape[1] - 2
    y2 = conv_pool_direct(planes2, params["conv2_w"], params["conv2_b"])
    y2 = y2.reshape(n, po2, po2, 64)                               # (n, 8, 8, 64)

    # stage 3: conv3(64->128)+ReLU+pool (2x2 output tiles -> tiny prebuilt patches).
    p3, po3, qo3 = _phase_im2col(y2, K5)                           # 4 x (n, 4, 1600)
    y3 = conv_pool_prepatched(p3, params["conv3_w"], params["conv3_b"],
                              out_dtype=jnp.bfloat16)              # (n, 4, 128)
    y3 = y3.reshape(n, po3, qo3, 128)                              # (n, 2, 2, 128)

    # PyTorch's x.view(-1, 512) flattens NCHW, i.e. (c, h, w)-major.
    feats = jnp.transpose(y3, (0, 3, 1, 2)).reshape(n, 128 * 2 * 2)

    # fused fc1 + ReLU + fc2 + softmax(dim=-1)
    return mlp_head(feats, params["fc1_w"], params["fc1_b"],
                    params["fc2_w"], params["fc2_b"])


if __name__ == "__main__":
    key = jax.random.PRNGKey(0)
    pkey, xkey = jax.random.split(key)
    params = init_params(pkey)
    # 44x44 single-channel input is what the module implies (gives 128*2*2 at fc1).
    x = jax.random.normal(xkey, (2, 1, 44, 44), jnp.float32)       # NCHW like PyTorch
    out = jax.jit(net_forward)(params, x)
    out = jax.block_until_ready(out)
    assert out.shape == (2, 2)
    assert bool(jnp.all(jnp.isfinite(out)))
    # bf16 matmul inputs + approx reciprocal in the softmax => looser tolerance
    assert bool(jnp.allclose(jnp.sum(out, axis=-1), 1.0, atol=5e-3))
    print("KERNEL_OK")
</pallas_src>

<mosaic_0001>
module attributes {stable_mosaic.version = 11 : i64} {
  func.func @_phase_matmul_pool_kernel(%arg0: i32, %arg1: memref<1x400x25xbf16, #tpu.memory_space<vmem>>, %arg2: memref<1x400x25xbf16, #tpu.memory_space<vmem>>, %arg3: memref<1x400x25xbf16, #tpu.memory_space<vmem>>, %arg4: memref<1x400x25xbf16, #tpu.memory_space<vmem>>, %arg5: memref<25x32xbf16, #tpu.memory_space<vmem>>, %arg6: memref<1x32xf32, #tpu.memory_space<vmem>>, %arg7: memref<1x400x32xf32, #tpu.memory_space<vmem>>) attributes {dimension_semantics = [#tpu.dimension_semantics<parallel>], iteration_bounds = array<i64: 2>, scalar_prefetch = 0 : i64, scratch_operands = 0 : i64, tpu.core_type = #tpu.core_type<tc>, window_params = [{transform_indices = @transform_0, window_bounds = array<i64: 1, 400, 25>}, {transform_indices = @transform_1, window_bounds = array<i64: 1, 400, 25>}, {transform_indices = @transform_2, window_bounds = array<i64: 1, 400, 25>}, {transform_indices = @transform_3, window_bounds = array<i64: 1, 400, 25>}, {pipeline_mode = #tpu.pipeline_mode<synchronous>, transform_indices = @transform_4, window_bounds = array<i64: 25, 32>}, {pipeline_mode = #tpu.pipeline_mode<synchronous>, transform_indices = @transform_5, window_bounds = array<i64: 1, 32>}, {transform_indices = @transform_6, window_bounds = array<i64: 1, 400, 32>}]} {
    %c0 = arith.constant 0 : index
    %c0_0 = arith.constant 0 : index
    %0 = vector.load %arg5[%c0, %c0_0] : memref<25x32xbf16, #tpu.memory_space<vmem>>, vector<25x32xbf16>
    %c0_1 = arith.constant 0 : index
    %c0_2 = arith.constant 0 : index
    %c0_3 = arith.constant 0 : index
    %1 = vector.load %arg1[%c0_1, %c0_2, %c0_3] : memref<1x400x25xbf16, #tpu.memory_space<vmem>>, vector<1x400x25xbf16>
    %2 = vector.shape_cast %1 : vector<1x400x25xbf16> to vector<400x25xbf16>
    %cst = arith.constant dense<0.000000e+00> : vector<400x32xf32>
    %3 = tpu.matmul %2, %0, %cst {dimension_numbers = #tpu.dot_dimension_numbers<[1], [0], [0], [1], [0, 0, 1, 1], [], []>} : vector<400x25xbf16>, vector<25x32xbf16>, vector<400x32xf32> -> vector<400x32xf32>
    %c0_4 = arith.constant 0 : index
    %c0_5 = arith.constant 0 : index
    %c0_6 = arith.constant 0 : index
    %4 = vector.load %arg2[%c0_4, %c0_5, %c0_6] : memref<1x400x25xbf16, #tpu.memory_space<vmem>>, vector<1x400x25xbf16>
    %5 = vector.shape_cast %4 : vector<1x400x25xbf16> to vector<400x25xbf16>
    %cst_7 = arith.constant dense<0.000000e+00> : vector<400x32xf32>
    %6 = tpu.matmul %5, %0, %cst_7 {dimension_numbers = #tpu.dot_dimension_numbers<[1], [0], [0], [1], [0, 0, 1, 1], [], []>} : vector<400x25xbf16>, vector<25x32xbf16>, vector<400x32xf32> -> vector<400x32xf32>
    %7 = arith.maximumf %3, %6 : vector<400x32xf32>
    %c0_8 = arith.constant 0 : index
    %c0_9 = arith.constant 0 : index
    %c0_10 = arith.constant 0 : index
    %8 = vector.load %arg3[%c0_8, %c0_9, %c0_10] : memref<1x400x25xbf16, #tpu.memory_space<vmem>>, vector<1x400x25xbf16>
    %9 = vector.shape_cast %8 : vector<1x400x25xbf16> to vector<400x25xbf16>
    %cst_11 = arith.constant dense<0.000000e+00> : vector<400x32xf32>
    %10 = tpu.matmul %9, %0, %cst_11 {dimension_numbers = #tpu.dot_dimension_numbers<[1], [0], [0], [1], [0, 0, 1, 1], [], []>} : vector<400x25xbf16>, vector<25x32xbf16>, vector<400x32xf32> -> vector<400x32xf32>
    %11 = arith.maximumf %7, %10 : vector<400x32xf32>
    %c0_12 = arith.constant 0 : index
    %c0_13 = arith.constant 0 : index
    %c0_14 = arith.constant 0 : index
    %12 = vector.load %arg4[%c0_12, %c0_13, %c0_14] : memref<1x400x25xbf16, #tpu.memory_space<vmem>>, vector<1x400x25xbf16>
    %13 = vector.shape_cast %12 : vector<1x400x25xbf16> to vector<400x25xbf16>
    %cst_15 = arith.constant dense<0.000000e+00> : vector<400x32xf32>
    %14 = tpu.matmul %13, %0, %cst_15 {dimension_numbers = #tpu.dot_dimension_numbers<[1], [0], [0], [1], [0, 0, 1, 1], [], []>} : vector<400x25xbf16>, vector<25x32xbf16>, vector<400x32xf32> -> vector<400x32xf32>
    %15 = arith.maximumf %11, %14 : vector<400x32xf32>
    %c0_16 = arith.constant 0 : index
    %c0_17 = arith.constant 0 : index
    %16 = vector.load %arg6[%c0_16, %c0_17] : memref<1x32xf32, #tpu.memory_space<vmem>>, vector<1x32xf32>
    %17 = vector.broadcast %16 : vector<1x32xf32> to vector<400x32xf32>
    %18 = arith.addf %15, %17 : vector<400x32xf32>
    %cst_18 = arith.constant 0.000000e+00 : f32
    %19 = vector.broadcast %cst_18 : f32 to vector<400x32xf32>
    %20 = arith.maximumf %18, %19 : vector<400x32xf32>
    %21 = vector.shape_cast %20 : vector<400x32xf32> to vector<1x400x32xf32>
    %c0_19 = arith.constant 0 : index
    %c0_20 = arith.constant 0 : index
    %c0_21 = arith.constant 0 : index
    %22 = vector.load %arg7[%c0_19, %c0_20, %c0_21] : memref<1x400x32xf32, #tpu.memory_space<vmem>>, vector<1x400x32xf32>
    tpu.vector_store %arg7[%c0_19, %c0_20, %c0_21], %21 {strides = array<i32>} : memref<1x400x32xf32, #tpu.memory_space<vmem>>, vector<1x400x32xf32>,
    return
  }
  func.func @transform_0(%arg0: i32) -> (i32, i32, i32) {
    %c0_i32 = arith.constant 0 : i32
    %c0_i32_0 = arith.constant 0 : i32
    %c0_i32_1 = arith.constant 0 : i32
    return %arg0, %c0_i32, %c0_i32_0 : i32, i32, i32
  }
  func.func @transform_1(%arg0: i32) -> (i32, i32, i32) {
    %c0_i32 = arith.constant 0 : i32
    %c0_i32_0 = arith.constant 0 : i32
    %c0_i32_1 = arith.constant 0 : i32
    return %arg0, %c0_i32, %c0_i32_0 : i32, i32, i32
  }
  func.func @transform_2(%arg0: i32) -> (i32, i32, i32) {
    %c0_i32 = arith.constant 0 : i32
    %c0_i32_0 = arith.constant 0 : i32
    %c0_i32_1 = arith.constant 0 : i32
    return %arg0, %c0_i32, %c0_i32_0 : i32, i32, i32
  }
  func.func @transform_3(%arg0: i32) -> (i32, i32, i32) {
    %c0_i32 = arith.constant 0 : i32
    %c0_i32_0 = arith.constant 0 : i32
    %c0_i32_1 = arith.constant 0 : i32
    return %arg0, %c0_i32, %c0_i32_0 : i32, i32, i32
  }
  func.func @transform_4(%arg0: i32) -> (i32, i32) {
    %c0_i32 = arith.constant 0 : i32
    %c0_i32_0 = arith.constant 0 : i32
    %c0_i32_1 = arith.constant 0 : i32
    return %c0_i32, %c0_i32_0 : i32, i32
  }
  func.func @transform_5(%arg0: i32) -> (i32, i32) {
    %c0_i32 = arith.constant 0 : i32
    %c0_i32_0 = arith.constant 0 : i32
    %c0_i32_1 = arith.constant 0 : i32
    return %c0_i32, %c0_i32_0 : i32, i32
  }
  func.func @transform_6(%arg0: i32) -> (i32, i32, i32) {
    %c0_i32 = arith.constant 0 : i32
    %c0_i32_0 = arith.constant 0 : i32
    %c0_i32_1 = arith.constant 0 : i32
    return %arg0, %c0_i32, %c0_i32_0 : i32, i32, i32
  }
}

module attributes {stable_mosaic.version = 11 : i64} {
  func.func @_direct_conv_pool_kernel(%arg0: i32, %arg1: memref<1x10x10x32xf32, #tpu.memory_space<vmem>>, %arg2: memref<1x10x10x32xf32, #tpu.memory_space<vmem>>, %arg3: memref<1x10x10x32xf32, #tpu.memory_space<vmem>>, %arg4: memref<1x10x10x32xf32, #tpu.memory_space<vmem>>, %arg5: memref<25x32x64xbf16, #tpu.memory_space<vmem>>, %arg6: memref<1x64xf32, #tpu.memory_space<vmem>>, %arg7: memref<1x64x64xbf16, #tpu.memory_space<vmem>>) attributes {dimension_semantics = [#tpu.dimension_semantics<parallel>], iteration_bounds = array<i64: 2>, scalar_prefetch = 0 : i64, scratch_operands = 0 : i64, tpu.core_type = #tpu.core_type<tc>, window_params = [{transform_indices = @transform_0, window_bounds = array<i64: 1, 10, 10, 32>}, {transform_indices = @transform_1, window_bounds = array<i64: 1, 10, 10, 32>}, {transform_indices = @transform_2, window_bounds = array<i64: 1, 10, 10, 32>}, {transform_indices = @transform_3, window_bounds = array<i64: 1, 10, 10, 32>}, {pipeline_mode = #tpu.pipeline_mode<synchronous>, transform_indices = @transform_4, window_bounds = array<i64: 25, 32, 64>}, {pipeline_mode = #tpu.pipeline_mode<synchronous>, transform_indices = @transform_5, window_bounds = array<i64: 1, 64>}, {transform_indices = @transform_6, window_bounds = array<i64: 1, 64, 64>}]} {
    %cst = arith.constant 0.000000e+00 : f32
    %0 = vector.broadcast %cst : f32 to vector<64x64xf32>
    %c0 = arith.constant 0 : index
    %c0_0 = arith.constant 0 : index
    %c0_1 = arith.constant 0 : index
    %c0_2 = arith.constant 0 : index
    %1 = vector.load %arg1[%c0, %c0_0, %c0_1, %c0_2] : memref<1x10x10x32xf32, #tpu.memory_space<vmem>>, vector<1x8x8x32xf32>
    %2 = vector.shape_cast %1 : vector<1x8x8x32xf32> to vector<8x8x32xf32>
    %3 = vector.shape_cast %2 : vector<8x8x32xf32> to vector<64x32xf32>
    %4 = arith.truncf %3 : vector<64x32xf32> to vector<64x32xbf16>
    %c0_3 = arith.constant 0 : index
    %c0_4 = arith.constant 0 : index
    %c0_5 = arith.constant 0 : index
    %5 = vector.load %arg5[%c0_3, %c0_4, %c0_5] : memref<25x32x64xbf16, #tpu.memory_space<vmem>>, vector<1x32x64xbf16>
    %6 = vector.shape_cast %5 : vector<1x32x64xbf16> to vector<32x64xbf16>
    %cst_6 = arith.constant dense<0.000000e+00> : vector<64x64xf32>
    %7 = tpu.matmul %4, %6, %cst_6 {dimension_numbers = #tpu.dot_dimension_numbers<[1], [0], [0], [1], [0, 0, 1, 1], [], []>} : vector<64x32xbf16>, vector<32x64xbf16>, vector<64x64xf32> -> vector<64x64xf32>
    %8 = arith.addf %0, %7 : vector<64x64xf32>
    %c0_7 = arith.constant 0 : index
    %c0_8 = arith.constant 0 : index
    %c0_9 = arith.constant 0 : index
    %c0_10 = arith.constant 0 : index
    %9 = vector.load %arg2[%c0_7, %c0_8, %c0_9, %c0_10] : memref<1x10x10x32xf32, #tpu.memory_space<vmem>>, vector<1x8x8x32xf32>
    %10 = vector.shape_cast %9 : vector<1x8x8x32xf32> to vector<8x8x32xf32>
    %11 = vector.shape_cast %10 : vector<8x8x32xf32> to vector<64x32xf32>
    %12 = arith.truncf %11 : vector<64x32xf32> to vector<64x32xbf16>
    %c1 = arith.constant 1 : index
    %c0_11 = arith.constant 0 : index
    %c0_12 = arith.constant 0 : index
    %13 = vector.load %arg5[%c1, %c0_11, %c0_12] : memref<25x32x64xbf16, #tpu.memory_space<vmem>>, vector<1x32x64xbf16>
    %14 = vector.shape_cast %13 : vector<1x32x64xbf16> to vector<32x64xbf16>
    %cst_13 = arith.constant dense<0.000000e+00> : vector<64x64xf32>
    %15 = tpu.matmul %12, %14, %cst_13 {dimension_numbers = #tpu.dot_dimension_numbers<[1], [0], [0], [1], [0, 0, 1, 1], [], []>} : vector<64x32xbf16>, vector<32x64xbf16>, vector<64x64xf32> -> vector<64x64xf32>
    %16 = arith.addf %8, %15 : vector<64x64xf32>
    %c0_14 = arith.constant 0 : index
    %c0_15 = arith.constant 0 : index
    %c1_16 = arith.constant 1 : index
    %c0_17 = arith.constant 0 : index
    %17 = vector.load %arg1[%c0_14, %c0_15, %c1_16, %c0_17] : memref<1x10x10x32xf32, #tpu.memory_space<vmem>>, vector<1x8x8x32xf32>
    %18 = vector.shape_cast %17 : vector<1x8x8x32xf32> to vector<8x8x32xf32>
    %19 = vector.shape_cast %18 : vector<8x8x32xf32> to vector<64x32xf32>
    %20 = arith.truncf %19 : vector<64x32xf32> to vector<64x32xbf16>
    %c2 = arith.constant 2 : index
    %c0_18 = arith.constant 0 : index
    %c0_19 = arith.constant 0 : index
    %21 = vector.load %arg5[%c2, %c0_18, %c0_19] : memref<25x32x64xbf16, #tpu.memory_space<vmem>>, vector<1x32x64xbf16>
    %22 = vector.shape_cast %21 : vector<1x32x64xbf16> to vector<32x64xbf16>
    %cst_20 = arith.constant dense<0.000000e+00> : vector<64x64xf32>
    %23 = tpu.matmul %20, %22, %cst_20 {dimension_numbers = #tpu.dot_dimension_numbers<[1], [0], [0], [1], [0, 0, 1, 1], [], []>} : vector<64x32xbf16>, vector<32x64xbf16>, vector<64x64xf32> -> vector<64x64xf32>
    %24 = arith.addf %16, %23 : vector<64x64xf32>
    %c0_21 = arith.constant 0 : index
    %c0_22 = arith.constant 0 : index
    %c1_23 = arith.constant 1 : index
    %c0_24 = arith.constant 0 : index
    %25 = vector.load %arg2[%c0_21, %c0_22, %c1_23, %c0_24] : memref<1x10x10x32xf32, #tpu.memory_space<vmem>>, vector<1x8x8x32xf32>
    %26 = vector.shape_cast %25 : vector<1x8x8x32xf32> to vector<8x8x32xf32>
    %27 = vector.shape_cast %26 : vector<8x8x32xf32> to vector<64x32xf32>
    %28 = arith.truncf %27 : vector<64x32xf32> to vector<64x32xbf16>
    %c3 = arith.constant 3 : index
    %c0_25 = arith.constant 0 : index
    %c0_26 = arith.constant 0 : index
    %29 = vector.load %arg5[%c3, %c0_25, %c0_26] : memref<25x32x64xbf16, #tpu.memory_space<vmem>>, vector<1x32x64xbf16>
    %30 = vector.shape_cast %29 : vector<1x32x64xbf16> to vector<32x64xbf16>
    %cst_27 = arith.constant dense<0.000000e+00> : vector<64x64xf32>
    %31 = tpu.matmul %28, %30, %cst_27 {dimension_numbers = #tpu.dot_dimension_numbers<[1], [0], [0], [1], [0, 0, 1, 1], [], []>} : vector<64x32xbf16>, vector<32x64xbf16>, vector<64x64xf32> -> vector<64x64xf32>
    %32 = arith.addf %24, %31 : vector<64x64xf32>
    %c0_28 = arith.constant 0 : index
    %c0_29 = arith.constant 0 : index
    %c2_30 = arith.constant 2 : index
    %c0_31 = arith.constant 0 : index
    %33 = vector.load %arg1[%c0_28, %c0_29, %c2_30, %c0_31] : memref<1x10x10x32xf32, #tpu.memory_space<vmem>>, vector<1x8x8x32xf32>
    %34 = vector.shape_cast %33 : vector<1x8x8x32xf32> to vector<8x8x32xf32>
    %35 = vector.shape_cast %34 : vector<8x8x32xf32> to vector<64x32xf32>
    %36 = arith.truncf %35 : vector<64x32xf32> to vector<64x32xbf16>
    %c4 = arith.constant 4 : index
    %c0_32 = arith.constant 0 : index
    %c0_33 = arith.constant 0 : index
    %37 = vector.load %arg5[%c4, %c0_32, %c0_33] : memref<25x32x64xbf16, #tpu.memory_space<vmem>>, vector<1x32x64xbf16>
    %38 = vector.shape_cast %37 : vector<1x32x64xbf16> to vector<32x64xbf16>
    %cst_34 = arith.constant dense<0.000000e+00> : vector<64x64xf32>
    %39 = tpu.matmul %36, %38, %cst_34 {dimension_numbers = #tpu.dot_dimension_numbers<[1], [0], [0], [1], [0, 0, 1, 1], [], []>} : vector<64x32xbf16>, vector<32x64xbf16>, vector<64x64xf32> -> vector<64x64xf32>
    %40 = arith.addf %32, %39 : vector<64x64xf32>
    %c0_35 = arith.constant 0 : index
    %c0_36 = arith.constant 0 : index
    %c0_37 = arith.constant 0 : index
    %c0_38 = arith.constant 0 : index
    %41 = vector.load %arg3[%c0_35, %c0_36, %c0_37, %c0_38] : memref<1x10x10x32xf32, #tpu.memory_space<vmem>>, vector<1x8x8x32xf32>
    %42 = vector.shape_cast %41 : vector<1x8x8x32xf32> to vector<8x8x32xf32>
    %43 = vector.shape_cast %42 : vector<8x8x32xf32> to vector<64x32xf32>
    %44 = arith.truncf %43 : vector<64x32xf32> to vector<64x32xbf16>
    %c5 = arith.constant 5 : index
    %c0_39 = arith.constant 0 : index
    %c0_40 = arith.constant 0 : index
    %45 = vector.load %arg5[%c5, %c0_39, %c0_40] : memref<25x32x64xbf16, #tpu.memory_space<vmem>>, vector<1x32x64xbf16>
    %46 = vector.shape_cast %45 : vector<1x32x64xbf16> to vector<32x64xbf16>
    %cst_41 = arith.constant dense<0.000000e+00> : vector<64x64xf32>
    %47 = tpu.matmul %44, %46, %cst_41 {dimension_numbers = #tpu.dot_dimension_numbers<[1], [0], [0], [1], [0, 0, 1, 1], [], []>} : vector<64x32xbf16>, vector<32x64xbf16>, vector<64x64xf32> -> vector<64x64xf32>
    %48 = arith.addf %40, %47 : vector<64x64xf32>
    %c0_42 = arith.constant 0 : index
    %c0_43 = arith.constant 0 : index
    %c0_44 = arith.constant 0 : index
    %c0_45 = arith.constant 0 : index
    %49 = vector.load %arg4[%c0_42, %c0_43, %c0_44, %c0_45] : memref<1x10x10x32xf32, #tpu.memory_space<vmem>>, vector<1x8x8x32xf32>
    %50 = vector.shape_cast %49 : vector<1x8x8x32xf32> to vector<8x8x32xf32>
    %51 = vector.shape_cast %50 : vector<8x8x32xf32> to vector<64x32xf32>
    %52 = arith.truncf %51 : vector<64x32xf32> to vector<64x32xbf16>
    %c6 = arith.constant 6 : index
    %c0_46 = arith.constant 0 : index
    %c0_47 = arith.constant 0 : index
    %53 = vector.load %arg5[%c6, %c0_46, %c0_47] : memref<25x32x64xbf16, #tpu.memory_space<vmem>>, vector<1x32x64xbf16>
    %54 = vector.shape_cast %53 : vector<1x32x64xbf16> to vector<32x64xbf16>
    %cst_48 = arith.constant dense<0.000000e+00> : vector<64x64xf32>
    %55 = tpu.matmul %52, %54, %cst_48 {dimension_numbers = #tpu.dot_dimension_numbers<[1], [0], [0], [1], [0, 0, 1, 1], [], []>} : vector<64x32xbf16>, vector<32x64xbf16>, vector<64x64xf32> -> vector<64x64xf32>
    %56 = arith.addf %48, %55 : vector<64x64xf32>
    %c0_49 = arith.constant 0 : index
    %c0_50 = arith.constant 0 : index
    %c1_51 = arith.constant 1 : index
    %c0_52 = arith.constant 0 : index
    %57 = vector.load %arg3[%c0_49, %c0_50, %c1_51, %c0_52] : memref<1x10x10x32xf32, #tpu.memory_space<vmem>>, vector<1x8x8x32xf32>
    %58 = vector.shape_cast %57 : vector<1x8x8x32xf32> to vector<8x8x32xf32>
    %59 = vector.shape_cast %58 : vector<8x8x32xf32> to vector<64x32xf32>
    %60 = arith.truncf %59 : vector<64x32xf32> to vector<64x32xbf16>
    %c7 = arith.constant 7 : index
    %c0_53 = arith.constant 0 : index
    %c0_54 = arith.constant 0 : index
    %61 = vector.load %arg5[%c7, %c0_53, %c0_54] : memref<25x32x64xbf16, #tpu.memory_space<vmem>>, vector<1x32x64xbf16>
    %62 = vector.shape_cast %61 : vector<1x32x64xbf16> to vector<32x64xbf16>
    %cst_55 = arith.constant dense<0.000000e+00> : vector<64x64xf32>
    %63 = tpu.matmul %60, %62, %cst_55 {dimension_numbers = #tpu.dot_dimension_numbers<[1], [0], [0], [1], [0, 0, 1, 1], [], []>} : vector<64x32xbf16>, vector<32x64xbf16>, vector<64x64xf32> -> vector<64x64xf32>
    %64 = arith.addf %56, %63 : vector<64x64xf32>
    %c0_56 = arith.constant 0 : index
    %c0_57 = arith.constant 0 : index
    %c1_58 = arith.constant 1 : index
    %c0_59 = arith.constant 0 : index
    %65 = vector.load %arg4[%c0_56, %c0_57, %c1_58, %c0_59] : memref<1x10x10x32xf32, #tpu.memory_space<vmem>>, vector<1x8x8x32xf32>
    %66 = vector.shape_cast %65 : vector<1x8x8x32xf32> to vector<8x8x32xf32>
    %67 = vector.shape_cast %66 : vector<8x8x32xf32> to vector<64x32xf32>
    %68 = arith.truncf %67 : vector<64x32xf32> to vector<64x32xbf16>
    %c8 = arith.constant 8 : index
    %c0_60 = arith.constant 0 : index
    %c0_61 = arith.constant 0 : index
    %69 = vector.load %arg5[%c8, %c0_60, %c0_61] : memref<25x32x64xbf16, #tpu.memory_space<vmem>>, vector<1x32x64xbf16>
    %70 = vector.shape_cast %69 : vector<1x32x64xbf16> to vector<32x64xbf16>
    %cst_62 = arith.constant dense<0.000000e+00> : vector<64x64xf32>
    %71 = tpu.matmul %68, %70, %cst_62 {dimension_numbers = #tpu.dot_dimension_numbers<[1], [0], [0], [1], [0, 0, 1, 1], [], []>} : vector<64x32xbf16>, vector<32x64xbf16>, vector<64x64xf32> -> vector<64x64xf32>
    %72 = arith.addf %64, %71 : vector<64x64xf32>
    %c0_63 = arith.constant 0 : index
    %c0_64 = arith.constant 0 : index
    %c2_65 = arith.constant 2 : index
    %c0_66 = arith.constant 0 : index
    %73 = vector.load %arg3[%c0_63, %c0_64, %c2_65, %c0_66] : memref<1x10x10x32xf32, #tpu.memory_space<vmem>>, vector<1x8x8x32xf32>
    %74 = vector.shape_cast %73 : vector<1x8x8x32xf32> to vector<8x8x32xf32>
    %75 = vector.shape_cast %74 : vector<8x8x32xf32> to vector<64x32xf32>
    %76 = arith.truncf %75 : vector<64x32xf32> to vector<64x32xbf16>
    %c9 = arith.constant 9 : index
    %c0_67 = arith.constant 0 : index
    %c0_68 = arith.constant 0 : index
    %77 = vector.load %arg5[%c9, %c0_67, %c0_68] : memref<25x32x64xbf16, #tpu.memory_space<vmem>>, vector<1x32x64xbf16>
    %78 = vector.shape_cast %77 : vector<1x32x64xbf16> to vector<32x64xbf16>
    %cst_69 = arith.constant dense<0.000000e+00> : vector<64x64xf32>
    %79 = tpu.matmul %76, %78, %cst_69 {dimension_numbers = #tpu.dot_dimension_numbers<[1], [0], [0], [1], [0, 0, 1, 1], [], []>} : vector<64x32xbf16>, vector<32x64xbf16>, vector<64x64xf32> -> vector<64x64xf32>
    %80 = arith.addf %72, %79 : vector<64x64xf32>
    %c0_70 = arith.constant 0 : index
    %c1_71 = arith.constant 1 : index
    %c0_72 = arith.constant 0 : index
    %c0_73 = arith.constant 0 : index
    %81 = vector.load %arg1[%c0_70, %c1_71, %c0_72, %c0_73] : memref<1x10x10x32xf32, #tpu.memory_space<vmem>>, vector<1x8x8x32xf32>
    %82 = vector.shape_cast %81 : vector<1x8x8x32xf32> to vector<8x8x32xf32>
    %83 = vector.shape_cast %82 : vector<8x8x32xf32> to vector<64x32xf32>
    %84 = arith.truncf %83 : vector<64x32xf32> to vector<64x32xbf16>
    %c10 = arith.constant 10 : index
    %c0_74 = arith.constant 0 : index
    %c0_75 = arith.constant 0 : index
    %85 = vector.load %arg5[%c10, %c0_74, %c0_75] : memref<25x32x64xbf16, #tpu.memory_space<vmem>>, vector<1x32x64xbf16>
    %86 = vector.shape_cast %85 : vector<1x32x64xbf16> to vector<32x64xbf16>
    %cst_76 = arith.constant dense<0.000000e+00> : vector<64x64xf32>
    %87 = tpu.matmul %84, %86, %cst_76 {dimension_numbers = #tpu.dot_dimension_numbers<[1], [0], [0], [1], [0, 0, 1, 1], [], []>} : vector<64x32xbf16>, vector<32x64xbf16>, vector<64x64xf32> -> vector<64x64xf32>
    %88 = arith.addf %80, %87 : vector<64x64xf32>
    %c0_77 = arith.constant 0 : index
    %c1_78 = arith.constant 1 : index
    %c0_79 = arith.constant 0 : index
    %c0_80 = arith.constant 0 : index
    %89 = vector.load %arg2[%c0_77, %c1_78, %c0_79, %c0_80] : memref<1x10x10x32xf32, #tpu.memory_space<vmem>>, vector<1x8x8x32xf32>
    %90 = vector.shape_cast %89 : vector<1x8x8x32xf32> to vector<8x8x32xf32>
    %91 = vector.shape_cast %90 : vector<8x8x32xf32> to vector<64x32xf32>
    %92 = arith.truncf %91 : vector<64x32xf32> to vector<64x32xbf16>
    %c11 = arith.constant 11 : index
    %c0_81 = arith.constant 0 : index
    %c0_82 = arith.constant 0 : index
    %93 = vector.load %arg5[%c11, %c0_81, %c0_82] : memref<25x32x64xbf16, #tpu.memory_space<vmem>>, vector<1x32x64xbf16>
    %94 = vector.shape_cast %93 : vector<1x32x64xbf16> to vector<32x64xbf16>
    %cst_83 = arith.constant dense<0.000000e+00> : vector<64x64xf32>
    %95 = tpu.matmul %92, %94, %cst_83 {dimension_numbers = #tpu.dot_dimension_numbers<[1], [0], [0], [1], [0, 0, 1, 1], [], []>} : vector<64x32xbf16>, vector<32x64xbf16>, vector<64x64xf32> -> vector<64x64xf32>
    %96 = arith.addf %88, %95 : vector<64x64xf32>
    %c0_84 = arith.constant 0 : index
    %c1_85 = arith.constant 1 : index
    %c1_86 = arith.constant 1 : index
    %c0_87 = arith.constant 0 : index
    %97 = vector.load %arg1[%c0_84, %c1_85, %c1_86, %c0_87] : memref<1x10x10x32xf32, #tpu.memory_space<vmem>>, vector<1x8x8x32xf32>
    %98 = vector.shape_cast %97 : vector<1x8x8x32xf32> to vector<8x8x32xf32>
    %99 = vector.shape_cast %98 : vector<8x8x32xf32> to vector<64x32xf32>
    %100 = arith.truncf %99 : vector<64x32xf32> to vector<64x32xbf16>
    %c12 = arith.constant 12 : index
    %c0_88 = arith.constant 0 : index
    %c0_89 = arith.constant 0 : index
    %101 = vector.load %arg5[%c12, %c0_88, %c0_89] : memref<25x32x64xbf16, #tpu.memory_space<vmem>>, vector<1x32x64xbf16>
    %102 = vector.shape_cast %101 : vector<1x32x64xbf16> to vector<32x64xbf16>
    %cst_90 = arith.constant dense<0.000000e+00> : vector<64x64xf32>
    %103 = tpu.matmul %100, %102, %cst_90 {dimension_numbers = #tpu.dot_dimension_numbers<[1], [0], [0], [1], [0, 0, 1, 1], [], []>} : vector<64x32xbf16>, vector<32x64xbf16>, vector<64x64xf32> -> vector<64x64xf32>
    %104 = arith.addf %96, %103 : vector<64x64xf32>
    %c0_91 = arith.constant 0 : index
    %c1_92 = arith.constant 1 : index
    %c1_93 = arith.constant 1 : index
    %c0_94 = arith.constant 0 : index
    %105 = vector.load %arg2[%c0_91, %c1_92, %c1_93, %c0_94] : memref<1x10x10x32xf32, #tpu.memory_space<vmem>>, vector<1x8x8x32xf32>
    %106 = vector.shape_cast %105 : vector<1x8x8x32xf32> to vector<8x8x32xf32>
    %107 = vector.shape_cast %106 : vector<8x8x32xf32> to vector<64x32xf32>
    %108 = arith.truncf %107 : vector<64x32xf32> to vector<64x32xbf16>
    %c13 = arith.constant 13 : index
    %c0_95 = arith.constant 0 : index
    %c0_96 = arith.constant 0 : index
    %109 = vector.load %arg5[%c13, %c0_95, %c0_96] : memref<25x32x64xbf16, #tpu.memory_space<vmem>>, vector<1x32x64xbf16>
    %110 = vector.shape_cast %109 : vector<1x32x64xbf16> to vector<32x64xbf16>
    %cst_97 = arith.constant dense<0.000000e+00> : vector<64x64xf32>
    %111 = tpu.matmul %108, %110, %cst_97 {dimension_numbers = #tpu.dot_dimension_numbers<[1], [0], [0], [1], [0, 0, 1, 1], [], []>} : vector<64x32xbf16>, vector<32x64xbf16>, vector<64x64xf32> -> vector<64x64xf32>
    %112 = arith.addf %104, %111 : vector<64x64xf32>
    %c0_98 = arith.constant 0 : index
    %c1_99 = arith.constant 1 : index
    %c2_100 = arith.constant 2 : index
    %c0_101 = arith.constant 0 : index
    %113 = vector.load %arg1[%c0_98, %c1_99, %c2_100, %c0_101] : memref<1x10x10x32xf32, #tpu.memory_space<vmem>>, vector<1x8x8x32xf32>
    %114 = vector.shape_cast %113 : vector<1x8x8x32xf32> to vector<8x8x32xf32>
    %115 = vector.shape_cast %114 : vector<8x8x32xf32> to vector<64x32xf32>
    %116 = arith.truncf %115 : vector<64x32xf32> to vector<64x32xbf16>
    %c14 = arith.constant 14 : index
    %c0_102 = arith.constant 0 : index
    %c0_103 = arith.constant 0 : index
    %117 = vector.load %arg5[%c14, %c0_102, %c0_103] : memref<25x32x64xbf16, #tpu.memory_space<vmem>>, vector<1x32x64xbf16>
    %118 = vector.shape_cast %117 : vector<1x32x64xbf16> to vector<32x64xbf16>
    %cst_104 = arith.constant dense<0.000000e+00> : vector<64x64xf32>
    %119 = tpu.matmul %116, %118, %cst_104 {dimension_numbers = #tpu.dot_dimension_numbers<[1], [0], [0], [1], [0, 0, 1, 1], [], []>} : vector<64x32xbf16>, vector<32x64xbf16>, vector<64x64xf32> -> vector<64x64xf32>
    %120 = arith.addf %112, %119 : vector<64x64xf32>
    %c0_105 = arith.constant 0 : index
    %c1_106 = arith.constant 1 : index
    %c0_107 = arith.constant 0 : index
    %c0_108 = arith.constant 0 : index
    %121 = vector.load %arg3[%c0_105, %c1_106, %c0_107, %c0_108] : memref<1x10x10x32xf32, #tpu.memory_space<vmem>>, vector<1x8x8x32xf32>
    %122 = vector.shape_cast %121 : vector<1x8x8x32xf32> to vector<8x8x32xf32>
    %123 = vector.shape_cast %122 : vector<8x8x32xf32> to vector<64x32xf32>
    %124 = arith.truncf %123 : vector<64x32xf32> to vector<64x32xbf16>
    %c15 = arith.constant 15 : index
    %c0_109 = arith.constant 0 : index
    %c0_110 = arith.constant 0 : index
    %125 = vector.load %arg5[%c15, %c0_109, %c0_110] : memref<25x32x64xbf16, #tpu.memory_space<vmem>>, vector<1x32x64xbf16>
    %126 = vector.shape_cast %125 : vector<1x32x64xbf16> to vector<32x64xbf16>
    %cst_111 = arith.constant dense<0.000000e+00> : vector<64x64xf32>
    %127 = tpu.matmul %124, %126, %cst_111 {dimension_numbers = #tpu.dot_dimension_numbers<[1], [0], [0], [1], [0, 0, 1, 1], [], []>} : vector<64x32xbf16>, vector<32x64xbf16>, vector<64x64xf32> -> vector<64x64xf32>
    %128 = arith.addf %120, %127 : vector<64x64xf32>
    %c0_112 = arith.constant 0 : index
    %c1_113 = arith.constant 1 : index
    %c0_114 = arith.constant 0 : index
    %c0_115 = arith.constant 0 : index
    %129 = vector.load %arg4[%c0_112, %c1_113, %c0_114, %c0_115] : memref<1x10x10x32xf32, #tpu.memory_space<vmem>>, vector<1x8x8x32xf32>
    %130 = vector.shape_cast %129 : vector<1x8x8x32xf32> to vector<8x8x32xf32>
    %131 = vector.shape_cast %130 : vector<8x8x32xf32> to vector<64x32xf32>
    %132 = arith.truncf %131 : vector<64x32xf32> to vector<64x32xbf16>
    %c16 = arith.constant 16 : index
    %c0_116 = arith.constant 0 : index
    %c0_117 = arith.constant 0 : index
    %133 = vector.load %arg5[%c16, %c0_116, %c0_117] : memref<25x32x64xbf16, #tpu.memory_space<vmem>>, vector<1x32x64xbf16>
    %134 = vector.shape_cast %133 : vector<1x32x64xbf16> to vector<32x64xbf16>
    %cst_118 = arith.constant dense<0.000000e+00> : vector<64x64xf32>
    %135 = tpu.matmul %132, %134, %cst_118 {dimension_numbers = #tpu.dot_dimension_numbers<[1], [0], [0], [1], [0, 0, 1, 1], [], []>} : vector<64x32xbf16>, vector<32x64xbf16>, vector<64x64xf32> -> vector<64x64xf32>
    %136 = arith.addf %128, %135 : vector<64x64xf32>
    %c0_119 = arith.constant 0 : index
    %c1_120 = arith.constant 1 : index
    %c1_121 = arith.constant 1 : index
    %c0_122 = arith.constant 0 : index
    %137 = vector.load %arg3[%c0_119, %c1_120, %c1_121, %c0_122] : memref<1x10x10x32xf32, #tpu.memory_space<vmem>>, vector<1x8x8x32xf32>
    %138 = vector.shape_cast %137 : vector<1x8x8x32xf32> to vector<8x8x32xf32>
    %139 = vector.shape_cast %138 : vector<8x8x32xf32> to vector<64x32xf32>
    %140 = arith.truncf %139 : vector<64x32xf32> to vector<64x32xbf16>
    %c17 = arith.constant 17 : index
    %c0_123 = arith.constant 0 : index
    %c0_124 = arith.constant 0 : index
    %141 = vector.load %arg5[%c17, %c0_123, %c0_124] : memref<25x32x64xbf16, #tpu.memory_space<vmem>>, vector<1x32x64xbf16>
    %142 = vector.shape_cast %141 : vector<1x32x64xbf16> to vector<32x64xbf16>
    %cst_125 = arith.constant dense<0.000000e+00> : vector<64x64xf32>
    %143 = tpu.matmul %140, %142, %cst_125 {dimension_numbers = #tpu.dot_dimension_numbers<[1], [0], [0], [1], [0, 0, 1, 1], [], []>} : vector<64x32xbf16>, vector<32x64xbf16>, vector<64x64xf32> -> vector<64x64xf32>
    %144 = arith.addf %136, %143 : vector<64x64xf32>
    %c0_126 = arith.constant 0 : index
    %c1_127 = arith.constant 1 : index
    %c1_128 = arith.constant 1 : index
    %c0_129 = arith.constant 0 : index
    %145 = vector.load %arg4[%c0_126, %c1_127, %c1_128, %c0_129] : memref<1x10x10x32xf32, #tpu.memory_space<vmem>>, vector<1x8x8x32xf32>
    %146 = vector.shape_cast %145 : vector<1x8x8x32xf32> to vector<8x8x32xf32>
    %147 = vector.shape_cast %146 : vector<8x8x32xf32> to vector<64x32xf32>
    %148 = arith.truncf %147 : vector<64x32xf32> to vector<64x32xbf16>
    %c18 = arith.constant 18 : index
    %c0_130 = arith.constant 0 : index
    %c0_131 = arith.constant 0 : index
    %149 = vector.load %arg5[%c18, %c0_130, %c0_131] : memref<25x32x64xbf16, #tpu.memory_space<vmem>>, vector<1x32x64xbf16>
    %150 = vector.shape_cast %149 : vector<1x32x64xbf16> to vector<32x64xbf16>
    %cst_132 = arith.constant dense<0.000000e+00> : vector<64x64xf32>
    %151 = tpu.matmul %148, %150, %cst_132 {dimension_numbers = #tpu.dot_dimension_numbers<[1], [0], [0], [1], [0, 0, 1, 1], [], []>} : vector<64x32xbf16>, vector<32x64xbf16>, vector<64x64xf32> -> vector<64x64xf32>
    %152 = arith.addf %144, %151 : vector<64x64xf32>
    %c0_133 = arith.constant 0 : index
    %c1_134 = arith.constant 1 : index
    %c2_135 = arith.constant 2 : index
    %c0_136 = arith.constant 0 : index
    %153 = vector.load %arg3[%c0_133, %c1_134, %c2_135, %c0_136] : memref<1x10x10x32xf32, #tpu.memory_space<vmem>>, vector<1x8x8x32xf32>
    %154 = vector.shape_cast %153 : vector<1x8x8x32xf32> to vector<8x8x32xf32>
    %155 = vector.shape_cast %154 : vector<8x8x32xf32> to vector<64x32xf32>
    %156 = arith.truncf %155 : vector<64x32xf32> to vector<64x32xbf16>
    %c19 = arith.constant 19 : index
    %c0_137 = arith.constant 0 : index
    %c0_138 = arith.constant 0 : index
    %157 = vector.load %arg5[%c19, %c0_137, %c0_138] : memref<25x32x64xbf16, #tpu.memory_space<vmem>>, vector<1x32x64xbf16>
    %158 = vector.shape_cast %157 : vector<1x32x64xbf16> to vector<32x64xbf16>
    %cst_139 = arith.constant dense<0.000000e+00> : vector<64x64xf32>
    %159 = tpu.matmul %156, %158, %cst_139 {dimension_numbers = #tpu.dot_dimension_numbers<[1], [0], [0], [1], [0, 0, 1, 1], [], []>} : vector<64x32xbf16>, vector<32x64xbf16>, vector<64x64xf32> -> vector<64x64xf32>
    %160 = arith.addf %152, %159 : vector<64x64xf32>
    %c0_140 = arith.constant 0 : index
    %c2_141 = arith.constant 2 : index
    %c0_142 = arith.constant 0 : index
    %c0_143 = arith.constant 0 : index
    %161 = vector.load %arg1[%c0_140, %c2_141, %c0_142, %c0_143] : memref<1x10x10x32xf32, #tpu.memory_space<vmem>>, vector<1x8x8x32xf32>
    %162 = vector.shape_cast %161 : vector<1x8x8x32xf32> to vector<8x8x32xf32>
    %163 = vector.shape_cast %162 : vector<8x8x32xf32> to vector<64x32xf32>
    %164 = arith.truncf %163 : vector<64x32xf32> to vector<64x32xbf16>
    %c20 = arith.constant 20 : index
    %c0_144 = arith.constant 0 : index
    %c0_145 = arith.constant 0 : index
    %165 = vector.load %arg5[%c20, %c0_144, %c0_145] : memref<25x32x64xbf16, #tpu.memory_space<vmem>>, vector<1x32x64xbf16>
    %166 = vector.shape_cast %165 : vector<1x32x64xbf16> to vector<32x64xbf16>
    %cst_146 = arith.constant dense<0.000000e+00> : vector<64x64xf32>
    %167 = tpu.matmul %164, %166, %cst_146 {dimension_numbers = #tpu.dot_dimension_numbers<[1], [0], [0], [1], [0, 0, 1, 1], [], []>} : vector<64x32xbf16>, vector<32x64xbf16>, vector<64x64xf32> -> vector<64x64xf32>
    %168 = arith.addf %160, %167 : vector<64x64xf32>
    %c0_147 = arith.constant 0 : index
    %c2_148 = arith.constant 2 : index
    %c0_149 = arith.constant 0 : index
    %c0_150 = arith.constant 0 : index
    %169 = vector.load %arg2[%c0_147, %c2_148, %c0_149, %c0_150] : memref<1x10x10x32xf32, #tpu.memory_space<vmem>>, vector<1x8x8x32xf32>
    %170 = vector.shape_cast %169 : vector<1x8x8x32xf32> to vector<8x8x32xf32>
    %171 = vector.shape_cast %170 : vector<8x8x32xf32> to vector<64x32xf32>
    %172 = arith.truncf %171 : vector<64x32xf32> to vector<64x32xbf16>
    %c21 = arith.constant 21 : index
    %c0_151 = arith.constant 0 : index
    %c0_152 = arith.constant 0 : index
    %173 = vector.load %arg5[%c21, %c0_151, %c0_152] : memref<25x32x64xbf16, #tpu.memory_space<vmem>>, vector<1x32x64xbf16>
    %174 = vector.shape_cast %173 : vector<1x32x64xbf16> to vector<32x64xbf16>
    %cst_153 = arith.constant dense<0.000000e+00> : vector<64x64xf32>
    %175 = tpu.matmul %172, %174, %cst_153 {dimension_numbers = #tpu.dot_dimension_numbers<[1], [0], [0], [1], [0, 0, 1, 1], [], []>} : vector<64x32xbf16>, vector<32x64xbf16>, vector<64x64xf32> -> vector<64x64xf32>
    %176 = arith.addf %168, %175 : vector<64x64xf32>
    %c0_154 = arith.constant 0 : index
    %c2_155 = arith.constant 2 : index
    %c1_156 = arith.constant 1 : index
    %c0_157 = arith.constant 0 : index
    %177 = vector.load %arg1[%c0_154, %c2_155, %c1_156, %c0_157] : memref<1x10x10x32xf32, #tpu.memory_space<vmem>>, vector<1x8x8x32xf32>
    %178 = vector.shape_cast %177 : vector<1x8x8x32xf32> to vector<8x8x32xf32>
    %179 = vector.shape_cast %178 : vector<8x8x32xf32> to vector<64x32xf32>
    %180 = arith.truncf %179 : vector<64x32xf32> to vector<64x32xbf16>
    %c22 = arith.constant 22 : index
    %c0_158 = arith.constant 0 : index
    %c0_159 = arith.constant 0 : index
    %181 = vector.load %arg5[%c22, %c0_158, %c0_159] : memref<25x32x64xbf16, #tpu.memory_space<vmem>>, vector<1x32x64xbf16>
    %182 = vector.shape_cast %181 : vector<1x32x64xbf16> to vector<32x64xbf16>
    %cst_160 = arith.constant dense<0.000000e+00> : vector<64x64xf32>
    %183 = tpu.matmul %180, %182, %cst_160 {dimension_numbers = #tpu.dot_dimension_numbers<[1], [0], [0], [1], [0, 0, 1, 1], [], []>} : vector<64x32xbf16>, vector<32x64xbf16>, vector<64x64xf32> -> vector<64x64xf32>
    %184 = arith.addf %176, %183 : vector<64x64xf32>
    %c0_161 = arith.constant 0 : index
    %c2_162 = arith.constant 2 : index
    %c1_163 = arith.constant 1 : index
    %c0_164 = arith.constant 0 : index
    %185 = vector.load %arg2[%c0_161, %c2_162, %c1_163, %c0_164] : memref<1x10x10x32xf32, #tpu.memory_space<vmem>>, vector<1x8x8x32xf32>
    %186 = vector.shape_cast %185 : vector<1x8x8x32xf32> to vector<8x8x32xf32>
    %187 = vector.shape_cast %186 : vector<8x8x32xf32> to vector<64x32xf32>
    %188 = arith.truncf %187 : vector<64x32xf32> to vector<64x32xbf16>
    %c23 = arith.constant 23 : index
    %c0_165 = arith.constant 0 : index
    %c0_166 = arith.constant 0 : index
    %189 = vector.load %arg5[%c23, %c0_165, %c0_166] : memref<25x32x64xbf16, #tpu.memory_space<vmem>>, vector<1x32x64xbf16>
    %190 = vector.shape_cast %189 : vector<1x32x64xbf16> to vector<32x64xbf16>
    %cst_167 = arith.constant dense<0.000000e+00> : vector<64x64xf32>
    %191 = tpu.matmul %188, %190, %cst_167 {dimension_numbers = #tpu.dot_dimension_numbers<[1], [0], [0], [1], [0, 0, 1, 1], [], []>} : vector<64x32xbf16>, vector<32x64xbf16>, vector<64x64xf32> -> vector<64x64xf32>
    %192 = arith.addf %184, %191 : vector<64x64xf32>
    %c0_168 = arith.constant 0 : index
    %c2_169 = arith.constant 2 : index
    %c2_170 = arith.constant 2 : index
    %c0_171 = arith.constant 0 : index
    %193 = vector.load %arg1[%c0_168, %c2_169, %c2_170, %c0_171] : memref<1x10x10x32xf32, #tpu.memory_space<vmem>>, vector<1x8x8x32xf32>
    %194 = vector.shape_cast %193 : vector<1x8x8x32xf32> to vector<8x8x32xf32>
    %195 = vector.shape_cast %194 : vector<8x8x32xf32> to vector<64x32xf32>
    %196 = arith.truncf %195 : vector<64x32xf32> to vector<64x32xbf16>
    %c24 = arith.constant 24 : index
    %c0_172 = arith.constant 0 : index
    %c0_173 = arith.constant 0 : index
    %197 = vector.load %arg5[%c24, %c0_172, %c0_173] : memref<25x32x64xbf16, #tpu.memory_space<vmem>>, vector<1x32x64xbf16>
    %198 = vector.shape_cast %197 : vector<1x32x64xbf16> to vector<32x64xbf16>
    %cst_174 = arith.constant dense<0.000000e+00> : vector<64x64xf32>
    %199 = tpu.matmul %196, %198, %cst_174 {dimension_numbers = #tpu.dot_dimension_numbers<[1], [0], [0], [1], [0, 0, 1, 1], [], []>} : vector<64x32xbf16>, vector<32x64xbf16>, vector<64x64xf32> -> vector<64x64xf32>
    %200 = arith.addf %192, %199 : vector<64x64xf32>
    %cst_175 = arith.constant 0.000000e+00 : f32
    %201 = vector.broadcast %cst_175 : f32 to vector<64x64xf32>
    %c0_176 = arith.constant 0 : index
    %c0_177 = arith.constant 0 : index
    %c0_178 = arith.constant 0 : index
    %c0_179 = arith.constant 0 : index
    %202 = vector.load %arg2[%c0_176, %c0_177, %c0_178, %c0_179] : memref<1x10x10x32xf32, #tpu.memory_space<vmem>>, vector<1x8x8x32xf32>
    %203 = vector.shape_cast %202 : vector<1x8x8x32xf32> to vector<8x8x32xf32>
    %204 = vector.shape_cast %203 : vector<8x8x32xf32> to vector<64x32xf32>
    %205 = arith.truncf %204 : vector<64x32xf32> to vector<64x32xbf16>
    %c0_180 = arith.constant 0 : index
    %c0_181 = arith.constant 0 : index
    %c0_182 = arith.constant 0 : index
    %206 = vector.load %arg5[%c0_180, %c0_181, %c0_182] : memref<25x32x64xbf16, #tpu.memory_space<vmem>>, vector<1x32x64xbf16>
    %207 = vector.shape_cast %206 : vector<1x32x64xbf16> to vector<32x64xbf16>
    %cst_183 = arith.constant dense<0.000000e+00> : vector<64x64xf32>
    %208 = tpu.matmul %205, %207, %cst_183 {dimension_numbers = #tpu.dot_dimension_numbers<[1], [0], [0], [1], [0, 0, 1, 1], [], []>} : vector<64x32xbf16>, vector<32x64xbf16>, vector<64x64xf32> -> vector<64x64xf32>
    %209 = arith.addf %201, %208 : vector<64x64xf32>
    %c0_184 = arith.constant 0 : index
    %c0_185 = arith.constant 0 : index
    %c1_186 = arith.constant 1 : index
    %c0_187 = arith.constant 0 : index
    %210 = vector.load %arg1[%c0_184, %c0_185, %c1_186, %c0_187] : memref<1x10x10x32xf32, #tpu.memory_space<vmem>>, vector<1x8x8x32xf32>
    %211 = vector.shape_cast %210 : vector<1x8x8x32xf32> to vector<8x8x32xf32>
    %212 = vector.shape_cast %211 : vector<8x8x32xf32> to vector<64x32xf32>
    %213 = arith.truncf %212 : vector<64x32xf32> to vector<64x32xbf16>
    %c1_188 = arith.constant 1 : index
    %c0_189 = arith.constant 0 : index
    %c0_190 = arith.constant 0 : index
    %214 = vector.load %arg5[%c1_188, %c0_189, %c0_190] : memref<25x32x64xbf16, #tpu.memory_space<vmem>>, vector<1x32x64xbf16>
    %215 = vector.shape_cast %214 : vector<1x32x64xbf16> to vector<32x64xbf16>
    %cst_191 = arith.constant dense<0.000000e+00> : vector<64x64xf32>
    %216 = tpu.matmul %213, %215, %cst_191 {dimension_numbers = #tpu.dot_dimension_numbers<[1], [0], [0], [1], [0, 0, 1, 1], [], []>} : vector<64x32xbf16>, vector<32x64xbf16>, vector<64x64xf32> -> vector<64x64xf32>
    %217 = arith.addf %209, %216 : vector<64x64xf32>
    %c0_192 = arith.constant 0 : index
    %c0_193 = arith.constant 0 : index
    %c1_194 = arith.constant 1 : index
    %c0_195 = arith.constant 0 : index
    %218 = vector.load %arg2[%c0_192, %c0_193, %c1_194, %c0_195] : memref<1x10x10x32xf32, #tpu.memory_space<vmem>>, vector<1x8x8x32xf32>
    %219 = vector.shape_cast %218 : vector<1x8x8x32xf32> to vector<8x8x32xf32>
    %220 = vector.shape_cast %219 : vector<8x8x32xf32> to vector<64x32xf32>
    %221 = arith.truncf %220 : vector<64x32xf32> to vector<64x32xbf16>
    %c2_196 = arith.constant 2 : index
    %c0_197 = arith.constant 0 : index
    %c0_198 = arith.constant 0 : index
    %222 = vector.load %arg5[%c2_196, %c0_197, %c0_198] : memref<25x32x64xbf16, #tpu.memory_space<vmem>>, vector<1x32x64xbf16>
    %223 = vector.shape_cast %222 : vector<1x32x64xbf16> to vector<32x64xbf16>
    %cst_199 = arith.constant dense<0.000000e+00> : vector<64x64xf32>
    %224 = tpu.matmul %221, %223, %cst_199 {dimension_numbers = #tpu.dot_dimension_numbers<[1], [0], [0], [1], [0, 0, 1, 1], [], []>} : vector<64x32xbf16>, vector<32x64xbf16>, vector<64x64xf32> -> vector<64x64xf32>
    %225 = arith.addf %217, %224 : vector<64x64xf32>
    %c0_200 = arith.constant 0 : index
    %c0_201 = arith.constant 0 : index
    %c2_202 = arith.constant 2 : index
    %c0_203 = arith.constant 0 : index
    %226 = vector.load %arg1[%c0_200, %c0_201, %c2_202, %c0_203] : memref<1x10x10x32xf32, #tpu.memory_space<vmem>>, vector<1x8x8x32xf32>
    %227 = vector.shape_cast %226 : vector<1x8x8x32xf32> to vector<8x8x32xf32>
    %228 = vector.shape_cast %227 : vector<8x8x32xf32> to vector<64x32xf32>
    %229 = arith.truncf %228 : vector<64x32xf32> to vector<64x32xbf16>
    %c3_204 = arith.constant 3 : index
    %c0_205 = arith.constant 0 : index
    %c0_206 = arith.constant 0 : index
    %230 = vector.load %arg5[%c3_204, %c0_205, %c0_206] : memref<25x32x64xbf16, #tpu.memory_space<vmem>>, vector<1x32x64xbf16>
    %231 = vector.shape_cast %230 : vector<1x32x64xbf16> to vector<32x64xbf16>
    %cst_207 = arith.constant dense<0.000000e+00> : vector<64x64xf32>
    %232 = tpu.matmul %229, %231, %cst_207 {dimension_numbers = #tpu.dot_dimension_numbers<[1], [0], [0], [1], [0, 0, 1, 1], [], []>} : vector<64x32xbf16>, vector<32x64xbf16>, vector<64x64xf32> -> vector<64x64xf32>
    %233 = arith.addf %225, %232 : vector<64x64xf32>
    %c0_208 = arith.constant 0 : index
    %c0_209 = arith.constant 0 : index
    %c2_210 = arith.constant 2 : index
    %c0_211 = arith.constant 0 : index
    %234 = vector.load %arg2[%c0_208, %c0_209, %c2_210, %c0_211] : memref<1x10x10x32xf32, #tpu.memory_space<vmem>>, vector<1x8x8x32xf32>
    %235 = vector.shape_cast %234 : vector<1x8x8x32xf32> to vector<8x8x32xf32>
    %236 = vector.shape_cast %235 : vector<8x8x32xf32> to vector<64x32xf32>
    %237 = arith.truncf %236 : vector<64x32xf32> to vector<64x32xbf16>
    %c4_212 = arith.constant 4 : index
    %c0_213 = arith.constant 0 : index
    %c0_214 = arith.constant 0 : index
    %238 = vector.load %arg5[%c4_212, %c0_213, %c0_214] : memref<25x32x64xbf16, #tpu.memory_space<vmem>>, vector<1x32x64xbf16>
    %239 = vector.shape_cast %238 : vector<1x32x64xbf16> to vector<32x64xbf16>
    %cst_215 = arith.constant dense<0.000000e+00> : vector<64x64xf32>
    %240 = tpu.matmul %237, %239, %cst_215 {dimension_numbers = #tpu.dot_dimension_numbers<[1], [0], [0], [1], [0, 0, 1, 1], [], []>} : vector<64x32xbf16>, vector<32x64xbf16>, vector<64x64xf32> -> vector<64x64xf32>
    %241 = arith.addf %233, %240 : vector<64x64xf32>
    %c0_216 = arith.constant 0 : index
    %c0_217 = arith.constant 0 : index
    %c0_218 = arith.constant 0 : index
    %c0_219 = arith.constant 0 : index
    %242 = vector.load %arg4[%c0_216, %c0_217, %c0_218, %c0_219] : memref<1x10x10x32xf32, #tpu.memory_space<vmem>>, vector<1x8x8x32xf32>
    %243 = vector.shape_cast %242 : vector<1x8x8x32xf32> to vector<8x8x32xf32>
    %244 = vector.shape_cast %243 : vector<8x8x32xf32> to vector<64x32xf32>
    %245 = arith.truncf %244 : vector<64x32xf32> to vector<64x32xbf16>
    %c5_220 = arith.constant 5 : index
    %c0_221 = arith.constant 0 : index
    %c0_222 = arith.constant 0 : index
    %246 = vector.load %arg5[%c5_220, %c0_221, %c0_222] : memref<25x32x64xbf16, #tpu.memory_space<vmem>>, vector<1x32x64xbf16>
    %247 = vector.shape_cast %246 : vector<1x32x64xbf16> to vector<32x64xbf16>
    %cst_223 = arith.constant dense<0.000000e+00> : vector<64x64xf32>
    %248 = tpu.matmul %245, %247, %cst_223 {dimension_numbers = #tpu.dot_dimension_numbers<[1], [0], [0], [1], [0, 0, 1, 1], [], []>} : vector<64x32xbf16>, vector<32x64xbf16>, vector<64x64xf32> -> vector<64x64xf32>
    %249 = arith.addf %241, %248 : vector<64x64xf32>
    %c0_224 = arith.constant 0 : index
    %c0_225 = arith.constant 0 : index
    %c1_226 = arith.constant 1 : index
    %c0_227 = arith.constant 0 : index
    %250 = vector.load %arg3[%c0_224, %c0_225, %c1_226, %c0_227] : memref<1x10x10x32xf32, #tpu.memory_space<vmem>>, vector<1x8x8x32xf32>
    %251 = vector.shape_cast %250 : vector<1x8x8x32xf32> to vector<8x8x32xf32>
    %252 = vector.shape_cast %251 : vector<8x8x32xf32> to vector<64x32xf32>
    %253 = arith.truncf %252 : vector<64x32xf32> to vector<64x32xbf16>
    %c6_228 = arith.constant 6 : index
    %c0_229 = arith.constant 0 : index
    %c0_230 = arith.constant 0 : index
    %254 = vector.load %arg5[%c6_228, %c0_229, %c0_230] : memref<25x32x64xbf16, #tpu.memory_space<vmem>>, vector<1x32x64xbf16>
    %255 = vector.shape_cast %254 : vector<1x32x64xbf16> to vector<32x64xbf16>
    %cst_231 = arith.constant dense<0.000000e+00> : vector<64x64xf32>
    %256 = tpu.matmul %253, %255, %cst_231 {dimension_numbers = #tpu.dot_dimension_numbers<[1], [0], [0], [1], [0, 0, 1, 1], [], []>} : vector<64x32xbf16>, vector<32x64xbf16>, vector<64x64xf32> -> vector<64x64xf32>
    %257 = arith.addf %249, %256 : vector<64x64xf32>
    %c0_232 = arith.constant 0 : index
    %c0_233 = arith.constant 0 : index
    %c1_234 = arith.constant 1 : index
    %c0_235 = arith.constant 0 : index
    %258 = vector.load %arg4[%c0_232, %c0_233, %c1_234, %c0_235] : memref<1x10x10x32xf32, #tpu.memory_space<vmem>>, vector<1x8x8x32xf32>
    %259 = vector.shape_cast %258 : vector<1x8x8x32xf32> to vector<8x8x32xf32>
    %260 = vector.shape_cast %259 : vector<8x8x32xf32> to vector<64x32xf32>
    %261 = arith.truncf %260 : vector<64x32xf32> to vector<64x32xbf16>
    %c7_236 = arith.constant 7 : index
    %c0_237 = arith.constant 0 : index
    %c0_238 = arith.constant 0 : index
    %262 = vector.load %arg5[%c7_236, %c0_237, %c0_238] : memref<25x32x64xbf16, #tpu.memory_space<vmem>>, vector<1x32x64xbf16>
    %263 = vector.shape_cast %262 : vector<1x32x64xbf16> to vector<32x64xbf16>
    %cst_239 = arith.constant dense<0.000000e+00> : vector<64x64xf32>
    %264 = tpu.matmul %261, %263, %cst_239 {dimension_numbers = #tpu.dot_dimension_numbers<[1], [0], [0], [1], [0, 0, 1, 1], [], []>} : vector<64x32xbf16>, vector<32x64xbf16>, vector<64x64xf32> -> vector<64x64xf32>
    %265 = arith.addf %257, %264 : vector<64x64xf32>
    %c0_240 = arith.constant 0 : index
    %c0_241 = arith.constant 0 : index
    %c2_242 = arith.constant 2 : index
    %c0_243 = arith.constant 0 : index
    %266 = vector.load %arg3[%c0_240, %c0_241, %c2_242, %c0_243] : memref<1x10x10x32xf32, #tpu.memory_space<vmem>>, vector<1x8x8x32xf32>
    %267 = vector.shape_cast %266 : vector<1x8x8x32xf32> to vector<8x8x32xf32>
    %268 = vector.shape_cast %267 : vector<8x8x32xf32> to vector<64x32xf32>
    %269 = arith.truncf %268 : vector<64x32xf32> to vector<64x32xbf16>
    %c8_244 = arith.constant 8 : index
    %c0_245 = arith.constant 0 : index
    %c0_246 = arith.constant 0 : index
    %270 = vector.load %arg5[%c8_244, %c0_245, %c0_246] : memref<25x32x64xbf16, #tpu.memory_space<vmem>>, vector<1x32x64xbf16>
    %271 = vector.shape_cast %270 : vector<1x32x64xbf16> to vector<32x64xbf16>
    %cst_247 = arith.constant dense<0.000000e+00> : vector<64x64xf32>
    %272 = tpu.matmul %269, %271, %cst_247 {dimension_numbers = #tpu.dot_dimension_numbers<[1], [0], [0], [1], [0, 0, 1, 1], [], []>} : vector<64x32xbf16>, vector<32x64xbf16>, vector<64x64xf32> -> vector<64x64xf32>
    %273 = arith.addf %265, %272 : vector<64x64xf32>
    %c0_248 = arith.constant 0 : index
    %c0_249 = arith.constant 0 : index
    %c2_250 = arith.constant 2 : index
    %c0_251 = arith.constant 0 : index
    %274 = vector.load %arg4[%c0_248, %c0_249, %c2_250, %c0_251] : memref<1x10x10x32xf32, #tpu.memory_space<vmem>>, vector<1x8x8x32xf32>
    %275 = vector.shape_cast %274 : vector<1x8x8x32xf32> to vector<8x8x32xf32>
    %276 = vector.shape_cast %275 : vector<8x8x32xf32> to vector<64x32xf32>
    %277 = arith.truncf %276 : vector<64x32xf32> to vector<64x32xbf16>
    %c9_252 = arith.constant 9 : index
    %c0_253 = arith.constant 0 : index
    %c0_254 = arith.constant 0 : index
    %278 = vector.load %arg5[%c9_252, %c0_253, %c0_254] : memref<25x32x64xbf16, #tpu.memory_space<vmem>>, vector<1x32x64xbf16>
    %279 = vector.shape_cast %278 : vector<1x32x64xbf16> to vector<32x64xbf16>
    %cst_255 = arith.constant dense<0.000000e+00> : vector<64x64xf32>
    %280 = tpu.matmul %277, %279, %cst_255 {dimension_numbers = #tpu.dot_dimension_numbers<[1], [0], [0], [1], [0, 0, 1, 1], [], []>} : vector<64x32xbf16>, vector<32x64xbf16>, vector<64x64xf32> -> vector<64x64xf32>
    %281 = arith.addf %273, %280 : vector<64x64xf32>
    %c0_256 = arith.constant 0 : index
    %c1_257 = arith.constant 1 : index
    %c0_258 = arith.constant 0 : index
    %c0_259 = arith.constant 0 : index
    %282 = vector.load %arg2[%c0_256, %c1_257, %c0_258, %c0_259] : memref<1x10x10x32xf32, #tpu.memory_space<vmem>>, vector<1x8x8x32xf32>
    %283 = vector.shape_cast %282 : vector<1x8x8x32xf32> to vector<8x8x32xf32>
    %284 = vector.shape_cast %283 : vector<8x8x32xf32> to vector<64x32xf32>
    %285 = arith.truncf %284 : vector<64x32xf32> to vector<64x32xbf16>
    %c10_260 = arith.constant 10 : index
    %c0_261 = arith.constant 0 : index
    %c0_262 = arith.constant 0 : index
    %286 = vector.load %arg5[%c10_260, %c0_261, %c0_262] : memref<25x32x64xbf16, #tpu.memory_space<vmem>>, vector<1x32x64xbf16>
    %287 = vector.shape_cast %286 : vector<1x32x64xbf16> to vector<32x64xbf16>
    %cst_263 = arith.constant dense<0.000000e+00> : vector<64x64xf32>
    %288 = tpu.matmul %285, %287, %cst_263 {dimension_numbers = #tpu.dot_dimension_numbers<[1], [0], [0], [1], [0, 0, 1, 1], [], []>} : vector<64x32xbf16>, vector<32x64xbf16>, vector<64x64xf32> -> vector<64x64xf32>
    %289 = arith.addf %281, %288 : vector<64x64xf32>
    %c0_264 = arith.constant 0 : index
    %c1_265 = arith.constant 1 : index
    %c1_266 = arith.constant 1 : index
    %c0_267 = arith.constant 0 : index
    %290 = vector.load %arg1[%c0_264, %c1_265, %c1_266, %c0_267] : memref<1x10x10x32xf32, #tpu.memory_space<vmem>>, vector<1x8x8x32xf32>
    %291 = vector.shape_cast %290 : vector<1x8x8x32xf32> to vector<8x8x32xf32>
    %292 = vector.shape_cast %291 : vector<8x8x32xf32> to vector<64x32xf32>
    %293 = arith.truncf %292 : vector<64x32xf32> to vector<64x32xbf16>
    %c11_268 = arith.constant 11 : index
    %c0_269 = arith.constant 0 : index
    %c0_270 = arith.constant 0 : index
    %294 = vector.load %arg5[%c11_268, %c0_269, %c0_270] : memref<25x32x64xbf16, #tpu.memory_space<vmem>>, vector<1x32x64xbf16>
    %295 = vector.shape_cast %294 : vector<1x32x64xbf16> to vector<32x64xbf16>
    %cst_271 = arith.constant dense<0.000000e+00> : vector<64x64xf32>
    %296 = tpu.matmul %293, %295, %cst_271 {dimension_numbers = #tpu.dot_dimension_numbers<[1], [0], [0], [1], [0, 0, 1, 1], [], []>} : vector<64x32xbf16>, vector<32x64xbf16>, vector<64x64xf32> -> vector<64x64xf32>
    %297 = arith.addf %289, %296 : vector<64x64xf32>
    %c0_272 = arith.constant 0 : index
    %c1_273 = arith.constant 1 : index
    %c1_274 = arith.constant 1 : index
    %c0_275 = arith.constant 0 : index
    %298 = vector.load %arg2[%c0_272, %c1_273, %c1_274, %c0_275] : memref<1x10x10x32xf32, #tpu.memory_space<vmem>>, vector<1x8x8x32xf32>
    %299 = vector.shape_cast %298 : vector<1x8x8x32xf32> to vector<8x8x32xf32>
    %300 = vector.shape_cast %299 : vector<8x8x32xf32> to vector<64x32xf32>
    %301 = arith.truncf %300 : vector<64x32xf32> to vector<64x32xbf16>
    %c12_276 = arith.constant 12 : index
    %c0_277 = arith.constant 0 : index
    %c0_278 = arith.constant 0 : index
    %302 = vector.load %arg5[%c12_276, %c0_277, %c0_278] : memref<25x32x64xbf16, #tpu.memory_space<vmem>>, vector<1x32x64xbf16>
    %303 = vector.shape_cast %302 : vector<1x32x64xbf16> to vector<32x64xbf16>
    %cst_279 = arith.constant dense<0.000000e+00> : vector<64x64xf32>
    %304 = tpu.matmul %301, %303, %cst_279 {dimension_numbers = #tpu.dot_dimension_numbers<[1], [0], [0], [1], [0, 0, 1, 1], [], []>} : vector<64x32xbf16>, vector<32x64xbf16>, vector<64x64xf32> -> vector<64x64xf32>
    %305 = arith.addf %297, %304 : vector<64x64xf32>
    %c0_280 = arith.constant 0 : index
    %c1_281 = arith.constant 1 : index
    %c2_282 = arith.constant 2 : index
    %c0_283 = arith.constant 0 : index
    %306 = vector.load %arg1[%c0_280, %c1_281, %c2_282, %c0_283] : memref<1x10x10x32xf32, #tpu.memory_space<vmem>>, vector<1x8x8x32xf32>
    %307 = vector.shape_cast %306 : vector<1x8x8x32xf32> to vector<8x8x32xf32>
    %308 = vector.shape_cast %307 : vector<8x8x32xf32> to vector<64x32xf32>
    %309 = arith.truncf %308 : vector<64x32xf32> to vector<64x32xbf16>
    %c13_284 = arith.constant 13 : index
    %c0_285 = arith.constant 0 : index
    %c0_286 = arith.constant 0 : index
    %310 = vector.load %arg5[%c13_284, %c0_285, %c0_286] : memref<25x32x64xbf16, #tpu.memory_space<vmem>>, vector<1x32x64xbf16>
    %311 = vector.shape_cast %310 : vector<1x32x64xbf16> to vector<32x64xbf16>
    %cst_287 = arith.constant dense<0.000000e+00> : vector<64x64xf32>
    %312 = tpu.matmul %309, %311, %cst_287 {dimension_numbers = #tpu.dot_dimension_numbers<[1], [0], [0], [1], [0, 0, 1, 1], [], []>} : vector<64x32xbf16>, vector<32x64xbf16>, vector<64x64xf32> -> vector<64x64xf32>
    %313 = arith.addf %305, %312 : vector<64x64xf32>
    %c0_288 = arith.constant 0 : index
    %c1_289 = arith.constant 1 : index
    %c2_290 = arith.constant 2 : index
    %c0_291 = arith.constant 0 : index
    %314 = vector.load %arg2[%c0_288, %c1_289, %c2_290, %c0_291] : memref<1x10x10x32xf32, #tpu.memory_space<vmem>>, vector<1x8x8x32xf32>
    %315 = vector.shape_cast %314 : vector<1x8x8x32xf32> to vector<8x8x32xf32>
    %316 = vector.shape_cast %315 : vector<8x8x32xf32> to vector<64x32xf32>
    %317 = arith.truncf %316 : vector<64x32xf32> to vector<64x32xbf16>
    %c14_292 = arith.constant 14 : index
    %c0_293 = arith.constant 0 : index
    %c0_294 = arith.constant 0 : index
    %318 = vector.load %arg5[%c14_292, %c0_293, %c0_294] : memref<25x32x64xbf16, #tpu.memory_space<vmem>>, vector<1x32x64xbf16>
    %319 = vector.shape_cast %318 : vector<1x32x64xbf16> to vector<32x64xbf16>
    %cst_295 = arith.constant dense<0.000000e+00> : vector<64x64xf32>
    %320 = tpu.matmul %317, %319, %cst_295 {dimension_numbers = #tpu.dot_dimension_numbers<[1], [0], [0], [1], [0, 0, 1, 1], [], []>} : vector<64x32xbf16>, vector<32x64xbf16>, vector<64x64xf32> -> vector<64x64xf32>
    %321 = arith.addf %313, %320 : vector<64x64xf32>
    %c0_296 = arith.constant 0 : index
    %c1_297 = arith.constant 1 : index
    %c0_298 = arith.constant 0 : index
    %c0_299 = arith.constant 0 : index
    %322 = vector.load %arg4[%c0_296, %c1_297, %c0_298, %c0_299] : memref<1x10x10x32xf32, #tpu.memory_space<vmem>>, vector<1x8x8x32xf32>
    %323 = vector.shape_cast %322 : vector<1x8x8x32xf32> to vector<8x8x32xf32>
    %324 = vector.shape_cast %323 : vector<8x8x32xf32> to vector<64x32xf32>
    %325 = arith.truncf %324 : vector<64x32xf32> to vector<64x32xbf16>
    %c15_300 = arith.constant 15 : index
    %c0_301 = arith.constant 0 : index
    %c0_302 = arith.constant 0 : index
    %326 = vector.load %arg5[%c15_300, %c0_301, %c0_302] : memref<25x32x64xbf16, #tpu.memory_space<vmem>>, vector<1x32x64xbf16>
    %327 = vector.shape_cast %326 : vector<1x32x64xbf16> to vector<32x64xbf16>
    %cst_303 = arith.constant dense<0.000000e+00> : vector<64x64xf32>
    %328 = tpu.matmul %325, %327, %cst_303 {dimension_numbers = #tpu.dot_dimension_numbers<[1], [0], [0], [1], [0, 0, 1, 1], [], []>} : vector<64x32xbf16>, vector<32x64xbf16>, vector<64x64xf32> -> vector<64x64xf32>
    %329 = arith.addf %321, %328 : vector<64x64xf32>
    %c0_304 = arith.constant 0 : index
    %c1_305 = arith.constant 1 : index
    %c1_306 = arith.constant 1 : index
    %c0_307 = arith.constant 0 : index
    %330 = vector.load %arg3[%c0_304, %c1_305, %c1_306, %c0_307] : memref<1x10x10x32xf32, #tpu.memory_space<vmem>>, vector<1x8x8x32xf32>
    %331 = vector.shape_cast %330 : vector<1x8x8x32xf32> to vector<8x8x32xf32>
    %332 = vector.shape_cast %331 : vector<8x8x32xf32> to vector<64x32xf32>
    %333 = arith.truncf %332 : vector<64x32xf32> to vector<64x32xbf16>
    %c16_308 = arith.constant 16 : index
    %c0_309 = arith.constant 0 : index
    %c0_310 = arith.constant 0 : index
    %334 = vector.load %arg5[%c16_308, %c0_309, %c0_310] : memref<25x32x64xbf16, #tpu.memory_space<vmem>>, vector<1x32x64xbf16>
    %335 = vector.shape_cast %334 : vector<1x32x64xbf16> to vector<32x64xbf16>
    %cst_311 = arith.constant dense<0.000000e+00> : vector<64x64xf32>
    %336 = tpu.matmul %333, %335, %cst_311 {dimension_numbers = #tpu.dot_dimension_numbers<[1], [0], [0], [1], [0, 0, 1, 1], [], []>} : vector<64x32xbf16>, vector<32x64xbf16>, vector<64x64xf32> -> vector<64x64xf32>
    %337 = arith.addf %329, %336 : vector<64x64xf32>
    %c0_312 = arith.constant 0 : index
    %c1_313 = arith.constant 1 : index
    %c1_314 = arith.constant 1 : index
    %c0_315 = arith.constant 0 : index
    %338 = vector.load %arg4[%c0_312, %c1_313, %c1_314, %c0_315] : memref<1x10x10x32xf32, #tpu.memory_space<vmem>>, vector<1x8x8x32xf32>
    %339 = vector.shape_cast %338 : vector<1x8x8x32xf32> to vector<8x8x32xf32>
    %340 = vector.shape_cast %339 : vector<8x8x32xf32> to vector<64x32xf32>
    %341 = arith.truncf %340 : vector<64x32xf32> to vector<64x32xbf16>
    %c17_316 = arith.constant 17 : index
    %c0_317 = arith.constant 0 : index
    %c0_318 = arith.constant 0 : index
    %342 = vector.load %arg5[%c17_316, %c0_317, %c0_318] : memref<25x32x64xbf16, #tpu.memory_space<vmem>>, vector<1x32x64xbf16>
    %343 = vector.shape_cast %342 : vector<1x32x64xbf16> to vector<32x64xbf16>
    %cst_319 = arith.constant dense<0.000000e+00> : vector<64x64xf32>
    %344 = tpu.matmul %341, %343, %cst_319 {dimension_numbers = #tpu.dot_dimension_numbers<[1], [0], [0], [1], [0, 0, 1, 1], [], []>} : vector<64x32xbf16>, vector<32x64xbf16>, vector<64x64xf32> -> vector<64x64xf32>
    %345 = arith.addf %337, %344 : vector<64x64xf32>
    %c0_320 = arith.constant 0 : index
    %c1_321 = arith.constant 1 : index
    %c2_322 = arith.constant 2 : index
    %c0_323 = arith.constant 0 : index
    %346 = vector.load %arg3[%c0_320, %c1_321, %c2_322, %c0_323] : memref<1x10x10x32xf32, #tpu.memory_space<vmem>>, vector<1x8x8x32xf32>
    %347 = vector.shape_cast %346 : vector<1x8x8x32xf32> to vector<8x8x32xf32>
    %348 = vector.shape_cast %347 : vector<8x8x32xf32> to vector<64x32xf32>
    %349 = arith.truncf %348 : vector<64x32xf32> to vector<64x32xbf16>
    %c18_324 = arith.constant 18 : index
    %c0_325 = arith.constant 0 : index
    %c0_326 = arith.constant 0 : index
    %350 = vector.load %arg5[%c18_324, %c0_325, %c0_326] : memref<25x32x64xbf16, #tpu.memory_space<vmem>>, vector<1x32x64xbf16>
    %351 = vector.shape_cast %350 : vector<1x32x64xbf16> to vector<32x64xbf16>
    %cst_327 = arith.constant dense<0.000000e+00> : vector<64x64xf32>
    %352 = tpu.matmul %349, %351, %cst_327 {dimension_numbers = #tpu.dot_dimension_numbers<[1], [0], [0], [1], [0, 0, 1, 1], [], []>} : vector<64x32xbf16>, vector<32x64xbf16>, vector<64x64xf32> -> vector<64x64xf32>
    %353 = arith.addf %345, %352 : vector<64x64xf32>
    %c0_328 = arith.constant 0 : index
    %c1_329 = arith.constant 1 : index
    %c2_330 = arith.constant 2 : index
    %c0_331 = arith.constant 0 : index
    %354 = vector.load %arg4[%c0_328, %c1_329, %c2_330, %c0_331] : memref<1x10x10x32xf32, #tpu.memory_space<vmem>>, vector<1x8x8x32xf32>
    %355 = vector.shape_cast %354 : vector<1x8x8x32xf32> to vector<8x8x32xf32>
    %356 = vector.shape_cast %355 : vector<8x8x32xf32> to vector<64x32xf32>
    %357 = arith.truncf %356 : vector<64x32xf32> to vector<64x32xbf16>
    %c19_332 = arith.constant 19 : index
    %c0_333 = arith.constant 0 : index
    %c0_334 = arith.constant 0 : index
    %358 = vector.load %arg5[%c19_332, %c0_333, %c0_334] : memref<25x32x64xbf16, #tpu.memory_space<vmem>>, vector<1x32x64xbf16>
    %359 = vector.shape_cast %358 : vector<1x32x64xbf16> to vector<32x64xbf16>
    %cst_335 = arith.constant dense<0.000000e+00> : vector<64x64xf32>
    %360 = tpu.matmul %357, %359, %cst_335 {dimension_numbers = #tpu.dot_dimension_numbers<[1], [0], [0], [1], [0, 0, 1, 1], [], []>} : vector<64x32xbf16>, vector<32x64xbf16>, vector<64x64xf32> -> vector<64x64xf32>
    %361 = arith.addf %353, %360 : vector<64x64xf32>
    %c0_336 = arith.constant 0 : index
    %c2_337 = arith.constant 2 : index
    %c0_338 = arith.constant 0 : index
    %c0_339 = arith.constant 0 : index
    %362 = vector.load %arg2[%c0_336, %c2_337, %c0_338, %c0_339] : memref<1x10x10x32xf32, #tpu.memory_space<vmem>>, vector<1x8x8x32xf32>
    %363 = vector.shape_cast %362 : vector<1x8x8x32xf32> to vector<8x8x32xf32>
    %364 = vector.shape_cast %363 : vector<8x8x32xf32> to vector<64x32xf32>
    %365 = arith.truncf %364 : vector<64x32xf32> to vector<64x32xbf16>
    %c20_340 = arith.constant 20 : index
    %c0_341 = arith.constant 0 : index
    %c0_342 = arith.constant 0 : index
    %366 = vector.load %arg5[%c20_340, %c0_341, %c0_342] : memref<25x32x64xbf16, #tpu.memory_space<vmem>>, vector<1x32x64xbf16>
    %367 = vector.shape_cast %366 : vector<1x32x64xbf16> to vector<32x64xbf16>
    %cst_343 = arith.constant dense<0.000000e+00> : vector<64x64xf32>
    %368 = tpu.matmul %365, %367, %cst_343 {dimension_numbers = #tpu.dot_dimension_numbers<[1], [0], [0], [1], [0, 0, 1, 1], [], []>} : vector<64x32xbf16>, vector<32x64xbf16>, vector<64x64xf32> -> vector<64x64xf32>
    %369 = arith.addf %361, %368 : vector<64x64xf32>
    %c0_344 = arith.constant 0 : index
    %c2_345 = arith.constant 2 : index
    %c1_346 = arith.constant 1 : index
    %c0_347 = arith.constant 0 : index
    %370 = vector.load %arg1[%c0_344, %c2_345, %c1_346, %c0_347] : memref<1x10x10x32xf32, #tpu.memory_space<vmem>>, vector<1x8x8x32xf32>
    %371 = vector.shape_cast %370 : vector<1x8x8x32xf32> to vector<8x8x32xf32>
    %372 = vector.shape_cast %371 : vector<8x8x32xf32> to vector<64x32xf32>
    %373 = arith.truncf %372 : vector<64x32xf32> to vector<64x32xbf16>
    %c21_348 = arith.constant 21 : index
    %c0_349 = arith.constant 0 : index
    %c0_350 = arith.constant 0 : index
    %374 = vector.load %arg5[%c21_348, %c0_349, %c0_350] : memref<25x32x64xbf16, #tpu.memory_space<vmem>>, vector<1x32x64xbf16>
    %375 = vector.shape_cast %374 : vector<1x32x64xbf16> to vector<32x64xbf16>
    %cst_351 = arith.constant dense<0.000000e+00> : vector<64x64xf32>
    %376 = tpu.matmul %373, %375, %cst_351 {dimension_numbers = #tpu.dot_dimension_numbers<[1], [0], [0], [1], [0, 0, 1, 1], [], []>} : vector<64x32xbf16>, vector<32x64xbf16>, vector<64x64xf32> -> vector<64x64xf32>
    %377 = arith.addf %369, %376 : vector<64x64xf32>
    %c0_352 = arith.constant 0 : index
    %c2_353 = arith.constant 2 : index
    %c1_354 = arith.constant 1 : index
    %c0_355 = arith.constant 0 : index
    %378 = vector.load %arg2[%c0_352, %c2_353, %c1_354, %c0_355] : memref<1x10x10x32xf32, #tpu.memory_space<vmem>>, vector<1x8x8x32xf32>
    %379 = vector.shape_cast %378 : vector<1x8x8x32xf32> to vector<8x8x32xf32>
    %380 = vector.shape_cast %379 : vector<8x8x32xf32> to vector<64x32xf32>
    %381 = arith.truncf %380 : vector<64x32xf32> to vector<64x32xbf16>
    %c22_356 = arith.constant 22 : index
    %c0_357 = arith.constant 0 : index
    %c0_358 = arith.constant 0 : index
    %382 = vector.load %arg5[%c22_356, %c0_357, %c0_358] : memref<25x32x64xbf16, #tpu.memory_space<vmem>>, vector<1x32x64xbf16>
    %383 = vector.shape_cast %382 : vector<1x32x64xbf16> to vector<32x64xbf16>
    %cst_359 = arith.constant dense<0.000000e+00> : vector<64x64xf32>
    %384 = tpu.matmul %381, %383, %cst_359 {dimension_numbers = #tpu.dot_dimension_numbers<[1], [0], [0], [1], [0, 0, 1, 1], [], []>} : vector<64x32xbf16>, vector<32x64xbf16>, vector<64x64xf32> -> vector<64x64xf32>
    %385 = arith.addf %377, %384 : vector<64x64xf32>
    %c0_360 = arith.constant 0 : index
    %c2_361 = arith.constant 2 : index
    %c2_362 = arith.constant 2 : index
    %c0_363 = arith.constant 0 : index
    %386 = vector.load %arg1[%c0_360, %c2_361, %c2_362, %c0_363] : memref<1x10x10x32xf32, #tpu.memory_space<vmem>>, vector<1x8x8x32xf32>
    %387 = vector.shape_cast %386 : vector<1x8x8x32xf32> to vector<8x8x32xf32>
    %388 = vector.shape_cast %387 : vector<8x8x32xf32> to vector<64x32xf32>
    %389 = arith.truncf %388 : vector<64x32xf32> to vector<64x32xbf16>
    %c23_364 = arith.constant 23 : index
    %c0_365 = arith.constant 0 : index
    %c0_366 = arith.constant 0 : index
    %390 = vector.load %arg5[%c23_364, %c0_365, %c0_366] : memref<25x32x64xbf16, #tpu.memory_space<vmem>>, vector<1x32x64xbf16>
    %391 = vector.shape_cast %390 : vector<1x32x64xbf16> to vector<32x64xbf16>
    %cst_367 = arith.constant dense<0.000000e+00> : vector<64x64xf32>
    %392 = tpu.matmul %389, %391, %cst_367 {dimension_numbers = #tpu.dot_dimension_numbers<[1], [0], [0], [1], [0, 0, 1, 1], [], []>} : vector<64x32xbf16>, vector<32x64xbf16>, vector<64x64xf32> -> vector<64x64xf32>
    %393 = arith.addf %385, %392 : vector<64x64xf32>
    %c0_368 = arith.constant 0 : index
    %c2_369 = arith.constant 2 : index
    %c2_370 = arith.constant 2 : index
    %c0_371 = arith.constant 0 : index
    %394 = vector.load %arg2[%c0_368, %c2_369, %c2_370, %c0_371] : memref<1x10x10x32xf32, #tpu.memory_space<vmem>>, vector<1x8x8x32xf32>
    %395 = vector.shape_cast %394 : vector<1x8x8x32xf32> to vector<8x8x32xf32>
    %396 = vector.shape_cast %395 : vector<8x8x32xf32> to vector<64x32xf32>
    %397 = arith.truncf %396 : vector<64x32xf32> to vector<64x32xbf16>
    %c24_372 = arith.constant 24 : index
    %c0_373 = arith.constant 0 : index
    %c0_374 = arith.constant 0 : index
    %398 = vector.load %arg5[%c24_372, %c0_373, %c0_374] : memref<25x32x64xbf16, #tpu.memory_space<vmem>>, vector<1x32x64xbf16>
    %399 = vector.shape_cast %398 : vector<1x32x64xbf16> to vector<32x64xbf16>
    %cst_375 = arith.constant dense<0.000000e+00> : vector<64x64xf32>
    %400 = tpu.matmul %397, %399, %cst_375 {dimension_numbers = #tpu.dot_dimension_numbers<[1], [0], [0], [1], [0, 0, 1, 1], [], []>} : vector<64x32xbf16>, vector<32x64xbf16>, vector<64x64xf32> -> vector<64x64xf32>
    %401 = arith.addf %393, %400 : vector<64x64xf32>
    %402 = arith.maximumf %200, %401 : vector<64x64xf32>
    %cst_376 = arith.constant 0.000000e+00 : f32
    %403 = vector.broadcast %cst_376 : f32 to vector<64x64xf32>
    %c0_377 = arith.constant 0 : index
    %c0_378 = arith.constant 0 : index
    %c0_379 = arith.constant 0 : index
    %c0_380 = arith.constant 0 : index
    %404 = vector.load %arg3[%c0_377, %c0_378, %c0_379, %c0_380] : memref<1x10x10x32xf32, #tpu.memory_space<vmem>>, vector<1x8x8x32xf32>
    %405 = vector.shape_cast %404 : vector<1x8x8x32xf32> to vector<8x8x32xf32>
    %406 = vector.shape_cast %405 : vector<8x8x32xf32> to vector<64x32xf32>
    %407 = arith.truncf %406 : vector<64x32xf32> to vector<64x32xbf16>
    %c0_381 = arith.constant 0 : index
    %c0_382 = arith.constant 0 : index
    %c0_383 = arith.constant 0 : index
    %408 = vector.load %arg5[%c0_381, %c0_382, %c0_383] : memref<25x32x64xbf16, #tpu.memory_space<vmem>>, vector<1x32x64xbf16>
    %409 = vector.shape_cast %408 : vector<1x32x64xbf16> to vector<32x64xbf16>
    %cst_384 = arith.constant dense<0.000000e+00> : vector<64x64xf32>
    %410 = tpu.matmul %407, %409, %cst_384 {dimension_numbers = #tpu.dot_dimension_numbers<[1], [0], [0], [1], [0, 0, 1, 1], [], []>} : vector<64x32xbf16>, vector<32x64xbf16>, vector<64x64xf32> -> vector<64x64xf32>
    %411 = arith.addf %403, %410 : vector<64x64xf32>
    %c0_385 = arith.constant 0 : index
    %c0_386 = arith.constant 0 : index
    %c0_387 = arith.constant 0 : index
    %c0_388 = arith.constant 0 : index
    %412 = vector.load %arg4[%c0_385, %c0_386, %c0_387, %c0_388] : memref<1x10x10x32xf32, #tpu.memory_space<vmem>>, vector<1x8x8x32xf32>
    %413 = vector.shape_cast %412 : vector<1x8x8x32xf32> to vector<8x8x32xf32>
    %414 = vector.shape_cast %413 : vector<8x8x32xf32> to vector<64x32xf32>
    %415 = arith.truncf %414 : vector<64x32xf32> to vector<64x32xbf16>
    %c1_389 = arith.constant 1 : index
    %c0_390 = arith.constant 0 : index
    %c0_391 = arith.constant 0 : index
    %416 = vector.load %arg5[%c1_389, %c0_390, %c0_391] : memref<25x32x64xbf16, #tpu.memory_space<vmem>>, vector<1x32x64xbf16>
    %417 = vector.shape_cast %416 : vector<1x32x64xbf16> to vector<32x64xbf16>
    %cst_392 = arith.constant dense<0.000000e+00> : vector<64x64xf32>
    %418 = tpu.matmul %415, %417, %cst_392 {dimension_numbers = #tpu.dot_dimension_numbers<[1], [0], [0], [1], [0, 0, 1, 1], [], []>} : vector<64x32xbf16>, vector<32x64xbf16>, vector<64x64xf32> -> vector<64x64xf32>
    %419 = arith.addf %411, %418 : vector<64x64xf32>
    %c0_393 = arith.constant 0 : index
    %c0_394 = arith.constant 0 : index
    %c1_395 = arith.constant 1 : index
    %c0_396 = arith.constant 0 : index
    %420 = vector.load %arg3[%c0_393, %c0_394, %c1_395, %c0_396] : memref<1x10x10x32xf32, #tpu.memory_space<vmem>>, vector<1x8x8x32xf32>
    %421 = vector.shape_cast %420 : vector<1x8x8x32xf32> to vector<8x8x32xf32>
    %422 = vector.shape_cast %421 : vector<8x8x32xf32> to vector<64x32xf32>
    %423 = arith.truncf %422 : vector<64x32xf32> to vector<64x32xbf16>
    %c2_397 = arith.constant 2 : index
    %c0_398 = arith.constant 0 : index
    %c0_399 = arith.constant 0 : index
    %424 = vector.load %arg5[%c2_397, %c0_398, %c0_399] : memref<25x32x64xbf16, #tpu.memory_space<vmem>>, vector<1x32x64xbf16>
    %425 = vector.shape_cast %424 : vector<1x32x64xbf16> to vector<32x64xbf16>
    %cst_400 = arith.constant dense<0.000000e+00> : vector<64x64xf32>
    %426 = tpu.matmul %423, %425, %cst_400 {dimension_numbers = #tpu.dot_dimension_numbers<[1], [0], [0], [1], [0, 0, 1, 1], [], []>} : vector<64x32xbf16>, vector<32x64xbf16>, vector<64x64xf32> -> vector<64x64xf32>
    %427 = arith.addf %419, %426 : vector<64x64xf32>
    %c0_401 = arith.constant 0 : index
    %c0_402 = arith.constant 0 : index
    %c1_403 = arith.constant 1 : index
    %c0_404 = arith.constant 0 : index
    %428 = vector.load %arg4[%c0_401, %c0_402, %c1_403, %c0_404] : memref<1x10x10x32xf32, #tpu.memory_space<vmem>>, vector<1x8x8x32xf32>
    %429 = vector.shape_cast %428 : vector<1x8x8x32xf32> to vector<8x8x32xf32>
    %430 = vector.shape_cast %429 : vector<8x8x32xf32> to vector<64x32xf32>
    %431 = arith.truncf %430 : vector<64x32xf32> to vector<64x32xbf16>
    %c3_405 = arith.constant 3 : index
    %c0_406 = arith.constant 0 : index
    %c0_407 = arith.constant 0 : index
    %432 = vector.load %arg5[%c3_405, %c0_406, %c0_407] : memref<25x32x64xbf16, #tpu.memory_space<vmem>>, vector<1x32x64xbf16>
    %433 = vector.shape_cast %432 : vector<1x32x64xbf16> to vector<32x64xbf16>
    %cst_408 = arith.constant dense<0.000000e+00> : vector<64x64xf32>
    %434 = tpu.matmul %431, %433, %cst_408 {dimension_numbers = #tpu.dot_dimension_numbers<[1], [0], [0], [1], [0, 0, 1, 1], [], []>} : vector<64x32xbf16>, vector<32x64xbf16>, vector<64x64xf32> -> vector<64x64xf32>
    %435 = arith.addf %427, %434 : vector<64x64xf32>
    %c0_409 = arith.constant 0 : index
    %c0_410 = arith.constant 0 : index
    %c2_411 = arith.constant 2 : index
    %c0_412 = arith.constant 0 : index
    %436 = vector.load %arg3[%c0_409, %c0_410, %c2_411, %c0_412] : memref<1x10x10x32xf32, #tpu.memory_space<vmem>>, vector<1x8x8x32xf32>
    %437 = vector.shape_cast %436 : vector<1x8x8x32xf32> to vector<8x8x32xf32>
    %438 = vector.shape_cast %437 : vector<8x8x32xf32> to vector<64x32xf32>
    %439 = arith.truncf %438 : vector<64x32xf32> to vector<64x32xbf16>
    %c4_413 = arith.constant 4 : index
    %c0_414 = arith.constant 0 : index
    %c0_415 = arith.constant 0 : index
    %440 = vector.load %arg5[%c4_413, %c0_414, %c0_415] : memref<25x32x64xbf16, #tpu.memory_space<vmem>>, vector<1x32x64xbf16>
    %441 = vector.shape_cast %440 : vector<1x32x64xbf16> to vector<32x64xbf16>
    %cst_416 = arith.constant dense<0.000000e+00> : vector<64x64xf32>
    %442 = tpu.matmul %439, %441, %cst_416 {dimension_numbers = #tpu.dot_dimension_numbers<[1], [0], [0], [1], [0, 0, 1, 1], [], []>} : vector<64x32xbf16>, vector<32x64xbf16>, vector<64x64xf32> -> vector<64x64xf32>
    %443 = arith.addf %435, %442 : vector<64x64xf32>
    %c0_417 = arith.constant 0 : index
    %c1_418 = arith.constant 1 : index
    %c0_419 = arith.constant 0 : index
    %c0_420 = arith.constant 0 : index
    %444 = vector.load %arg1[%c0_417, %c1_418, %c0_419, %c0_420] : memref<1x10x10x32xf32, #tpu.memory_space<vmem>>, vector<1x8x8x32xf32>
    %445 = vector.shape_cast %444 : vector<1x8x8x32xf32> to vector<8x8x32xf32>
    %446 = vector.shape_cast %445 : vector<8x8x32xf32> to vector<64x32xf32>
    %447 = arith.truncf %446 : vector<64x32xf32> to vector<64x32xbf16>
    %c5_421 = arith.constant 5 : index
    %c0_422 = arith.constant 0 : index
    %c0_423 = arith.constant 0 : index
    %448 = vector.load %arg5[%c5_421, %c0_422, %c0_423] : memref<25x32x64xbf16, #tpu.memory_space<vmem>>, vector<1x32x64xbf16>
    %449 = vector.shape_cast %448 : vector<1x32x64xbf16> to vector<32x64xbf16>
    %cst_424 = arith.constant dense<0.000000e+00> : vector<64x64xf32>
    %450 = tpu.matmul %447, %449, %cst_424 {dimension_numbers = #tpu.dot_dimension_numbers<[1], [0], [0], [1], [0, 0, 1, 1], [], []>} : vector<64x32xbf16>, vector<32x64xbf16>, vector<64x64xf32> -> vector<64x64xf32>
    %451 = arith.addf %443, %450 : vector<64x64xf32>
    %c0_425 = arith.constant 0 : index
    %c1_426 = arith.constant 1 : index
    %c0_427 = arith.constant 0 : index
    %c0_428 = arith.constant 0 : index
    %452 = vector.load %arg2[%c0_425, %c1_426, %c0_427, %c0_428] : memref<1x10x10x32xf32, #tpu.memory_space<vmem>>, vector<1x8x8x32xf32>
    %453 = vector.shape_cast %452 : vector<1x8x8x32xf32> to vector<8x8x32xf32>
    %454 = vector.shape_cast %453 : vector<8x8x32xf32> to vector<64x32xf32>
    %455 = arith.truncf %454 : vector<64x32xf32> to vector<64x32xbf16>
    %c6_429 = arith.constant 6 : index
    %c0_430 = arith.constant 0 : index
    %c0_431 = arith.constant 0 : index
    %456 = vector.load %arg5[%c6_429, %c0_430, %c0_431] : memref<25x32x64xbf16, #tpu.memory_space<vmem>>, vector<1x32x64xbf16>
    %457 = vector.shape_cast %456 : vector<1x32x64xbf16> to vector<32x64xbf16>
    %cst_432 = arith.constant dense<0.000000e+00> : vector<64x64xf32>
    %458 = tpu.matmul %455, %457, %cst_432 {dimension_numbers = #tpu.dot_dimension_numbers<[1], [0], [0], [1], [0, 0, 1, 1], [], []>} : vector<64x32xbf16>, vector<32x64xbf16>, vector<64x64xf32> -> vector<64x64xf32>
    %459 = arith.addf %451, %458 : vector<64x64xf32>
    %c0_433 = arith.constant 0 : index
    %c1_434 = arith.constant 1 : index
    %c1_435 = arith.constant 1 : index
    %c0_436 = arith.constant 0 : index
    %460 = vector.load %arg1[%c0_433, %c1_434, %c1_435, %c0_436] : memref<1x10x10x32xf32, #tpu.memory_space<vmem>>, vector<1x8x8x32xf32>
    %461 = vector.shape_cast %460 : vector<1x8x8x32xf32> to vector<8x8x32xf32>
    %462 = vector.shape_cast %461 : vector<8x8x32xf32> to vector<64x32xf32>
    %463 = arith.truncf %462 : vector<64x32xf32> to vector<64x32xbf16>
    %c7_437 = arith.constant 7 : index
    %c0_438 = arith.constant 0 : index
    %c0_439 = arith.constant 0 : index
    %464 = vector.load %arg5[%c7_437, %c0_438, %c0_439] : memref<25x32x64xbf16, #tpu.memory_space<vmem>>, vector<1x32x64xbf16>
    %465 = vector.shape_cast %464 : vector<1x32x64xbf16> to vector<32x64xbf16>
    %cst_440 = arith.constant dense<0.000000e+00> : vector<64x64xf32>
    %466 = tpu.matmul %463, %465, %cst_440 {dimension_numbers = #tpu.dot_dimension_numbers<[1], [0], [0], [1], [0, 0, 1, 1], [], []>} : vector<64x32xbf16>, vector<32x64xbf16>, vector<64x64xf32> -> vector<64x64xf32>
    %467 = arith.addf %459, %466 : vector<64x64xf32>
    %c0_441 = arith.constant 0 : index
    %c1_442 = arith.constant 1 : index
    %c1_443 = arith.constant 1 : index
    %c0_444 = arith.constant 0 : index
    %468 = vector.load %arg2[%c0_441, %c1_442, %c1_443, %c0_444] : memref<1x10x10x32xf32, #tpu.memory_space<vmem>>, vector<1x8x8x32xf32>
    %469 = vector.shape_cast %468 : vector<1x8x8x32xf32> to vector<8x8x32xf32>
    %470 = vector.shape_cast %469 : vector<8x8x32xf32> to vector<64x32xf32>
    %471 = arith.truncf %470 : vector<64x32xf32> to vector<64x32xbf16>
    %c8_445 = arith.constant 8 : index
    %c0_446 = arith.constant 0 : index
    %c0_447 = arith.constant 0 : index
    %472 = vector.load %arg5[%c8_445, %c0_446, %c0_447] : memref<25x32x64xbf16, #tpu.memory_space<vmem>>, vector<1x32x64xbf16>
    %473 = vector.shape_cast %472 : vector<1x32x64xbf16> to vector<32x64xbf16>
    %cst_448 = arith.constant dense<0.000000e+00> : vector<64x64xf32>
    %474 = tpu.matmul %471, %473, %cst_448 {dimension_numbers = #tpu.dot_dimension_numbers<[1], [0], [0], [1], [0, 0, 1, 1], [], []>} : vector<64x32xbf16>, vector<32x64xbf16>, vector<64x64xf32> -> vector<64x64xf32>
    %475 = arith.addf %467, %474 : vector<64x64xf32>
    %c0_449 = arith.constant 0 : index
    %c1_450 = arith.constant 1 : index
    %c2_451 = arith.constant 2 : index
    %c0_452 = arith.constant 0 : index
    %476 = vector.load %arg1[%c0_449, %c1_450, %c2_451, %c0_452] : memref<1x10x10x32xf32, #tpu.memory_space<vmem>>, vector<1x8x8x32xf32>
    %477 = vector.shape_cast %476 : vector<1x8x8x32xf32> to vector<8x8x32xf32>
    %478 = vector.shape_cast %477 : vector<8x8x32xf32> to vector<64x32xf32>
    %479 = arith.truncf %478 : vector<64x32xf32> to vector<64x32xbf16>
    %c9_453 = arith.constant 9 : index
    %c0_454 = arith.constant 0 : index
    %c0_455 = arith.constant 0 : index
    %480 = vector.load %arg5[%c9_453, %c0_454, %c0_455] : memref<25x32x64xbf16, #tpu.memory_space<vmem>>, vector<1x32x64xbf16>
    %481 = vector.shape_cast %480 : vector<1x32x64xbf16> to vector<32x64xbf16>
    %cst_456 = arith.constant dense<0.000000e+00> : vector<64x64xf32>
    %482 = tpu.matmul %479, %481, %cst_456 {dimension_numbers = #tpu.dot_dimension_numbers<[1], [0], [0], [1], [0, 0, 1, 1], [], []>} : vector<64x32xbf16>, vector<32x64xbf16>, vector<64x64xf32> -> vector<64x64xf32>
    %483 = arith.addf %475, %482 : vector<64x64xf32>
    %c0_457 = arith.constant 0 : index
    %c1_458 = arith.constant 1 : index
    %c0_459 = arith.constant 0 : index
    %c0_460 = arith.constant 0 : index
    %484 = vector.load %arg3[%c0_457, %c1_458, %c0_459, %c0_460] : memref<1x10x10x32xf32, #tpu.memory_space<vmem>>, vector<1x8x8x32xf32>
    %485 = vector.shape_cast %484 : vector<1x8x8x32xf32> to vector<8x8x32xf32>
    %486 = vector.shape_cast %485 : vector<8x8x32xf32> to vector<64x32xf32>
    %487 = arith.truncf %486 : vector<64x32xf32> to vector<64x32xbf16>
    %c10_461 = arith.constant 10 : index
    %c0_462 = arith.constant 0 : index
    %c0_463 = arith.constant 0 : index
    %488 = vector.load %arg5[%c10_461, %c0_462, %c0_463] : memref<25x32x64xbf16, #tpu.memory_space<vmem>>, vector<1x32x64xbf16>
    %489 = vector.shape_cast %488 : vector<1x32x64xbf16> to vector<32x64xbf16>
    %cst_464 = arith.constant dense<0.000000e+00> : vector<64x64xf32>
    %490 = tpu.matmul %487, %489, %cst_464 {dimension_numbers = #tpu.dot_dimension_numbers<[1], [0], [0], [1], [0, 0, 1, 1], [], []>} : vector<64x32xbf16>, vector<32x64xbf16>, vector<64x64xf32> -> vector<64x64xf32>
    %491 = arith.addf %483, %490 : vector<64x64xf32>
    %c0_465 = arith.constant 0 : index
    %c1_466 = arith.constant 1 : index
    %c0_467 = arith.constant 0 : index
    %c0_468 = arith.constant 0 : index
    %492 = vector.load %arg4[%c0_465, %c1_466, %c0_467, %c0_468] : memref<1x10x10x32xf32, #tpu.memory_space<vmem>>, vector<1x8x8x32xf32>
    %493 = vector.shape_cast %492 : vector<1x8x8x32xf32> to vector<8x8x32xf32>
    %494 = vector.shape_cast %493 : vector<8x8x32xf32> to vector<64x32xf32>
    %495 = arith.truncf %494 : vector<64x32xf32> to vector<64x32xbf16>
    %c11_469 = arith.constant 11 : index
    %c0_470 = arith.constant 0 : index
    %c0_471 = arith.constant 0 : index
    %496 = vector.load %arg5[%c11_469, %c0_470, %c0_471] : memref<25x32x64xbf16, #tpu.memory_space<vmem>>, vector<1x32x64xbf16>
    %497 = vector.shape_cast %496 : vector<1x32x64xbf16> to vector<32x64xbf16>
    %cst_472 = arith.constant dense<0.000000e+00> : vector<64x64xf32>
    %498 = tpu.matmul %495, %497, %cst_472 {dimension_numbers = #tpu.dot_dimension_numbers<[1], [0], [0], [1], [0, 0, 1, 1], [], []>} : vector<64x32xbf16>, vector<32x64xbf16>, vector<64x64xf32> -> vector<64x64xf32>
    %499 = arith.addf %491, %498 : vector<64x64xf32>
    %c0_473 = arith.constant 0 : index
    %c1_474 = arith.constant 1 : index
    %c1_475 = arith.constant 1 : index
    %c0_476 = arith.constant 0 : index
    %500 = vector.load %arg3[%c0_473, %c1_474, %c1_475, %c0_476] : memref<1x10x10x32xf32, #tpu.memory_space<vmem>>, vector<1x8x8x32xf32>
    %501 = vector.shape_cast %500 : vector<1x8x8x32xf32> to vector<8x8x32xf32>
    %502 = vector.shape_cast %501 : vector<8x8x32xf32> to vector<64x32xf32>
    %503 = arith.truncf %502 : vector<64x32xf32> to vector<64x32xbf16>
    %c12_477 = arith.constant 12 : index
    %c0_478 = arith.constant 0 : index
    %c0_479 = arith.constant 0 : index
    %504 = vector.load %arg5[%c12_477, %c0_478, %c0_479] : memref<25x32x64xbf16, #tpu.memory_space<vmem>>, vector<1x32x64xbf16>
    %505 = vector.shape_cast %504 : vector<1x32x64xbf16> to vector<32x64xbf16>
    %cst_480 = arith.constant dense<0.000000e+00> : vector<64x64xf32>
    %506 = tpu.matmul %503, %505, %cst_480 {dimension_numbers = #tpu.dot_dimension_numbers<[1], [0], [0], [1], [0, 0, 1, 1], [], []>} : vector<64x32xbf16>, vector<32x64xbf16>, vector<64x64xf32> -> vector<64x64xf32>
    %507 = arith.addf %499, %506 : vector<64x64xf32>
    %c0_481 = arith.constant 0 : index
    %c1_482 = arith.constant 1 : index
    %c1_483 = arith.constant 1 : index
    %c0_484 = arith.constant 0 : index
    %508 = vector.load %arg4[%c0_481, %c1_482, %c1_483, %c0_484] : memref<1x10x10x32xf32, #tpu.memory_space<vmem>>, vector<1x8x8x32xf32>
    %509 = vector.shape_cast %508 : vector<1x8x8x32xf32> to vector<8x8x32xf32>
    %510 = vector.shape_cast %509 : vector<8x8x32xf32> to vector<64x32xf32>
    %511 = arith.truncf %510 : vector<64x32xf32> to vector<64x32xbf16>
    %c13_485 = arith.constant 13 : index
    %c0_486 = arith.constant 0 : index
    %c0_487 = arith.constant 0 : index
    %512 = vector.load %arg5[%c13_485, %c0_486, %c0_487] : memref<25x32x64xbf16, #tpu.memory_space<vmem>>, vector<1x32x64xbf16>
    %513 = vector.shape_cast %512 : vector<1x32x64xbf16> to vector<32x64xbf16>
    %cst_488 = arith.constant dense<0.000000e+00> : vector<64x64xf32>
    %514 = tpu.matmul %511, %513, %cst_488 {dimension_numbers = #tpu.dot_dimension_numbers<[1], [0], [0], [1], [0, 0, 1, 1], [], []>} : vector<64x32xbf16>, vector<32x64xbf16>, vector<64x64xf32> -> vector<64x64xf32>
    %515 = arith.addf %507, %514 : vector<64x64xf32>
    %c0_489 = arith.constant 0 : index
    %c1_490 = arith.constant 1 : index
    %c2_491 = arith.constant 2 : index
    %c0_492 = arith.constant 0 : index
    %516 = vector.load %arg3[%c0_489, %c1_490, %c2_491, %c0_492] : memref<1x10x10x32xf32, #tpu.memory_space<vmem>>, vector<1x8x8x32xf32>
    %517 = vector.shape_cast %516 : vector<1x8x8x32xf32> to vector<8x8x32xf32>
    %518 = vector.shape_cast %517 : vector<8x8x32xf32> to vector<64x32xf32>
    %519 = arith.truncf %518 : vector<64x32xf32> to vector<64x32xbf16>
    %c14_493 = arith.constant 14 : index
    %c0_494 = arith.constant 0 : index
    %c0_495 = arith.constant 0 : index
    %520 = vector.load %arg5[%c14_493, %c0_494, %c0_495] : memref<25x32x64xbf16, #tpu.memory_space<vmem>>, vector<1x32x64xbf16>
    %521 = vector.shape_cast %520 : vector<1x32x64xbf16> to vector<32x64xbf16>
    %cst_496 = arith.constant dense<0.000000e+00> : vector<64x64xf32>
    %522 = tpu.matmul %519, %521, %cst_496 {dimension_numbers = #tpu.dot_dimension_numbers<[1], [0], [0], [1], [0, 0, 1, 1], [], []>} : vector<64x32xbf16>, vector<32x64xbf16>, vector<64x64xf32> -> vector<64x64xf32>
    %523 = arith.addf %515, %522 : vector<64x64xf32>
    %c0_497 = arith.constant 0 : index
    %c2_498 = arith.constant 2 : index
    %c0_499 = arith.constant 0 : index
    %c0_500 = arith.constant 0 : index
    %524 = vector.load %arg1[%c0_497, %c2_498, %c0_499, %c0_500] : memref<1x10x10x32xf32, #tpu.memory_space<vmem>>, vector<1x8x8x32xf32>
    %525 = vector.shape_cast %524 : vector<1x8x8x32xf32> to vector<8x8x32xf32>
    %526 = vector.shape_cast %525 : vector<8x8x32xf32> to vector<64x32xf32>
    %527 = arith.truncf %526 : vector<64x32xf32> to vector<64x32xbf16>
    %c15_501 = arith.constant 15 : index
    %c0_502 = arith.constant 0 : index
    %c0_503 = arith.constant 0 : index
    %528 = vector.load %arg5[%c15_501, %c0_502, %c0_503] : memref<25x32x64xbf16, #tpu.memory_space<vmem>>, vector<1x32x64xbf16>
    %529 = vector.shape_cast %528 : vector<1x32x64xbf16> to vector<32x64xbf16>
    %cst_504 = arith.constant dense<0.000000e+00> : vector<64x64xf32>
    %530 = tpu.matmul %527, %529, %cst_504 {dimension_numbers = #tpu.dot_dimension_numbers<[1], [0], [0], [1], [0, 0, 1, 1], [], []>} : vector<64x32xbf16>, vector<32x64xbf16>, vector<64x64xf32> -> vector<64x64xf32>
    %531 = arith.addf %523, %530 : vector<64x64xf32>
    %c0_505 = arith.constant 0 : index
    %c2_506 = arith.constant 2 : index
    %c0_507 = arith.constant 0 : index
    %c0_508 = arith.constant 0 : index
    %532 = vector.load %arg2[%c0_505, %c2_506, %c0_507, %c0_508] : memref<1x10x10x32xf32, #tpu.memory_space<vmem>>, vector<1x8x8x32xf32>
    %533 = vector.shape_cast %532 : vector<1x8x8x32xf32> to vector<8x8x32xf32>
    %534 = vector.shape_cast %533 : vector<8x8x32xf32> to vector<64x32xf32>
    %535 = arith.truncf %534 : vector<64x32xf32> to vector<64x32xbf16>
    %c16_509 = arith.constant 16 : index
    %c0_510 = arith.constant 0 : index
    %c0_511 = arith.constant 0 : index
    %536 = vector.load %arg5[%c16_509, %c0_510, %c0_511] : memref<25x32x64xbf16, #tpu.memory_space<vmem>>, vector<1x32x64xbf16>
    %537 = vector.shape_cast %536 : vector<1x32x64xbf16> to vector<32x64xbf16>
    %cst_512 = arith.constant dense<0.000000e+00> : vector<64x64xf32>
    %538 = tpu.matmul %535, %537, %cst_512 {dimension_numbers = #tpu.dot_dimension_numbers<[1], [0], [0], [1], [0, 0, 1, 1], [], []>} : vector<64x32xbf16>, vector<32x64xbf16>, vector<64x64xf32> -> vector<64x64xf32>
    %539 = arith.addf %531, %538 : vector<64x64xf32>
    %c0_513 = arith.constant 0 : index
    %c2_514 = arith.constant 2 : index
    %c1_515 = arith.constant 1 : index
    %c0_516 = arith.constant 0 : index
    %540 = vector.load %arg1[%c0_513, %c2_514, %c1_515, %c0_516] : memref<1x10x10x32xf32, #tpu.memory_space<vmem>>, vector<1x8x8x32xf32>
    %541 = vector.shape_cast %540 : vector<1x8x8x32xf32> to vector<8x8x32xf32>
    %542 = vector.shape_cast %541 : vector<8x8x32xf32> to vector<64x32xf32>
    %543 = arith.truncf %542 : vector<64x32xf32> to vector<64x32xbf16>
    %c17_517 = arith.constant 17 : index
    %c0_518 = arith.constant 0 : index
    %c0_519 = arith.constant 0 : index
    %544 = vector.load %arg5[%c17_517, %c0_518, %c0_519] : memref<25x32x64xbf16, #tpu.memory_space<vmem>>, vector<1x32x64xbf16>
    %545 = vector.shape_cast %544 : vector<1x32x64xbf16> to vector<32x64xbf16>
    %cst_520 = arith.constant dense<0.000000e+00> : vector<64x64xf32>
    %546 = tpu.matmul %543, %545, %cst_520 {dimension_numbers = #tpu.dot_dimension_numbers<[1], [0], [0], [1], [0, 0, 1, 1], [], []>} : vector<64x32xbf16>, vector<32x64xbf16>, vector<64x64xf32> -> vector<64x64xf32>
    %547 = arith.addf %539, %546 : vector<64x64xf32>
    %c0_521 = arith.constant 0 : index
    %c2_522 = arith.constant 2 : index
    %c1_523 = arith.constant 1 : index
    %c0_524 = arith.constant 0 : index
    %548 = vector.load %arg2[%c0_521, %c2_522, %c1_523, %c0_524] : memref<1x10x10x32xf32, #tpu.memory_space<vmem>>, vector<1x8x8x32xf32>
    %549 = vector.shape_cast %548 : vector<1x8x8x32xf32> to vector<8x8x32xf32>
    %550 = vector.shape_cast %549 : vector<8x8x32xf32> to vector<64x32xf32>
    %551 = arith.truncf %550 : vector<64x32xf32> to vector<64x32xbf16>
    %c18_525 = arith.constant 18 : index
    %c0_526 = arith.constant 0 : index
    %c0_527 = arith.constant 0 : index
    %552 = vector.load %arg5[%c18_525, %c0_526, %c0_527] : memref<25x32x64xbf16, #tpu.memory_space<vmem>>, vector<1x32x64xbf16>
    %553 = vector.shape_cast %552 : vector<1x32x64xbf16> to vector<32x64xbf16>
    %cst_528 = arith.constant dense<0.000000e+00> : vector<64x64xf32>
    %554 = tpu.matmul %551, %553, %cst_528 {dimension_numbers = #tpu.dot_dimension_numbers<[1], [0], [0], [1], [0, 0, 1, 1], [], []>} : vector<64x32xbf16>, vector<32x64xbf16>, vector<64x64xf32> -> vector<64x64xf32>
    %555 = arith.addf %547, %554 : vector<64x64xf32>
    %c0_529 = arith.constant 0 : index
    %c2_530 = arith.constant 2 : index
    %c2_531 = arith.constant 2 : index
    %c0_532 = arith.constant 0 : index
    %556 = vector.load %arg1[%c0_529, %c2_530, %c2_531, %c0_532] : memref<1x10x10x32xf32, #tpu.memory_space<vmem>>, vector<1x8x8x32xf32>
    %557 = vector.shape_cast %556 : vector<1x8x8x32xf32> to vector<8x8x32xf32>
    %558 = vector.shape_cast %557 : vector<8x8x32xf32> to vector<64x32xf32>
    %559 = arith.truncf %558 : vector<64x32xf32> to vector<64x32xbf16>
    %c19_533 = arith.constant 19 : index
    %c0_534 = arith.constant 0 : index
    %c0_535 = arith.constant 0 : index
    %560 = vector.load %arg5[%c19_533, %c0_534, %c0_535] : memref<25x32x64xbf16, #tpu.memory_space<vmem>>, vector<1x32x64xbf16>
    %561 = vector.shape_cast %560 : vector<1x32x64xbf16> to vector<32x64xbf16>
    %cst_536 = arith.constant dense<0.000000e+00> : vector<64x64xf32>
    %562 = tpu.matmul %559, %561, %cst_536 {dimension_numbers = #tpu.dot_dimension_numbers<[1], [0], [0], [1], [0, 0, 1, 1], [], []>} : vector<64x32xbf16>, vector<32x64xbf16>, vector<64x64xf32> -> vector<64x64xf32>
    %563 = arith.addf %555, %562 : vector<64x64xf32>
    %c0_537 = arith.constant 0 : index
    %c2_538 = arith.constant 2 : index
    %c0_539 = arith.constant 0 : index
    %c0_540 = arith.constant 0 : index
    %564 = vector.load %arg3[%c0_537, %c2_538, %c0_539, %c0_540] : memref<1x10x10x32xf32, #tpu.memory_space<vmem>>, vector<1x8x8x32xf32>
    %565 = vector.shape_cast %564 : vector<1x8x8x32xf32> to vector<8x8x32xf32>
    %566 = vector.shape_cast %565 : vector<8x8x32xf32> to vector<64x32xf32>
    %567 = arith.truncf %566 : vector<64x32xf32> to vector<64x32xbf16>
    %c20_541 = arith.constant 20 : index
    %c0_542 = arith.constant 0 : index
    %c0_543 = arith.constant 0 : index
    %568 = vector.load %arg5[%c20_541, %c0_542, %c0_543] : memref<25x32x64xbf16, #tpu.memory_space<vmem>>, vector<1x32x64xbf16>
    %569 = vector.shape_cast %568 : vector<1x32x64xbf16> to vector<32x64xbf16>
    %cst_544 = arith.constant dense<0.000000e+00> : vector<64x64xf32>
    %570 = tpu.matmul %567, %569, %cst_544 {dimension_numbers = #tpu.dot_dimension_numbers<[1], [0], [0], [1], [0, 0, 1, 1], [], []>} : vector<64x32xbf16>, vector<32x64xbf16>, vector<64x64xf32> -> vector<64x64xf32>
    %571 = arith.addf %563, %570 : vector<64x64xf32>
    %c0_545 = arith.constant 0 : index
    %c2_546 = arith.constant 2 : index
    %c0_547 = arith.constant 0 : index
    %c0_548 = arith.constant 0 : index
    %572 = vector.load %arg4[%c0_545, %c2_546, %c0_547, %c0_548] : memref<1x10x10x32xf32, #tpu.memory_space<vmem>>, vector<1x8x8x32xf32>
    %573 = vector.shape_cast %572 : vector<1x8x8x32xf32> to vector<8x8x32xf32>
    %574 = vector.shape_cast %573 : vector<8x8x32xf32> to vector<64x32xf32>
    %575 = arith.truncf %574 : vector<64x32xf32> to vector<64x32xbf16>
    %c21_549 = arith.constant 21 : index
    %c0_550 = arith.constant 0 : index
    %c0_551 = arith.constant 0 : index
    %576 = vector.load %arg5[%c21_549, %c0_550, %c0_551] : memref<25x32x64xbf16, #tpu.memory_space<vmem>>, vector<1x32x64xbf16>
    %577 = vector.shape_cast %576 : vector<1x32x64xbf16> to vector<32x64xbf16>
    %cst_552 = arith.constant dense<0.000000e+00> : vector<64x64xf32>
    %578 = tpu.matmul %575, %577, %cst_552 {dimension_numbers = #tpu.dot_dimension_numbers<[1], [0], [0], [1], [0, 0, 1, 1], [], []>} : vector<64x32xbf16>, vector<32x64xbf16>, vector<64x64xf32> -> vector<64x64xf32>
    %579 = arith.addf %571, %578 : vector<64x64xf32>
    %c0_553 = arith.constant 0 : index
    %c2_554 = arith.constant 2 : index
    %c1_555 = arith.constant 1 : index
    %c0_556 = arith.constant 0 : index
    %580 = vector.load %arg3[%c0_553, %c2_554, %c1_555, %c0_556] : memref<1x10x10x32xf32, #tpu.memory_space<vmem>>, vector<1x8x8x32xf32>
    %581 = vector.shape_cast %580 : vector<1x8x8x32xf32> to vector<8x8x32xf32>
    %582 = vector.shape_cast %581 : vector<8x8x32xf32> to vector<64x32xf32>
    %583 = arith.truncf %582 : vector<64x32xf32> to vector<64x32xbf16>
    %c22_557 = arith.constant 22 : index
    %c0_558 = arith.constant 0 : index
    %c0_559 = arith.constant 0 : index
    %584 = vector.load %arg5[%c22_557, %c0_558, %c0_559] : memref<25x32x64xbf16, #tpu.memory_space<vmem>>, vector<1x32x64xbf16>
    %585 = vector.shape_cast %584 : vector<1x32x64xbf16> to vector<32x64xbf16>
    %cst_560 = arith.constant dense<0.000000e+00> : vector<64x64xf32>
    %586 = tpu.matmul %583, %585, %cst_560 {dimension_numbers = #tpu.dot_dimension_numbers<[1], [0], [0], [1], [0, 0, 1, 1], [], []>} : vector<64x32xbf16>, vector<32x64xbf16>, vector<64x64xf32> -> vector<64x64xf32>
    %587 = arith.addf %579, %586 : vector<64x64xf32>
    %c0_561 = arith.constant 0 : index
    %c2_562 = arith.constant 2 : index
    %c1_563 = arith.constant 1 : index
    %c0_564 = arith.constant 0 : index
    %588 = vector.load %arg4[%c0_561, %c2_562, %c1_563, %c0_564] : memref<1x10x10x32xf32, #tpu.memory_space<vmem>>, vector<1x8x8x32xf32>
    %589 = vector.shape_cast %588 : vector<1x8x8x32xf32> to vector<8x8x32xf32>
    %590 = vector.shape_cast %589 : vector<8x8x32xf32> to vector<64x32xf32>
    %591 = arith.truncf %590 : vector<64x32xf32> to vector<64x32xbf16>
    %c23_565 = arith.constant 23 : index
    %c0_566 = arith.constant 0 : index
    %c0_567 = arith.constant 0 : index
    %592 = vector.load %arg5[%c23_565, %c0_566, %c0_567] : memref<25x32x64xbf16, #tpu.memory_space<vmem>>, vector<1x32x64xbf16>
    %593 = vector.shape_cast %592 : vector<1x32x64xbf16> to vector<32x64xbf16>
    %cst_568 = arith.constant dense<0.000000e+00> : vector<64x64xf32>
    %594 = tpu.matmul %591, %593, %cst_568 {dimension_numbers = #tpu.dot_dimension_numbers<[1], [0], [0], [1], [0, 0, 1, 1], [], []>} : vector<64x32xbf16>, vector<32x64xbf16>, vector<64x64xf32> -> vector<64x64xf32>
    %595 = arith.addf %587, %594 : vector<64x64xf32>
    %c0_569 = arith.constant 0 : index
    %c2_570 = arith.constant 2 : index
    %c2_571 = arith.constant 2 : index
    %c0_572 = arith.constant 0 : index
    %596 = vector.load %arg3[%c0_569, %c2_570, %c2_571, %c0_572] : memref<1x10x10x32xf32, #tpu.memory_space<vmem>>, vector<1x8x8x32xf32>
    %597 = vector.shape_cast %596 : vector<1x8x8x32xf32> to vector<8x8x32xf32>
    %598 = vector.shape_cast %597 : vector<8x8x32xf32> to vector<64x32xf32>
    %599 = arith.truncf %598 : vector<64x32xf32> to vector<64x32xbf16>
    %c24_573 = arith.constant 24 : index
    %c0_574 = arith.constant 0 : index
    %c0_575 = arith.constant 0 : index
    %600 = vector.load %arg5[%c24_573, %c0_574, %c0_575] : memref<25x32x64xbf16, #tpu.memory_space<vmem>>, vector<1x32x64xbf16>
    %601 = vector.shape_cast %600 : vector<1x32x64xbf16> to vector<32x64xbf16>
    %cst_576 = arith.constant dense<0.000000e+00> : vector<64x64xf32>
    %602 = tpu.matmul %599, %601, %cst_576 {dimension_numbers = #tpu.dot_dimension_numbers<[1], [0], [0], [1], [0, 0, 1, 1], [], []>} : vector<64x32xbf16>, vector<32x64xbf16>, vector<64x64xf32> -> vector<64x64xf32>
    %603 = arith.addf %595, %602 : vector<64x64xf32>
    %604 = arith.maximumf %402, %603 : vector<64x64xf32>
    %cst_577 = arith.constant 0.000000e+00 : f32
    %605 = vector.broadcast %cst_577 : f32 to vector<64x64xf32>
    %c0_578 = arith.constant 0 : index
    %c0_579 = arith.constant 0 : index
    %c0_580 = arith.constant 0 : index
    %c0_581 = arith.constant 0 : index
    %606 = vector.load %arg4[%c0_578, %c0_579, %c0_580, %c0_581] : memref<1x10x10x32xf32, #tpu.memory_space<vmem>>, vector<1x8x8x32xf32>
    %607 = vector.shape_cast %606 : vector<1x8x8x32xf32> to vector<8x8x32xf32>
    %608 = vector.shape_cast %607 : vector<8x8x32xf32> to vector<64x32xf32>
    %609 = arith.truncf %608 : vector<64x32xf32> to vector<64x32xbf16>
    %c0_582 = arith.constant 0 : index
    %c0_583 = arith.constant 0 : index
    %c0_584 = arith.constant 0 : index
    %610 = vector.load %arg5[%c0_582, %c0_583, %c0_584] : memref<25x32x64xbf16, #tpu.memory_space<vmem>>, vector<1x32x64xbf16>
    %611 = vector.shape_cast %610 : vector<1x32x64xbf16> to vector<32x64xbf16>
    %cst_585 = arith.constant dense<0.000000e+00> : vector<64x64xf32>
    %612 = tpu.matmul %609, %611, %cst_585 {dimension_numbers = #tpu.dot_dimension_numbers<[1], [0], [0], [1], [0, 0, 1, 1], [], []>} : vector<64x32xbf16>, vector<32x64xbf16>, vector<64x64xf32> -> vector<64x64xf32>
    %613 = arith.addf %605, %612 : vector<64x64xf32>
    %c0_586 = arith.constant 0 : index
    %c0_587 = arith.constant 0 : index
    %c1_588 = arith.constant 1 : index
    %c0_589 = arith.constant 0 : index
    %614 = vector.load %arg3[%c0_586, %c0_587, %c1_588, %c0_589] : memref<1x10x10x32xf32, #tpu.memory_space<vmem>>, vector<1x8x8x32xf32>
    %615 = vector.shape_cast %614 : vector<1x8x8x32xf32> to vector<8x8x32xf32>
    %616 = vector.shape_cast %615 : vector<8x8x32xf32> to vector<64x32xf32>
    %617 = arith.truncf %616 : vector<64x32xf32> to vector<64x32xbf16>
    %c1_590 = arith.constant 1 : index
    %c0_591 = arith.constant 0 : index
    %c0_592 = arith.constant 0 : index
    %618 = vector.load %arg5[%c1_590, %c0_591, %c0_592] : memref<25x32x64xbf16, #tpu.memory_space<vmem>>, vector<1x32x64xbf16>
    %619 = vector.shape_cast %618 : vector<1x32x64xbf16> to vector<32x64xbf16>
    %cst_593 = arith.constant dense<0.000000e+00> : vector<64x64xf32>
    %620 = tpu.matmul %617, %619, %cst_593 {dimension_numbers = #tpu.dot_dimension_numbers<[1], [0], [0], [1], [0, 0, 1, 1], [], []>} : vector<64x32xbf16>, vector<32x64xbf16>, vector<64x64xf32> -> vector<64x64xf32>
    %621 = arith.addf %613, %620 : vector<64x64xf32>
    %c0_594 = arith.constant 0 : index
    %c0_595 = arith.constant 0 : index
    %c1_596 = arith.constant 1 : index
    %c0_597 = arith.constant 0 : index
    %622 = vector.load %arg4[%c0_594, %c0_595, %c1_596, %c0_597] : memref<1x10x10x32xf32, #tpu.memory_space<vmem>>, vector<1x8x8x32xf32>
    %623 = vector.shape_cast %622 : vector<1x8x8x32xf32> to vector<8x8x32xf32>
    %624 = vector.shape_cast %623 : vector<8x8x32xf32> to vector<64x32xf32>
    %625 = arith.truncf %624 : vector<64x32xf32> to vector<64x32xbf16>
    %c2_598 = arith.constant 2 : index
    %c0_599 = arith.constant 0 : index
    %c0_600 = arith.constant 0 : index
    %626 = vector.load %arg5[%c2_598, %c0_599, %c0_600] : memref<25x32x64xbf16, #tpu.memory_space<vmem>>, vector<1x32x64xbf16>
    %627 = vector.shape_cast %626 : vector<1x32x64xbf16> to vector<32x64xbf16>
    %cst_601 = arith.constant dense<0.000000e+00> : vector<64x64xf32>
    %628 = tpu.matmul %625, %627, %cst_601 {dimension_numbers = #tpu.dot_dimension_numbers<[1], [0], [0], [1], [0, 0, 1, 1], [], []>} : vector<64x32xbf16>, vector<32x64xbf16>, vector<64x64xf32> -> vector<64x64xf32>
    %629 = arith.addf %621, %628 : vector<64x64xf32>
    %c0_602 = arith.constant 0 : index
    %c0_603 = arith.constant 0 : index
    %c2_604 = arith.constant 2 : index
    %c0_605 = arith.constant 0 : index
    %630 = vector.load %arg3[%c0_602, %c0_603, %c2_604, %c0_605] : memref<1x10x10x32xf32, #tpu.memory_space<vmem>>, vector<1x8x8x32xf32>
    %631 = vector.shape_cast %630 : vector<1x8x8x32xf32> to vector<8x8x32xf32>
    %632 = vector.shape_cast %631 : vector<8x8x32xf32> to vector<64x32xf32>
    %633 = arith.truncf %632 : vector<64x32xf32> to vector<64x32xbf16>
    %c3_606 = arith.constant 3 : index
    %c0_607 = arith.constant 0 : index
    %c0_608 = arith.constant 0 : index
    %634 = vector.load %arg5[%c3_606, %c0_607, %c0_608] : memref<25x32x64xbf16, #tpu.memory_space<vmem>>, vector<1x32x64xbf16>
    %635 = vector.shape_cast %634 : vector<1x32x64xbf16> to vector<32x64xbf16>
    %cst_609 = arith.constant dense<0.000000e+00> : vector<64x64xf32>
    %636 = tpu.matmul %633, %635, %cst_609 {dimension_numbers = #tpu.dot_dimension_numbers<[1], [0], [0], [1], [0, 0, 1, 1], [], []>} : vector<64x32xbf16>, vector<32x64xbf16>, vector<64x64xf32> -> vector<64x64xf32>
    %637 = arith.addf %629, %636 : vector<64x64xf32>
    %c0_610 = arith.constant 0 : index
    %c0_611 = arith.constant 0 : index
    %c2_612 = arith.constant 2 : index
    %c0_613 = arith.constant 0 : index
    %638 = vector.load %arg4[%c0_610, %c0_611, %c2_612, %c0_613] : memref<1x10x10x32xf32, #tpu.memory_space<vmem>>, vector<1x8x8x32xf32>
    %639 = vector.shape_cast %638 : vector<1x8x8x32xf32> to vector<8x8x32xf32>
    %640 = vector.shape_cast %639 : vector<8x8x32xf32> to vector<64x32xf32>
    %641 = arith.truncf %640 : vector<64x32xf32> to vector<64x32xbf16>
    %c4_614 = arith.constant 4 : index
    %c0_615 = arith.constant 0 : index
    %c0_616 = arith.constant 0 : index
    %642 = vector.load %arg5[%c4_614, %c0_615, %c0_616] : memref<25x32x64xbf16, #tpu.memory_space<vmem>>, vector<1x32x64xbf16>
    %643 = vector.shape_cast %642 : vector<1x32x64xbf16> to vector<32x64xbf16>
    %cst_617 = arith.constant dense<0.000000e+00> : vector<64x64xf32>
    %644 = tpu.matmul %641, %643, %cst_617 {dimension_numbers = #tpu.dot_dimension_numbers<[1], [0], [0], [1], [0, 0, 1, 1], [], []>} : vector<64x32xbf16>, vector<32x64xbf16>, vector<64x64xf32> -> vector<64x64xf32>
    %645 = arith.addf %637, %644 : vector<64x64xf32>
    %c0_618 = arith.constant 0 : index
    %c1_619 = arith.constant 1 : index
    %c0_620 = arith.constant 0 : index
    %c0_621 = arith.constant 0 : index
    %646 = vector.load %arg2[%c0_618, %c1_619, %c0_620, %c0_621] : memref<1x10x10x32xf32, #tpu.memory_space<vmem>>, vector<1x8x8x32xf32>
    %647 = vector.shape_cast %646 : vector<1x8x8x32xf32> to vector<8x8x32xf32>
    %648 = vector.shape_cast %647 : vector<8x8x32xf32> to vector<64x32xf32>
    %649 = arith.truncf %648 : vector<64x32xf32> to vector<64x32xbf16>
    %c5_622 = arith.constant 5 : index
    %c0_623 = arith.constant 0 : index
    %c0_624 = arith.constant 0 : index
    %650 = vector.load %arg5[%c5_622, %c0_623, %c0_624] : memref<25x32x64xbf16, #tpu.memory_space<vmem>>, vector<1x32x64xbf16>
    %651 = vector.shape_cast %650 : vector<1x32x64xbf16> to vector<32x64xbf16>
    %cst_625 = arith.constant dense<0.000000e+00> : vector<64x64xf32>
    %652 = tpu.matmul %649, %651, %cst_625 {dimension_numbers = #tpu.dot_dimension_numbers<[1], [0], [0], [1], [0, 0, 1, 1], [], []>} : vector<64x32xbf16>, vector<32x64xbf16>, vector<64x64xf32> -> vector<64x64xf32>
    %653 = arith.addf %645, %652 : vector<64x64xf32>
    %c0_626 = arith.constant 0 : index
    %c1_627 = arith.constant 1 : index
    %c1_628 = arith.constant 1 : index
    %c0_629 = arith.constant 0 : index
    %654 = vector.load %arg1[%c0_626, %c1_627, %c1_628, %c0_629] : memref<1x10x10x32xf32, #tpu.memory_space<vmem>>, vector<1x8x8x32xf32>
    %655 = vector.shape_cast %654 : vector<1x8x8x32xf32> to vector<8x8x32xf32>
    %656 = vector.shape_cast %655 : vector<8x8x32xf32> to vector<64x32xf32>
    %657 = arith.truncf %656 : vector<64x32xf32> to vector<64x32xbf16>
    %c6_630 = arith.constant 6 : index
    %c0_631 = arith.constant 0 : index
    %c0_632 = arith.constant 0 : index
    %658 = vector.load %arg5[%c6_630, %c0_631, %c0_632] : memref<25x32x64xbf16, #tpu.memory_space<vmem>>, vector<1x32x64xbf16>
    %659 = vector.shape_cast %658 : vector<1x32x64xbf16> to vector<32x64xbf16>
    %cst_633 = arith.constant dense<0.000000e+00> : vector<64x64xf32>
    %660 = tpu.matmul %657, %659, %cst_633 {dimension_numbers = #tpu.dot_dimension_numbers<[1], [0], [0], [1], [0, 0, 1, 1], [], []>} : vector<64x32xbf16>, vector<32x64xbf16>, vector<64x64xf32> -> vector<64x64xf32>
    %661 = arith.addf %653, %660 : vector<64x64xf32>
    %c0_634 = arith.constant 0 : index
    %c1_635 = arith.constant 1 : index
    %c1_636 = arith.constant 1 : index
    %c0_637 = arith.constant 0 : index
    %662 = vector.load %arg2[%c0_634, %c1_635, %c1_636, %c0_637] : memref<1x10x10x32xf32, #tpu.memory_space<vmem>>, vector<1x8x8x32xf32>
    %663 = vector.shape_cast %662 : vector<1x8x8x32xf32> to vector<8x8x32xf32>
    %664 = vector.shape_cast %663 : vector<8x8x32xf32> to vector<64x32xf32>
    %665 = arith.truncf %664 : vector<64x32xf32> to vector<64x32xbf16>
    %c7_638 = arith.constant 7 : index
    %c0_639 = arith.constant 0 : index
    %c0_640 = arith.constant 0 : index
    %666 = vector.load %arg5[%c7_638, %c0_639, %c0_640] : memref<25x32x64xbf16, #tpu.memory_space<vmem>>, vector<1x32x64xbf16>
    %667 = vector.shape_cast %666 : vector<1x32x64xbf16> to vector<32x64xbf16>
    %cst_641 = arith.constant dense<0.000000e+00> : vector<64x64xf32>
    %668 = tpu.matmul %665, %667, %cst_641 {dimension_numbers = #tpu.dot_dimension_numbers<[1], [0], [0], [1], [0, 0, 1, 1], [], []>} : vector<64x32xbf16>, vector<32x64xbf16>, vector<64x64xf32> -> vector<64x64xf32>
    %669 = arith.addf %661, %668 : vector<64x64xf32>
    %c0_642 = arith.constant 0 : index
    %c1_643 = arith.constant 1 : index
    %c2_644 = arith.constant 2 : index
    %c0_645 = arith.constant 0 : index
    %670 = vector.load %arg1[%c0_642, %c1_643, %c2_644, %c0_645] : memref<1x10x10x32xf32, #tpu.memory_space<vmem>>, vector<1x8x8x32xf32>
    %671 = vector.shape_cast %670 : vector<1x8x8x32xf32> to vector<8x8x32xf32>
    %672 = vector.shape_cast %671 : vector<8x8x32xf32> to vector<64x32xf32>
    %673 = arith.truncf %672 : vector<64x32xf32> to vector<64x32xbf16>
    %c8_646 = arith.constant 8 : index
    %c0_647 = arith.constant 0 : index
    %c0_648 = arith.constant 0 : index
    %674 = vector.load %arg5[%c8_646, %c0_647, %c0_648] : memref<25x32x64xbf16, #tpu.memory_space<vmem>>, vector<1x32x64xbf16>
    %675 = vector.shape_cast %674 : vector<1x32x64xbf16> to vector<32x64xbf16>
    %cst_649 = arith.constant dense<0.000000e+00> : vector<64x64xf32>
    %676 = tpu.matmul %673, %675, %cst_649 {dimension_numbers = #tpu.dot_dimension_numbers<[1], [0], [0], [1], [0, 0, 1, 1], [], []>} : vector<64x32xbf16>, vector<32x64xbf16>, vector<64x64xf32> -> vector<64x64xf32>
    %677 = arith.addf %669, %676 : vector<64x64xf32>
    %c0_650 = arith.constant 0 : index
    %c1_651 = arith.constant 1 : index
    %c2_652 = arith.constant 2 : index
    %c0_653 = arith.constant 0 : index
    %678 = vector.load %arg2[%c0_650, %c1_651, %c2_652, %c0_653] : memref<1x10x10x32xf32, #tpu.memory_space<vmem>>, vector<1x8x8x32xf32>
    %679 = vector.shape_cast %678 : vector<1x8x8x32xf32> to vector<8x8x32xf32>
    %680 = vector.shape_cast %679 : vector<8x8x32xf32> to vector<64x32xf32>
    %681 = arith.truncf %680 : vector<64x32xf32> to vector<64x32xbf16>
    %c9_654 = arith.constant 9 : index
    %c0_655 = arith.constant 0 : index
    %c0_656 = arith.constant 0 : index
    %682 = vector.load %arg5[%c9_654, %c0_655, %c0_656] : memref<25x32x64xbf16, #tpu.memory_space<vmem>>, vector<1x32x64xbf16>
    %683 = vector.shape_cast %682 : vector<1x32x64xbf16> to vector<32x64xbf16>
    %cst_657 = arith.constant dense<0.000000e+00> : vector<64x64xf32>
    %684 = tpu.matmul %681, %683, %cst_657 {dimension_numbers = #tpu.dot_dimension_numbers<[1], [0], [0], [1], [0, 0, 1, 1], [], []>} : vector<64x32xbf16>, vector<32x64xbf16>, vector<64x64xf32> -> vector<64x64xf32>
    %685 = arith.addf %677, %684 : vector<64x64xf32>
    %c0_658 = arith.constant 0 : index
    %c1_659 = arith.constant 1 : index
    %c0_660 = arith.constant 0 : index
    %c0_661 = arith.constant 0 : index
    %686 = vector.load %arg4[%c0_658, %c1_659, %c0_660, %c0_661] : memref<1x10x10x32xf32, #tpu.memory_space<vmem>>, vector<1x8x8x32xf32>
    %687 = vector.shape_cast %686 : vector<1x8x8x32xf32> to vector<8x8x32xf32>
    %688 = vector.shape_cast %687 : vector<8x8x32xf32> to vector<64x32xf32>
    %689 = arith.truncf %688 : vector<64x32xf32> to vector<64x32xbf16>
    %c10_662 = arith.constant 10 : index
    %c0_663 = arith.constant 0 : index
    %c0_664 = arith.constant 0 : index
    %690 = vector.load %arg5[%c10_662, %c0_663, %c0_664] : memref<25x32x64xbf16, #tpu.memory_space<vmem>>, vector<1x32x64xbf16>
    %691 = vector.shape_cast %690 : vector<1x32x64xbf16> to vector<32x64xbf16>
    %cst_665 = arith.constant dense<0.000000e+00> : vector<64x64xf32>
    %692 = tpu.matmul %689, %691, %cst_665 {dimension_numbers = #tpu.dot_dimension_numbers<[1], [0], [0], [1], [0, 0, 1, 1], [], []>} : vector<64x32xbf16>, vector<32x64xbf16>, vector<64x64xf32> -> vector<64x64xf32>
    %693 = arith.addf %685, %692 : vector<64x64xf32>
    %c0_666 = arith.constant 0 : index
    %c1_667 = arith.constant 1 : index
    %c1_668 = arith.constant 1 : index
    %c0_669 = arith.constant 0 : index
    %694 = vector.load %arg3[%c0_666, %c1_667, %c1_668, %c0_669] : memref<1x10x10x32xf32, #tpu.memory_space<vmem>>, vector<1x8x8x32xf32>
    %695 = vector.shape_cast %694 : vector<1x8x8x32xf32> to vector<8x8x32xf32>
    %696 = vector.shape_cast %695 : vector<8x8x32xf32> to vector<64x32xf32>
    %697 = arith.truncf %696 : vector<64x32xf32> to vector<64x32xbf16>
    %c11_670 = arith.constant 11 : index
    %c0_671 = arith.constant 0 : index
    %c0_672 = arith.constant 0 : index
    %698 = vector.load %arg5[%c11_670, %c0_671, %c0_672] : memref<25x32x64xbf16, #tpu.memory_space<vmem>>, vector<1x32x64xbf16>
    %699 = vector.shape_cast %698 : vector<1x32x64xbf16> to vector<32x64xbf16>
    %cst_673 = arith.constant dense<0.000000e+00> : vector<64x64xf32>
    %700 = tpu.matmul %697, %699, %cst_673 {dimension_numbers = #tpu.dot_dimension_numbers<[1], [0], [0], [1], [0, 0, 1, 1], [], []>} : vector<64x32xbf16>, vector<32x64xbf16>, vector<64x64xf32> -> vector<64x64xf32>
    %701 = arith.addf %693, %700 : vector<64x64xf32>
    %c0_674 = arith.constant 0 : index
    %c1_675 = arith.constant 1 : index
    %c1_676 = arith.constant 1 : index
    %c0_677 = arith.constant 0 : index
    %702 = vector.load %arg4[%c0_674, %c1_675, %c1_676, %c0_677] : memref<1x10x10x32xf32, #tpu.memory_space<vmem>>, vector<1x8x8x32xf32>
    %703 = vector.shape_cast %702 : vector<1x8x8x32xf32> to vector<8x8x32xf32>
    %704 = vector.shape_cast %703 : vector<8x8x32xf32> to vector<64x32xf32>
    %705 = arith.truncf %704 : vector<64x32xf32> to vector<64x32xbf16>
    %c12_678 = arith.constant 12 : index
    %c0_679 = arith.constant 0 : index
    %c0_680 = arith.constant 0 : index
    %706 = vector.load %arg5[%c12_678, %c0_679, %c0_680] : memref<25x32x64xbf16, #tpu.memory_space<vmem>>, vector<1x32x64xbf16>
    %707 = vector.shape_cast %706 : vector<1x32x64xbf16> to vector<32x64xbf16>
    %cst_681 = arith.constant dense<0.000000e+00> : vector<64x64xf32>
    %708 = tpu.matmul %705, %707, %cst_681 {dimension_numbers = #tpu.dot_dimension_numbers<[1], [0], [0], [1], [0, 0, 1, 1], [], []>} : vector<64x32xbf16>, vector<32x64xbf16>, vector<64x64xf32> -> vector<64x64xf32>
    %709 = arith.addf %701, %708 : vector<64x64xf32>
    %c0_682 = arith.constant 0 : index
    %c1_683 = arith.constant 1 : index
    %c2_684 = arith.constant 2 : index
    %c0_685 = arith.constant 0 : index
    %710 = vector.load %arg3[%c0_682, %c1_683, %c2_684, %c0_685] : memref<1x10x10x32xf32, #tpu.memory_space<vmem>>, vector<1x8x8x32xf32>
    %711 = vector.shape_cast %710 : vector<1x8x8x32xf32> to vector<8x8x32xf32>
    %712 = vector.shape_cast %711 : vector<8x8x32xf32> to vector<64x32xf32>
    %713 = arith.truncf %712 : vector<64x32xf32> to vector<64x32xbf16>
    %c13_686 = arith.constant 13 : index
    %c0_687 = arith.constant 0 : index
    %c0_688 = arith.constant 0 : index
    %714 = vector.load %arg5[%c13_686, %c0_687, %c0_688] : memref<25x32x64xbf16, #tpu.memory_space<vmem>>, vector<1x32x64xbf16>
    %715 = vector.shape_cast %714 : vector<1x32x64xbf16> to vector<32x64xbf16>
    %cst_689 = arith.constant dense<0.000000e+00> : vector<64x64xf32>
    %716 = tpu.matmul %713, %715, %cst_689 {dimension_numbers = #tpu.dot_dimension_numbers<[1], [0], [0], [1], [0, 0, 1, 1], [], []>} : vector<64x32xbf16>, vector<32x64xbf16>, vector<64x64xf32> -> vector<64x64xf32>
    %717 = arith.addf %709, %716 : vector<64x64xf32>
    %c0_690 = arith.constant 0 : index
    %c1_691 = arith.constant 1 : index
    %c2_692 = arith.constant 2 : index
    %c0_693 = arith.constant 0 : index
    %718 = vector.load %arg4[%c0_690, %c1_691, %c2_692, %c0_693] : memref<1x10x10x32xf32, #tpu.memory_space<vmem>>, vector<1x8x8x32xf32>
    %719 = vector.shape_cast %718 : vector<1x8x8x32xf32> to vector<8x8x32xf32>
    %720 = vector.shape_cast %719 : vector<8x8x32xf32> to vector<64x32xf32>
    %721 = arith.truncf %720 : vector<64x32xf32> to vector<64x32xbf16>
    %c14_694 = arith.constant 14 : index
    %c0_695 = arith.constant 0 : index
    %c0_696 = arith.constant 0 : index
    %722 = vector.load %arg5[%c14_694, %c0_695, %c0_696] : memref<25x32x64xbf16, #tpu.memory_space<vmem>>, vector<1x32x64xbf16>
    %723 = vector.shape_cast %722 : vector<1x32x64xbf16> to vector<32x64xbf16>
    %cst_697 = arith.constant dense<0.000000e+00> : vector<64x64xf32>
    %724 = tpu.matmul %721, %723, %cst_697 {dimension_numbers = #tpu.dot_dimension_numbers<[1], [0], [0], [1], [0, 0, 1, 1], [], []>} : vector<64x32xbf16>, vector<32x64xbf16>, vector<64x64xf32> -> vector<64x64xf32>
    %725 = arith.addf %717, %724 : vector<64x64xf32>
    %c0_698 = arith.constant 0 : index
    %c2_699 = arith.constant 2 : index
    %c0_700 = arith.constant 0 : index
    %c0_701 = arith.constant 0 : index
    %726 = vector.load %arg2[%c0_698, %c2_699, %c0_700, %c0_701] : memref<1x10x10x32xf32, #tpu.memory_space<vmem>>, vector<1x8x8x32xf32>
    %727 = vector.shape_cast %726 : vector<1x8x8x32xf32> to vector<8x8x32xf32>
    %728 = vector.shape_cast %727 : vector<8x8x32xf32> to vector<64x32xf32>
    %729 = arith.truncf %728 : vector<64x32xf32> to vector<64x32xbf16>
    %c15_702 = arith.constant 15 : index
    %c0_703 = arith.constant 0 : index
    %c0_704 = arith.constant 0 : index
    %730 = vector.load %arg5[%c15_702, %c0_703, %c0_704] : memref<25x32x64xbf16, #tpu.memory_space<vmem>>, vector<1x32x64xbf16>
    %731 = vector.shape_cast %730 : vector<1x32x64xbf16> to vector<32x64xbf16>
    %cst_705 = arith.constant dense<0.000000e+00> : vector<64x64xf32>
    %732 = tpu.matmul %729, %731, %cst_705 {dimension_numbers = #tpu.dot_dimension_numbers<[1], [0], [0], [1], [0, 0, 1, 1], [], []>} : vector<64x32xbf16>, vector<32x64xbf16>, vector<64x64xf32> -> vector<64x64xf32>
    %733 = arith.addf %725, %732 : vector<64x64xf32>
    %c0_706 = arith.constant 0 : index
    %c2_707 = arith.constant 2 : index
    %c1_708 = arith.constant 1 : index
    %c0_709 = arith.constant 0 : index
    %734 = vector.load %arg1[%c0_706, %c2_707, %c1_708, %c0_709] : memref<1x10x10x32xf32, #tpu.memory_space<vmem>>, vector<1x8x8x32xf32>
    %735 = vector.shape_cast %734 : vector<1x8x8x32xf32> to vector<8x8x32xf32>
    %736 = vector.shape_cast %735 : vector<8x8x32xf32> to vector<64x32xf32>
    %737 = arith.truncf %736 : vector<64x32xf32> to vector<64x32xbf16>
    %c16_710 = arith.constant 16 : index
    %c0_711 = arith.constant 0 : index
    %c0_712 = arith.constant 0 : index
    %738 = vector.load %arg5[%c16_710, %c0_711, %c0_712] : memref<25x32x64xbf16, #tpu.memory_space<vmem>>, vector<1x32x64xbf16>
    %739 = vector.shape_cast %738 : vector<1x32x64xbf16> to vector<32x64xbf16>
    %cst_713 = arith.constant dense<0.000000e+00> : vector<64x64xf32>
    %740 = tpu.matmul %737, %739, %cst_713 {dimension_numbers = #tpu.dot_dimension_numbers<[1], [0], [0], [1], [0, 0, 1, 1], [], []>} : vector<64x32xbf16>, vector<32x64xbf16>, vector<64x64xf32> -> vector<64x64xf32>
    %741 = arith.addf %733, %740 : vector<64x64xf32>
    %c0_714 = arith.constant 0 : index
    %c2_715 = arith.constant 2 : index
    %c1_716 = arith.constant 1 : index
    %c0_717 = arith.constant 0 : index
    %742 = vector.load %arg2[%c0_714, %c2_715, %c1_716, %c0_717] : memref<1x10x10x32xf32, #tpu.memory_space<vmem>>, vector<1x8x8x32xf32>
    %743 = vector.shape_cast %742 : vector<1x8x8x32xf32> to vector<8x8x32xf32>
    %744 = vector.shape_cast %743 : vector<8x8x32xf32> to vector<64x32xf32>
    %745 = arith.truncf %744 : vector<64x32xf32> to vector<64x32xbf16>
    %c17_718 = arith.constant 17 : index
    %c0_719 = arith.constant 0 : index
    %c0_720 = arith.constant 0 : index
    %746 = vector.load %arg5[%c17_718, %c0_719, %c0_720] : memref<25x32x64xbf16, #tpu.memory_space<vmem>>, vector<1x32x64xbf16>
    %747 = vector.shape_cast %746 : vector<1x32x64xbf16> to vector<32x64xbf16>
    %cst_721 = arith.constant dense<0.000000e+00> : vector<64x64xf32>
    %748 = tpu.matmul %745, %747, %cst_721 {dimension_numbers = #tpu.dot_dimension_numbers<[1], [0], [0], [1], [0, 0, 1, 1], [], []>} : vector<64x32xbf16>, vector<32x64xbf16>, vector<64x64xf32> -> vector<64x64xf32>
    %749 = arith.addf %741, %748 : vector<64x64xf32>
    %c0_722 = arith.constant 0 : index
    %c2_723 = arith.constant 2 : index
    %c2_724 = arith.constant 2 : index
    %c0_725 = arith.constant 0 : index
    %750 = vector.load %arg1[%c0_722, %c2_723, %c2_724, %c0_725] : memref<1x10x10x32xf32, #tpu.memory_space<vmem>>, vector<1x8x8x32xf32>
    %751 = vector.shape_cast %750 : vector<1x8x8x32xf32> to vector<8x8x32xf32>
    %752 = vector.shape_cast %751 : vector<8x8x32xf32> to vector<64x32xf32>
    %753 = arith.truncf %752 : vector<64x32xf32> to vector<64x32xbf16>
    %c18_726 = arith.constant 18 : index
    %c0_727 = arith.constant 0 : index
    %c0_728 = arith.constant 0 : index
    %754 = vector.load %arg5[%c18_726, %c0_727, %c0_728] : memref<25x32x64xbf16, #tpu.memory_space<vmem>>, vector<1x32x64xbf16>
    %755 = vector.shape_cast %754 : vector<1x32x64xbf16> to vector<32x64xbf16>
    %cst_729 = arith.constant dense<0.000000e+00> : vector<64x64xf32>
    %756 = tpu.matmul %753, %755, %cst_729 {dimension_numbers = #tpu.dot_dimension_numbers<[1], [0], [0], [1], [0, 0, 1, 1], [], []>} : vector<64x32xbf16>, vector<32x64xbf16>, vector<64x64xf32> -> vector<64x64xf32>
    %757 = arith.addf %749, %756 : vector<64x64xf32>
    %c0_730 = arith.constant 0 : index
    %c2_731 = arith.constant 2 : index
    %c2_732 = arith.constant 2 : index
    %c0_733 = arith.constant 0 : index
    %758 = vector.load %arg2[%c0_730, %c2_731, %c2_732, %c0_733] : memref<1x10x10x32xf32, #tpu.memory_space<vmem>>, vector<1x8x8x32xf32>
    %759 = vector.shape_cast %758 : vector<1x8x8x32xf32> to vector<8x8x32xf32>
    %760 = vector.shape_cast %759 : vector<8x8x32xf32> to vector<64x32xf32>
    %761 = arith.truncf %760 : vector<64x32xf32> to vector<64x32xbf16>
    %c19_734 = arith.constant 19 : index
    %c0_735 = arith.constant 0 : index
    %c0_736 = arith.constant 0 : index
    %762 = vector.load %arg5[%c19_734, %c0_735, %c0_736] : memref<25x32x64xbf16, #tpu.memory_space<vmem>>, vector<1x32x64xbf16>
    %763 = vector.shape_cast %762 : vector<1x32x64xbf16> to vector<32x64xbf16>
    %cst_737 = arith.constant dense<0.000000e+00> : vector<64x64xf32>
    %764 = tpu.matmul %761, %763, %cst_737 {dimension_numbers = #tpu.dot_dimension_numbers<[1], [0], [0], [1], [0, 0, 1, 1], [], []>} : vector<64x32xbf16>, vector<32x64xbf16>, vector<64x64xf32> -> vector<64x64xf32>
    %765 = arith.addf %757, %764 : vector<64x64xf32>
    %c0_738 = arith.constant 0 : index
    %c2_739 = arith.constant 2 : index
    %c0_740 = arith.constant 0 : index
    %c0_741 = arith.constant 0 : index
    %766 = vector.load %arg4[%c0_738, %c2_739, %c0_740, %c0_741] : memref<1x10x10x32xf32, #tpu.memory_space<vmem>>, vector<1x8x8x32xf32>
    %767 = vector.shape_cast %766 : vector<1x8x8x32xf32> to vector<8x8x32xf32>
    %768 = vector.shape_cast %767 : vector<8x8x32xf32> to vector<64x32xf32>
    %769 = arith.truncf %768 : vector<64x32xf32> to vector<64x32xbf16>
    %c20_742 = arith.constant 20 : index
    %c0_743 = arith.constant 0 : index
    %c0_744 = arith.constant 0 : index
    %770 = vector.load %arg5[%c20_742, %c0_743, %c0_744] : memref<25x32x64xbf16, #tpu.memory_space<vmem>>, vector<1x32x64xbf16>
    %771 = vector.shape_cast %770 : vector<1x32x64xbf16> to vector<32x64xbf16>
    %cst_745 = arith.constant dense<0.000000e+00> : vector<64x64xf32>
    %772 = tpu.matmul %769, %771, %cst_745 {dimension_numbers = #tpu.dot_dimension_numbers<[1], [0], [0], [1], [0, 0, 1, 1], [], []>} : vector<64x32xbf16>, vector<32x64xbf16>, vector<64x64xf32> -> vector<64x64xf32>
    %773 = arith.addf %765, %772 : vector<64x64xf32>
    %c0_746 = arith.constant 0 : index
    %c2_747 = arith.constant 2 : index
    %c1_748 = arith.constant 1 : index
    %c0_749 = arith.constant 0 : index
    %774 = vector.load %arg3[%c0_746, %c2_747, %c1_748, %c0_749] : memref<1x10x10x32xf32, #tpu.memory_space<vmem>>, vector<1x8x8x32xf32>
    %775 = vector.shape_cast %774 : vector<1x8x8x32xf32> to vector<8x8x32xf32>
    %776 = vector.shape_cast %775 : vector<8x8x32xf32> to vector<64x32xf32>
    %777 = arith.truncf %776 : vector<64x32xf32> to vector<64x32xbf16>
    %c21_750 = arith.constant 21 : index
    %c0_751 = arith.constant 0 : index
    %c0_752 = arith.constant 0 : index
    %778 = vector.load %arg5[%c21_750, %c0_751, %c0_752] : memref<25x32x64xbf16, #tpu.memory_space<vmem>>, vector<1x32x64xbf16>
    %779 = vector.shape_cast %778 : vector<1x32x64xbf16> to vector<32x64xbf16>
    %cst_753 = arith.constant dense<0.000000e+00> : vector<64x64xf32>
    %780 = tpu.matmul %777, %779, %cst_753 {dimension_numbers = #tpu.dot_dimension_numbers<[1], [0], [0], [1], [0, 0, 1, 1], [], []>} : vector<64x32xbf16>, vector<32x64xbf16>, vector<64x64xf32> -> vector<64x64xf32>
    %781 = arith.addf %773, %780 : vector<64x64xf32>
    %c0_754 = arith.constant 0 : index
    %c2_755 = arith.constant 2 : index
    %c1_756 = arith.constant 1 : index
    %c0_757 = arith.constant 0 : index
    %782 = vector.load %arg4[%c0_754, %c2_755, %c1_756, %c0_757] : memref<1x10x10x32xf32, #tpu.memory_space<vmem>>, vector<1x8x8x32xf32>
    %783 = vector.shape_cast %782 : vector<1x8x8x32xf32> to vector<8x8x32xf32>
    %784 = vector.shape_cast %783 : vector<8x8x32xf32> to vector<64x32xf32>
    %785 = arith.truncf %784 : vector<64x32xf32> to vector<64x32xbf16>
    %c22_758 = arith.constant 22 : index
    %c0_759 = arith.constant 0 : index
    %c0_760 = arith.constant 0 : index
    %786 = vector.load %arg5[%c22_758, %c0_759, %c0_760] : memref<25x32x64xbf16, #tpu.memory_space<vmem>>, vector<1x32x64xbf16>
    %787 = vector.shape_cast %786 : vector<1x32x64xbf16> to vector<32x64xbf16>
    %cst_761 = arith.constant dense<0.000000e+00> : vector<64x64xf32>
    %788 = tpu.matmul %785, %787, %cst_761 {dimension_numbers = #tpu.dot_dimension_numbers<[1], [0], [0], [1], [0, 0, 1, 1], [], []>} : vector<64x32xbf16>, vector<32x64xbf16>, vector<64x64xf32> -> vector<64x64xf32>
    %789 = arith.addf %781, %788 : vector<64x64xf32>
    %c0_762 = arith.constant 0 : index
    %c2_763 = arith.constant 2 : index
    %c2_764 = arith.constant 2 : index
    %c0_765 = arith.constant 0 : index
    %790 = vector.load %arg3[%c0_762, %c2_763, %c2_764, %c0_765] : memref<1x10x10x32xf32, #tpu.memory_space<vmem>>, vector<1x8x8x32xf32>
    %791 = vector.shape_cast %790 : vector<1x8x8x32xf32> to vector<8x8x32xf32>
    %792 = vector.shape_cast %791 : vector<8x8x32xf32> to vector<64x32xf32>
    %793 = arith.truncf %792 : vector<64x32xf32> to vector<64x32xbf16>
    %c23_766 = arith.constant 23 : index
    %c0_767 = arith.constant 0 : index
    %c0_768 = arith.constant 0 : index
    %794 = vector.load %arg5[%c23_766, %c0_767, %c0_768] : memref<25x32x64xbf16, #tpu.memory_space<vmem>>, vector<1x32x64xbf16>
    %795 = vector.shape_cast %794 : vector<1x32x64xbf16> to vector<32x64xbf16>
    %cst_769 = arith.constant dense<0.000000e+00> : vector<64x64xf32>
    %796 = tpu.matmul %793, %795, %cst_769 {dimension_numbers = #tpu.dot_dimension_numbers<[1], [0], [0], [1], [0, 0, 1, 1], [], []>} : vector<64x32xbf16>, vector<32x64xbf16>, vector<64x64xf32> -> vector<64x64xf32>
    %797 = arith.addf %789, %796 : vector<64x64xf32>
    %c0_770 = arith.constant 0 : index
    %c2_771 = arith.constant 2 : index
    %c2_772 = arith.constant 2 : index
    %c0_773 = arith.constant 0 : index
    %798 = vector.load %arg4[%c0_770, %c2_771, %c2_772, %c0_773] : memref<1x10x10x32xf32, #tpu.memory_space<vmem>>, vector<1x8x8x32xf32>
    %799 = vector.shape_cast %798 : vector<1x8x8x32xf32> to vector<8x8x32xf32>
    %800 = vector.shape_cast %799 : vector<8x8x32xf32> to vector<64x32xf32>
    %801 = arith.truncf %800 : vector<64x32xf32> to vector<64x32xbf16>
    %c24_774 = arith.constant 24 : index
    %c0_775 = arith.constant 0 : index
    %c0_776 = arith.constant 0 : index
    %802 = vector.load %arg5[%c24_774, %c0_775, %c0_776] : memref<25x32x64xbf16, #tpu.memory_space<vmem>>, vector<1x32x64xbf16>
    %803 = vector.shape_cast %802 : vector<1x32x64xbf16> to vector<32x64xbf16>
    %cst_777 = arith.constant dense<0.000000e+00> : vector<64x64xf32>
    %804 = tpu.matmul %801, %803, %cst_777 {dimension_numbers = #tpu.dot_dimension_numbers<[1], [0], [0], [1], [0, 0, 1, 1], [], []>} : vector<64x32xbf16>, vector<32x64xbf16>, vector<64x64xf32> -> vector<64x64xf32>
    %805 = arith.addf %797, %804 : vector<64x64xf32>
    %806 = arith.maximumf %604, %805 : vector<64x64xf32>
    %c0_778 = arith.constant 0 : index
    %c0_779 = arith.constant 0 : index
    %807 = vector.load %arg6[%c0_778, %c0_779] : memref<1x64xf32, #tpu.memory_space<vmem>>, vector<1x64xf32>
    %808 = vector.broadcast %807 : vector<1x64xf32> to vector<64x64xf32>
    %809 = arith.addf %806, %808 : vector<64x64xf32>
    %cst_780 = arith.constant 0.000000e+00 : f32
    %810 = vector.broadcast %cst_780 : f32 to vector<64x64xf32>
    %811 = arith.maximumf %809, %810 : vector<64x64xf32>
    %812 = vector.shape_cast %811 : vector<64x64xf32> to vector<1x64x64xf32>
    %813 = arith.truncf %812 : vector<1x64x64xf32> to vector<1x64x64xbf16>
    %c0_781 = arith.constant 0 : index
    %c0_782 = arith.constant 0 : index
    %c0_783 = arith.constant 0 : index
    %814 = vector.load %arg7[%c0_781, %c0_782, %c0_783] : memref<1x64x64xbf16, #tpu.memory_space<vmem>>, vector<1x64x64xbf16>
    tpu.vector_store %arg7[%c0_781, %c0_782, %c0_783], %813 {strides = array<i32>} : memref<1x64x64xbf16, #tpu.memory_space<vmem>>, vector<1x64x64xbf16>,
    return
  }
  func.func @transform_0(%arg0: i32) -> (i32, i32, i32, i32) {
    %c0_i32 = arith.constant 0 : i32
    %c0_i32_0 = arith.constant 0 : i32
    %c0_i32_1 = arith.constant 0 : i32
    %c0_i32_2 = arith.constant 0 : i32
    return %arg0, %c0_i32, %c0_i32_0, %c0_i32_1 : i32, i32, i32, i32
  }
  func.func @transform_1(%arg0: i32) -> (i32, i32, i32, i32) {
    %c0_i32 = arith.constant 0 : i32
    %c0_i32_0 = arith.constant 0 : i32
    %c0_i32_1 = arith.constant 0 : i32
    %c0_i32_2 = arith.constant 0 : i32
    return %arg0, %c0_i32, %c0_i32_0, %c0_i32_1 : i32, i32, i32, i32
  }
  func.func @transform_2(%arg0: i32) -> (i32, i32, i32, i32) {
    %c0_i32 = arith.constant 0 : i32
    %c0_i32_0 = arith.constant 0 : i32
    %c0_i32_1 = arith.constant 0 : i32
    %c0_i32_2 = arith.constant 0 : i32
    return %arg0, %c0_i32, %c0_i32_0, %c0_i32_1 : i32, i32, i32, i32
  }
  func.func @transform_3(%arg0: i32) -> (i32, i32, i32, i32) {
    %c0_i32 = arith.constant 0 : i32
    %c0_i32_0 = arith.constant 0 : i32
    %c0_i32_1 = arith.constant 0 : i32
    %c0_i32_2 = arith.constant 0 : i32
    return %arg0, %c0_i32, %c0_i32_0, %c0_i32_1 : i32, i32, i32, i32
  }
  func.func @transform_4(%arg0: i32) -> (i32, i32, i32) {
    %c0_i32 = arith.constant 0 : i32
    %c0_i32_0 = arith.constant 0 : i32
    %c0_i32_1 = arith.constant 0 : i32
    %c0_i32_2 = arith.constant 0 : i32
    return %c0_i32, %c0_i32_0, %c0_i32_1 : i32, i32, i32
  }
  func.func @transform_5(%arg0: i32) -> (i32, i32) {
    %c0_i32 = arith.constant 0 : i32
    %c0_i32_0 = arith.constant 0 : i32
    %c0_i32_1 = arith.constant 0 : i32
    return %c0_i32, %c0_i32_0 : i32, i32
  }
  func.func @transform_6(%arg0: i32) -> (i32, i32, i32) {
    %c0_i32 = arith.constant 0 : i32
    %c0_i32_0 = arith.constant 0 : i32
    %c0_i32_1 = arith.constant 0 : i32
    return %arg0, %c0_i32, %c0_i32_0 : i32, i32, i32
  }
}

module attributes {stable_mosaic.version = 11 : i64} {
  func.func @_phase_matmul_pool_kernel(%arg0: i32, %arg1: memref<1x4x1600xbf16, #tpu.memory_space<vmem>>, %arg2: memref<1x4x1600xbf16, #tpu.memory_space<vmem>>, %arg3: memref<1x4x1600xbf16, #tpu.memory_space<vmem>>, %arg4: memref<1x4x1600xbf16, #tpu.memory_space<vmem>>, %arg5: memref<1600x128xbf16, #tpu.memory_space<vmem>>, %arg6: memref<1x128xf32, #tpu.memory_space<vmem>>, %arg7: memref<1x4x128xbf16, #tpu.memory_space<vmem>>) attributes {dimension_semantics = [#tpu.dimension_semantics<parallel>], iteration_bounds = array<i64: 2>, scalar_prefetch = 0 : i64, scratch_operands = 0 : i64, tpu.core_type = #tpu.core_type<tc>, window_params = [{transform_indices = @transform_0, window_bounds = array<i64: 1, 4, 1600>}, {transform_indices = @transform_1, window_bounds = array<i64: 1, 4, 1600>}, {transform_indices = @transform_2, window_bounds = array<i64: 1, 4, 1600>}, {transform_indices = @transform_3, window_bounds = array<i64: 1, 4, 1600>}, {pipeline_mode = #tpu.pipeline_mode<synchronous>, transform_indices = @transform_4, window_bounds = array<i64: 1600, 128>}, {pipeline_mode = #tpu.pipeline_mode<synchronous>, transform_indices = @transform_5, window_bounds = array<i64: 1, 128>}, {transform_indices = @transform_6, window_bounds = array<i64: 1, 4, 128>}]} {
    %c0 = arith.constant 0 : index
    %c0_0 = arith.constant 0 : index
    %0 = vector.load %arg5[%c0, %c0_0] : memref<1600x128xbf16, #tpu.memory_space<vmem>>, vector<1600x128xbf16>
    %c0_1 = arith.constant 0 : index
    %c0_2 = arith.constant 0 : index
    %c0_3 = arith.constant 0 : index
    %1 = vector.load %arg1[%c0_1, %c0_2, %c0_3] : memref<1x4x1600xbf16, #tpu.memory_space<vmem>>, vector<1x4x1600xbf16>
    %2 = vector.shape_cast %1 : vector<1x4x1600xbf16> to vector<4x1600xbf16>
    %cst = arith.constant dense<0.000000e+00> : vector<4x128xf32>
    %3 = tpu.matmul %2, %0, %cst {dimension_numbers = #tpu.dot_dimension_numbers<[1], [0], [0], [1], [0, 0, 1, 1], [], []>} : vector<4x1600xbf16>, vector<1600x128xbf16>, vector<4x128xf32> -> vector<4x128xf32>
    %c0_4 = arith.constant 0 : index
    %c0_5 = arith.constant 0 : index
    %c0_6 = arith.constant 0 : index
    %4 = vector.load %arg2[%c0_4, %c0_5, %c0_6] : memref<1x4x1600xbf16, #tpu.memory_space<vmem>>, vector<1x4x1600xbf16>
    %5 = vector.shape_cast %4 : vector<1x4x1600xbf16> to vector<4x1600xbf16>
    %cst_7 = arith.constant dense<0.000000e+00> : vector<4x128xf32>
    %6 = tpu.matmul %5, %0, %cst_7 {dimension_numbers = #tpu.dot_dimension_numbers<[1], [0], [0], [1], [0, 0, 1, 1], [], []>} : vector<4x1600xbf16>, vector<1600x128xbf16>, vector<4x128xf32> -> vector<4x128xf32>
    %7 = arith.maximumf %3, %6 : vector<4x128xf32>
    %c0_8 = arith.constant 0 : index
    %c0_9 = arith.constant 0 : index
    %c0_10 = arith.constant 0 : index
    %8 = vector.load %arg3[%c0_8, %c0_9, %c0_10] : memref<1x4x1600xbf16, #tpu.memory_space<vmem>>, vector<1x4x1600xbf16>
    %9 = vector.shape_cast %8 : vector<1x4x1600xbf16> to vector<4x1600xbf16>
    %cst_11 = arith.constant dense<0.000000e+00> : vector<4x128xf32>
    %10 = tpu.matmul %9, %0, %cst_11 {dimension_numbers = #tpu.dot_dimension_numbers<[1], [0], [0], [1], [0, 0, 1, 1], [], []>} : vector<4x1600xbf16>, vector<1600x128xbf16>, vector<4x128xf32> -> vector<4x128xf32>
    %11 = arith.maximumf %7, %10 : vector<4x128xf32>
    %c0_12 = arith.constant 0 : index
    %c0_13 = arith.constant 0 : index
    %c0_14 = arith.constant 0 : index
    %12 = vector.load %arg4[%c0_12, %c0_13, %c0_14] : memref<1x4x1600xbf16, #tpu.memory_space<vmem>>, vector<1x4x1600xbf16>
    %13 = vector.shape_cast %12 : vector<1x4x1600xbf16> to vector<4x1600xbf16>
    %cst_15 = arith.constant dense<0.000000e+00> : vector<4x128xf32>
    %14 = tpu.matmul %13, %0, %cst_15 {dimension_numbers = #tpu.dot_dimension_numbers<[1], [0], [0], [1], [0, 0, 1, 1], [], []>} : vector<4x1600xbf16>, vector<1600x128xbf16>, vector<4x128xf32> -> vector<4x128xf32>
    %15 = arith.maximumf %11, %14 : vector<4x128xf32>
    %c0_16 = arith.constant 0 : index
    %c0_17 = arith.constant 0 : index
    %16 = vector.load %arg6[%c0_16, %c0_17] : memref<1x128xf32, #tpu.memory_space<vmem>>, vector<1x128xf32>
    %17 = vector.broadcast %16 : vector<1x128xf32> to vector<4x128xf32>
    %18 = arith.addf %15, %17 : vector<4x128xf32>
    %cst_18 = arith.constant 0.000000e+00 : f32
    %19 = vector.broadcast %cst_18 : f32 to vector<4x128xf32>
    %20 = arith.maximumf %18, %19 : vector<4x128xf32>
    %21 = vector.shape_cast %20 : vector<4x128xf32> to vector<1x4x128xf32>
    %22 = arith.truncf %21 : vector<1x4x128xf32> to vector<1x4x128xbf16>
    %c0_19 = arith.constant 0 : index
    %c0_20 = arith.constant 0 : index
    %c0_21 = arith.constant 0 : index
    %23 = vector.load %arg7[%c0_19, %c0_20, %c0_21] : memref<1x4x128xbf16, #tpu.memory_space<vmem>>, vector<1x4x128xbf16>
    tpu.vector_store %arg7[%c0_19, %c0_20, %c0_21], %22 {strides = array<i32>} : memref<1x4x128xbf16, #tpu.memory_space<vmem>>, vector<1x4x128xbf16>,
    return
  }
  func.func @transform_0(%arg0: i32) -> (i32, i32, i32) {
    %c0_i32 = arith.constant 0 : i32
    %c0_i32_0 = arith.constant 0 : i32
    %c0_i32_1 = arith.constant 0 : i32
    return %arg0, %c0_i32, %c0_i32_0 : i32, i32, i32
  }
  func.func @transform_1(%arg0: i32) -> (i32, i32, i32) {
    %c0_i32 = arith.constant 0 : i32
    %c0_i32_0 = arith.constant 0 : i32
    %c0_i32_1 = arith.constant 0 : i32
    return %arg0, %c0_i32, %c0_i32_0 : i32, i32, i32
  }
  func.func @transform_2(%arg0: i32) -> (i32, i32, i32) {
    %c0_i32 = arith.constant 0 : i32
    %c0_i32_0 = arith.constant 0 : i32
    %c0_i32_1 = arith.constant 0 : i32
    return %arg0, %c0_i32, %c0_i32_0 : i32, i32, i32
  }
  func.func @transform_3(%arg0: i32) -> (i32, i32, i32) {
    %c0_i32 = arith.constant 0 : i32
    %c0_i32_0 = arith.constant 0 : i32
    %c0_i32_1 = arith.constant 0 : i32
    return %arg0, %c0_i32, %c0_i32_0 : i32, i32, i32
  }
  func.func @transform_4(%arg0: i32) -> (i32, i32) {
    %c0_i32 = arith.constant 0 : i32
    %c0_i32_0 = arith.constant 0 : i32
    %c0_i32_1 = arith.constant 0 : i32
    return %c0_i32, %c0_i32_0 : i32, i32
  }
  func.func @transform_5(%arg0: i32) -> (i32, i32) {
    %c0_i32 = arith.constant 0 : i32
    %c0_i32_0 = arith.constant 0 : i32
    %c0_i32_1 = arith.constant 0 : i32
    return %c0_i32, %c0_i32_0 : i32, i32
  }
  func.func @transform_6(%arg0: i32) -> (i32, i32, i32) {
    %c0_i32 = arith.constant 0 : i32
    %c0_i32_0 = arith.constant 0 : i32
    %c0_i32_1 = arith.constant 0 : i32
    return %arg0, %c0_i32, %c0_i32_0 : i32, i32, i32
  }
}

module attributes {stable_mosaic.version = 11 : i64} {
  func.func @_mlp_head_kernel(%arg0: i32, %arg1: memref<2x512xbf16, #tpu.memory_space<vmem>>, %arg2: memref<512x512xbf16, #tpu.memory_space<vmem>>, %arg3: memref<1x512xf32, #tpu.memory_space<vmem>>, %arg4: memref<512x2xbf16, #tpu.memory_space<vmem>>, %arg5: memref<1x2xf32, #tpu.memory_space<vmem>>, %arg6: memref<2x2xf32, #tpu.memory_space<vmem>>) attributes {dimension_semantics = [#tpu.dimension_semantics<arbitrary>], iteration_bounds = array<i64: 1>, scalar_prefetch = 0 : i64, scratch_operands = 0 : i64, tpu.core_type = #tpu.core_type<tc>, window_params = [{pipeline_mode = #tpu.pipeline_mode<synchronous>, transform_indices = @transform_0, window_bounds = array<i64: 2, 512>}, {pipeline_mode = #tpu.pipeline_mode<synchronous>, transform_indices = @transform_1, window_bounds = array<i64: 512, 512>}, {pipeline_mode = #tpu.pipeline_mode<synchronous>, transform_indices = @transform_2, window_bounds = array<i64: 1, 512>}, {pipeline_mode = #tpu.pipeline_mode<synchronous>, transform_indices = @transform_3, window_bounds = array<i64: 512, 2>}, {pipeline_mode = #tpu.pipeline_mode<synchronous>, transform_indices = @transform_4, window_bounds = array<i64: 1, 2>}, {pipeline_mode = #tpu.pipeline_mode<synchronous>, transform_indices = @transform_5, window_bounds = array<i64: 2, 2>}]} {
    %c0 = arith.constant 0 : index
    %c0_0 = arith.constant 0 : index
    %0 = vector.load %arg1[%c0, %c0_0] : memref<2x512xbf16, #tpu.memory_space<vmem>>, vector<2x512xbf16>
    %c0_1 = arith.constant 0 : index
    %c0_2 = arith.constant 0 : index
    %1 = vector.load %arg2[%c0_1, %c0_2] : memref<512x512xbf16, #tpu.memory_space<vmem>>, vector<512x512xbf16>
    %cst = arith.constant dense<0.000000e+00> : vector<2x512xf32>
    %2 = tpu.matmul %0, %1, %cst {dimension_numbers = #tpu.dot_dimension_numbers<[1], [0], [0], [1], [0, 0, 1, 1], [], []>} : vector<2x512xbf16>, vector<512x512xbf16>, vector<2x512xf32> -> vector<2x512xf32>
    %c0_3 = arith.constant 0 : index
    %c0_4 = arith.constant 0 : index
    %3 = vector.load %arg3[%c0_3, %c0_4] : memref<1x512xf32, #tpu.memory_space<vmem>>, vector<1x512xf32>
    %4 = vector.broadcast %3 : vector<1x512xf32> to vector<2x512xf32>
    %5 = arith.addf %2, %4 : vector<2x512xf32>
    %cst_5 = arith.constant 0.000000e+00 : f32
    %6 = vector.broadcast %cst_5 : f32 to vector<2x512xf32>
    %7 = arith.maximumf %5, %6 : vector<2x512xf32>
    %8 = arith.truncf %7 : vector<2x512xf32> to vector<2x512xbf16>
    %c0_6 = arith.constant 0 : index
    %c0_7 = arith.constant 0 : index
    %9 = vector.load %arg4[%c0_6, %c0_7] : memref<512x2xbf16, #tpu.memory_space<vmem>>, vector<512x2xbf16>
    %cst_8 = arith.constant dense<0.000000e+00> : vector<2x2xf32>
    %10 = tpu.matmul %8, %9, %cst_8 {dimension_numbers = #tpu.dot_dimension_numbers<[1], [0], [0], [1], [0, 0, 1, 1], [], []>} : vector<2x512xbf16>, vector<512x2xbf16>, vector<2x2xf32> -> vector<2x2xf32>
    %c0_9 = arith.constant 0 : index
    %c0_10 = arith.constant 0 : index
    %11 = vector.load %arg5[%c0_9, %c0_10] : memref<1x2xf32, #tpu.memory_space<vmem>>, vector<1x2xf32>
    %12 = vector.broadcast %11 : vector<1x2xf32> to vector<2x2xf32>
    %13 = arith.addf %10, %12 : vector<2x2xf32>
    %cst_11 = arith.constant dense<0xFF800000> : vector<2xf32>
    %14 = vector.multi_reduction <maximumf>, %13, %cst_11 [1] : vector<2x2xf32> to vector<2xf32>
    %15 = vector.shape_cast %14 : vector<2xf32> to vector<2x1xf32>
    %16 = vector.broadcast %15 : vector<2x1xf32> to vector<2x2xf32>
    %17 = arith.subf %13, %16 : vector<2x2xf32>
    %18 = math.exp %17 : vector<2x2xf32>
    %cst_12 = arith.constant dense<0.000000e+00> : vector<2xf32>
    %19 = vector.multi_reduction <add>, %18, %cst_12 [1] : vector<2x2xf32> to vector<2xf32>
    %20 = vector.shape_cast %19 : vector<2xf32> to vector<2x1xf32>
    %21 = tpu.reciprocal %20 {approx = true} : vector<2x1xf32> -> vector<2x1xf32>
    %22 = vector.broadcast %21 : vector<2x1xf32> to vector<2x2xf32>
    %23 = arith.mulf %18, %22 : vector<2x2xf32>
    %c0_13 = arith.constant 0 : index
    %c0_14 = arith.constant 0 : index
    %24 = vector.load %arg6[%c0_13, %c0_14] : memref<2x2xf32, #tpu.memory_space<vmem>>, vector<2x2xf32>
    tpu.vector_store %arg6[%c0_13, %c0_14], %23 {strides = array<i32>} : memref<2x2xf32, #tpu.memory_space<vmem>>, vector<2x2xf32>,
    return
  }
  func.func @transform_0(%arg0: i32) -> (i32, i32) {
    %c0_i32 = arith.constant 0 : i32
    %c0_i32_0 = arith.constant 0 : i32
    %c0_i32_1 = arith.constant 0 : i32
    return %c0_i32, %c0_i32_0 : i32, i32
  }
  func.func @transform_1(%arg0: i32) -> (i32, i32) {
    %c0_i32 = arith.constant 0 : i32
    %c0_i32_0 = arith.constant 0 : i32
    %c0_i32_1 = arith.constant 0 : i32
    return %c0_i32, %c0_i32_0 : i32, i32
  }
  func.func @transform_2(%arg0: i32) -> (i32, i32) {
    %c0_i32 = arith.constant 0 : i32
    %c0_i32_0 = arith.constant 0 : i32
    %c0_i32_1 = arith.constant 0 : i32
    return %c0_i32, %c0_i32_0 : i32, i32
  }
  func.func @transform_3(%arg0: i32) -> (i32, i32) {
    %c0_i32 = arith.constant 0 : i32
    %c0_i32_0 = arith.constant 0 : i32
    %c0_i32_1 = arith.constant 0 : i32
    return %c0_i32, %c0_i32_0 : i32, i32
  }
  func.func @transform_4(%arg0: i32) -> (i32, i32) {
    %c0_i32 = arith.constant 0 : i32
    %c0_i32_0 = arith.constant 0 : i32
    %c0_i32_1 = arith.constant 0 : i32
    return %c0_i32, %c0_i32_0 : i32, i32
  }
  func.func @transform_5(%arg0: i32) -> (i32, i32) {
    %c0_i32 = arith.constant 0 : i32
    %c0_i32_0 = arith.constant 0 : i32
    %c0_i32_1 = arith.constant 0 : i32
    return %c0_i32, %c0_i32_0 : i32, i32
  }
}

</mosaic_0001>

<bundles_post_ra>
// kernel: net_forward.4
= control target key start
LH: loop header
LB: loop body
LE: loop exit
PB: predicated region body
PF: predicated region fallthrough
CT: control target
= control target key end

     0   :  { %s3567_s21 = smov 0   ;;  %s4632_s0 = inlined_call_operand.vmem [shape: bf16[2,400,25], index: 0, kind: input, shape index: {}]   ;;  %s4633_s1 = inlined_call_operand.vmem [shape: bf16[2,400,25], index: 1, kind: input, shape index: {}]   ;;  %s4634_s2 = inlined_call_operand.vmem [shape: bf16[2,400,25], index: 2, kind: input, shape index: {}]   ;;  %s4635_s3 = inlined_call_operand.vmem [shape: bf16[2,400,25], index: 3, kind: input, shape index: {}]   ;;  %s4636_s4 = inlined_call_operand.vmem [shape: bf16[25,32], index: 4, kind: input, shape index: {}]   ;;  %s4637_s5 = inlined_call_operand.vmem [shape: f32[1,32], index: 5, kind: input, shape index: {}]   ;;  %s4638_s6 = inlined_call_operand.vmem [shape: f32[2,400,32], index: 6, kind: output, shape index: {}]  }
   0x1 LB: > { %s2667_s22 = sadd.s32 4294967295, %s3527_s21   ;;  %p2671_p0 = scmp.ge.s32.totalorder %s3527_s21, 1  ;;  %s3527_s21 = sphi %s3567_s21, %s16_s21  }
   0x2   : > { %p242_p1 = scmp.lt.s32.totalorder %s3527_s21, 3 }
   0x4   : > { %p243_p2 = pnand %p2671_p0, %p242_p1 }
   0x6   : > { %246 = sbr.rel (%p243_p2) target bundleno = 637 (0x27d), region = 44 }
   0xd   : > { %v3419_v0 = vld [vmem:[%s4636_s4] sm:$0xff]   ;;  %v4639_v1 = vmov 0.0   ;;  %v3420_v2 = vld [vmem:[%s4636_s4 + $0x8] sm:$0x1f]   ;;  %vm579_vm0 = vcmask 1043456   ;;  %vm580_vm1 = vcmask 1044480  }
   0xe   : > { %2990 = vmatprep.subr.bf16.mxu0 %v4639_v1  ;;  %3094 = vmatprep.subr.bf16.mxu1 %v4639_v1  ;;  %p287_p3 = scmp.lt.s32.totalorder %s2667_s22, 1  ;;  %v3530_v3 = vmov 65535   ;;  %vm3531_vm2 = vmmov 0   ;;  %vm503_vm3 = vcmask 203776   ;;  %vm2525_vm4 = vcmask 261120  }
   0xf   : > { %2991 = vmatpush3.bf16.msra.mxu0 %v3419_v0  ;;  %3095 = vmatpush3.bf16.msra.mxu1 %v3419_v0  ;;  %v581_v4 = vsel %vm579_vm0, 4294967295, %v3530_v3 }
  0x10   : > { %2992 = vmatprep.subr.bf16.mxu0 %v4639_v1  ;;  %3096 = vmatprep.subr.bf16.mxu1 %v4639_v1  ;;  %v582_v5 = vsel %vm580_vm1, %v581_v4, 0  ;;  %s4843_s22 = smov (!%p287_p3, %s2667_s22), 1 }
  0x11   : > { %2994 = vmatprep.mubr.msk.bf16.mxu0 %vm3531_vm2, %v4639_v1  ;;  %3098 = vmatprep.mubr.msk.bf16.mxu1 %vm3531_vm2, %v4639_v1  ;;  %v584_v6 = vand.u32 %v3420_v2, %v582_v5  ;;  %s3592_s27 = smul.u32 200, %s4843_s22 }
  0x12   : > { %s3407_s16 = smul.u32 400, %s4843_s22 }
  0x13   : > { %2993 = vmatpush3.bf16.msra.mxu0 %v584_v6  ;;  %3097 = vmatpush3.bf16.msra.mxu1 %v584_v6  ;;  %s3598_s30 = scalar_lea.vmem %s4632_s0, %s3592_s27  ;;  %s3604_s9 = scalar_lea.vmem %s4633_s1, %s3592_s27 }
  0x14   : > { %3198 = vmatprep.subr.bf16.mxu0 %v4639_v1  ;;  %3302 = vmatprep.subr.bf16.mxu1 %v4639_v1  ;;  %v3421_v7 = vld [vmem:[%s3598_s30] sm:$0xff]   ;;  %v3423_v9 = vld [vmem:[%s3598_s30 + $0x8] sm:$0xff]   ;;  %v3425_v11 = vld [vmem:[%s3598_s30 + $0x10] sm:$0xff]   ;;  %s3687_s12 = scalar_lea.vmem %s4634_s2, %s3592_s27  ;;  %s3694_s15 = scalar_lea.vmem %s4635_s3, %s3592_s27 }
  0x15   : > { %v3422_v8 = vld [vmem:[%s3604_s9] sm:$0xff]   ;;  %v3424_v10 = vld [vmem:[%s3604_s9 + $0x8] sm:$0xff]   ;;  %v3426_v12 = vld [vmem:[%s3604_s9 + $0x10] sm:$0xff]   ;;  %s4334_s22 = scalar_lea.vmem %s4638_s6, %s3407_s16 }
  0x16   : > { %2995 = vmatmul.mubr.msk.bf16.vlgmr.msra.gmra.mrb[0].mxu0 %vm503_vm3, %v3421_v7  ;;  %3099 = vmatmul.mubr.msk.bf16.vlgmr.msra.gmra.mrb[0].mxu1 %vm503_vm3, %v3422_v8  ;;  %v3427_v13 = vld [vmem:[%s3598_s30 + $0x18] sm:$0xff]   ;;  %v3429_v15 = vld [vmem:[%s3598_s30 + $0x20] sm:$0xff]   ;;  %v3431_v17 = vld [vmem:[%s3598_s30 + $0x28] sm:$0xff]  }
  0x17   : > { %3199 = vmatpush3.bf16.msra.mxu0 %v3419_v0  ;;  %3303 = vmatpush3.bf16.msra.mxu1 %v3419_v0  ;;  %v3428_v14 = vld [vmem:[%s3604_s9 + $0x18] sm:$0xff]   ;;  %v3430_v16 = vld [vmem:[%s3604_s9 + $0x20] sm:$0xff]   ;;  %v3432_v18 = vld [vmem:[%s3604_s9 + $0x28] sm:$0xff]  }
  0x18   : > { %2998 = vmatprep.mubr.msk.bf16.mxu0 %vm3531_vm2, %v4639_v1  ;;  %3102 = vmatprep.mubr.msk.bf16.mxu1 %vm3531_vm2, %v4639_v1  ;;  %v3433_v19 = vld [vmem:[%s3598_s30 + $0x30] sm:$0xff]   ;;  %v3435_v21 = vld [vmem:[%s3598_s30 + $0x38] sm:$0xff]   ;;  %v3437_v23 = vld [vmem:[%s3598_s30 + $0x40] sm:$0xff]  }
  0x19   : > { %3200 = vmatprep.subr.bf16.mxu0 %v4639_v1  ;;  %3304 = vmatprep.subr.bf16.mxu1 %v4639_v1  ;;  %v3434_v20 = vld [vmem:[%s3604_s9 + $0x30] sm:$0xff]   ;;  %v3436_v22 = vld [vmem:[%s3604_s9 + $0x38] sm:$0xff]   ;;  %v3438_v24 = vld [vmem:[%s3604_s9 + $0x40] sm:$0xff]  }
  0x1a   : > { %v3439_v25 = vld [vmem:[%s3598_s30 + $0x48] sm:$0xff]   ;;  %v3441_v27 = vld [vmem:[%s3598_s30 + $0x50] sm:$0xff]   ;;  %v3443_v29 = vld [vmem:[%s3598_s30 + $0x58] sm:$0xff]  }
  0x1b   : > { %3201 = vmatpush3.bf16.msra.mxu0 %v584_v6  ;;  %3305 = vmatpush3.bf16.msra.mxu1 %v584_v6  ;;  %v3440_v26 = vld [vmem:[%s3604_s9 + $0x48] sm:$0xff]   ;;  %v3442_v28 = vld [vmem:[%s3604_s9 + $0x50] sm:$0xff]   ;;  %v3444_v30 = vld [vmem:[%s3604_s9 + $0x58] sm:$0xff]  }
  0x1c   : > { %v3445_v31 = vld [vmem:[%s3598_s30 + $0x60] sm:$0xff]   ;;  %v3447_v33 = vld [vmem:[%s3598_s30 + $0x68] sm:$0xff]   ;;  %v3449_v35 = vld [vmem:[%s3598_s30 + $0x70] sm:$0xff]  }
  0x1d   : > { %v3446_v32 = vld [vmem:[%s3604_s9 + $0x60] sm:$0xff]   ;;  %v3448_v34 = vld [vmem:[%s3604_s9 + $0x68] sm:$0xff]   ;;  %v3450_v36 = vld [vmem:[%s3604_s9 + $0x70] sm:$0xff]  }
  0x1e   : > { %2999 = vmatmul.mubr.msk.bf16.gmra.mrb[4].mxu0 %vm503_vm3, %v3423_v9  ;;  %3103 = vmatmul.mubr.msk.bf16.gmra.mrb[4].mxu1 %vm503_vm3, %v3424_v10  ;;  %v3451_v37 = vld [vmem:[%s3598_s30 + $0x78] sm:$0xff]   ;;  %v3453_v39 = vld [vmem:[%s3598_s30 + $0x80] sm:$0xff]   ;;  %v3455_v41 = vld [vmem:[%s3598_s30 + $0x88] sm:$0xff]  }
  0x1f   : > { %3002 = vmatprep.mubr.msk.bf16.mxu0 %vm3531_vm2, %v4639_v1  ;;  %3106 = vmatprep.mubr.msk.bf16.mxu1 %vm3531_vm2, %v4639_v1  ;;  %v3452_v38 = vld [vmem:[%s3604_s9 + $0x78] sm:$0xff]   ;;  %v3454_v40 = vld [vmem:[%s3604_s9 + $0x80] sm:$0xff]   ;;  %v3456_v42 = vld [vmem:[%s3604_s9 + $0x88] sm:$0xff]  }
  0x20   : > { %v3457_v43 = vld [vmem:[%s3598_s30 + $0x90] sm:$0xff]   ;;  %v3459_v45 = vld [vmem:[%s3598_s30 + $0x98] sm:$0xff]   ;;  %v3461_v47 = vld [vmem:[%s3598_s30 + $0xa0] sm:$0xff]  }
  0x21   : > { %v3458_v44 = vld [vmem:[%s3604_s9 + $0x90] sm:$0xff]   ;;  %v3460_v46 = vld [vmem:[%s3604_s9 + $0x98] sm:$0xff]   ;;  %v3462_v48 = vld [vmem:[%s3604_s9 + $0xa0] sm:$0xff]  }
  0x22   : > { %v3463_v49 = vld [vmem:[%s3598_s30 + $0xa8] sm:$0xff]   ;;  %v3465_v51 = vld [vmem:[%s3598_s30 + $0xb0] sm:$0xff]   ;;  %v3467_v53 = vld [vmem:[%s3598_s30 + $0xb8] sm:$0xff]  }
  0x23   : > { %v3464_v50 = vld [vmem:[%s3604_s9 + $0xa8] sm:$0xff]   ;;  %v3466_v52 = vld [vmem:[%s3604_s9 + $0xb0] sm:$0xff]   ;;  %v3468_v54 = vld [vmem:[%s3604_s9 + $0xb8] sm:$0xff]  }
  0x24   : > { %v3469_v55 = vld [vmem:[%s3598_s30 + $0xc0] sm:$0xff]   ;;  %v3473_v59 = vld [vmem:[%s3687_s12 + $0x8] sm:$0xff]   ;;  %v3475_v0 = vld [vmem:[%s3687_s12 + $0x10] sm:$0xff]  }
  0x25   : > { %v3470_v56 = vld [vmem:[%s3604_s9 + $0xc0] sm:$0xff]   ;;  %v3474_v60 = vld [vmem:[%s3694_s15 + $0x8] sm:$0xff]   ;;  %v3476_v5 = vld [vmem:[%s3694_s15 + $0x10] sm:$0xff]  }
  0x26   : > { %3003 = vmatmul.mubr.msk.bf16.gmra.mrb[8].mxu0 %vm503_vm3, %v3425_v11  ;;  %3107 = vmatmul.mubr.msk.bf16.gmra.mrb[8].mxu1 %vm503_vm3, %v3426_v12  ;;  %v3471_v57 = vld [vmem:[%s3687_s12] sm:$0xff]  }
  0x27   : > { %3006 = vmatprep.mubr.msk.bf16.mxu0 %vm3531_vm2, %v4639_v1  ;;  %3110 = vmatprep.mubr.msk.bf16.mxu1 %vm3531_vm2, %v4639_v1  ;;  %v3472_v58 = vld [vmem:[%s3694_s15] sm:$0xff]  }
  0x2e   : > { %3007 = vmatmul.mubr.msk.bf16.gmra.mrb[12].mxu0 %vm503_vm3, %v3427_v13  ;;  %3111 = vmatmul.mubr.msk.bf16.gmra.mrb[12].mxu1 %vm503_vm3, %v3428_v14  ;;  %v3477_v13 = vld [vmem:[%s3687_s12 + $0x18] sm:$0xff]  }
  0x2f   : > { %3010 = vmatprep.mubr.msk.bf16.mxu0 %vm3531_vm2, %v4639_v1  ;;  %3114 = vmatprep.mubr.msk.bf16.mxu1 %vm3531_vm2, %v4639_v1 }
  0x36   : > { %3011 = vmatmul.mubr.msk.bf16.gmra.mrb[16].mxu0 %vm503_vm3, %v3429_v15  ;;  %3115 = vmatmul.mubr.msk.bf16.gmra.mrb[16].mxu1 %vm503_vm3, %v3430_v16 }
  0x37   : > { %3014 = vmatprep.mubr.msk.bf16.mxu0 %vm3531_vm2, %v4639_v1  ;;  %3118 = vmatprep.mubr.msk.bf16.mxu1 %vm3531_vm2, %v4639_v1 }
  0x3e   : > { %3015 = vmatmul.mubr.msk.bf16.gmra.mrb[20].mxu0 %vm503_vm3, %v3431_v17  ;;  %3119 = vmatmul.mubr.msk.bf16.gmra.mrb[20].mxu1 %vm503_vm3, %v3432_v18  ;;  %v3478_v17 = vld [vmem:[%s3694_s15 + $0x18] sm:$0xff]  }
  0x3f   : > { %3018 = vmatprep.mubr.msk.bf16.mxu0 %vm3531_vm2, %v4639_v1  ;;  %3122 = vmatprep.mubr.msk.bf16.mxu1 %vm3531_vm2, %v4639_v1 }
  0x46   : > { %3019 = vmatmul.mubr.msk.bf16.gmra.mrb[24].mxu0 %vm503_vm3, %v3433_v19  ;;  %3123 = vmatmul.mubr.msk.bf16.gmra.mrb[24].mxu1 %vm503_vm3, %v3434_v20 }
  0x47   : > { %3022 = vmatprep.mubr.msk.bf16.mxu0 %vm3531_vm2, %v4639_v1  ;;  %3126 = vmatprep.mubr.msk.bf16.mxu1 %vm3531_vm2, %v4639_v1 }
  0x4e   : > { %3023 = vmatmul.mubr.msk.bf16.gmra.mrb[28].mxu0 %vm503_vm3, %v3435_v21  ;;  %3127 = vmatmul.mubr.msk.bf16.gmra.mrb[28].mxu1 %vm503_vm3, %v3436_v22 }
  0x4f   : > { %3026 = vmatprep.mubr.msk.bf16.mxu0 %vm3531_vm2, %v4639_v1  ;;  %3130 = vmatprep.mubr.msk.bf16.mxu1 %vm3531_vm2, %v4639_v1 }
  0x56   : > { %3027 = vmatmul.mubr.msk.bf16.gmra.mrb[32].mxu0 %vm503_vm3, %v3437_v23  ;;  %3131 = vmatmul.mubr.msk.bf16.gmra.mrb[32].mxu1 %vm503_vm3, %v3438_v24 }
  0x57   : > { %3030 = vmatprep.mubr.msk.bf16.mxu0 %vm3531_vm2, %v4639_v1  ;;  %3134 = vmatprep.mubr.msk.bf16.mxu1 %vm3531_vm2, %v4639_v1 }
  0x5e   : > { %3031 = vmatmul.mubr.msk.bf16.gmra.mrb[36].mxu0 %vm503_vm3, %v3439_v25  ;;  %3135 = vmatmul.mubr.msk.bf16.gmra.mrb[36].mxu1 %vm503_vm3, %v3440_v26  ;;  %v3479_v25 = vld [vmem:[%s3687_s12 + $0x20] sm:$0xff]  }
  0x5f   : > { %3034 = vmatprep.mubr.msk.bf16.mxu0 %vm3531_vm2, %v4639_v1  ;;  %3138 = vmatprep.mubr.msk.bf16.mxu1 %vm3531_vm2, %v4639_v1 }
  0x66   : > { %3035 = vmatmul.mubr.msk.bf16.gmra.mrb[40].mxu0 %vm503_vm3, %v3441_v27  ;;  %3139 = vmatmul.mubr.msk.bf16.gmra.mrb[40].mxu1 %vm503_vm3, %v3442_v28 }
  0x67   : > { %3038 = vmatprep.mubr.msk.bf16.mxu0 %vm3531_vm2, %v4639_v1  ;;  %3142 = vmatprep.mubr.msk.bf16.mxu1 %vm3531_vm2, %v4639_v1 }
  0x6e   : > { %3039 = vmatmul.mubr.msk.bf16.gmra.mrb[44].mxu0 %vm503_vm3, %v3443_v29  ;;  %3143 = vmatmul.mubr.msk.bf16.gmra.mrb[44].mxu1 %vm503_vm3, %v3444_v30  ;;  %v3480_v29 = vld [vmem:[%s3694_s15 + $0x20] sm:$0xff]  }
  0x6f   : > { %3042 = vmatprep.mubr.msk.bf16.mxu0 %vm3531_vm2, %v4639_v1  ;;  %3146 = vmatprep.mubr.msk.bf16.mxu1 %vm3531_vm2, %v4639_v1 }
  0x76   : > { %3043 = vmatmul.mubr.msk.bf16.gmra.mrb[48].mxu0 %vm503_vm3, %v3445_v31  ;;  %3147 = vmatmul.mubr.msk.bf16.gmra.mrb[48].mxu1 %vm503_vm3, %v3446_v32 }
  0x77   : > { %3046 = vmatprep.mubr.msk.bf16.mxu0 %vm3531_vm2, %v4639_v1  ;;  %3150 = vmatprep.mubr.msk.bf16.mxu1 %vm3531_vm2, %v4639_v1 }
  0x7e   : > { %3047 = vmatmul.mubr.msk.bf16.gmra.mrb[52].mxu0 %vm503_vm3, %v3447_v33  ;;  %3151 = vmatmul.mubr.msk.bf16.gmra.mrb[52].mxu1 %vm503_vm3, %v3448_v34 }
  0x7f   : > { %3050 = vmatprep.mubr.msk.bf16.mxu0 %vm3531_vm2, %v4639_v1  ;;  %3154 = vmatprep.mubr.msk.bf16.mxu1 %vm3531_vm2, %v4639_v1 }
  0x86   : > { %3051 = vmatmul.mubr.msk.bf16.gmra.mrb[56].mxu0 %vm503_vm3, %v3449_v35  ;;  %3155 = vmatmul.mubr.msk.bf16.gmra.mrb[56].mxu1 %vm503_vm3, %v3450_v36 }
  0x87   : > { %3054 = vmatprep.mubr.msk.bf16.mxu0 %vm3531_vm2, %v4639_v1  ;;  %3158 = vmatprep.mubr.msk.bf16.mxu1 %vm3531_vm2, %v4639_v1 }
  0x8e   : > { %3055 = vmatmul.mubr.msk.bf16.gmra.mrb[60].mxu0 %vm503_vm3, %v3451_v37  ;;  %3159 = vmatmul.mubr.msk.bf16.gmra.mrb[60].mxu1 %vm503_vm3, %v3452_v38  ;;  %v3481_v37 = vld [vmem:[%s3687_s12 + $0x28] sm:$0xff]  }
  0x8f   : > { %3058 = vmatprep.mubr.msk.bf16.mxu0 %vm3531_vm2, %v4639_v1  ;;  %3162 = vmatprep.mubr.msk.bf16.mxu1 %vm3531_vm2, %v4639_v1 }
  0x96   : > { %3059 = vmatmul.mubr.msk.bf16.gmra.mrb[64].mxu0 %vm503_vm3, %v3453_v39  ;;  %3163 = vmatmul.mubr.msk.bf16.gmra.mrb[64].mxu1 %vm503_vm3, %v3454_v40 }
  0x97   : > { %3062 = vmatprep.mubr.msk.bf16.mxu0 %vm3531_vm2, %v4639_v1  ;;  %3166 = vmatprep.mubr.msk.bf16.mxu1 %vm3531_vm2, %v4639_v1 }
  0x9e   : > { %3063 = vmatmul.mubr.msk.bf16.gmra.mrb[68].mxu0 %vm503_vm3, %v3455_v41  ;;  %3167 = vmatmul.mubr.msk.bf16.gmra.mrb[68].mxu1 %vm503_vm3, %v3456_v42  ;;  %v3482_v41 = vld [vmem:[%s3694_s15 + $0x28] sm:$0xff]  }
  0x9f   : > { %3066 = vmatprep.mubr.msk.bf16.mxu0 %vm3531_vm2, %v4639_v1  ;;  %3170 = vmatprep.mubr.msk.bf16.mxu1 %vm3531_vm2, %v4639_v1 }
  0xa6   : > { %3067 = vmatmul.mubr.msk.bf16.gmra.mrb[72].mxu0 %vm503_vm3, %v3457_v43  ;;  %3171 = vmatmul.mubr.msk.bf16.gmra.mrb[72].mxu1 %vm503_vm3, %v3458_v44 }
  0xa7   : > { %3070 = vmatprep.mubr.msk.bf16.mxu0 %vm3531_vm2, %v4639_v1  ;;  %3174 = vmatprep.mubr.msk.bf16.mxu1 %vm3531_vm2, %v4639_v1 }
  0xae   : > { %3071 = vmatmul.mubr.msk.bf16.gmra.mrb[76].mxu0 %vm503_vm3, %v3459_v45  ;;  %3175 = vmatmul.mubr.msk.bf16.gmra.mrb[76].mxu1 %vm503_vm3, %v3460_v46 }
  0xaf   : > { %3074 = vmatprep.mubr.msk.bf16.mxu0 %vm3531_vm2, %v4639_v1  ;;  %3178 = vmatprep.mubr.msk.bf16.mxu1 %vm3531_vm2, %v4639_v1 }
  0xb6   : > { %3075 = vmatmul.mubr.msk.bf16.gmra.mrb[80].mxu0 %vm503_vm3, %v3461_v47  ;;  %3179 = vmatmul.mubr.msk.bf16.gmra.mrb[80].mxu1 %vm503_vm3, %v3462_v48 }
  0xb7   : > { %3078 = vmatprep.mubr.msk.bf16.mxu0 %vm3531_vm2, %v4639_v1  ;;  %3182 = vmatprep.mubr.msk.bf16.mxu1 %vm3531_vm2, %v4639_v1 }
  0xbe   : > { %3079 = vmatmul.mubr.msk.bf16.gmra.mrb[84].mxu0 %vm503_vm3, %v3463_v49  ;;  %3183 = vmatmul.mubr.msk.bf16.gmra.mrb[84].mxu1 %vm503_vm3, %v3464_v50  ;;  %v3483_v49 = vld [vmem:[%s3687_s12 + $0x30] sm:$0xff]  }
  0xbf   : > { %3082 = vmatprep.mubr.msk.bf16.mxu0 %vm3531_vm2, %v4639_v1  ;;  %3186 = vmatprep.mubr.msk.bf16.mxu1 %vm3531_vm2, %v4639_v1 }
  0xc6   : > { %3083 = vmatmul.mubr.msk.bf16.gmra.mrb[88].mxu0 %vm503_vm3, %v3465_v51  ;;  %3187 = vmatmul.mubr.msk.bf16.gmra.mrb[88].mxu1 %vm503_vm3, %v3466_v52 }
  0xc7   : > { %3086 = vmatprep.mubr.msk.bf16.mxu0 %vm3531_vm2, %v4639_v1  ;;  %3190 = vmatprep.mubr.msk.bf16.mxu1 %vm3531_vm2, %v4639_v1 }
  0xce   : > { %3087 = vmatmul.mubr.msk.bf16.gmra.mrb[92].mxu0 %vm503_vm3, %v3467_v53  ;;  %3191 = vmatmul.mubr.msk.bf16.gmra.mrb[92].mxu1 %vm503_vm3, %v3468_v54  ;;  %v3484_v53 = vld [vmem:[%s3694_s15 + $0x30] sm:$0xff]  }
  0xcf   : > { %3090 = vmatprep.mubr.msk.bf16.mxu0 %vm3531_vm2, %v4639_v1  ;;  %3194 = vmatprep.mubr.msk.bf16.mxu1 %vm3531_vm2, %v4639_v1 }
  0xd6   : > { %3091 = vmatmul.mubr.msk.bf16.gmra.mrb[96].mxu0 %vm503_vm3, %v3469_v55  ;;  %3195 = vmatmul.mubr.msk.bf16.gmra.mrb[96].mxu1 %vm503_vm3, %v3470_v56 }
  0xd7   : > { %3202 = vmatprep.mubr.msk.bf16.mxu0 %vm3531_vm2, %v4639_v1  ;;  %3306 = vmatprep.mubr.msk.bf16.mxu1 %vm3531_vm2, %v4639_v1 }
  0xde   : > { %3203 = vmatmul.mubr.msk.bf16.vlgmr.msra.gmra.mrb[100].mxu0 %vm503_vm3, %v3471_v57  ;;  %3307 = vmatmul.mubr.msk.bf16.vlgmr.msra.gmra.mrb[100].mxu1 %vm503_vm3, %v3472_v58 }
  0xdf   : > { %3206 = vmatprep.mubr.msk.bf16.mxu0 %vm3531_vm2, %v4639_v1  ;;  %3310 = vmatprep.mubr.msk.bf16.mxu1 %vm3531_vm2, %v4639_v1 }
  0xe6   : > { %3207 = vmatmul.mubr.msk.bf16.gmra.mrb[104].mxu0 %vm503_vm3, %v3473_v59  ;;  %3311 = vmatmul.mubr.msk.bf16.gmra.mrb[104].mxu1 %vm503_vm3, %v3474_v60 }
  0xe7   : > { %3210 = vmatprep.mubr.msk.bf16.mxu0 %vm3531_vm2, %v4639_v1  ;;  %3314 = vmatprep.mubr.msk.bf16.mxu1 %vm3531_vm2, %v4639_v1 }
  0xe9   : > { %v3838_v61 = vpop.f32.mrb[0].mxu0  ;;  %v3840_v62 = vpop.f32.mrb[0].mxu1 }
  0xea   : > { %v2996_v63 = vpop.f32.mrb[1].mxu0  ;;  %v3100_v3 = vpop.f32.mrb[1].mxu1 }
  0xeb   : > { %v3845_v4 = vpop.f32.mrb[2].mxu0  ;;  %v3848_v6 = vpop.f32.mrb[2].mxu1  ;;  %v3485_v63 = vld [vmem:[%s3687_s12 + $0x38] sm:$0xff]  }
  0xec   : > { %v2997_v7 = vpop.f32.mrb[3].mxu0  ;;  %v3101_v9 = vpop.f32.mrb[3].mxu1 }
  0xed   : > { %v3486_v7 = vld [vmem:[%s3694_s15 + $0x38] sm:$0xff]  }
  0xee   : > { %3211 = vmatmul.mubr.msk.bf16.gmra.mrb[108].mxu0 %vm503_vm3, %v3475_v0  ;;  %3315 = vmatmul.mubr.msk.bf16.gmra.mrb[108].mxu1 %vm503_vm3, %v3476_v5 }
  0xef   : > { %3214 = vmatprep.mubr.msk.bf16.mxu0 %vm3531_vm2, %v4639_v1  ;;  %3318 = vmatprep.mubr.msk.bf16.mxu1 %vm3531_vm2, %v4639_v1 }
  0xf1   : > { %v3858_v10 = vpop.f32.mrb[4].mxu0  ;;  %v3860_v11 = vpop.f32.mrb[4].mxu1 }
  0xf2   : > { %v3000_v12 = vpop.f32.mrb[5].mxu0  ;;  %v3104_v15 = vpop.f32.mrb[5].mxu1 }
  0xf3   : > { %v3865_v16 = vpop.f32.mrb[6].mxu0  ;;  %v3868_v18 = vpop.f32.mrb[6].mxu1 }
  0xf4   : > { %v3001_v19 = vpop.f32.mrb[7].mxu0  ;;  %v3105_v21 = vpop.f32.mrb[7].mxu1 }
  0xf6   : > { %3215 = vmatmul.mubr.msk.bf16.gmra.mrb[112].mxu0 %vm503_vm3, %v3477_v13  ;;  %3319 = vmatmul.mubr.msk.bf16.gmra.mrb[112].mxu1 %vm503_vm3, %v3478_v17 }
  0xf7   : > { %3218 = vmatprep.mubr.msk.bf16.mxu0 %vm3531_vm2, %v4639_v1  ;;  %3322 = vmatprep.mubr.msk.bf16.mxu1 %vm3531_vm2, %v4639_v1 }
  0xf9   : > { %v3878_v22 = vpop.f32.mrb[8].mxu0  ;;  %v3880_v23 = vpop.f32.mrb[8].mxu1 }
  0xfa   : > { %v3004_v24 = vpop.f32.mrb[9].mxu0  ;;  %v3108_v27 = vpop.f32.mrb[9].mxu1 }
  0xfb   : > { %v3885_v28 = vpop.f32.mrb[10].mxu0  ;;  %v3888_v30 = vpop.f32.mrb[10].mxu1  ;;  %v3487_v24 = vld [vmem:[%s3687_s12 + $0x40] sm:$0xff]  }
  0xfc   : > { %v3005_v31 = vpop.f32.mrb[11].mxu0  ;;  %v3109_v33 = vpop.f32.mrb[11].mxu1 }
  0xfd   : > { %v3488_v31 = vld [vmem:[%s3694_s15 + $0x40] sm:$0xff]  }
  0xfe   : > { %3219 = vmatmul.mubr.msk.bf16.gmra.mrb[116].mxu0 %vm503_vm3, %v3479_v25  ;;  %3323 = vmatmul.mubr.msk.bf16.gmra.mrb[116].mxu1 %vm503_vm3, %v3480_v29 }
  0xff   : > { %3222 = vmatprep.mubr.msk.bf16.mxu0 %vm3531_vm2, %v4639_v1  ;;  %3326 = vmatprep.mubr.msk.bf16.mxu1 %vm3531_vm2, %v4639_v1 }
 0x101   : > { %v3898_v34 = vpop.f32.mrb[12].mxu0  ;;  %v3900_v35 = vpop.f32.mrb[12].mxu1 }
 0x102   : > { %v3008_v36 = vpop.f32.mrb[13].mxu0  ;;  %v3112_v39 = vpop.f32.mrb[13].mxu1 }
 0x103   : > { %v3905_v40 = vpop.f32.mrb[14].mxu0  ;;  %v3908_v42 = vpop.f32.mrb[14].mxu1 }
 0x104   : > { %v3009_v43 = vpop.f32.mrb[15].mxu0  ;;  %v3113_v45 = vpop.f32.mrb[15].mxu1 }
 0x106   : > { %3223 = vmatmul.mubr.msk.bf16.gmra.mrb[120].mxu0 %vm503_vm3, %v3481_v37  ;;  %3327 = vmatmul.mubr.msk.bf16.gmra.mrb[120].mxu1 %vm503_vm3, %v3482_v41 }
 0x107   : > { %3226 = vmatprep.mubr.msk.bf16.mxu0 %vm3531_vm2, %v4639_v1  ;;  %3330 = vmatprep.mubr.msk.bf16.mxu1 %vm3531_vm2, %v4639_v1 }
 0x109   : > { %v3918_v46 = vpop.f32.mrb[16].mxu0  ;;  %v3920_v47 = vpop.f32.mrb[16].mxu1 }
 0x10a   : > { %v3012_v48 = vpop.f32.mrb[17].mxu0  ;;  %v3116_v51 = vpop.f32.mrb[17].mxu1 }
 0x10b   : > { %v3925_v52 = vpop.f32.mrb[18].mxu0  ;;  %v3928_v54 = vpop.f32.mrb[18].mxu1  ;;  %v3489_v48 = vld [vmem:[%s3687_s12 + $0x48] sm:$0xff]  }
 0x10c   : > { %v3013_v55 = vpop.f32.mrb[19].mxu0  ;;  %v3117_v57 = vpop.f32.mrb[19].mxu1 }
 0x10d   : > { %v3490_v55 = vld [vmem:[%s3694_s15 + $0x48] sm:$0xff]  }
 0x10e   : > { %3227 = vmatmul.mubr.msk.bf16.gmra.mrb[124].mxu0 %vm503_vm3, %v3483_v49  ;;  %3331 = vmatmul.mubr.msk.bf16.gmra.mrb[124].mxu1 %vm503_vm3, %v3484_v53 }
 0x10f   : > { %3230 = vmatprep.mubr.msk.bf16.mxu0 %vm3531_vm2, %v4639_v1  ;;  %3334 = vmatprep.mubr.msk.bf16.mxu1 %vm3531_vm2, %v4639_v1 }
 0x111   : > { %v3938_v58 = vpop.f32.mrb[20].mxu0  ;;  %v3940_v59 = vpop.f32.mrb[20].mxu1 }
 0x112   : > { %v3016_v60 = vpop.f32.mrb[21].mxu0  ;;  %v3120_v3 = vpop.f32.mrb[21].mxu1 }
 0x113   : > { %v3945_v5 = vpop.f32.mrb[22].mxu0  ;;  %v3948_v9 = vpop.f32.mrb[22].mxu1 }
 0x114   : > { %v3017_v12 = vpop.f32.mrb[23].mxu0  ;;  %v3121_v15 = vpop.f32.mrb[23].mxu1 }
 0x116   : > { %3231 = vmatmul.mubr.msk.bf16.gmra.mrb[128].mxu0 %vm503_vm3, %v3485_v63  ;;  %3335 = vmatmul.mubr.msk.bf16.gmra.mrb[128].mxu1 %vm503_vm3, %v3486_v7 }
 0x117   : > { %3234 = vmatprep.mubr.msk.bf16.mxu0 %vm3531_vm2, %v4639_v1  ;;  %3338 = vmatprep.mubr.msk.bf16.mxu1 %vm3531_vm2, %v4639_v1 }
 0x119   : > { %v3958_v17 = vpop.f32.mrb[24].mxu0  ;;  %v3960_v19 = vpop.f32.mrb[24].mxu1 }
 0x11a   : > { %v3020_v21 = vpop.f32.mrb[25].mxu0  ;;  %v3124_v27 = vpop.f32.mrb[25].mxu1 }
 0x11b   : > { %v3965_v29 = vpop.f32.mrb[26].mxu0  ;;  %v3968_v33 = vpop.f32.mrb[26].mxu1  ;;  %v3491_v21 = vld [vmem:[%s3687_s12 + $0x50] sm:$0xff]  }
 0x11c   : > { %v3021_v36 = vpop.f32.mrb[27].mxu0  ;;  %v3125_v39 = vpop.f32.mrb[27].mxu1 }
 0x11d   : > { %v3492_v36 = vld [vmem:[%s3694_s15 + $0x50] sm:$0xff]  }
 0x11e   : > { %3235 = vmatmul.mubr.msk.bf16.gmra.mrb[132].mxu0 %vm503_vm3, %v3487_v24  ;;  %3339 = vmatmul.mubr.msk.bf16.gmra.mrb[132].mxu1 %vm503_vm3, %v3488_v31 }
 0x11f   : > { %3238 = vmatprep.mubr.msk.bf16.mxu0 %vm3531_vm2, %v4639_v1  ;;  %3342 = vmatprep.mubr.msk.bf16.mxu1 %vm3531_vm2, %v4639_v1 }
 0x121   : > { %v3978_v41 = vpop.f32.mrb[28].mxu0  ;;  %v3980_v43 = vpop.f32.mrb[28].mxu1 }
 0x122   : > { %v3024_v45 = vpop.f32.mrb[29].mxu0  ;;  %v3128_v51 = vpop.f32.mrb[29].mxu1 }
 0x123   : > { %v3985_v53 = vpop.f32.mrb[30].mxu0  ;;  %v3988_v57 = vpop.f32.mrb[30].mxu1 }
 0x124   : > { %v3025_v60 = vpop.f32.mrb[31].mxu0  ;;  %v3129_v3 = vpop.f32.mrb[31].mxu1 }
 0x126   : > { %3239 = vmatmul.mubr.msk.bf16.gmra.mrb[136].mxu0 %vm503_vm3, %v3489_v48  ;;  %3343 = vmatmul.mubr.msk.bf16.gmra.mrb[136].mxu1 %vm503_vm3, %v3490_v55 }
 0x127   : > { %3242 = vmatprep.mubr.msk.bf16.mxu0 %vm3531_vm2, %v4639_v1  ;;  %3346 = vmatprep.mubr.msk.bf16.mxu1 %vm3531_vm2, %v4639_v1 }
 0x129   : > { %v3998_v7 = vpop.f32.mrb[32].mxu0  ;;  %v4000_v12 = vpop.f32.mrb[32].mxu1 }
 0x12a   : > { %v3028_v15 = vpop.f32.mrb[33].mxu0  ;;  %v3132_v27 = vpop.f32.mrb[33].mxu1 }
 0x12b   : > { %v4005_v31 = vpop.f32.mrb[34].mxu0  ;;  %v4008_v39 = vpop.f32.mrb[34].mxu1  ;;  %v3493_v15 = vld [vmem:[%s3687_s12 + $0x58] sm:$0xff]  }
 0x12c   : > { %v3029_v45 = vpop.f32.mrb[35].mxu0  ;;  %v3133_v51 = vpop.f32.mrb[35].mxu1 }
 0x12e   : > { %3243 = vmatmul.mubr.msk.bf16.gmra.mrb[140].mxu0 %vm503_vm3, %v3491_v21  ;;  %3347 = vmatmul.mubr.msk.bf16.gmra.mrb[140].mxu1 %vm503_vm3, %v3492_v36  ;;  %v3494_v36 = vld [vmem:[%s3694_s15 + $0x58] sm:$0xff]  }
 0x12f   : > { %3246 = vmatprep.mubr.msk.bf16.mxu0 %vm3531_vm2, %v4639_v1  ;;  %3350 = vmatprep.mubr.msk.bf16.mxu1 %vm3531_vm2, %v4639_v1 }
 0x131   : > { %v4018_v55 = vpop.f32.mrb[36].mxu0  ;;  %v4020_v60 = vpop.f32.mrb[36].mxu1 }
 0x132   : > { %v3032_v3 = vpop.f32.mrb[37].mxu0  ;;  %v3136_v45 = vpop.f32.mrb[37].mxu1 }
 0x133   : > { %v4025_v21 = vpop.f32.mrb[38].mxu0  ;;  %v4028_v51 = vpop.f32.mrb[38].mxu1 }
 0x134   : > { %v3033_v48 = vpop.f32.mrb[39].mxu0  ;;  %v3137_v63 = vpop.f32.mrb[39].mxu1 }
 0x135   : > { %v3495_v48 = vld [vmem:[%s3687_s12 + $0x60] sm:$0xff]  }
 0x136   : > { %3247 = vmatmul.mubr.msk.bf16.gmra.mrb[144].mxu0 %vm503_vm3, %v3493_v15  ;;  %3351 = vmatmul.mubr.msk.bf16.gmra.mrb[144].mxu1 %vm503_vm3, %v3494_v36  ;;  %v3496_v36 = vld [vmem:[%s3694_s15 + $0x60] sm:$0xff]  }
 0x137   : > { %3250 = vmatprep.mubr.msk.bf16.mxu0 %vm3531_vm2, %v4639_v1  ;;  %3354 = vmatprep.mubr.msk.bf16.mxu1 %vm3531_vm2, %v4639_v1 }
 0x139   : > { %v4038_v3 = vpop.f32.mrb[40].mxu0  ;;  %v4040_v45 = vpop.f32.mrb[40].mxu1 }
 0x13a   : > { %v3036_v27 = vpop.f32.mrb[41].mxu0  ;;  %v3140_v24 = vpop.f32.mrb[41].mxu1 }
 0x13b   : > { %v4045_v15 = vpop.f32.mrb[42].mxu0  ;;  %v4048_v49 = vpop.f32.mrb[42].mxu1 }
 0x13c   : > { %v3037_v37 = vpop.f32.mrb[43].mxu0  ;;  %v3141_v13 = vpop.f32.mrb[43].mxu1 }
 0x13d   : > { %v3497_v37 = vld [vmem:[%s3687_s12 + $0x68] sm:$0xff]  }
 0x13e   : > { %3251 = vmatmul.mubr.msk.bf16.gmra.mrb[148].mxu0 %vm503_vm3, %v3495_v48  ;;  %3355 = vmatmul.mubr.msk.bf16.gmra.mrb[148].mxu1 %vm503_vm3, %v3496_v36  ;;  %v3498_v36 = vld [vmem:[%s3694_s15 + $0x68] sm:$0xff]  }
 0x13f   : > { %3254 = vmatprep.mubr.msk.bf16.mxu0 %vm3531_vm2, %v4639_v1  ;;  %3358 = vmatprep.mubr.msk.bf16.mxu1 %vm3531_vm2, %v4639_v1 }
 0x141   : > { %v4058_v24 = vpop.f32.mrb[44].mxu0  ;;  %v4060_v27 = vpop.f32.mrb[44].mxu1 }
 0x142   : > { %v3040_v63 = vpop.f32.mrb[45].mxu0  ;;  %v3144_v25 = vpop.f32.mrb[45].mxu1 }
 0x143   : > { %v4065_v48 = vpop.f32.mrb[46].mxu0  ;;  %v4068_v0 = vpop.f32.mrb[46].mxu1 }
 0x144   : > { %v3041_v56 = vpop.f32.mrb[47].mxu0  ;;  %v3145_v44 = vpop.f32.mrb[47].mxu1 }
 0x145   : > { %v3499_v56 = vld [vmem:[%s3687_s12 + $0x70] sm:$0xff]  }
 0x146   : > { %3255 = vmatmul.mubr.msk.bf16.gmra.mrb[152].mxu0 %vm503_vm3, %v3497_v37  ;;  %3359 = vmatmul.mubr.msk.bf16.gmra.mrb[152].mxu1 %vm503_vm3, %v3498_v36  ;;  %v3500_v36 = vld [vmem:[%s3694_s15 + $0x70] sm:$0xff]  }
 0x147   : > { %3258 = vmatprep.mubr.msk.bf16.mxu0 %vm3531_vm2, %v4639_v1  ;;  %3362 = vmatprep.mubr.msk.bf16.mxu1 %vm3531_vm2, %v4639_v1 }
 0x149   : > { %v4078_v25 = vpop.f32.mrb[48].mxu0  ;;  %v4080_v63 = vpop.f32.mrb[48].mxu1 }
 0x14a   : > { %v3044_v13 = vpop.f32.mrb[49].mxu0  ;;  %v3148_v50 = vpop.f32.mrb[49].mxu1 }
 0x14b   : > { %v4085_v37 = vpop.f32.mrb[50].mxu0  ;;  %v4088_v38 = vpop.f32.mrb[50].mxu1 }
 0x14c   : > { %4691 = vst [vmem:[#allocation2_spill] sm:$0xff] %v4085_v37  ;;  %4692 = vst [vmem:[#allocation3_spill] sm:$0xff] %v4088_v38  ;;  %v3045_v32 = vpop.f32.mrb[51].mxu0  ;;  %v3149_v20 = vpop.f32.mrb[51].mxu1 }
 0x14d   : > { %v3501_v32 = vld [vmem:[%s3687_s12 + $0x78] sm:$0xff]  }
 0x14e   : > { %3259 = vmatmul.mubr.msk.bf16.gmra.mrb[156].mxu0 %vm503_vm3, %v3499_v56  ;;  %3363 = vmatmul.mubr.msk.bf16.gmra.mrb[156].mxu1 %vm503_vm3, %v3500_v36  ;;  %v3502_v36 = vld [vmem:[%s3694_s15 + $0x78] sm:$0xff]  }
 0x14f   : > { %3262 = vmatprep.mubr.msk.bf16.mxu0 %vm3531_vm2, %v4639_v1  ;;  %3366 = vmatprep.mubr.msk.bf16.mxu1 %vm3531_vm2, %v4639_v1 }
 0x151   : > { %v4098_v50 = vpop.f32.mrb[52].mxu0  ;;  %v4100_v13 = vpop.f32.mrb[52].mxu1 }
 0x152   : > { %4693 = vst [vmem:[#allocation4_spill] sm:$0xff] %v4098_v50  ;;  %4694 = vst [vmem:[#allocation5_spill] sm:$0xff] %v4100_v13  ;;  %v3048_v44 = vpop.f32.mrb[53].mxu0  ;;  %v3152_v26 = vpop.f32.mrb[53].mxu1 }
 0x153   : > { %v4105_v56 = vpop.f32.mrb[54].mxu0  ;;  %v4108_v14 = vpop.f32.mrb[54].mxu1  ;;  %v4697_v44 = vmov 0.0  }
 0x154   : > { %4695 = vst [vmem:[#allocation6_spill] sm:$0xff] %v4105_v56  ;;  %4696 = vst [vmem:[#allocation7_spill] sm:$0xff] %v4108_v14  ;;  %v3049_v8 = vpop.f32.mrb[55].mxu0  ;;  %v3153_v1 = vpop.f32.mrb[55].mxu1 }
 0x155   : > { %v3503_v8 = vld [vmem:[%s3687_s12 + $0x80] sm:$0xff]  }
 0x156   : > { %3263 = vmatmul.mubr.msk.bf16.gmra.mrb[160].mxu0 %vm503_vm3, %v3501_v32  ;;  %3367 = vmatmul.mubr.msk.bf16.gmra.mrb[160].mxu1 %vm503_vm3, %v3502_v36  ;;  %v3504_v36 = vld [vmem:[%s3694_s15 + $0x80] sm:$0xff]  }
 0x157   : > { %3266 = vmatprep.mubr.msk.bf16.mxu0 %vm3531_vm2, %v4697_v44  ;;  %3370 = vmatprep.mubr.msk.bf16.mxu1 %vm3531_vm2, %v4697_v44 }
 0x159   : > { %v4118_v26 = vpop.f32.mrb[56].mxu0  ;;  %v4120_v20 = vpop.f32.mrb[56].mxu1 }
 0x15a   : > { %4698 = vst [vmem:[#allocation8_spill] sm:$0xff] %v4118_v26  ;;  %4699 = vst [vmem:[#allocation9_spill] sm:$0xff] %v4120_v20  ;;  %v3052_v13 = vpop.f32.mrb[57].mxu0  ;;  %v3156_v2 = vpop.f32.mrb[57].mxu1 }
 0x15b   : > { %v4125_v32 = vpop.f32.mrb[58].mxu0  ;;  %v4128_v14 = vpop.f32.mrb[58].mxu1 }
 0x15c   : > { %4700 = vst [vmem:[#allocation10_spill] sm:$0xff] %v4125_v32  ;;  %4701 = vst [vmem:[#allocation11_spill] sm:$0xff] %v4128_v14  ;;  %v3053_v56 = vpop.f32.mrb[59].mxu0  ;;  %v3157_v38 = vpop.f32.mrb[59].mxu1 }
 0x15d   : > { %v3505_v56 = vld [vmem:[%s3687_s12 + $0x88] sm:$0xff]  }
 0x15e   : > { %3267 = vmatmul.mubr.msk.bf16.gmra.mrb[164].mxu0 %vm503_vm3, %v3503_v8  ;;  %3371 = vmatmul.mubr.msk.bf16.gmra.mrb[164].mxu1 %vm503_vm3, %v3504_v36  ;;  %v3506_v36 = vld [vmem:[%s3694_s15 + $0x88] sm:$0xff]  }
 0x15f   : > { %3270 = vmatprep.mubr.msk.bf16.mxu0 %vm3531_vm2, %v4697_v44  ;;  %3374 = vmatprep.mubr.msk.bf16.mxu1 %vm3531_vm2, %v4697_v44 }
 0x161   : > { %v4138_v2 = vpop.f32.mrb[60].mxu0  ;;  %v4140_v13 = vpop.f32.mrb[60].mxu1 }
 0x162   : > { %4702 = vst [vmem:[#allocation12_spill] sm:$0xff] %v4138_v2  ;;  %4703 = vst [vmem:[#allocation13_spill] sm:$0xff] %v4140_v13  ;;  %v3056_v1 = vpop.f32.mrb[61].mxu0  ;;  %v3160_v50 = vpop.f32.mrb[61].mxu1 }
 0x163   : > { %v4145_v8 = vpop.f32.mrb[62].mxu0  ;;  %v4148_v14 = vpop.f32.mrb[62].mxu1 }
 0x164   : > { %4704 = vst [vmem:[#allocation14_spill] sm:$0xff] %v4145_v8  ;;  %4705 = vst [vmem:[#allocation15_spill] sm:$0xff] %v4148_v14  ;;  %v3057_v32 = vpop.f32.mrb[63].mxu0  ;;  %v3161_v26 = vpop.f32.mrb[63].mxu1 }
 0x165   : > { %v3507_v32 = vld [vmem:[%s3687_s12 + $0x90] sm:$0xff]  }
 0x166   : > { %3271 = vmatmul.mubr.msk.bf16.gmra.mrb[168].mxu0 %vm503_vm3, %v3505_v56  ;;  %3375 = vmatmul.mubr.msk.bf16.gmra.mrb[168].mxu1 %vm503_vm3, %v3506_v36  ;;  %v3508_v36 = vld [vmem:[%s3694_s15 + $0x90] sm:$0xff]  }
 0x167   : > { %3274 = vmatprep.mubr.msk.bf16.mxu0 %vm3531_vm2, %v4697_v44  ;;  %3378 = vmatprep.mubr.msk.bf16.mxu1 %vm3531_vm2, %v4697_v44 }
 0x169   : > { %v4158_v50 = vpop.f32.mrb[64].mxu0  ;;  %v4160_v1 = vpop.f32.mrb[64].mxu1 }
 0x16a   : > { %4706 = vst [vmem:[#allocation16_spill] sm:$0xff] %v4158_v50  ;;  %4707 = vst [vmem:[#allocation17_spill] sm:$0xff] %v4160_v1  ;;  %v3060_v38 = vpop.f32.mrb[65].mxu0  ;;  %v3164_v20 = vpop.f32.mrb[65].mxu1 }
 0x16b   : > { %v4165_v56 = vpop.f32.mrb[66].mxu0  ;;  %v4168_v14 = vpop.f32.mrb[66].mxu1 }
 0x16c   : > { %4708 = vst [vmem:[#allocation18_spill] sm:$0xff] %v4165_v56  ;;  %4709 = vst [vmem:[#allocation19_spill] sm:$0xff] %v4168_v14  ;;  %v3061_v8 = vpop.f32.mrb[67].mxu0  ;;  %v3165_v2 = vpop.f32.mrb[67].mxu1 }
 0x16d   : > { %v3509_v8 = vld [vmem:[%s3687_s12 + $0x98] sm:$0xff]  }
 0x16e   : > { %3275 = vmatmul.mubr.msk.bf16.gmra.mrb[172].mxu0 %vm503_vm3, %v3507_v32  ;;  %3379 = vmatmul.mubr.msk.bf16.gmra.mrb[172].mxu1 %vm503_vm3, %v3508_v36  ;;  %v3510_v36 = vld [vmem:[%s3694_s15 + $0x98] sm:$0xff]  }
 0x16f   : > { %3278 = vmatprep.mubr.msk.bf16.mxu0 %vm3531_vm2, %v4697_v44  ;;  %3382 = vmatprep.mubr.msk.bf16.mxu1 %vm3531_vm2, %v4697_v44 }
 0x171   : > { %v4178_v20 = vpop.f32.mrb[68].mxu0  ;;  %v4180_v38 = vpop.f32.mrb[68].mxu1 }
 0x172   : > { %4710 = vst [vmem:[#allocation20_spill] sm:$0xff] %v4178_v20  ;;  %4711 = vst [vmem:[#allocation21_spill] sm:$0xff] %v4180_v38  ;;  %v3064_v26 = vpop.f32.mrb[69].mxu0  ;;  %v3168_v13 = vpop.f32.mrb[69].mxu1 }
 0x173   : > { %v4185_v32 = vpop.f32.mrb[70].mxu0  ;;  %v4188_v14 = vpop.f32.mrb[70].mxu1 }
 0x174   : > { %4712 = vst [vmem:[#allocation22_spill] sm:$0xff] %v4185_v32  ;;  %4713 = vst [vmem:[#allocation23_spill] sm:$0xff] %v4188_v14  ;;  %v3065_v56 = vpop.f32.mrb[71].mxu0  ;;  %v3169_v50 = vpop.f32.mrb[71].mxu1 }
 0x175   : > { %v3511_v56 = vld [vmem:[%s3687_s12 + $0xa0] sm:$0xff]  }
 0x176   : > { %3279 = vmatmul.mubr.msk.bf16.gmra.mrb[176].mxu0 %vm503_vm3, %v3509_v8  ;;  %3383 = vmatmul.mubr.msk.bf16.gmra.mrb[176].mxu1 %vm503_vm3, %v3510_v36  ;;  %v3512_v36 = vld [vmem:[%s3694_s15 + $0xa0] sm:$0xff]  }
 0x177   : > { %3282 = vmatprep.mubr.msk.bf16.mxu0 %vm3531_vm2, %v4697_v44  ;;  %3386 = vmatprep.mubr.msk.bf16.mxu1 %vm3531_vm2, %v4697_v44 }
 0x179   : > { %v4198_v13 = vpop.f32.mrb[72].mxu0  ;;  %v4200_v26 = vpop.f32.mrb[72].mxu1 }
 0x17a   : > { %4714 = vst [vmem:[#allocation24_spill] sm:$0xff] %v4198_v13  ;;  %4715 = vst [vmem:[#allocation25_spill] sm:$0xff] %v4200_v26  ;;  %v3068_v2 = vpop.f32.mrb[73].mxu0  ;;  %v3172_v1 = vpop.f32.mrb[73].mxu1 }
 0x17b   : > { %v4205_v8 = vpop.f32.mrb[74].mxu0  ;;  %v4208_v14 = vpop.f32.mrb[74].mxu1 }
 0x17c   : > { %4716 = vst [vmem:[#allocation26_spill] sm:$0xff] %v4205_v8  ;;  %4717 = vst [vmem:[#allocation27_spill] sm:$0xff] %v4208_v14  ;;  %v3069_v32 = vpop.f32.mrb[75].mxu0  ;;  %v3173_v20 = vpop.f32.mrb[75].mxu1 }
 0x17d   : > { %v3513_v32 = vld [vmem:[%s3687_s12 + $0xa8] sm:$0xff]  }
 0x17e   : > { %3283 = vmatmul.mubr.msk.bf16.gmra.mrb[180].mxu0 %vm503_vm3, %v3511_v56  ;;  %3387 = vmatmul.mubr.msk.bf16.gmra.mrb[180].mxu1 %vm503_vm3, %v3512_v36  ;;  %v3514_v36 = vld [vmem:[%s3694_s15 + $0xa8] sm:$0xff]  }
 0x17f   : > { %3286 = vmatprep.mubr.msk.bf16.mxu0 %vm3531_vm2, %v4697_v44  ;;  %3390 = vmatprep.mubr.msk.bf16.mxu1 %vm3531_vm2, %v4697_v44 }
 0x181   : > { %v4218_v1 = vpop.f32.mrb[76].mxu0  ;;  %v4220_v2 = vpop.f32.mrb[76].mxu1 }
 0x182   : > { %4718 = vst [vmem:[#allocation28_spill] sm:$0xff] %v4218_v1  ;;  %4719 = vst [vmem:[#allocation29_spill] sm:$0xff] %v4220_v2  ;;  %v3072_v50 = vpop.f32.mrb[77].mxu0  ;;  %v3176_v38 = vpop.f32.mrb[77].mxu1 }
 0x183   : > { %v4225_v56 = vpop.f32.mrb[78].mxu0  ;;  %v4228_v14 = vpop.f32.mrb[78].mxu1 }
 0x184   : > { %4720 = vst [vmem:[#allocation30_spill] sm:$0xff] %v4225_v56  ;;  %4721 = vst [vmem:[#allocation31_spill] sm:$0xff] %v4228_v14  ;;  %v3073_v8 = vpop.f32.mrb[79].mxu0  ;;  %v3177_v13 = vpop.f32.mrb[79].mxu1 }
 0x185   : > { %v3515_v8 = vld [vmem:[%s3687_s12 + $0xb0] sm:$0xff]  }
 0x186   : > { %3287 = vmatmul.mubr.msk.bf16.gmra.mrb[184].mxu0 %vm503_vm3, %v3513_v32  ;;  %3391 = vmatmul.mubr.msk.bf16.gmra.mrb[184].mxu1 %vm503_vm3, %v3514_v36  ;;  %v3516_v36 = vld [vmem:[%s3694_s15 + $0xb0] sm:$0xff]  }
 0x187   : > { %3290 = vmatprep.mubr.msk.bf16.mxu0 %vm3531_vm2, %v4697_v44  ;;  %3394 = vmatprep.mubr.msk.bf16.mxu1 %vm3531_vm2, %v4697_v44 }
 0x189   : > { %v4238_v38 = vpop.f32.mrb[80].mxu0  ;;  %v4240_v50 = vpop.f32.mrb[80].mxu1 }
 0x18a   : > { %4722 = vst [vmem:[#allocation32_spill] sm:$0xff] %v4238_v38  ;;  %4723 = vst [vmem:[#allocation33_spill] sm:$0xff] %v4240_v50  ;;  %v3076_v20 = vpop.f32.mrb[81].mxu0  ;;  %v3180_v26 = vpop.f32.mrb[81].mxu1 }
 0x18b   : > { %v4245_v32 = vpop.f32.mrb[82].mxu0  ;;  %v4248_v14 = vpop.f32.mrb[82].mxu1 }
 0x18c   : > { %4724 = vst [vmem:[#allocation34_spill] sm:$0xff] %v4245_v32  ;;  %4725 = vst [vmem:[#allocation35_spill] sm:$0xff] %v4248_v14  ;;  %v3077_v56 = vpop.f32.mrb[83].mxu0  ;;  %v3181_v1 = vpop.f32.mrb[83].mxu1 }
 0x18d   : > { %v3517_v56 = vld [vmem:[%s3687_s12 + $0xb8] sm:$0xff]  }
 0x18e   : > { %3291 = vmatmul.mubr.msk.bf16.gmra.mrb[188].mxu0 %vm503_vm3, %v3515_v8  ;;  %3395 = vmatmul.mubr.msk.bf16.gmra.mrb[188].mxu1 %vm503_vm3, %v3516_v36  ;;  %v3518_v36 = vld [vmem:[%s3694_s15 + $0xb8] sm:$0xff]  }
 0x18f   : > { %3294 = vmatprep.mubr.msk.bf16.mxu0 %vm3531_vm2, %v4697_v44  ;;  %3398 = vmatprep.mubr.msk.bf16.mxu1 %vm3531_vm2, %v4697_v44 }
 0x191   : > { %v4258_v26 = vpop.f32.mrb[84].mxu0  ;;  %v4260_v20 = vpop.f32.mrb[84].mxu1 }
 0x192   : > { %4726 = vst [vmem:[#allocation36_spill] sm:$0xff] %v4258_v26  ;;  %4727 = vst [vmem:[#allocation37_spill] sm:$0xff] %v4260_v20  ;;  %v3080_v13 = vpop.f32.mrb[85].mxu0  ;;  %v3184_v2 = vpop.f32.mrb[85].mxu1 }
 0x193   : > { %v4265_v8 = vpop.f32.mrb[86].mxu0  ;;  %v4268_v14 = vpop.f32.mrb[86].mxu1 }
 0x194   : > { %4728 = vst [vmem:[#allocation38_spill] sm:$0xff] %v4265_v8  ;;  %4729 = vst [vmem:[#allocation39_spill] sm:$0xff] %v4268_v14  ;;  %v3081_v32 = vpop.f32.mrb[87].mxu0  ;;  %v3185_v38 = vpop.f32.mrb[87].mxu1 }
 0x195   : > { %v3519_v32 = vld [vmem:[%s3687_s12 + $0xc0] sm:$0xff]  }
 0x196   : > { %3295 = vmatmul.mubr.msk.bf16.gmra.mrb[192].mxu0 %vm503_vm3, %v3517_v56  ;;  %3399 = vmatmul.mubr.msk.bf16.gmra.mrb[192].mxu1 %vm503_vm3, %v3518_v36  ;;  %v3520_v56 = vld [vmem:[%s3694_s15 + $0xc0] sm:$0xff]  }
 0x197   : > { %3298 = vmatprep.mubr.msk.bf16.mxu0 %vm3531_vm2, %v4697_v44  ;;  %3402 = vmatprep.mubr.msk.bf16.mxu1 %vm3531_vm2, %v4697_v44 }
 0x199   : > { %v4278_v2 = vpop.f32.mrb[88].mxu0  ;;  %v4280_v13 = vpop.f32.mrb[88].mxu1 }
 0x19a   : > { %4730 = vst [vmem:[#allocation40_spill] sm:$0xff] %v4278_v2  ;;  %4731 = vst [vmem:[#allocation41_spill] sm:$0xff] %v4280_v13  ;;  %v3084_v1 = vpop.f32.mrb[89].mxu0  ;;  %v3188_v38 = vpop.f32.mrb[89].mxu1 }
 0x19b   : > { %v4285_v14 = vpop.f32.mrb[90].mxu0  ;;  %v4288_v36 = vpop.f32.mrb[90].mxu1 }
 0x19c   : > { %4732 = vst [vmem:[#allocation42_spill] sm:$0xff] %v4285_v14  ;;  %4733 = vst [vmem:[#allocation43_spill] sm:$0xff] %v4288_v36  ;;  %v3085_v8 = vpop.f32.mrb[91].mxu0  ;;  %v3189_v44 = vpop.f32.mrb[91].mxu1 }
 0x19e   : > { %3299 = vmatmul.mubr.msk.bf16.gmra.mrb[196].mxu0 %vm503_vm3, %v3519_v32  ;;  %3403 = vmatmul.mubr.msk.bf16.gmra.mrb[196].mxu1 %vm503_vm3, %v3520_v56 }
 0x1a1   : > { %v4294_v1 = vpop.f32.mrb[92].mxu0  ;;  %v4296_v26 = vpop.f32.mrb[92].mxu1 }
 0x1a2   : > { %4734 = vst [vmem:[#allocation44_spill] sm:$0xff] %v4294_v1  ;;  %4735 = vst [vmem:[#allocation45_spill] sm:$0xff] %v4296_v26  ;;  %v3088_v50 = vpop.f32.mrb[93].mxu0  ;;  %v3192_v13 = vpop.f32.mrb[93].mxu1 }
 0x1a3   : > { %v4300_v2 = vpop.f32.mrb[94].mxu0  ;;  %v4302_v8 = vpop.f32.mrb[94].mxu1 }
 0x1a4   : > { %4736 = vst [vmem:[#allocation46_spill] sm:$0xff] %v4300_v2  ;;  %4737 = vst [vmem:[#allocation47_spill] sm:$0xff] %v4302_v8  ;;  %v3089_v37 = vpop.f32.mrb[95].mxu0  ;;  %v3193_v32 = vpop.f32.mrb[95].mxu1 }
 0x1a5   : > { %v4742_v32 = vmax.f32 %v3838_v61, %v3840_v62  ;;  %v4743_v37 = vmax.f32 %v3845_v4, %v3848_v6  ;;  %v4744_v6 = vmax.f32 %v3858_v10, %v3860_v11 }
 0x1a9   : > { %v4306_v56 = vpop.f32.mrb[96].mxu0  ;;  %v4308_v20 = vpop.f32.mrb[96].mxu1 }
 0x1aa   : > { %4738 = vst [vmem:[#allocation48_spill] sm:$0xff] %v4306_v56  ;;  %4739 = vst [vmem:[#allocation49_spill] sm:$0xff] %v4308_v20  ;;  %v3092_v36 = vpop.f32.mrb[97].mxu0  ;;  %v3196_v38 = vpop.f32.mrb[97].mxu1 }
 0x1ab   : > { %v4312_v13 = vpop.f32.mrb[98].mxu0  ;;  %v4314_v26 = vpop.f32.mrb[98].mxu1  ;;  %v4325_v38 = vld [vmem:[%s4637_s5] ss:$0 sm:$0xff] }
 0x1ac   : > { %4740 = vst [vmem:[#allocation50_spill] sm:$0xff] %v4312_v13  ;;  %4741 = vst [vmem:[#allocation51_spill] sm:$0xff] %v4314_v26  ;;  %v3093_v1 = vpop.f32.mrb[99].mxu0  ;;  %v3197_v44 = vpop.f32.mrb[99].mxu1 }
 0x1b1   : > { %v1636_v8 = vpop.f32.mrb[100].mxu0  ;;  %v2169_v14 = vpop.f32.mrb[100].mxu1 }
 0x1b2   : > { %v1835_v2 = vmax.f32 %v4742_v32, %v1636_v8  ;;  %v3204_v36 = vpop.f32.mrb[101].mxu0  ;;  %v3308_v50 = vpop.f32.mrb[101].mxu1  ;;  %v4745_v32 = vmax.f32 %v3865_v16, %v3868_v18 }
 0x1b3   : > { %v1639_v20 = vpop.f32.mrb[102].mxu0  ;;  %v2172_v26 = vpop.f32.mrb[102].mxu1 }
 0x1b4   : > { %v2368_v1 = vmax.f32 %v1835_v2, %v2169_v14  ;;  %v1836_v44 = vmax.f32 %v4743_v37, %v1639_v20  ;;  %v3205_v13 = vpop.f32.mrb[103].mxu0  ;;  %v3309_v56 = vpop.f32.mrb[103].mxu1 }
 0x1b6   : > { %v2425_v61 = vadd.f32 %v4325_v38, %v2368_v1  ;;  %v2369_v62 = vmax.f32 %v1836_v44, %v2172_v26 }
 0x1b8   : > { %v2475_v8 = vmax.f32 %v2425_v61, 0.0  ;;  %v2426_v14 = vadd.f32 %v4325_v38, %v2369_v62 }
 0x1b9   : > { %v1644_v2 = vpop.f32.mrb[104].mxu0  ;;  %v2177_v26 = vpop.f32.mrb[104].mxu1 }
 0x1ba   : > { %2526 = vst.msk [vmem:[%s4334_s22] sm:$0xff] %vm2525_vm4, %v2475_v8  ;;  %v2476_v4 = vmax.f32 %v2426_v14, 0.0  ;;  %v1837_v20 = vmax.f32 %v4744_v6, %v1644_v2  ;;  %v3208_v56 = vpop.f32.mrb[105].mxu0  ;;  %v3312_v50 = vpop.f32.mrb[105].mxu1 }
 0x1bb   : > { %v1647_v13 = vpop.f32.mrb[106].mxu0  ;;  %v2180_v1 = vpop.f32.mrb[106].mxu1  ;;  %v4747_v50 = vmax.f32 %v3885_v28, %v3888_v30 }
 0x1bc   : > { %2527 = vst.msk [vmem:[%s4334_s22 + $0x8] sm:$0xff] %vm2525_vm4, %v2476_v4  ;;  %v2370_v37 = vmax.f32 %v1837_v20, %v2177_v26  ;;  %v1838_v36 = vmax.f32 %v4745_v32, %v1647_v13  ;;  %v3209_v44 = vpop.f32.mrb[107].mxu0  ;;  %v3313_v61 = vpop.f32.mrb[107].mxu1  ;;  %v4746_v4 = vmax.f32 %v3878_v22, %v3880_v23 }
 0x1be   : > { %v2427_v62 = vadd.f32 %v4325_v38, %v2370_v37  ;;  %v2371_v10 = vmax.f32 %v1838_v36, %v2180_v1 }
 0x1c0   : > { %v2477_v11 = vmax.f32 %v2427_v62, 0.0  ;;  %v2428_v8 = vadd.f32 %v4325_v38, %v2371_v10  ;;  %v4748_v10 = vmax.f32 %v3898_v34, %v3900_v35 }
 0x1c1   : > { %v1652_v14 = vpop.f32.mrb[108].mxu0  ;;  %v2185_v16 = vpop.f32.mrb[108].mxu1 }
 0x1c2   : > { %2528 = vst.msk [vmem:[%s4334_s22 + $0x10] sm:$0xff] %vm2525_vm4, %v2477_v11  ;;  %v2478_v2 = vmax.f32 %v2428_v8, 0.0  ;;  %v1839_v6 = vmax.f32 %v4746_v4, %v1652_v14  ;;  %v3212_v18 = vpop.f32.mrb[109].mxu0  ;;  %v3316_v20 = vpop.f32.mrb[109].mxu1  ;;  %v4749_v4 = vmax.f32 %v3905_v40, %v3908_v42 }
 0x1c3   : > { %v1655_v26 = vpop.f32.mrb[110].mxu0  ;;  %v2188_v37 = vpop.f32.mrb[110].mxu1 }
 0x1c4   : > { %2529 = vst.msk [vmem:[%s4334_s22 + $0x18] sm:$0xff] %vm2525_vm4, %v2478_v2  ;;  %v2372_v56 = vmax.f32 %v1839_v6, %v2185_v16  ;;  %v1840_v13 = vmax.f32 %v4747_v50, %v1655_v26  ;;  %v3213_v32 = vpop.f32.mrb[111].mxu0  ;;  %v3317_v36 = vpop.f32.mrb[111].mxu1 }
 0x1c6   : > { %v2429_v1 = vadd.f32 %v4325_v38, %v2372_v56  ;;  %v2373_v22 = vmax.f32 %v1840_v13, %v2188_v37  ;;  %v4750_v37 = vmax.f32 %v3918_v46, %v3920_v47 }
 0x1c8   : > { %v2479_v23 = vmax.f32 %v2429_v1, 0.0  ;;  %v2430_v44 = vadd.f32 %v4325_v38, %v2373_v22 }
 0x1c9   : > { %v1660_v61 = vpop.f32.mrb[112].mxu0  ;;  %v2193_v28 = vpop.f32.mrb[112].mxu1 }
 0x1ca   : > { %2530 = vst.msk [vmem:[%s4334_s22 + $0x20] sm:$0xff] %vm2525_vm4, %v2479_v23  ;;  %v2480_v62 = vmax.f32 %v2430_v44, 0.0  ;;  %v1841_v11 = vmax.f32 %v4748_v10, %v1660_v61  ;;  %v3216_v30 = vpop.f32.mrb[113].mxu0  ;;  %v3320_v8 = vpop.f32.mrb[113].mxu1  ;;  %v4751_v23 = vmax.f32 %v3925_v52, %v3928_v54 }
 0x1cb   : > { %v1663_v14 = vpop.f32.mrb[114].mxu0  ;;  %v2196_v16 = vpop.f32.mrb[114].mxu1 }
 0x1cc   : > { %2531 = vst.msk [vmem:[%s4334_s22 + $0x28] sm:$0xff] %vm2525_vm4, %v2480_v62  ;;  %v2374_v2 = vmax.f32 %v1841_v11, %v2193_v28  ;;  %v1842_v6 = vmax.f32 %v4749_v4, %v1663_v14  ;;  %v3217_v18 = vpop.f32.mrb[115].mxu0  ;;  %v3321_v20 = vpop.f32.mrb[115].mxu1  ;;  %v4752_v14 = vmax.f32 %v3938_v58, %v3940_v59 }
 0x1cd   : > { %v4753_v18 = vmax.f32 %v3945_v5, %v3948_v9 }
 0x1ce   : > { %v2431_v26 = vadd.f32 %v4325_v38, %v2374_v2  ;;  %v2375_v34 = vmax.f32 %v1842_v6, %v2196_v16 }
 0x1d0   : > { %v2481_v35 = vmax.f32 %v2431_v26, 0.0  ;;  %v2432_v56 = vadd.f32 %v4325_v38, %v2375_v34 }
 0x1d1   : > { %v1668_v50 = vpop.f32.mrb[116].mxu0  ;;  %v2201_v40 = vpop.f32.mrb[116].mxu1 }
 0x1d2   : > { %2532 = vst.msk [vmem:[%s4334_s22 + $0x30] sm:$0xff] %vm2525_vm4, %v2481_v35  ;;  %v2482_v13 = vmax.f32 %v2432_v56, 0.0  ;;  %v1843_v32 = vmax.f32 %v4750_v37, %v1668_v50  ;;  %v3220_v42 = vpop.f32.mrb[117].mxu0  ;;  %v3324_v36 = vpop.f32.mrb[117].mxu1 }
 0x1d3   : > { %v1671_v1 = vpop.f32.mrb[118].mxu0  ;;  %v2204_v61 = vpop.f32.mrb[118].mxu1 }
 0x1d4   : > { %2533 = vst.msk [vmem:[%s4334_s22 + $0x38] sm:$0xff] %vm2525_vm4, %v2482_v13  ;;  %v2376_v22 = vmax.f32 %v1843_v32, %v2201_v40  ;;  %v1844_v44 = vmax.f32 %v4751_v23, %v1671_v1  ;;  %v3221_v62 = vpop.f32.mrb[119].mxu0  ;;  %v3325_v10 = vpop.f32.mrb[119].mxu1  ;;  %v4754_v32 = vmax.f32 %v3958_v17, %v3960_v19 }
 0x1d6   : > { %v2433_v11 = vadd.f32 %v4325_v38, %v2376_v22  ;;  %v2377_v46 = vmax.f32 %v1844_v44, %v2204_v61  ;;  %v4755_v22 = vmax.f32 %v3965_v29, %v3968_v33 }
 0x1d8   : > { %v2483_v47 = vmax.f32 %v2433_v11, 0.0  ;;  %v2434_v28 = vadd.f32 %v4325_v38, %v2377_v46 }
 0x1d9   : > { %v1676_v30 = vpop.f32.mrb[120].mxu0  ;;  %v2209_v52 = vpop.f32.mrb[120].mxu1 }
 0x1da   : > { %2534 = vst.msk [vmem:[%s4334_s22 + $0x40] sm:$0xff] %vm2525_vm4, %v2483_v47  ;;  %v2484_v8 = vmax.f32 %v2434_v28, 0.0  ;;  %v1845_v2 = vmax.f32 %v4752_v14, %v1676_v30  ;;  %v3224_v54 = vpop.f32.mrb[121].mxu0  ;;  %v3328_v4 = vpop.f32.mrb[121].mxu1  ;;  %v4756_v28 = vmax.f32 %v3978_v41, %v3980_v43 }
 0x1db   : > { %v1679_v6 = vpop.f32.mrb[122].mxu0  ;;  %v2212_v26 = vpop.f32.mrb[122].mxu1 }
 0x1dc   : > { %2535 = vst.msk [vmem:[%s4334_s22 + $0x48] sm:$0xff] %vm2525_vm4, %v2484_v8  ;;  %v2378_v16 = vmax.f32 %v1845_v2, %v2209_v52  ;;  %v1846_v20 = vmax.f32 %v4753_v18, %v1679_v6  ;;  %v3225_v34 = vpop.f32.mrb[123].mxu0  ;;  %v3329_v35 = vpop.f32.mrb[123].mxu1  ;;  %v4757_v52 = vmax.f32 %v3985_v53, %v3988_v57 }
 0x1dd   : > { %v4758_v35 = vmax.f32 %v3998_v7, %v4000_v12 }
 0x1de   : > { %v2435_v56 = vadd.f32 %v4325_v38, %v2378_v16  ;;  %v2379_v58 = vmax.f32 %v1846_v20, %v2212_v26 }
 0x1e0   : > { %v2485_v59 = vmax.f32 %v2435_v56, 0.0  ;;  %v2436_v50 = vadd.f32 %v4325_v38, %v2379_v58 }
 0x1e1   : > { %v1684_v13 = vpop.f32.mrb[124].mxu0  ;;  %v2217_v5 = vpop.f32.mrb[124].mxu1 }
 0x1e2   : > { %2536 = vst.msk [vmem:[%s4334_s22 + $0x50] sm:$0xff] %vm2525_vm4, %v2485_v59  ;;  %v2486_v37 = vmax.f32 %v2436_v50, 0.0  ;;  %v1847_v40 = vmax.f32 %v4754_v32, %v1684_v13  ;;  %v3228_v9 = vpop.f32.mrb[125].mxu0  ;;  %v3332_v42 = vpop.f32.mrb[125].mxu1  ;;  %v4759_v13 = vmax.f32 %v4005_v31, %v4008_v39 }
 0x1e3   : > { %v1687_v36 = vpop.f32.mrb[126].mxu0  ;;  %v2220_v44 = vpop.f32.mrb[126].mxu1 }
 0x1e4   : > { %2537 = vst.msk [vmem:[%s4334_s22 + $0x58] sm:$0xff] %vm2525_vm4, %v2486_v37  ;;  %v2380_v1 = vmax.f32 %v1847_v40, %v2217_v5  ;;  %v1848_v23 = vmax.f32 %v4755_v22, %v1687_v36  ;;  %v3229_v61 = vpop.f32.mrb[127].mxu0  ;;  %v3333_v62 = vpop.f32.mrb[127].mxu1  ;;  %v4760_v22 = vmax.f32 %v4018_v55, %v4020_v60 }
 0x1e6   : > { %v2437_v10 = vadd.f32 %v4325_v38, %v2380_v1  ;;  %v2381_v17 = vmax.f32 %v1848_v23, %v2220_v44 }
 0x1e8   : > { %v2487_v19 = vmax.f32 %v2437_v10, 0.0  ;;  %v2438_v11 = vadd.f32 %v4325_v38, %v2381_v17  ;;  %v4761_v10 = vmax.f32 %v4025_v21, %v4028_v51 }
 0x1e9   : > { %v1692_v46 = vpop.f32.mrb[128].mxu0  ;;  %v2225_v29 = vpop.f32.mrb[128].mxu1 }
 0x1ea   : > { %2538 = vst.msk [vmem:[%s4334_s22 + $0x60] sm:$0xff] %vm2525_vm4, %v2487_v19  ;;  %v2488_v47 = vmax.f32 %v2438_v11, 0.0  ;;  %v1849_v30 = vmax.f32 %v4756_v28, %v1692_v46  ;;  %v3232_v33 = vpop.f32.mrb[129].mxu0  ;;  %v3336_v8 = vpop.f32.mrb[129].mxu1 }
 0x1eb   : > { %v1695_v14 = vpop.f32.mrb[130].mxu0  ;;  %v2228_v4 = vpop.f32.mrb[130].mxu1  ;;  %v4762_v33 = vmax.f32 %v4038_v3, %v4040_v45 }
 0x1ec   : > { %2539 = vst.msk [vmem:[%s4334_s22 + $0x68] sm:$0xff] %vm2525_vm4, %v2488_v47  ;;  %v2382_v2 = vmax.f32 %v1849_v30, %v2225_v29  ;;  %v1850_v54 = vmax.f32 %v4757_v52, %v1695_v14  ;;  %v3233_v6 = vpop.f32.mrb[131].mxu0  ;;  %v3337_v16 = vpop.f32.mrb[131].mxu1 }
 0x1ee   : > { %v2439_v18 = vadd.f32 %v4325_v38, %v2382_v2  ;;  %v2383_v41 = vmax.f32 %v1850_v54, %v2228_v4  ;;  %v4763_v54 = vmax.f32 %v4045_v15, %v4048_v49 }
 0x1f0   : > { %v2489_v43 = vmax.f32 %v2439_v18, 0.0  ;;  %v2440_v20 = vadd.f32 %v4325_v38, %v2383_v41 }
 0x1f1   : > { %v1700_v26 = vpop.f32.mrb[132].mxu0  ;;  %v2233_v53 = vpop.f32.mrb[132].mxu1 }
 0x1f2   : > { %2540 = vst.msk [vmem:[%s4334_s22 + $0x70] sm:$0xff] %vm2525_vm4, %v2489_v43  ;;  %v2490_v34 = vmax.f32 %v2440_v20, 0.0  ;;  %v1851_v56 = vmax.f32 %v4758_v35, %v1700_v26  ;;  %v3236_v57 = vpop.f32.mrb[133].mxu0  ;;  %v3340_v58 = vpop.f32.mrb[133].mxu1 }
 0x1f3   : > { %v1703_v59 = vpop.f32.mrb[134].mxu0  ;;  %v2236_v32 = vpop.f32.mrb[134].mxu1  ;;  %v4765_v58 = vmax.f32 %v4065_v48, %v4068_v0 }
 0x1f4   : > { %2541 = vst.msk [vmem:[%s4334_s22 + $0x78] sm:$0xff] %vm2525_vm4, %v2490_v34  ;;  %v2384_v50 = vmax.f32 %v1851_v56, %v2233_v53  ;;  %v1852_v37 = vmax.f32 %v4759_v13, %v1703_v59  ;;  %v3237_v40 = vpop.f32.mrb[135].mxu0  ;;  %v3341_v5 = vpop.f32.mrb[135].mxu1  ;;  %v4764_v34 = vmax.f32 %v4058_v24, %v4060_v27 }
 0x1f6   : > { %v2441_v9 = vadd.f32 %v4325_v38, %v2384_v50  ;;  %v2385_v7 = vmax.f32 %v1852_v37, %v2236_v32 }
 0x1f8   : > { %v2491_v12 = vmax.f32 %v2441_v9, 0.0  ;;  %v2442_v42 = vadd.f32 %v4325_v38, %v2385_v7  ;;  %v4766_v7 = vmax.f32 %v4078_v25, %v4080_v63 }
 0x1f9   : > { %v1708_v36 = vpop.f32.mrb[136].mxu0  ;;  %v2241_v31 = vpop.f32.mrb[136].mxu1 }
 0x1fa   : > { %2542 = vst.msk [vmem:[%s4334_s22 + $0x80] sm:$0xff] %vm2525_vm4, %v2491_v12  ;;  %v2492_v1 = vmax.f32 %v2442_v42, 0.0  ;;  %v1853_v23 = vmax.f32 %v4760_v22, %v1708_v36  ;;  %v3240_v39 = vpop.f32.mrb[137].mxu0  ;;  %v3344_v44 = vpop.f32.mrb[137].mxu1  ;;  %v4767_v22 = vld [vmem:[#allocation2_spill] sm:$0xff] }
 0x1fb   : > { %v1711_v61 = vpop.f32.mrb[138].mxu0  ;;  %v2244_v19 = vpop.f32.mrb[138].mxu1 }
 0x1fc   : > { %2543 = vst.msk [vmem:[%s4334_s22 + $0x88] sm:$0xff] %vm2525_vm4, %v2492_v1  ;;  %v2386_v62 = vmax.f32 %v1853_v23, %v2241_v31  ;;  %v1854_v17 = vmax.f32 %v4761_v10, %v1711_v61  ;;  %v3241_v11 = vpop.f32.mrb[139].mxu0  ;;  %v3345_v46 = vpop.f32.mrb[139].mxu1  ;;  %v4768_v23 = vld [vmem:[#allocation3_spill] sm:$0xff] }
 0x1fd   : > { %v4769_v31 = vmax.f32 %v4767_v22, %v4768_v23  ;;  %v4770_v46 = vld [vmem:[#allocation4_spill] sm:$0xff] }
 0x1fe   : > { %v2443_v47 = vadd.f32 %v4325_v38, %v2386_v62  ;;  %v2387_v55 = vmax.f32 %v1854_v17, %v2244_v19 }
 0x200   : > { %v2493_v60 = vmax.f32 %v2443_v47, 0.0  ;;  %v2444_v28 = vadd.f32 %v4325_v38, %v2387_v55  ;;  %v4771_v47 = vld [vmem:[#allocation5_spill] sm:$0xff] }
 0x201   : > { %v1716_v30 = vpop.f32.mrb[140].mxu0  ;;  %v2249_v21 = vpop.f32.mrb[140].mxu1  ;;  %v4772_v55 = vmax.f32 %v4770_v46, %v4771_v47 }
 0x202   : > { %2544 = vst.msk [vmem:[%s4334_s22 + $0x90] sm:$0xff] %vm2525_vm4, %v2493_v60  ;;  %v2494_v29 = vmax.f32 %v2444_v28, 0.0  ;;  %v1855_v8 = vmax.f32 %v4762_v33, %v1716_v30  ;;  %v3244_v51 = vpop.f32.mrb[141].mxu0  ;;  %v3348_v14 = vpop.f32.mrb[141].mxu1 }
 0x203   : > { %v1719_v2 = vpop.f32.mrb[142].mxu0  ;;  %v2252_v6 = vpop.f32.mrb[142].mxu1  ;;  %v4774_v51 = vld [vmem:[#allocation7_spill] sm:$0xff] }
 0x204   : > { %2545 = vst.msk [vmem:[%s4334_s22 + $0x98] sm:$0xff] %vm2525_vm4, %v2494_v29  ;;  %v2388_v52 = vmax.f32 %v1855_v8, %v2249_v21  ;;  %v1856_v4 = vmax.f32 %v4763_v54, %v1719_v2  ;;  %v3245_v16 = vpop.f32.mrb[143].mxu0  ;;  %v3349_v18 = vpop.f32.mrb[143].mxu1  ;;  %v4773_v21 = vld [vmem:[#allocation6_spill] sm:$0xff] }
 0x205   : > { %v4775_v14 = vmax.f32 %v4773_v21, %v4774_v51 }
 0x206   : > { %v2445_v41 = vadd.f32 %v4325_v38, %v2388_v52  ;;  %v2389_v3 = vmax.f32 %v1856_v4, %v2252_v6 }
 0x208   : > { %v2495_v45 = vmax.f32 %v2445_v41, 0.0  ;;  %v2446_v43 = vadd.f32 %v4325_v38, %v2389_v3 }
 0x209   : > { %v1724_v20 = vpop.f32.mrb[144].mxu0  ;;  %v2257_v49 = vpop.f32.mrb[144].mxu1 }
 0x20a   : > { %2546 = vst.msk [vmem:[%s4334_s22 + $0xa0] sm:$0xff] %vm2525_vm4, %v2495_v45  ;;  %v2496_v26 = vmax.f32 %v2446_v43, 0.0  ;;  %v1857_v35 = vmax.f32 %v4764_v34, %v1724_v20  ;;  %v3248_v15 = vpop.f32.mrb[145].mxu0  ;;  %v3352_v56 = vpop.f32.mrb[145].mxu1  ;;  %v4776_v43 = vld [vmem:[#allocation8_spill] sm:$0xff]  ;;  %v4777_v20 = vld [vmem:[#allocation9_spill] sm:$0xff] }
 0x20b   : > { %v1727_v53 = vpop.f32.mrb[146].mxu0  ;;  %v2260_v50 = vpop.f32.mrb[146].mxu1 }
 0x20c   : > { %2547 = vst.msk [vmem:[%s4334_s22 + $0xa8] sm:$0xff] %vm2525_vm4, %v2496_v26  ;;  %v2390_v57 = vmax.f32 %v1857_v35, %v2257_v49  ;;  %v1858_v59 = vmax.f32 %v4765_v58, %v1727_v53  ;;  %v3249_v13 = vpop.f32.mrb[147].mxu0  ;;  %v3353_v37 = vpop.f32.mrb[147].mxu1  ;;  %v4778_v26 = vmax.f32 %v4776_v43, %v4777_v20  ;;  %v4780_v58 = vld [vmem:[#allocation11_spill] sm:$0xff] }
 0x20e   : > { %v2447_v32 = vadd.f32 %v4325_v38, %v2390_v57  ;;  %v2391_v24 = vmax.f32 %v1858_v59, %v2260_v50  ;;  %v4779_v57 = vld [vmem:[#allocation10_spill] sm:$0xff] }
 0x20f   : > { %v4781_v59 = vmax.f32 %v4779_v57, %v4780_v58 }
 0x210   : > { %v2497_v27 = vmax.f32 %v2447_v32, 0.0  ;;  %v2448_v40 = vadd.f32 %v4325_v38, %v2391_v24 }
 0x211   : > { %v1732_v5 = vpop.f32.mrb[148].mxu0  ;;  %v2265_v0 = vpop.f32.mrb[148].mxu1 }
 0x212   : > { %2548 = vst.msk [vmem:[%s4334_s22 + $0xb0] sm:$0xff] %vm2525_vm4, %v2497_v27  ;;  %v2498_v9 = vmax.f32 %v2448_v40, 0.0  ;;  %v1859_v12 = vmax.f32 %v4766_v7, %v1732_v5  ;;  %v3252_v48 = vpop.f32.mrb[149].mxu0  ;;  %v3356_v42 = vpop.f32.mrb[149].mxu1 }
 0x213   : > { %v1735_v36 = vpop.f32.mrb[150].mxu0  ;;  %v2268_v44 = vpop.f32.mrb[150].mxu1 }
 0x214   : > { %2549 = vst.msk [vmem:[%s4334_s22 + $0xb8] sm:$0xff] %vm2525_vm4, %v2498_v9  ;;  %v2392_v1 = vmax.f32 %v1859_v12, %v2265_v0  ;;  %v1860_v39 = vmax.f32 %v4769_v31, %v1735_v36  ;;  %v3253_v61 = vpop.f32.mrb[151].mxu0  ;;  %v3357_v62 = vpop.f32.mrb[151].mxu1  ;;  %v4782_v12 = vld [vmem:[#allocation12_spill] sm:$0xff]  ;;  %v4783_v0 = vld [vmem:[#allocation13_spill] sm:$0xff] }
 0x215   : > { %v4784_v48 = vmax.f32 %v4782_v12, %v4783_v0 }
 0x216   : > { %v2449_v10 = vadd.f32 %v4325_v38, %v2392_v1  ;;  %v2393_v25 = vmax.f32 %v1860_v39, %v2268_v44  ;;  %v4785_v39 = vld [vmem:[#allocation14_spill] sm:$0xff]  ;;  %v4786_v44 = vld [vmem:[#allocation15_spill] sm:$0xff] }
 0x217   : > { %v4787_v61 = vmax.f32 %v4785_v39, %v4786_v44 }
 0x218   : > { %v2499_v63 = vmax.f32 %v2449_v10, 0.0  ;;  %v2450_v17 = vadd.f32 %v4325_v38, %v2393_v25 }
 0x219   : > { %v1740_v19 = vpop.f32.mrb[152].mxu0  ;;  %v2273_v28 = vpop.f32.mrb[152].mxu1 }
 0x21a   : > { %2550 = vst.msk [vmem:[%s4334_s22 + $0xc0] sm:$0xff] %vm2525_vm4, %v2499_v63  ;;  %v2500_v11 = vmax.f32 %v2450_v17, 0.0  ;;  %v1861_v60 = vmax.f32 %v4772_v55, %v1740_v19  ;;  %v3256_v30 = vpop.f32.mrb[153].mxu0  ;;  %v3360_v29 = vpop.f32.mrb[153].mxu1 }
 0x21b   : > { %v1743_v33 = vpop.f32.mrb[154].mxu0  ;;  %v2276_v52 = vpop.f32.mrb[154].mxu1 }
 0x21c   : > { %2551 = vst.msk [vmem:[%s4334_s22 + $0xc8] sm:$0xff] %vm2525_vm4, %v2500_v11  ;;  %v2394_v8 = vmax.f32 %v1861_v60, %v2273_v28  ;;  %v1862_v2 = vmax.f32 %v4775_v14, %v1743_v33  ;;  %v3257_v54 = vpop.f32.mrb[155].mxu0  ;;  %v3361_v4 = vpop.f32.mrb[155].mxu1  ;;  %v4788_v60 = vld [vmem:[#allocation16_spill] sm:$0xff]  ;;  %v4789_v28 = vld [vmem:[#allocation17_spill] sm:$0xff] }
 0x21d   : > { %v4790_v30 = vmax.f32 %v4788_v60, %v4789_v28 }
 0x21e   : > { %v2451_v6 = vadd.f32 %v4325_v38, %v2394_v8  ;;  %v2395_v16 = vmax.f32 %v1862_v2, %v2276_v52  ;;  %v4791_v2 = vld [vmem:[#allocation18_spill] sm:$0xff]  ;;  %v4792_v52 = vld [vmem:[#allocation19_spill] sm:$0xff] }
 0x21f   : > { %v4793_v54 = vmax.f32 %v4791_v2, %v4792_v52 }
 0x220   : > { %v2501_v18 = vmax.f32 %v2451_v6, 0.0  ;;  %v2452_v41 = vadd.f32 %v4325_v38, %v2395_v16 }
 0x221   : > { %v1748_v3 = vpop.f32.mrb[156].mxu0  ;;  %v2281_v35 = vpop.f32.mrb[156].mxu1 }
 0x222   : > { %2552 = vst.msk [vmem:[%s4334_s22 + $0xd0] sm:$0xff] %vm2525_vm4, %v2501_v18  ;;  %v2502_v45 = vmax.f32 %v2452_v41, 0.0  ;;  %v1863_v34 = vmax.f32 %v4778_v26, %v1748_v3  ;;  %v3260_v49 = vpop.f32.mrb[157].mxu0  ;;  %v3364_v15 = vpop.f32.mrb[157].mxu1 }
 0x223   : > { %v1751_v56 = vpop.f32.mrb[158].mxu0  ;;  %v2284_v13 = vpop.f32.mrb[158].mxu1 }
 0x224   : > { %2553 = vst.msk [vmem:[%s4334_s22 + $0xd8] sm:$0xff] %vm2525_vm4, %v2502_v45  ;;  %v2396_v53 = vmax.f32 %v1863_v34, %v2281_v35  ;;  %v1864_v50 = vmax.f32 %v4781_v59, %v1751_v56  ;;  %v3261_v37 = vpop.f32.mrb[159].mxu0  ;;  %v3365_v32 = vpop.f32.mrb[159].mxu1  ;;  %v4794_v34 = vld [vmem:[#allocation20_spill] sm:$0xff]  ;;  %v4795_v35 = vld [vmem:[#allocation21_spill] sm:$0xff] }
 0x225   : > { %v4796_v49 = vmax.f32 %v4794_v34, %v4795_v35 }
 0x226   : > { %v2453_v24 = vadd.f32 %v4325_v38, %v2396_v53  ;;  %v2397_v27 = vmax.f32 %v1864_v50, %v2284_v13  ;;  %v4797_v50 = vld [vmem:[#allocation22_spill] sm:$0xff]  ;;  %v4798_v13 = vld [vmem:[#allocation23_spill] sm:$0xff] }
 0x227   : > { %v4799_v37 = vmax.f32 %v4797_v50, %v4798_v13 }
 0x228   : > { %v2503_v40 = vmax.f32 %v2453_v24, 0.0  ;;  %v2454_v5 = vadd.f32 %v4325_v38, %v2397_v27 }
 0x229   : > { %v1756_v9 = vpop.f32.mrb[160].mxu0  ;;  %v2289_v36 = vpop.f32.mrb[160].mxu1 }
 0x22a   : > { %2554 = vst.msk [vmem:[%s4334_s22 + $0xe0] sm:$0xff] %vm2525_vm4, %v2503_v40  ;;  %v2504_v7 = vmax.f32 %v2454_v5, 0.0  ;;  %v1865_v42 = vmax.f32 %v4784_v48, %v1756_v9  ;;  %v3264_v1 = vpop.f32.mrb[161].mxu0  ;;  %v3368_v22 = vpop.f32.mrb[161].mxu1 }
 0x22b   : > { %v1759_v23 = vpop.f32.mrb[162].mxu0  ;;  %v2292_v10 = vpop.f32.mrb[162].mxu1 }
 0x22c   : > { %2555 = vst.msk [vmem:[%s4334_s22 + $0xe8] sm:$0xff] %vm2525_vm4, %v2504_v7  ;;  %v2398_v31 = vmax.f32 %v1865_v42, %v2289_v36  ;;  %v1866_v62 = vmax.f32 %v4787_v61, %v1759_v23  ;;  %v3265_v25 = vpop.f32.mrb[163].mxu0  ;;  %v3369_v63 = vpop.f32.mrb[163].mxu1  ;;  %v4800_v42 = vld [vmem:[#allocation24_spill] sm:$0xff]  ;;  %v4801_v36 = vld [vmem:[#allocation25_spill] sm:$0xff] }
 0x22d   : > { %v4802_v1 = vmax.f32 %v4800_v42, %v4801_v36 }
 0x22e   : > { %v2455_v17 = vadd.f32 %v4325_v38, %v2398_v31  ;;  %v2399_v19 = vmax.f32 %v1866_v62, %v2292_v10  ;;  %v4803_v62 = vld [vmem:[#allocation26_spill] sm:$0xff]  ;;  %v4804_v10 = vld [vmem:[#allocation27_spill] sm:$0xff] }
 0x22f   : > { %v4805_v25 = vmax.f32 %v4803_v62, %v4804_v10 }
 0x230   : > { %v2505_v11 = vmax.f32 %v2455_v17, 0.0  ;;  %v2456_v46 = vadd.f32 %v4325_v38, %v2399_v19 }
 0x231   : > { %v1764_v47 = vpop.f32.mrb[164].mxu0  ;;  %v2297_v33 = vpop.f32.mrb[164].mxu1 }
 0x232   : > { %2556 = vst.msk [vmem:[%s4334_s22 + $0xf0] sm:$0xff] %vm2525_vm4, %v2505_v11  ;;  %v2506_v55 = vmax.f32 %v2456_v46, 0.0  ;;  %v1867_v29 = vmax.f32 %v4790_v30, %v1764_v47  ;;  %v3268_v8 = vpop.f32.mrb[165].mxu0  ;;  %v3372_v21 = vpop.f32.mrb[165].mxu1 }
 0x233   : > { %v1767_v51 = vpop.f32.mrb[166].mxu0  ;;  %v2300_v6 = vpop.f32.mrb[166].mxu1 }
 0x234   : > { %2557 = vst.msk [vmem:[%s4334_s22 + $0xf8] sm:$0xff] %vm2525_vm4, %v2506_v55  ;;  %v2400_v14 = vmax.f32 %v1867_v29, %v2297_v33  ;;  %v1868_v4 = vmax.f32 %v4793_v54, %v1767_v51  ;;  %v3269_v16 = vpop.f32.mrb[167].mxu0  ;;  %v3373_v18 = vpop.f32.mrb[167].mxu1  ;;  %v4806_v29 = vld [vmem:[#allocation28_spill] sm:$0xff]  ;;  %v4807_v33 = vld [vmem:[#allocation29_spill] sm:$0xff] }
 0x235   : > { %v4808_v8 = vmax.f32 %v4806_v29, %v4807_v33 }
 0x236   : > { %v2457_v41 = vadd.f32 %v4325_v38, %v2400_v14  ;;  %v2401_v3 = vmax.f32 %v1868_v4, %v2300_v6  ;;  %v4809_v4 = vld [vmem:[#allocation30_spill] sm:$0xff]  ;;  %v4810_v6 = vld [vmem:[#allocation31_spill] sm:$0xff] }
 0x237   : > { %v4811_v16 = vmax.f32 %v4809_v4, %v4810_v6 }
 0x238   : > { %v2507_v45 = vmax.f32 %v2457_v41, 0.0  ;;  %v2458_v43 = vadd.f32 %v4325_v38, %v2401_v3 }
 0x239   : > { %v1772_v20 = vpop.f32.mrb[168].mxu0  ;;  %v2305_v56 = vpop.f32.mrb[168].mxu1 }
 0x23a   : > { %2558 = vst.msk [vmem:[%s4334_s22 + $0x100] sm:$0xff] %vm2525_vm4, %v2507_v45  ;;  %v2508_v26 = vmax.f32 %v2458_v43, 0.0  ;;  %v1869_v15 = vmax.f32 %v4796_v49, %v1772_v20  ;;  %v3272_v53 = vpop.f32.mrb[169].mxu0  ;;  %v3376_v57 = vpop.f32.mrb[169].mxu1 }
 0x23b   : > { %v1775_v58 = vpop.f32.mrb[170].mxu0  ;;  %v2308_v24 = vpop.f32.mrb[170].mxu1 }
 0x23c   : > { %2559 = vst.msk [vmem:[%s4334_s22 + $0x108] sm:$0xff] %vm2525_vm4, %v2508_v26  ;;  %v2402_v59 = vmax.f32 %v1869_v15, %v2305_v56  ;;  %v1870_v32 = vmax.f32 %v4799_v37, %v1775_v58  ;;  %v3273_v27 = vpop.f32.mrb[171].mxu0  ;;  %v3377_v40 = vpop.f32.mrb[171].mxu1  ;;  %v4812_v15 = vld [vmem:[#allocation32_spill] sm:$0xff]  ;;  %v4813_v56 = vld [vmem:[#allocation33_spill] sm:$0xff] }
 0x23d   : > { %v4814_v53 = vmax.f32 %v4812_v15, %v4813_v56 }
 0x23e   : > { %v2459_v5 = vadd.f32 %v4325_v38, %v2402_v59  ;;  %v2403_v9 = vmax.f32 %v1870_v32, %v2308_v24  ;;  %v4815_v32 = vld [vmem:[#allocation34_spill] sm:$0xff]  ;;  %v4816_v24 = vld [vmem:[#allocation35_spill] sm:$0xff] }
 0x23f   : > { %v4817_v27 = vmax.f32 %v4815_v32, %v4816_v24 }
 0x240   : > { %v2509_v7 = vmax.f32 %v2459_v5, 0.0  ;;  %v2460_v12 = vadd.f32 %v4325_v38, %v2403_v9 }
 0x241   : > { %v1780_v0 = vpop.f32.mrb[172].mxu0  ;;  %v2313_v23 = vpop.f32.mrb[172].mxu1 }
 0x242   : > { %2560 = vst.msk [vmem:[%s4334_s22 + $0x110] sm:$0xff] %vm2525_vm4, %v2509_v7  ;;  %v2510_v48 = vmax.f32 %v2460_v12, 0.0  ;;  %v1871_v22 = vmax.f32 %v4802_v1, %v1780_v0  ;;  %v3276_v31 = vpop.f32.mrb[173].mxu0  ;;  %v3380_v39 = vpop.f32.mrb[173].mxu1 }
 0x243   : > { %v1783_v44 = vpop.f32.mrb[174].mxu0  ;;  %v2316_v17 = vpop.f32.mrb[174].mxu1 }
 0x244   : > { %2561 = vst.msk [vmem:[%s4334_s22 + $0x118] sm:$0xff] %vm2525_vm4, %v2510_v48  ;;  %v2404_v61 = vmax.f32 %v1871_v22, %v2313_v23  ;;  %v1872_v63 = vmax.f32 %v4805_v25, %v1783_v44  ;;  %v3277_v19 = vpop.f32.mrb[175].mxu0  ;;  %v3381_v11 = vpop.f32.mrb[175].mxu1  ;;  %v4818_v22 = vld [vmem:[#allocation36_spill] sm:$0xff]  ;;  %v4819_v23 = vld [vmem:[#allocation37_spill] sm:$0xff] }
 0x245   : > { %v4820_v31 = vmax.f32 %v4818_v22, %v4819_v23 }
 0x246   : > { %v2461_v46 = vadd.f32 %v4325_v38, %v2404_v61  ;;  %v2405_v47 = vmax.f32 %v1872_v63, %v2316_v17  ;;  %v4821_v63 = vld [vmem:[#allocation38_spill] sm:$0xff]  ;;  %v4822_v17 = vld [vmem:[#allocation39_spill] sm:$0xff] }
 0x247   : > { %v4823_v19 = vmax.f32 %v4821_v63, %v4822_v17 }
 0x248   : > { %v2511_v55 = vmax.f32 %v2461_v46, 0.0  ;;  %v2462_v60 = vadd.f32 %v4325_v38, %v2405_v47 }
 0x249   : > { %v1788_v28 = vpop.f32.mrb[176].mxu0  ;;  %v2321_v51 = vpop.f32.mrb[176].mxu1 }
 0x24a   : > { %2562 = vst.msk [vmem:[%s4334_s22 + $0x120] sm:$0xff] %vm2525_vm4, %v2511_v55  ;;  %v2512_v30 = vmax.f32 %v2462_v60, 0.0  ;;  %v1873_v21 = vmax.f32 %v4808_v8, %v1788_v28  ;;  %v3280_v14 = vpop.f32.mrb[177].mxu0  ;;  %v3384_v2 = vpop.f32.mrb[177].mxu1 }
 0x24b   : > { %v1791_v52 = vpop.f32.mrb[178].mxu0  ;;  %v2324_v41 = vpop.f32.mrb[178].mxu1 }
 0x24c   : > { %2563 = vst.msk [vmem:[%s4334_s22 + $0x128] sm:$0xff] %vm2525_vm4, %v2512_v30  ;;  %v2406_v54 = vmax.f32 %v1873_v21, %v2321_v51  ;;  %v1874_v18 = vmax.f32 %v4811_v16, %v1791_v52  ;;  %v3281_v3 = vpop.f32.mrb[179].mxu0  ;;  %v3385_v45 = vpop.f32.mrb[179].mxu1  ;;  %v4824_v21 = vld [vmem:[#allocation40_spill] sm:$0xff]  ;;  %v4825_v51 = vld [vmem:[#allocation41_spill] sm:$0xff] }
 0x24d   : > { %v4826_v14 = vmax.f32 %v4824_v21, %v4825_v51 }
 0x24e   : > { %v2463_v43 = vadd.f32 %v4325_v38, %v2406_v54  ;;  %v2407_v20 = vmax.f32 %v1874_v18, %v2324_v41  ;;  %v4827_v18 = vld [vmem:[#allocation42_spill] sm:$0xff]  ;;  %v4828_v41 = vld [vmem:[#allocation43_spill] sm:$0xff] }
 0x24f   : > { %v4829_v3 = vmax.f32 %v4827_v18, %v4828_v41 }
 0x250   : > { %v2513_v26 = vmax.f32 %v2463_v43, 0.0  ;;  %v2464_v34 = vadd.f32 %v4325_v38, %v2407_v20 }
 0x251   : > { %v1796_v35 = vpop.f32.mrb[180].mxu0  ;;  %v2329_v58 = vpop.f32.mrb[180].mxu1 }
 0x252   : > { %2564 = vst.msk [vmem:[%s4334_s22 + $0x130] sm:$0xff] %vm2525_vm4, %v2513_v26  ;;  %v2514_v49 = vmax.f32 %v2464_v34, 0.0  ;;  %v1875_v57 = vmax.f32 %v4814_v53, %v1796_v35  ;;  %v3284_v59 = vpop.f32.mrb[181].mxu0  ;;  %v3388_v50 = vpop.f32.mrb[181].mxu1 }
 0x253   : > { %v1799_v13 = vpop.f32.mrb[182].mxu0  ;;  %v2332_v5 = vpop.f32.mrb[182].mxu1 }
 0x254   : > { %2565 = vst.msk [vmem:[%s4334_s22 + $0x138] sm:$0xff] %vm2525_vm4, %v2514_v49  ;;  %v2408_v37 = vmax.f32 %v1875_v57, %v2329_v58  ;;  %v1876_v40 = vmax.f32 %v4817_v27, %v1799_v13  ;;  %v3285_v9 = vpop.f32.mrb[183].mxu0  ;;  %v3389_v7 = vpop.f32.mrb[183].mxu1  ;;  %v4830_v57 = vld [vmem:[#allocation44_spill] sm:$0xff]  ;;  %v4831_v58 = vld [vmem:[#allocation45_spill] sm:$0xff] }
 0x255   : > { %v4832_v59 = vmax.f32 %v4830_v57, %v4831_v58 }
 0x256   : > { %v2465_v12 = vadd.f32 %v4325_v38, %v2408_v37  ;;  %v2409_v0 = vmax.f32 %v1876_v40, %v2332_v5  ;;  %v4833_v40 = vld [vmem:[#allocation46_spill] sm:$0xff]  ;;  %v4834_v5 = vld [vmem:[#allocation47_spill] sm:$0xff] }
 0x257   : > { %v4835_v9 = vmax.f32 %v4833_v40, %v4834_v5 }
 0x258   : > { %v2515_v48 = vmax.f32 %v2465_v12, 0.0  ;;  %v2466_v42 = vadd.f32 %v4325_v38, %v2409_v0 }
 0x259   : > { %v1804_v36 = vpop.f32.mrb[184].mxu0  ;;  %v2337_v44 = vpop.f32.mrb[184].mxu1 }
 0x25a   : > { %2566 = vst.msk [vmem:[%s4334_s22 + $0x140] sm:$0xff] %vm2525_vm4, %v2515_v48  ;;  %v2516_v1 = vmax.f32 %v2466_v42, 0.0  ;;  %v1877_v39 = vmax.f32 %v4820_v31, %v1804_v36  ;;  %v3288_v61 = vpop.f32.mrb[185].mxu0  ;;  %v3392_v62 = vpop.f32.mrb[185].mxu1 }
 0x25b   : > { %v1807_v10 = vpop.f32.mrb[186].mxu0  ;;  %v2340_v46 = vpop.f32.mrb[186].mxu1 }
 0x25c   : > { %2567 = vst.msk [vmem:[%s4334_s22 + $0x148] sm:$0xff] %vm2525_vm4, %v2516_v1  ;;  %v2410_v25 = vmax.f32 %v1877_v39, %v2337_v44  ;;  %v1878_v11 = vmax.f32 %v4823_v19, %v1807_v10  ;;  %v3289_v47 = vpop.f32.mrb[187].mxu0  ;;  %v3393_v55 = vpop.f32.mrb[187].mxu1  ;;  %v4836_v39 = vld [vmem:[#allocation48_spill] sm:$0xff]  ;;  %v4837_v44 = vld [vmem:[#allocation49_spill] sm:$0xff] }
 0x25d   : > { %v4838_v61 = vmax.f32 %v4836_v39, %v4837_v44 }
 0x25e   : > { %v2467_v60 = vadd.f32 %v4325_v38, %v2410_v25  ;;  %v2411_v28 = vmax.f32 %v1878_v11, %v2340_v46  ;;  %v4839_v11 = vld [vmem:[#allocation50_spill] sm:$0xff]  ;;  %v4840_v46 = vld [vmem:[#allocation51_spill] sm:$0xff] }
 0x25f   : > { %v4841_v47 = vmax.f32 %v4839_v11, %v4840_v46 }
 0x260   : > { %v2517_v30 = vmax.f32 %v2467_v60, 0.0  ;;  %v2468_v29 = vadd.f32 %v4325_v38, %v2411_v28 }
 0x261   : > { %v1812_v33 = vpop.f32.mrb[188].mxu0  ;;  %v2345_v52 = vpop.f32.mrb[188].mxu1 }
 0x262   : > { %2568 = vst.msk [vmem:[%s4334_s22 + $0x150] sm:$0xff] %vm2525_vm4, %v2517_v30  ;;  %v2518_v8 = vmax.f32 %v2468_v29, 0.0  ;;  %v1879_v2 = vmax.f32 %v4826_v14, %v1812_v33  ;;  %v3292_v54 = vpop.f32.mrb[189].mxu0  ;;  %v3396_v4 = vpop.f32.mrb[189].mxu1 }
 0x263   : > { %v1815_v6 = vpop.f32.mrb[190].mxu0  ;;  %v2348_v43 = vpop.f32.mrb[190].mxu1 }
 0x264   : > { %2569 = vst.msk [vmem:[%s4334_s22 + $0x158] sm:$0xff] %vm2525_vm4, %v2518_v8  ;;  %v2412_v16 = vmax.f32 %v1879_v2, %v2345_v52  ;;  %v1880_v45 = vmax.f32 %v4829_v3, %v1815_v6  ;;  %v3293_v20 = vpop.f32.mrb[191].mxu0  ;;  %v3397_v26 = vpop.f32.mrb[191].mxu1 }
 0x266   : > { %v2469_v34 = vadd.f32 %v4325_v38, %v2412_v16  ;;  %v2413_v35 = vmax.f32 %v1880_v45, %v2348_v43 }
 0x268   : > { %v2519_v49 = vmax.f32 %v2469_v34, 0.0  ;;  %v2470_v15 = vadd.f32 %v4325_v38, %v2413_v35 }
 0x269   : > { %v1820_v56 = vpop.f32.mrb[192].mxu0  ;;  %v2353_v13 = vpop.f32.mrb[192].mxu1 }
 0x26a   : > { %2570 = vst.msk [vmem:[%s4334_s22 + $0x160] sm:$0xff] %vm2525_vm4, %v2519_v49  ;;  %v2520_v53 = vmax.f32 %v2470_v15, 0.0  ;;  %v1881_v50 = vmax.f32 %v4832_v59, %v1820_v56  ;;  %v3296_v37 = vpop.f32.mrb[193].mxu0  ;;  %v3400_v32 = vpop.f32.mrb[193].mxu1 }
 0x26b   : > { %v1823_v24 = vpop.f32.mrb[194].mxu0  ;;  %v2356_v12 = vpop.f32.mrb[194].mxu1 }
 0x26c   : > { %2571 = vst.msk [vmem:[%s4334_s22 + $0x168] sm:$0xff] %vm2525_vm4, %v2520_v53  ;;  %v2414_v27 = vmax.f32 %v1881_v50, %v2353_v13  ;;  %v1882_v7 = vmax.f32 %v4835_v9, %v1823_v24  ;;  %v3297_v0 = vpop.f32.mrb[195].mxu0  ;;  %v3401_v48 = vpop.f32.mrb[195].mxu1 }
 0x26e   : > { %v2471_v42 = vadd.f32 %v4325_v38, %v2414_v27  ;;  %v2415_v36 = vmax.f32 %v1882_v7, %v2356_v12 }
 0x270   : > { %v2521_v1 = vmax.f32 %v2471_v42, 0.0  ;;  %v2472_v22 = vadd.f32 %v4325_v38, %v2415_v36 }
 0x271   : > { %v1828_v23 = vpop.f32.mrb[196].mxu0  ;;  %v2361_v10 = vpop.f32.mrb[196].mxu1 }
 0x272   : > { %2572 = vst.msk [vmem:[%s4334_s22 + $0x170] sm:$0xff] %vm2525_vm4, %v2521_v1  ;;  %v2522_v31 = vmax.f32 %v2472_v22, 0.0  ;;  %v1883_v62 = vmax.f32 %v4838_v61, %v1828_v23  ;;  %v3300_v25 = vpop.f32.mrb[197].mxu0  ;;  %v3404_v63 = vpop.f32.mrb[197].mxu1 }
 0x273   : > { %v1831_v17 = vpop.f32.mrb[198].mxu0  ;;  %v2364_v60 = vpop.f32.mrb[198].mxu1 }
 0x274   : > { %2573 = vst.msk [vmem:[%s4334_s22 + $0x178] sm:$0xff] %vm2525_vm4, %v2522_v31  ;;  %v2416_v19 = vmax.f32 %v1883_v62, %v2361_v10  ;;  %v1884_v55 = vmax.f32 %v4841_v47, %v1831_v17  ;;  %v3301_v28 = vpop.f32.mrb[199].mxu0  ;;  %v3405_v30 = vpop.f32.mrb[199].mxu1 }
 0x276   : > { %v2473_v29 = vadd.f32 %v4325_v38, %v2416_v19  ;;  %v2417_v33 = vmax.f32 %v1884_v55, %v2364_v60 }
 0x278   : > { %v2523_v8 = vmax.f32 %v2473_v29, 0.0  ;;  %v2474_v21 = vadd.f32 %v4325_v38, %v2417_v33 }
 0x27a   : > { %2574 = vst.msk [vmem:[%s4334_s22 + $0x180] sm:$0xff] %vm2525_vm4, %v2523_v8  ;;  %v2524_v51 = vmax.f32 %v2474_v21, 0.0 }
 0x27c   : > { %2575 = vst.msk [vmem:[%s4334_s22 + $0x188] sm:$0xff] %vm2525_vm4, %v2524_v51 }
 0x27d PF: > { %s16_s21 = sadd.s32 1, %s3527_s21  }
 0x27e   : > { %p13_p4 = scmp.ge.s32.totalorder %s16_s21, 4  }
 0x280   :  { %15 = sbr.rel (!%p13_p4) target bundleno = 1 (0x1), region = 83 }

// kernel: net_forward.6
= control target key start
LH: loop header
LB: loop body
LE: loop exit
PB: predicated region body
PF: predicated region fallthrough
CT: control target
= control target key end

     0   :  { %s3637_s21 = smov 0   ;;  %s4967_s0 = inlined_call_operand.vmem [shape: bf16[2,4,1600], index: 0, kind: input, shape index: {}]   ;;  %s4968_s1 = inlined_call_operand.vmem [shape: bf16[2,4,1600], index: 1, kind: input, shape index: {}]   ;;  %s4969_s2 = inlined_call_operand.vmem [shape: bf16[2,4,1600], index: 2, kind: input, shape index: {}]   ;;  %s4970_s3 = inlined_call_operand.vmem [shape: bf16[2,4,1600], index: 3, kind: input, shape index: {}]   ;;  %s4971_s4 = inlined_call_operand.vmem [shape: bf16[1600,128], index: 4, kind: input, shape index: {}]   ;;  %s4972_s5 = inlined_call_operand.vmem [shape: f32[1,128], index: 5, kind: input, shape index: {}]   ;;  %s4973_s6 = inlined_call_operand.vmem [shape: bf16[2,4,128], index: 6, kind: output, shape index: {}]  }
   0x1 LB: > { %s2659_s22 = sadd.s32 4294967295, %s3597_s21   ;;  %p2663_p0 = scmp.ge.s32.totalorder %s3597_s21, 1  ;;  %s3597_s21 = sphi %s3637_s21, %s16_s21  }
   0x2   : > { %p242_p1 = scmp.lt.s32.totalorder %s3597_s21, 3 }
   0x4   : > { %p243_p2 = pnand %p2663_p0, %p242_p1 }
   0x6   : > { %246 = sbr.rel (%p243_p2) target bundleno = 659 (0x293), region = 44 }
   0xd   : > { %v3648_v0 = vld [vmem:[%s4971_s4 + $0x40] sm:$0xff]   ;;  %v3671_v4 = vld [vmem:[%s4971_s4 + $0x48] sm:$0xff]   ;;  %v3695_v8 = vld [vmem:[%s4971_s4 + $0x50] sm:$0xff]   ;;  %p286_p3 = scmp.lt.s32.totalorder %s2659_s22, 1  ;;  %v523_v28 = vlaneseq  ;;  %v3599_v36 = vmov 1983009808  }
   0xe   : > { %v3653_v1 = vld [vmem:[%s4971_s4 + $0xc0] sm:$0xff]   ;;  %2780 = vmatprep.subr.bf16.mxu0 %v3648_v0  ;;  %v3677_v5 = vld [vmem:[%s4971_s4 + $0xc8] sm:$0xff]   ;;  %v3701_v9 = vld [vmem:[%s4971_s4 + $0xd0] sm:$0xff]   ;;  %v521_v37 = vunpack.c.l.s4 %v3599_v36  ;;  %vm3601_vm0 = vmmov 0   ;;  %vm1189_vm1 = vcmask 523264  }
   0xf   : > { %v3659_v2 = vld [vmem:[%s4971_s4] sm:$0xff]   ;;  %2802 = vmatprep.subr.bf16.mxu1 %v3653_v1  ;;  %v3683_v6 = vld [vmem:[%s4971_s4 + $0x8] sm:$0xff]   ;;  %v3707_v10 = vld [vmem:[%s4971_s4 + $0x10] sm:$0xff]   ;;  %s5261_s22 = smov (!%p286_p3, %s2659_s22), 1  ;;  %v524_v33 = vshrl.u32 %v523_v28, 7 }
  0x10   : > { %v3665_v3 = vld [vmem:[%s4971_s4 + $0x80] sm:$0xff]   ;;  %2781 = vmatpush3.bf16.msra.mxu0 %v3659_v2  ;;  %v3689_v7 = vld [vmem:[%s4971_s4 + $0x88] sm:$0xff]   ;;  %v3713_v11 = vld [vmem:[%s4971_s4 + $0x90] sm:$0xff]   ;;  %s3806_s7 = smul.u32 26, %s5261_s22  ;;  %v522_v39 = vunpack.c.0.s8 %v521_v37 }
  0x11   : > { %2803 = vmatpush3.bf16.msra.mxu1 %v3665_v3  ;;  %2782 = vmatprep.subr.bf16.mxu0 %v3671_v4  ;;  %v3719_v12 = vld [vmem:[%s4971_s4 + $0x58] sm:$0xff]   ;;  %v3743_v16 = vld [vmem:[%s4971_s4 + $0x60] sm:$0xff]   ;;  %v3769_v20 = vld [vmem:[%s4971_s4 + $0x68] sm:$0xff]  }
  0x12   : > { %2804 = vmatprep.subr.bf16.mxu1 %v3677_v5  ;;  %v3725_v13 = vld [vmem:[%s4971_s4 + $0xd8] sm:$0xff]   ;;  %v3749_v17 = vld [vmem:[%s4971_s4 + $0xe0] sm:$0xff]   ;;  %v3775_v21 = vld [vmem:[%s4971_s4 + $0xe8] sm:$0xff]   ;;  %s3836_s18 = scalar_lea.vmem %s4967_s0, %s3806_s7  ;;  %v3865_v41 = vsub.s32 %v522_v39, %v524_v33  ;;  %s4234_s8 = scalar_lea.vmem %s4968_s1, %s3806_s7 }
  0x13   : > { %v3731_v14 = vld [vmem:[%s4971_s4 + $0x18] sm:$0xff]   ;;  %v3757_v18 = vld [vmem:[%s4971_s4 + $0x20] sm:$0xff]   ;;  %v3785_v22 = vld [vmem:[%s4971_s4 + $0x28] sm:$0xff]   ;;  %s4390_s25 = scalar_lea.vmem %s4969_s2, %s3806_s7 }
  0x14   : > { %2783 = vmatpush3.bf16.msra.mxu0 %v3683_v6  ;;  %v3737_v15 = vld [vmem:[%s4971_s4 + $0x98] sm:$0xff]   ;;  %v3763_v19 = vld [vmem:[%s4971_s4 + $0xa0] sm:$0xff]   ;;  %v3791_v23 = vld [vmem:[%s4971_s4 + $0xa8] sm:$0xff]  }
  0x15   : > { %2805 = vmatpush3.bf16.msra.mxu1 %v3689_v7  ;;  %2784 = vmatprep.subr.bf16.mxu0 %v3695_v8  ;;  %v3797_v24 = vld [vmem:[%s4971_s4 + $0x70] sm:$0xff]   ;;  %v3824_v29 = vld [vmem:[%s4971_s4 + $0x78] sm:$0xff]   ;;  %v511_v34 = vld [vmem:[%s3836_s18] sm:$0xff] }
  0x16   : > { %2806 = vmatprep.subr.bf16.mxu1 %v3701_v9  ;;  %v3803_v25 = vld [vmem:[%s4971_s4 + $0xf0] sm:$0xff]   ;;  %v3830_v30 = vld [vmem:[%s4971_s4 + $0xf8] sm:$0xff]   ;;  %v3855_v35 = vld [vmem:[%s4971_s4 + $0x140] sm:$0xff]   ;;  %v519_v40 = vcombine.high %v511_v34, %v511_v34  ;;  %v526_v42 = vrot.slane %v511_v34, %v3865_v41 }
  0x17   : > { %v3812_v26 = vld [vmem:[%s4971_s4 + $0x30] sm:$0xff]   ;;  %v3842_v31 = vld [vmem:[%s4971_s4 + $0x38] sm:$0xff]   ;;  %v3862_v38 = vld [vmem:[%s4971_s4 + $0x1c0] sm:$0xff]  }
  0x18   : > { %2785 = vmatpush3.bf16.msra.mxu0 %v3707_v10  ;;  %v3818_v27 = vld [vmem:[%s4971_s4 + $0xb0] sm:$0xff]   ;;  %v3848_v32 = vld [vmem:[%s4971_s4 + $0xb8] sm:$0xff]   ;;  %v533_v43 = vrot.slane %v519_v40, %v3865_v41  ;;  %v3872_v44 = vld [vmem:[%s4971_s4 + $0x100] sm:$0xff]   ;;  %v534_v46 = vcombine.high %v526_v42, %v526_v42 }
  0x19   : > { %2807 = vmatpush3.bf16.msra.mxu1 %v3713_v11  ;;  %2786 = vmatprep.subr.bf16.mxu0 %v3719_v12  ;;  %v3877_v45 = vld [vmem:[%s4971_s4 + $0x180] sm:$0xff]   ;;  %v3882_v48 = vld [vmem:[%s4971_s4 + $0x148] sm:$0xff]   ;;  %v3904_v52 = vld [vmem:[%s4971_s4 + $0x150] sm:$0xff]  }
  0x1a   : > { %2808 = vmatprep.subr.bf16.mxu1 %v3725_v13  ;;  %v535_v47 = vcombine.high %v533_v43, %v533_v43  ;;  %v3887_v49 = vld [vmem:[%s4971_s4 + $0x1c8] sm:$0xff]   ;;  %1225 = vmatprep.mubr.bf16.mxu0 %v534_v46  ;;  %v3911_v53 = vld [vmem:[%s4971_s4 + $0x1d0] sm:$0xff]   ;;  %v3928_v56 = vld [vmem:[%s4971_s4 + $0x158] sm:$0xff]  }
  0x1b   : > { %v3892_v50 = vld [vmem:[%s4971_s4 + $0x108] sm:$0xff]   ;;  %v3916_v54 = vld [vmem:[%s4971_s4 + $0x110] sm:$0xff]   ;;  %v3935_v57 = vld [vmem:[%s4971_s4 + $0x1d8] sm:$0xff]  }
  0x1c   : > { %2787 = vmatpush3.bf16.msra.mxu0 %v3731_v14  ;;  %1265 = vmatprep.mubr.bf16.mxu1 %v535_v47  ;;  %v3897_v51 = vld [vmem:[%s4971_s4 + $0x188] sm:$0xff]   ;;  %v3921_v55 = vld [vmem:[%s4971_s4 + $0x190] sm:$0xff]   ;;  %5098 = vst [vmem:[#allocation3_spill] sm:$0xff] %v3935_v57  ;;  %v3940_v58 = vld [vmem:[%s4971_s4 + $0x118] sm:$0xff]  }
  0x1d   : > { %2809 = vmatpush3.bf16.msra.mxu1 %v3737_v15  ;;  %2788 = vmatprep.subr.bf16.mxu0 %v3743_v16  ;;  %5097 = vst [vmem:[#allocation2_spill] sm:$0xff] %v3921_v55  ;;  %v3945_v59 = vld [vmem:[%s4971_s4 + $0x198] sm:$0xff]   ;;  %v3952_v60 = vld [vmem:[%s4971_s4 + $0x160] sm:$0xff]   ;;  %v3976_v28 = vld [vmem:[%s4971_s4 + $0x168] sm:$0xff]  }
  0x1e   : > { %2810 = vmatprep.subr.bf16.mxu1 %v3749_v17  ;;  %5099 = vst [vmem:[#allocation4_spill] sm:$0xff] %v3945_v59  ;;  %v3959_v61 = vld [vmem:[%s4971_s4 + $0x1e0] sm:$0xff]   ;;  %v3983_v33 = vld [vmem:[%s4971_s4 + $0x1e8] sm:$0xff]   ;;  %v4000_v37 = vld [vmem:[%s4971_s4 + $0x170] sm:$0xff]  }
  0x1f   : > { %5100 = vst [vmem:[#allocation5_spill] sm:$0xff] %v3959_v61  ;;  %v3964_v62 = vld [vmem:[%s4971_s4 + $0x120] sm:$0xff]   ;;  %5102 = vst [vmem:[#allocation7_spill] sm:$0xff] %v3983_v33  ;;  %v3988_v34 = vld [vmem:[%s4971_s4 + $0x128] sm:$0xff]  }
  0x20   : > { %2789 = vmatpush3.bf16.msra.mxu0 %v3757_v18  ;;  %v3969_v63 = vld [vmem:[%s4971_s4 + $0x1a0] sm:$0xff]   ;;  %v3993_v36 = vld [vmem:[%s4971_s4 + $0x1a8] sm:$0xff]   ;;  %v4007_v39 = vld [vmem:[%s4971_s4 + $0x1f0] sm:$0xff]  }
  0x21   : > { %2811 = vmatpush3.bf16.msra.mxu1 %v3763_v19  ;;  %2790 = vmatprep.subr.bf16.mxu0 %v3769_v20  ;;  %5101 = vst [vmem:[#allocation6_spill] sm:$0xff] %v3969_v63  ;;  %5103 = vst [vmem:[#allocation8_spill] sm:$0xff] %v3993_v36  ;;  %v4012_v40 = vld [vmem:[%s4971_s4 + $0x130] sm:$0xff]   ;;  %v4025_v46 = vld [vmem:[%s4971_s4 + $0x178] sm:$0xff]  }
  0x22   : > { %2812 = vmatprep.subr.bf16.mxu1 %v3775_v21  ;;  %5104 = vst [vmem:[#allocation9_spill] sm:$0xff] %v4007_v39  ;;  %5106 = vst [vmem:[#allocation11_spill] sm:$0xff] %v4025_v46 }
  0x24   : > { %2791 = vmatpush3.bf16.msra.mxu0 %v3785_v22 }
  0x25   : > { %2813 = vmatpush3.bf16.msra.mxu1 %v3791_v23  ;;  %2792 = vmatprep.subr.bf16.mxu0 %v3797_v24 }
  0x26   : > { %2814 = vmatprep.subr.bf16.mxu1 %v3803_v25 }
  0x28   : > { %2793 = vmatpush3.bf16.msra.mxu0 %v3812_v26 }
  0x29   : > { %2815 = vmatpush3.bf16.msra.mxu1 %v3818_v27  ;;  %2794 = vmatprep.subr.bf16.mxu0 %v3824_v29 }
  0x2a   : > { %2816 = vmatprep.subr.bf16.mxu1 %v3830_v30 }
  0x2c   : > { %2795 = vmatpush3.bf16.msra.mxu0 %v3842_v31 }
  0x2d   : > { %2817 = vmatpush3.bf16.msra.mxu1 %v3848_v32  ;;  %2824 = vmatprep.subr.bf16.mxu0 %v3855_v35 }
  0x2e   : > { %2846 = vmatprep.subr.bf16.mxu1 %v3862_v38 }
  0x2f   : > { %1226 = vmatmul.mubr.bf16.vlgmr.msra.gmra.mrb[0].mxu0 %v526_v42  ;;  %v4017_v42 = vld [vmem:[%s4971_s4 + $0x1b0] sm:$0xff]  }
  0x30   : > { %1266 = vmatmul.mubr.bf16.vlgmr.msra.gmra.mrb[0].mxu1 %v533_v43  ;;  %2825 = vmatpush3.bf16.msra.mxu0 %v3872_v44  ;;  %5105 = vst [vmem:[#allocation10_spill] sm:$0xff] %v4017_v42  ;;  %v512_v43 = vld [vmem:[%s3836_s18 + $0x8] sm:$0xff] }
  0x31   : > { %2847 = vmatpush3.bf16.msra.mxu1 %v3877_v45  ;;  %2826 = vmatprep.subr.bf16.mxu0 %v3882_v48  ;;  %v543_v47 = vrot.slane %v512_v43, %v3865_v41 }
  0x32   : > { %2848 = vmatprep.subr.bf16.mxu1 %v3887_v49 }
  0x34   : > { %2827 = vmatpush3.bf16.msra.mxu0 %v3892_v50 }
  0x35   : > { %2849 = vmatpush3.bf16.msra.mxu1 %v3897_v51  ;;  %2828 = vmatprep.subr.bf16.mxu0 %v3904_v52 }
  0x36   : > { %2850 = vmatprep.subr.bf16.mxu1 %v3911_v53 }
  0x38   : > { %2829 = vmatpush3.bf16.msra.mxu0 %v3916_v54 }
  0x39   : > { %2851 = vmatpush3.bf16.msra.mxu1 %v3921_v55  ;;  %2830 = vmatprep.subr.bf16.mxu0 %v3928_v56  ;;  %v4068_v55 = vld [vmem:[%s4971_s4 + $0x280] sm:$0xff]  }
  0x3a   : > { %2852 = vmatprep.subr.bf16.mxu1 %v3935_v57  ;;  %v4051_v57 = vld [vmem:[%s4971_s4 + $0x240] sm:$0xff]   ;;  %5113 = vst [vmem:[#allocation18_spill] sm:$0xff] %v4068_v55 }
  0x3b   : > { %5110 = vst [vmem:[#allocation15_spill] sm:$0xff] %v4051_v57 }
  0x3c   : > { %2831 = vmatpush3.bf16.msra.mxu0 %v3940_v58 }
  0x3d   : > { %2853 = vmatpush3.bf16.msra.mxu1 %v3945_v59  ;;  %2832 = vmatprep.subr.bf16.mxu0 %v3952_v60 }
  0x3e   : > { %2854 = vmatprep.subr.bf16.mxu1 %v3959_v61  ;;  %v551_v61 = vcombine.high %v543_v47, %v543_v47 }
  0x40   : > { %2833 = vmatpush3.bf16.msra.mxu0 %v3964_v62  ;;  %1305 = vmatprep.mubr.bf16.mxu0 %v551_v61  ;;  %v4082_v61 = vld [vmem:[%s4971_s4 + $0x2c8] sm:$0xff]  }
  0x41   : > { %2855 = vmatpush3.bf16.msra.mxu1 %v3969_v63  ;;  %2834 = vmatprep.subr.bf16.mxu0 %v3976_v28  ;;  %v4033_v63 = vld [vmem:[%s4971_s4 + $0x1f8] sm:$0xff]   ;;  %5115 = vst [vmem:[#allocation20_spill] sm:$0xff] %v4082_v61 }
  0x42   : > { %2856 = vmatprep.subr.bf16.mxu1 %v3983_v33  ;;  %v536_v33 = vcombine.high %v512_v43, %v512_v43  ;;  %5107 = vst [vmem:[#allocation12_spill] sm:$0xff] %v4033_v63  ;;  %v4044_v43 = vld [vmem:[%s4971_s4 + $0x1b8] sm:$0xff]  }
  0x43   : > { %5109 = vst [vmem:[#allocation14_spill] sm:$0xff] %v4044_v43 }
  0x44   : > { %2835 = vmatpush3.bf16.msra.mxu0 %v3988_v34  ;;  %v550_v59 = vrot.slane %v536_v33, %v3865_v41  ;;  %v4058_v33 = vld [vmem:[%s4971_s4 + $0x2c0] sm:$0xff]  }
  0x45   : > { %2857 = vmatpush3.bf16.msra.mxu1 %v3993_v36  ;;  %2836 = vmatprep.subr.bf16.mxu0 %v4000_v37  ;;  %v4038_v36 = vld [vmem:[%s4971_s4 + $0x138] sm:$0xff]   ;;  %5111 = vst [vmem:[#allocation16_spill] sm:$0xff] %v4058_v33 }
  0x46   : > { %2858 = vmatprep.subr.bf16.mxu1 %v4007_v39  ;;  %5108 = vst [vmem:[#allocation13_spill] sm:$0xff] %v4038_v36  ;;  %v552_v39 = vcombine.high %v550_v59, %v550_v59 }
  0x48   : > { %2837 = vmatpush3.bf16.msra.mxu0 %v4012_v40  ;;  %1345 = vmatprep.mubr.bf16.mxu1 %v552_v39  ;;  %v4087_v39 = vld [vmem:[%s4971_s4 + $0x208] sm:$0xff]  }
  0x49   : > { %2859 = vmatpush3.bf16.msra.mxu1 %v4017_v42  ;;  %2838 = vmatprep.subr.bf16.mxu0 %v4025_v46  ;;  %v4063_v42 = vld [vmem:[%s4971_s4 + $0x200] sm:$0xff]   ;;  %5116 = vst [vmem:[#allocation21_spill] sm:$0xff] %v4087_v39 }
  0x4a   : > { %2860 = vmatprep.subr.bf16.mxu1 %v4033_v63  ;;  %5112 = vst [vmem:[#allocation17_spill] sm:$0xff] %v4063_v42  ;;  %v4075_v63 = vld [vmem:[%s4971_s4 + $0x248] sm:$0xff]   ;;  %v1473_v46 = vld [vmem:[%s4234_s8] sm:$0xff] }
  0x4b   : > { %5114 = vst [vmem:[#allocation19_spill] sm:$0xff] %v4075_v63 }
  0x4c   : > { %2839 = vmatpush3.bf16.msra.mxu0 %v4038_v36  ;;  %v4228_v36 = vld [vmem:[%s4971_s4 + $0x2f8] sm:$0xff]  }
  0x4d   : > { %2861 = vmatpush3.bf16.msra.mxu1 %v4044_v43  ;;  %2868 = vmatprep.subr.bf16.mxu0 %v4051_v57  ;;  %v4092_v43 = vld [vmem:[%s4971_s4 + $0x288] sm:$0xff]  }
  0x4e   : > { %2890 = vmatprep.subr.bf16.mxu1 %v4058_v33  ;;  %5117 = vst [vmem:[#allocation22_spill] sm:$0xff] %v4092_v43  ;;  %v4099_v33 = vld [vmem:[%s4971_s4 + $0x250] sm:$0xff]  }
  0x4f   : > { %1306 = vmatmul.mubr.bf16.vlgmr.msra.gmra.mrb[4].mxu0 %v543_v47  ;;  %5118 = vst [vmem:[#allocation23_spill] sm:$0xff] %v4099_v33  ;;  %v4111_v47 = vld [vmem:[%s4971_s4 + $0x210] sm:$0xff]  }
  0x50   : > { %1346 = vmatmul.mubr.bf16.vlgmr.msra.gmra.mrb[4].mxu1 %v550_v59  ;;  %2869 = vmatpush3.bf16.msra.mxu0 %v4063_v42  ;;  %v4106_v59 = vld [vmem:[%s4971_s4 + $0x2d0] sm:$0xff]   ;;  %5120 = vst [vmem:[#allocation25_spill] sm:$0xff] %v4111_v47 }
  0x51   : > { %2891 = vmatpush3.bf16.msra.mxu1 %v4068_v55  ;;  %2870 = vmatprep.subr.bf16.mxu0 %v4075_v63  ;;  %5119 = vst [vmem:[#allocation24_spill] sm:$0xff] %v4106_v59  ;;  %v4116_v55 = vld [vmem:[%s4971_s4 + $0x290] sm:$0xff]   ;;  %v4130_v63 = vld [vmem:[%s4971_s4 + $0x2d8] sm:$0xff]  }
  0x52   : > { %2892 = vmatprep.subr.bf16.mxu1 %v4082_v61  ;;  %5121 = vst [vmem:[#allocation26_spill] sm:$0xff] %v4116_v55  ;;  %v4123_v61 = vld [vmem:[%s4971_s4 + $0x258] sm:$0xff]   ;;  %5123 = vst [vmem:[#allocation28_spill] sm:$0xff] %v4130_v63  ;;  %v513_v42 = vld [vmem:[%s3836_s18 + $0x10] sm:$0xff] }
  0x53   : > { %5122 = vst [vmem:[#allocation27_spill] sm:$0xff] %v4123_v61  ;;  %v553_v57 = vcombine.high %v513_v42, %v513_v42 }
  0x54   : > { %2871 = vmatpush3.bf16.msra.mxu0 %v4087_v39  ;;  %v4135_v39 = vld [vmem:[%s4971_s4 + $0x218] sm:$0xff]  }
  0x55   : > { %2893 = vmatpush3.bf16.msra.mxu1 %v4092_v43  ;;  %2872 = vmatprep.subr.bf16.mxu0 %v4099_v33  ;;  %5124 = vst [vmem:[#allocation29_spill] sm:$0xff] %v4135_v39  ;;  %v4140_v43 = vld [vmem:[%s4971_s4 + $0x298] sm:$0xff]   ;;  %v4154_v33 = vld [vmem:[%s4971_s4 + $0x2e0] sm:$0xff]  }
  0x56   : > { %2894 = vmatprep.subr.bf16.mxu1 %v4106_v59  ;;  %5125 = vst [vmem:[#allocation30_spill] sm:$0xff] %v4140_v43  ;;  %v4147_v59 = vld [vmem:[%s4971_s4 + $0x260] sm:$0xff]   ;;  %5127 = vst [vmem:[#allocation32_spill] sm:$0xff] %v4154_v33 }
  0x57   : > { %5126 = vst [vmem:[#allocation31_spill] sm:$0xff] %v4147_v59 }
  0x58   : > { %2873 = vmatpush3.bf16.msra.mxu0 %v4111_v47  ;;  %v4159_v47 = vld [vmem:[%s4971_s4 + $0x220] sm:$0xff]  }
  0x59   : > { %2895 = vmatpush3.bf16.msra.mxu1 %v4116_v55  ;;  %2874 = vmatprep.subr.bf16.mxu0 %v4123_v61  ;;  %5128 = vst [vmem:[#allocation33_spill] sm:$0xff] %v4159_v47  ;;  %v4164_v55 = vld [vmem:[%s4971_s4 + $0x2a0] sm:$0xff]   ;;  %v4178_v61 = vld [vmem:[%s4971_s4 + $0x2e8] sm:$0xff]  }
  0x5a   : > { %2896 = vmatprep.subr.bf16.mxu1 %v4130_v63  ;;  %5129 = vst [vmem:[#allocation34_spill] sm:$0xff] %v4164_v55  ;;  %v4171_v63 = vld [vmem:[%s4971_s4 + $0x268] sm:$0xff]   ;;  %5131 = vst [vmem:[#allocation36_spill] sm:$0xff] %v4178_v61 }
  0x5b   : > { %5130 = vst [vmem:[#allocation35_spill] sm:$0xff] %v4171_v63 }
  0x5c   : > { %2875 = vmatpush3.bf16.msra.mxu0 %v4135_v39  ;;  %v4183_v39 = vld [vmem:[%s4971_s4 + $0x228] sm:$0xff]  }
  0x5d   : > { %2897 = vmatpush3.bf16.msra.mxu1 %v4140_v43  ;;  %2876 = vmatprep.subr.bf16.mxu0 %v4147_v59  ;;  %5132 = vst [vmem:[#allocation37_spill] sm:$0xff] %v4183_v39  ;;  %v4188_v43 = vld [vmem:[%s4971_s4 + $0x2a8] sm:$0xff]   ;;  %v4202_v59 = vld [vmem:[%s4971_s4 + $0x2f0] sm:$0xff]  }
  0x5e   : > { %2898 = vmatprep.subr.bf16.mxu1 %v4154_v33  ;;  %5133 = vst [vmem:[#allocation38_spill] sm:$0xff] %v4188_v43  ;;  %v4195_v33 = vld [vmem:[%s4971_s4 + $0x270] sm:$0xff]   ;;  %5135 = vst [vmem:[#allocation40_spill] sm:$0xff] %v4202_v59 }
  0x5f   : > { %5134 = vst [vmem:[#allocation39_spill] sm:$0xff] %v4195_v33 }
  0x60   : > { %2877 = vmatpush3.bf16.msra.mxu0 %v4159_v47  ;;  %v4207_v47 = vld [vmem:[%s4971_s4 + $0x230] sm:$0xff]  }
  0x61   : > { %2899 = vmatpush3.bf16.msra.mxu1 %v4164_v55  ;;  %2878 = vmatprep.subr.bf16.mxu0 %v4171_v63  ;;  %5136 = vst [vmem:[#allocation41_spill] sm:$0xff] %v4207_v47  ;;  %v4212_v55 = vld [vmem:[%s4971_s4 + $0x2b0] sm:$0xff]   ;;  %v560_v63 = vrot.slane %v513_v42, %v3865_v41  ;;  %v4242_v42 = vld [vmem:[%s4971_s4 + $0x238] sm:$0xff]  }
  0x62   : > { %2900 = vmatprep.subr.bf16.mxu1 %v4178_v61  ;;  %5137 = vst [vmem:[#allocation42_spill] sm:$0xff] %v4212_v55  ;;  %v4220_v61 = vld [vmem:[%s4971_s4 + $0x278] sm:$0xff]   ;;  %5139 = vst [vmem:[#allocation44_spill] sm:$0xff] %v4242_v42 }
  0x63   : > { %5138 = vst [vmem:[#allocation43_spill] sm:$0xff] %v4220_v61 }
  0x64   : > { %2879 = vmatpush3.bf16.msra.mxu0 %v4183_v39  ;;  %v567_v39 = vrot.slane %v553_v57, %v3865_v41  ;;  %v1488_v57 = vrot.slane %v1473_v46, %v3865_v41 }
  0x65   : > { %2901 = vmatpush3.bf16.msra.mxu1 %v4188_v43  ;;  %2880 = vmatprep.subr.bf16.mxu0 %v4195_v33  ;;  %v568_v43 = vcombine.high %v560_v63, %v560_v63 }
  0x66   : > { %2902 = vmatprep.subr.bf16.mxu1 %v4202_v59  ;;  %v4247_v59 = vld [vmem:[%s4971_s4 + $0x2b8] sm:$0xff]   ;;  %v569_v33 = vcombine.high %v567_v39, %v567_v39 }
  0x67   : > { %1385 = vmatprep.mubr.bf16.mxu0 %v568_v43  ;;  %v4267_v43 = vld [vmem:[%s4971_s4 + $0x308] sm:$0xff]  }
  0x68   : > { %2881 = vmatpush3.bf16.msra.mxu0 %v4207_v47  ;;  %1425 = vmatprep.mubr.bf16.mxu1 %v569_v33  ;;  %v5058_v47 = vmov 0.0   ;;  %5141 = vst [vmem:[#allocation46_spill] sm:$0xff] %v4267_v43 }
  0x69   : > { %2903 = vmatpush3.bf16.msra.mxu1 %v4212_v55  ;;  %2882 = vmatprep.subr.bf16.mxu0 %v4220_v61  ;;  %v4258_v55 = vld [vmem:[%s4971_s4 + $0x300] sm:$0xff]   ;;  %v1496_v61 = vcombine.high %v1488_v57, %v1488_v57 }
  0x6a   : > { %2904 = vmatprep.subr.bf16.mxu1 %v4228_v36  ;;  %5140 = vst [vmem:[#allocation45_spill] sm:$0xff] %v4258_v55 }
  0x6c   : > { %2883 = vmatpush3.bf16.msra.mxu0 %v4242_v42 }
  0x6d   : > { %2905 = vmatpush3.bf16.msra.mxu1 %v4247_v59  ;;  %3328 = vmatprep.subr.bf16.mxu0 %v5058_v47 }
  0x6e   : > { %2917 = vmatprep.subr.bf16.mxu1 %v3648_v0  ;;  %v4278_v0 = vld [vmem:[%s4971_s4 + $0x310] sm:$0xff]  }
  0x6f   : > { %1386 = vmatmul.mubr.bf16.vlgmr.msra.gmra.mrb[8].mxu0 %v560_v63  ;;  %5142 = vst [vmem:[#allocation47_spill] sm:$0xff] %v4278_v0  ;;  %v5157_v63 = vld [vmem:[#allocation9_spill] sm:$0xff] }
  0x70   : > { %1426 = vmatmul.mubr.bf16.vlgmr.msra.gmra.mrb[8].mxu1 %v567_v39  ;;  %3329 = vmatpush3.bf16.msra.mxu0 %v4258_v55  ;;  %v5160_v39 = vld [vmem:[#allocation25_spill] sm:$0xff] }
  0x71   : > { %2918 = vmatpush3.bf16.msra.mxu1 %v3659_v2  ;;  %3330 = vmatprep.subr.bf16.mxu0 %v5058_v47  ;;  %v1481_v2 = vcombine.high %v1473_v46, %v1473_v46  ;;  %v5158_v46 = vld [vmem:[#allocation23_spill] sm:$0xff] }
  0x72   : > { %2919 = vmatprep.subr.bf16.mxu1 %v3671_v4  ;;  %3336 = vmatprep.mubr.msk.bf16.mxu0 %vm3601_vm0, %v5058_v47  ;;  %v4287_v4 = vld [vmem:[%s4971_s4 + $0x318] sm:$0xff]  }
  0x73   : > { %1586 = vmatprep.mubr.bf16.mxu1 %v1496_v61  ;;  %5143 = vst [vmem:[#allocation48_spill] sm:$0xff] %v4287_v4  ;;  %v5159_v61 = vld [vmem:[#allocation10_spill] sm:$0xff] }
  0x74   : > { %3331 = vmatpush3.bf16.msra.mxu0 %v4267_v43 }
  0x75   : > { %2920 = vmatpush3.bf16.msra.mxu1 %v3683_v6  ;;  %3332 = vmatprep.subr.bf16.mxu0 %v5058_v47  ;;  %v1495_v6 = vrot.slane %v1481_v2, %v3865_v41  ;;  %v5162_v2 = vld [vmem:[#allocation27_spill] sm:$0xff] }
  0x76   : > { %2921 = vmatprep.subr.bf16.mxu1 %v3695_v8  ;;  %v2669_v8 = vld.sshfl [vmem:[%s3836_s18 + $0x18] sm:$0x3 pattern:$0x76325410]  ;;  %s4659_s18 = scalar_lea.vmem %s4970_s3, %s3806_s7 }
  0x78   : > { %3333 = vmatpush3.bf16.msra.mxu0 %v4278_v0 }
  0x79   : > { %2922 = vmatpush3.bf16.msra.mxu1 %v3707_v10  ;;  %3334 = vmatprep.subr.bf16.mxu0 %v5058_v47  ;;  %v1497_v10 = vcombine.high %v1495_v6, %v1495_v6  ;;  %v5172_v47 = vld [vmem:[#allocation22_spill] sm:$0xff] }
  0x7a   : > { %2923 = vmatprep.subr.bf16.mxu1 %v3719_v12  ;;  %v1475_v12 = vld [vmem:[%s4234_s8 + $0x10] sm:$0xff] }
  0x7b   : > { %v1515_v33 = vcombine.high %v1475_v12, %v1475_v12 }
  0x7c   : > { %3335 = vmatpush3.bf16.msra.mxu0 %v4287_v4 }
  0x7d   : > { %2924 = vmatpush3.bf16.msra.mxu1 %v3731_v14  ;;  %2939 = vmatprep.subr.bf16.mxu0 %v3653_v1  ;;  %v1474_v1 = vld [vmem:[%s4234_s8 + $0x8] sm:$0xff] }
  0x7e   : > { %2925 = vmatprep.subr.bf16.mxu1 %v3743_v16  ;;  %v5145_v14 = vld [vmem:[#allocation11_spill] sm:$0xff]  ;;  %v1522_v16 = vrot.slane %v1475_v12, %v3865_v41 }
  0x7f   : > { %3337 = vmatmul.mubr.msk.bf16.vlgmr.msra.gmra.mrb[12].mxu0 %vm1189_vm1, %v2669_v8  ;;  %v5163_v8 = vld [vmem:[#allocation14_spill] sm:$0xff]  ;;  %v5169_v12 = vld [vmem:[#allocation35_spill] sm:$0xff] }
  0x80   : > { %2940 = vmatpush3.bf16.msra.mxu0 %v3665_v3  ;;  %1626 = vmatprep.mubr.bf16.mxu0 %v1497_v10  ;;  %v1505_v3 = vrot.slane %v1474_v1, %v3865_v41  ;;  %v5164_v10 = vld [vmem:[#allocation29_spill] sm:$0xff] }
  0x81   : > { %2926 = vmatpush3.bf16.msra.mxu1 %v3757_v18  ;;  %2941 = vmatprep.subr.bf16.mxu0 %v3677_v5  ;;  %v5148_v18 = vld [vmem:[#allocation4_spill] sm:$0xff] }
  0x82   : > { %2927 = vmatprep.subr.bf16.mxu1 %v3769_v20  ;;  %v1513_v5 = vcombine.high %v1505_v3, %v1505_v3  ;;  %v5150_v20 = vld [vmem:[#allocation15_spill] sm:$0xff] }
  0x84   : > { %2942 = vmatpush3.bf16.msra.mxu0 %v3689_v7  ;;  %v1498_v7 = vcombine.high %v1474_v1, %v1474_v1  ;;  %v5165_v1 = vld [vmem:[#allocation31_spill] sm:$0xff] }
  0x85   : > { %2928 = vmatpush3.bf16.msra.mxu1 %v3785_v22  ;;  %2943 = vmatprep.subr.bf16.mxu0 %v3701_v9  ;;  %v5151_v22 = vld [vmem:[#allocation6_spill] sm:$0xff] }
  0x86   : > { %2929 = vmatprep.subr.bf16.mxu1 %v3797_v24  ;;  %v1512_v9 = vrot.slane %v1498_v7, %v3865_v41  ;;  %v5153_v24 = vld [vmem:[#allocation7_spill] sm:$0xff]  ;;  %v5167_v7 = vld [vmem:[#allocation33_spill] sm:$0xff] }
  0x88   : > { %2944 = vmatpush3.bf16.msra.mxu0 %v3713_v11  ;;  %v1514_v11 = vcombine.high %v1512_v9, %v1512_v9 }
  0x89   : > { %2930 = vmatpush3.bf16.msra.mxu1 %v3812_v26  ;;  %2945 = vmatprep.subr.bf16.mxu0 %v3725_v13  ;;  %v5144_v13 = vld [vmem:[#allocation2_spill] sm:$0xff]  ;;  %v5155_v26 = vld [vmem:[#allocation8_spill] sm:$0xff] }
  0x8a   : > { %2931 = vmatprep.subr.bf16.mxu1 %v3824_v29 }
  0x8c   : > { %2946 = vmatpush3.bf16.msra.mxu0 %v3737_v15  ;;  %v5146_v15 = vld [vmem:[#allocation3_spill] sm:$0xff] }
  0x8d   : > { %2932 = vmatpush3.bf16.msra.mxu1 %v3842_v31  ;;  %2947 = vmatprep.subr.bf16.mxu0 %v3749_v17  ;;  %v5147_v17 = vld [vmem:[#allocation13_spill] sm:$0xff] }
  0x8e   : > { %2961 = vmatprep.subr.bf16.mxu1 %v3855_v35 }
  0x90   : > { %1587 = vmatmul.mubr.bf16.vlgmr.msra.gmra.mrb[12].mxu1 %v1488_v57  ;;  %2948 = vmatpush3.bf16.msra.mxu0 %v3763_v19  ;;  %v5149_v19 = vld [vmem:[#allocation5_spill] sm:$0xff]  ;;  %v5161_v57 = vld [vmem:[#allocation12_spill] sm:$0xff] }
  0x91   : > { %2962 = vmatpush3.bf16.msra.mxu1 %v3872_v44  ;;  %2949 = vmatprep.subr.bf16.mxu0 %v3775_v21  ;;  %v1530_v21 = vcombine.high %v1522_v16, %v1522_v16 }
  0x92   : > { %2963 = vmatprep.subr.bf16.mxu1 %v3882_v48  ;;  %1666 = vmatprep.mubr.bf16.mxu1 %v1513_v5 }
  0x94   : > { %2950 = vmatpush3.bf16.msra.mxu0 %v3791_v23  ;;  %v5152_v23 = vld [vmem:[#allocation17_spill] sm:$0xff] }
  0x95   : > { %2964 = vmatpush3.bf16.msra.mxu1 %v3892_v50  ;;  %2951 = vmatprep.subr.bf16.mxu0 %v3803_v25  ;;  %v5154_v25 = vld [vmem:[#allocation19_spill] sm:$0xff] }
  0x96   : > { %2965 = vmatprep.subr.bf16.mxu1 %v3904_v52 }
  0x98   : > { %2952 = vmatpush3.bf16.msra.mxu0 %v3818_v27  ;;  %v5156_v27 = vld [vmem:[#allocation21_spill] sm:$0xff] }
  0x99   : > { %2966 = vmatpush3.bf16.msra.mxu1 %v3916_v54  ;;  %2953 = vmatprep.subr.bf16.mxu0 %v3830_v30 }
  0x9a   : > { %2967 = vmatprep.subr.bf16.mxu1 %v3928_v56 }
  0x9c   : > { %2954 = vmatpush3.bf16.msra.mxu0 %v3848_v32 }
  0x9d   : > { %2968 = vmatpush3.bf16.msra.mxu1 %v3940_v58  ;;  %2983 = vmatprep.subr.bf16.mxu0 %v3862_v38 }
  0x9e   : > { %2969 = vmatprep.subr.bf16.mxu1 %v3952_v60 }
  0x9f   : > { %1627 = vmatmul.mubr.bf16.vlgmr.msra.gmra.mrb[16].mxu0 %v1495_v6  ;;  %v1529_v6 = vrot.slane %v1515_v33, %v3865_v41  ;;  %v5171_v33 = vld [vmem:[#allocation37_spill] sm:$0xff] }
  0xa0   : > { %2984 = vmatpush3.bf16.msra.mxu0 %v3877_v45  ;;  %1706 = vmatprep.mubr.bf16.mxu0 %v1514_v11  ;;  %v5168_v11 = vld [vmem:[#allocation18_spill] sm:$0xff] }
  0xa1   : > { %2970 = vmatpush3.bf16.msra.mxu1 %v3964_v62  ;;  %2985 = vmatprep.subr.bf16.mxu0 %v3887_v49  ;;  %v1531_v5 = vcombine.high %v1529_v6, %v1529_v6 }
  0xa2   : > { %2971 = vmatprep.subr.bf16.mxu1 %v3976_v28 }
  0xa4   : > { %2986 = vmatpush3.bf16.msra.mxu0 %v3897_v51 }
  0xa5   : > { %2972 = vmatpush3.bf16.msra.mxu1 %v3988_v34  ;;  %2987 = vmatprep.subr.bf16.mxu0 %v3911_v53 }
  0xa6   : > { %2973 = vmatprep.subr.bf16.mxu1 %v4000_v37 }
  0xa8   : > { %2988 = vmatpush3.bf16.msra.mxu0 %v5144_v13 }
  0xa9   : > { %2974 = vmatpush3.bf16.msra.mxu1 %v4012_v40  ;;  %2989 = vmatprep.subr.bf16.mxu0 %v5146_v15 }
  0xaa   : > { %2975 = vmatprep.subr.bf16.mxu1 %v5145_v14 }
  0xac   : > { %2990 = vmatpush3.bf16.msra.mxu0 %v5148_v18 }
  0xad   : > { %2976 = vmatpush3.bf16.msra.mxu1 %v5147_v17  ;;  %2991 = vmatprep.subr.bf16.mxu0 %v5149_v19 }
  0xae   : > { %3005 = vmatprep.subr.bf16.mxu1 %v5150_v20 }
  0xb0   : > { %1667 = vmatmul.mubr.bf16.vlgmr.msra.gmra.mrb[16].mxu1 %v1505_v3  ;;  %2992 = vmatpush3.bf16.msra.mxu0 %v5151_v22  ;;  %v5166_v3 = vld [vmem:[#allocation16_spill] sm:$0xff] }
  0xb1   : > { %3006 = vmatpush3.bf16.msra.mxu1 %v5152_v23  ;;  %2993 = vmatprep.subr.bf16.mxu0 %v5153_v24 }
  0xb2   : > { %3007 = vmatprep.subr.bf16.mxu1 %v5154_v25  ;;  %1746 = vmatprep.mubr.bf16.mxu1 %v1530_v21  ;;  %v5170_v21 = vld [vmem:[#allocation20_spill] sm:$0xff] }
  0xb4   : > { %2994 = vmatpush3.bf16.msra.mxu0 %v5155_v26 }
  0xb5   : > { %3008 = vmatpush3.bf16.msra.mxu1 %v5156_v27  ;;  %2995 = vmatprep.subr.bf16.mxu0 %v5157_v63 }
  0xb6   : > { %3009 = vmatprep.subr.bf16.mxu1 %v5158_v46 }
  0xb8   : > { %2996 = vmatpush3.bf16.msra.mxu0 %v5159_v61 }
  0xb9   : > { %3010 = vmatpush3.bf16.msra.mxu1 %v5160_v39  ;;  %2997 = vmatprep.subr.bf16.mxu0 %v5161_v57  ;;  %v5178_v39 = vld [vmem:[#allocation28_spill] sm:$0xff] }
  0xba   : > { %3011 = vmatprep.subr.bf16.mxu1 %v5162_v2  ;;  %v5175_v2 = vld [vmem:[#allocation41_spill] sm:$0xff] }
  0xbc   : > { %2998 = vmatpush3.bf16.msra.mxu0 %v5163_v8 }
  0xbd   : > { %3012 = vmatpush3.bf16.msra.mxu1 %v5164_v10  ;;  %3027 = vmatprep.subr.bf16.mxu0 %v5166_v3  ;;  %v5173_v10 = vld [vmem:[#allocation39_spill] sm:$0xff] }
  0xbe   : > { %3013 = vmatprep.subr.bf16.mxu1 %v5165_v1  ;;  %v5174_v1 = vld [vmem:[#allocation24_spill] sm:$0xff] }
  0xbf   : > { %1707 = vmatmul.mubr.bf16.vlgmr.msra.gmra.mrb[20].mxu0 %v1512_v9  ;;  %v5176_v9 = vld [vmem:[#allocation26_spill] sm:$0xff] }
  0xc0   : > { %3028 = vmatpush3.bf16.msra.mxu0 %v5168_v11  ;;  %1786 = vmatprep.mubr.bf16.mxu0 %v1531_v5  ;;  %v5179_v5 = vld [vmem:[#allocation30_spill] sm:$0xff] }
  0xc1   : > { %3014 = vmatpush3.bf16.msra.mxu1 %v5167_v7  ;;  %3029 = vmatprep.subr.bf16.mxu0 %v5170_v21  ;;  %v5177_v7 = vld [vmem:[#allocation43_spill] sm:$0xff] }
  0xc2   : > { %3015 = vmatprep.subr.bf16.mxu1 %v5169_v12  ;;  %v5180_v12 = vld [vmem:[#allocation32_spill] sm:$0xff] }
  0xc4   : > { %3030 = vmatpush3.bf16.msra.mxu0 %v5172_v47 }
  0xc5   : > { %3016 = vmatpush3.bf16.msra.mxu1 %v5171_v33  ;;  %3031 = vmatprep.subr.bf16.mxu0 %v5174_v1  ;;  %v5181_v33 = vmov 0.0  }
  0xc6   : > { %3017 = vmatprep.subr.bf16.mxu1 %v5173_v10  ;;  %v5182_v10 = vld [vmem:[#allocation34_spill] sm:$0xff] }
  0xc8   : > { %3032 = vmatpush3.bf16.msra.mxu0 %v5176_v9 }
  0xc9   : > { %3018 = vmatpush3.bf16.msra.mxu1 %v5175_v2  ;;  %3033 = vmatprep.subr.bf16.mxu0 %v5178_v39 }
  0xca   : > { %3019 = vmatprep.subr.bf16.mxu1 %v5177_v7  ;;  %v5183_v7 = vld [vmem:[#allocation36_spill] sm:$0xff] }
  0xcc   : > { %3034 = vmatpush3.bf16.msra.mxu0 %v5179_v5 }
  0xcd   : > { %3020 = vmatpush3.bf16.msra.mxu1 %v4242_v42  ;;  %3035 = vmatprep.subr.bf16.mxu0 %v5180_v12  ;;  %v1835_v42 = vld [vmem:[%s4390_s25] sm:$0xff] }
  0xce   : > { %3340 = vmatprep.subr.bf16.mxu1 %v5181_v33  ;;  %v1843_v2 = vcombine.high %v1835_v42, %v1835_v42 }
  0xd0   : > { %1747 = vmatmul.mubr.bf16.vlgmr.msra.gmra.mrb[20].mxu1 %v1522_v16  ;;  %3036 = vmatpush3.bf16.msra.mxu0 %v5182_v10  ;;  %v5184_v16 = vld [vmem:[#allocation38_spill] sm:$0xff] }
  0xd1   : > { %3341 = vmatpush3.bf16.msra.mxu1 %v4258_v55  ;;  %3037 = vmatprep.subr.bf16.mxu0 %v5183_v7  ;;  %v5185_v55 = vld [vmem:[#allocation40_spill] sm:$0xff]  ;;  %v5186_v10 = vld [vmem:[#allocation42_spill] sm:$0xff]  ;;  %v4406_v7 = vrot.slane %v1835_v42, %v3865_v41 }
  0xd2   : > { %3342 = vmatprep.subr.bf16.mxu1 %v5181_v33  ;;  %3348 = vmatprep.mubr.msk.bf16.mxu1 %vm3601_vm0, %v5181_v33  ;;  %v4423_v42 = vld [vmem:[%s4971_s4 + $0xc0] sm:$0xff]  }
  0xd3   : > { %5188 = vst [vmem:[#allocation11_spill] sm:$0xff] %v4423_v42 }
  0xd4   : > { %3038 = vmatpush3.bf16.msra.mxu0 %v5184_v16  ;;  %v4409_v16 = vrot.slane %v1843_v2, %v3865_v41  ;;  %v1858_v2 = vcombine.high %v4406_v7, %v4406_v7 }
  0xd5   : > { %3343 = vmatpush3.bf16.msra.mxu1 %v4267_v43  ;;  %3039 = vmatprep.subr.bf16.mxu0 %v5185_v55  ;;  %v2771_v43 = vld.sshfl [vmem:[%s4234_s8 + $0x18] sm:$0x3 pattern:$0x76325410] }
  0xd6   : > { %3344 = vmatprep.subr.bf16.mxu1 %v5181_v33 }
  0xd8   : > { %3040 = vmatpush3.bf16.msra.mxu0 %v5186_v10  ;;  %v4417_v10 = vld [vmem:[%s4971_s4 + $0x40] sm:$0xff]  }
  0xd9   : > { %3345 = vmatpush3.bf16.msra.mxu1 %v4278_v0  ;;  %3041 = vmatprep.subr.bf16.mxu0 %v4228_v36  ;;  %5187 = vst [vmem:[#allocation2_spill] sm:$0xff] %v4417_v10  ;;  %v4434_v0 = vld [vmem:[%s4971_s4] sm:$0xff]  }
  0xda   : > { %3346 = vmatprep.subr.bf16.mxu1 %v5181_v33  ;;  %5189 = vst [vmem:[#allocation3_spill] sm:$0xff] %v4434_v0 }
  0xdc   : > { %3042 = vmatpush3.bf16.msra.mxu0 %v4247_v59 }
  0xdd   : > { %3347 = vmatpush3.bf16.msra.mxu1 %v4287_v4  ;;  %3054 = vmatprep.subr.bf16.mxu0 %v4417_v10  ;;  %v1859_v4 = vcombine.high %v4409_v16, %v4409_v16 }
  0xde   : > { %3076 = vmatprep.subr.bf16.mxu1 %v4423_v42  ;;  %v4440_v42 = vld [vmem:[%s4971_s4 + $0x80] sm:$0xff]  }
  0xdf   : > { %1787 = vmatmul.mubr.bf16.vlgmr.msra.gmra.mrb[24].mxu0 %v1529_v6  ;;  %5190 = vst [vmem:[#allocation13_spill] sm:$0xff] %v4440_v42  ;;  %v4446_v6 = vld [vmem:[%s4971_s4 + $0x48] sm:$0xff]  }
  0xe0   : > { %3349 = vmatmul.mubr.msk.bf16.vlgmr.msra.gmra.mrb[24].mxu1 %vm1189_vm1, %v2771_v43  ;;  %3055 = vmatpush3.bf16.msra.mxu0 %v4434_v0  ;;  %5191 = vst [vmem:[#allocation4_spill] sm:$0xff] %v4446_v6  ;;  %v4452_v43 = vld [vmem:[%s4971_s4 + $0xc8] sm:$0xff]   ;;  %v4579_v0 = vld [vmem:[%s4971_s4 + $0x30] sm:$0xff]  }
  0xe1   : > { %3077 = vmatpush3.bf16.msra.mxu1 %v4440_v42  ;;  %3056 = vmatprep.subr.bf16.mxu0 %v4446_v6  ;;  %5192 = vst [vmem:[#allocation5_spill] sm:$0xff] %v4452_v43  ;;  %v4458_v42 = vld [vmem:[%s4971_s4 + $0x8] sm:$0xff]   ;;  %5213 = vst [vmem:[#allocation32_spill] sm:$0xff] %v4579_v0 }
  0xe2   : > { %3078 = vmatprep.subr.bf16.mxu1 %v4452_v43  ;;  %1948 = vmatprep.mubr.bf16.mxu0 %v1858_v2  ;;  %5193 = vst [vmem:[#allocation15_spill] sm:$0xff] %v4458_v42  ;;  %v4464_v6 = vld [vmem:[%s4971_s4 + $0x88] sm:$0xff]   ;;  %v4470_v43 = vld [vmem:[%s4971_s4 + $0x50] sm:$0xff]  }
  0xe3   : > { %1988 = vmatprep.mubr.bf16.mxu1 %v1859_v4  ;;  %5194 = vst [vmem:[#allocation6_spill] sm:$0xff] %v4464_v6  ;;  %5195 = vst [vmem:[#allocation17_spill] sm:$0xff] %v4470_v43  ;;  %v4476_v4 = vld [vmem:[%s4971_s4 + $0xd0] sm:$0xff]  }
  0xe4   : > { %3057 = vmatpush3.bf16.msra.mxu0 %v4458_v42  ;;  %5196 = vst [vmem:[#allocation7_spill] sm:$0xff] %v4476_v4  ;;  %v4482_v2 = vld [vmem:[%s4971_s4 + $0x10] sm:$0xff]   ;;  %v4555_v42 = vld [vmem:[%s4971_s4 + $0x28] sm:$0xff]  }
  0xe5   : > { %3079 = vmatpush3.bf16.msra.mxu1 %v4464_v6  ;;  %3058 = vmatprep.subr.bf16.mxu0 %v4470_v43  ;;  %5197 = vst [vmem:[#allocation19_spill] sm:$0xff] %v4482_v2  ;;  %v4488_v6 = vld [vmem:[%s4971_s4 + $0x90] sm:$0xff]   ;;  %v4494_v43 = vld [vmem:[%s4971_s4 + $0x58] sm:$0xff]   ;;  %5209 = vst [vmem:[#allocation24_spill] sm:$0xff] %v4555_v42 }
  0xe6   : > { %3080 = vmatprep.subr.bf16.mxu1 %v4476_v4  ;;  %5198 = vst [vmem:[#allocation8_spill] sm:$0xff] %v4488_v6  ;;  %5199 = vst [vmem:[#allocation21_spill] sm:$0xff] %v4494_v43  ;;  %v4500_v4 = vld [vmem:[%s4971_s4 + $0xd8] sm:$0xff]  }
  0xe7   : > { %5200 = vst [vmem:[#allocation9_spill] sm:$0xff] %v4500_v4 }
  0xe8   : > { %3059 = vmatpush3.bf16.msra.mxu0 %v4482_v2  ;;  %v4506_v2 = vld [vmem:[%s4971_s4 + $0x18] sm:$0xff]  }
  0xe9   : > { %3081 = vmatpush3.bf16.msra.mxu1 %v4488_v6  ;;  %3060 = vmatprep.subr.bf16.mxu0 %v4494_v43  ;;  %5201 = vst [vmem:[#allocation23_spill] sm:$0xff] %v4506_v2  ;;  %v4512_v6 = vld [vmem:[%s4971_s4 + $0x98] sm:$0xff]   ;;  %v4518_v43 = vld [vmem:[%s4971_s4 + $0x60] sm:$0xff]  }
  0xea   : > { %3082 = vmatprep.subr.bf16.mxu1 %v4500_v4  ;;  %5202 = vst [vmem:[#allocation10_spill] sm:$0xff] %v4512_v6  ;;  %5203 = vst [vmem:[#allocation12_spill] sm:$0xff] %v4518_v43  ;;  %v4524_v4 = vld [vmem:[%s4971_s4 + $0xe0] sm:$0xff]  }
  0xeb   : > { %5204 = vst [vmem:[#allocation14_spill] sm:$0xff] %v4524_v4 }
  0xec   : > { %3061 = vmatpush3.bf16.msra.mxu0 %v4506_v2  ;;  %v4530_v2 = vld [vmem:[%s4971_s4 + $0x20] sm:$0xff]  }
  0xed   : > { %3083 = vmatpush3.bf16.msra.mxu1 %v4512_v6  ;;  %3062 = vmatprep.subr.bf16.mxu0 %v4518_v43  ;;  %5205 = vst [vmem:[#allocation16_spill] sm:$0xff] %v4530_v2  ;;  %v4536_v6 = vld [vmem:[%s4971_s4 + $0xa0] sm:$0xff]   ;;  %v4542_v43 = vld [vmem:[%s4971_s4 + $0x68] sm:$0xff]  }
  0xee   : > { %3084 = vmatprep.subr.bf16.mxu1 %v4524_v4  ;;  %5206 = vst [vmem:[#allocation18_spill] sm:$0xff] %v4536_v6  ;;  %5207 = vst [vmem:[#allocation20_spill] sm:$0xff] %v4542_v43  ;;  %v4548_v4 = vld [vmem:[%s4971_s4 + $0xe8] sm:$0xff]  }
  0xef   : > { %5208 = vst [vmem:[#allocation22_spill] sm:$0xff] %v4548_v4 }
  0xf0   : > { %3063 = vmatpush3.bf16.msra.mxu0 %v4530_v2  ;;  %v1836_v2 = vld [vmem:[%s4390_s25 + $0x8] sm:$0xff] }
  0xf1   : > { %3085 = vmatpush3.bf16.msra.mxu1 %v4536_v6  ;;  %3064 = vmatprep.subr.bf16.mxu0 %v4542_v43  ;;  %v4561_v6 = vld [vmem:[%s4971_s4 + $0xa8] sm:$0xff]   ;;  %v4567_v43 = vld [vmem:[%s4971_s4 + $0x70] sm:$0xff]  }
  0xf2   : > { %3086 = vmatprep.subr.bf16.mxu1 %v4548_v4  ;;  %5210 = vst [vmem:[#allocation26_spill] sm:$0xff] %v4561_v6  ;;  %5211 = vst [vmem:[#allocation28_spill] sm:$0xff] %v4567_v43  ;;  %v4573_v4 = vld [vmem:[%s4971_s4 + $0xf0] sm:$0xff]  }
  0xf3   : > { %5212 = vst [vmem:[#allocation30_spill] sm:$0xff] %v4573_v4 }
  0xf4   : > { %3065 = vmatpush3.bf16.msra.mxu0 %v4555_v42  ;;  %v1860_v42 = vcombine.high %v1836_v2, %v1836_v2 }
  0xf5   : > { %3087 = vmatpush3.bf16.msra.mxu1 %v4561_v6  ;;  %3066 = vmatprep.subr.bf16.mxu0 %v4567_v43  ;;  %v4585_v6 = vld [vmem:[%s4971_s4 + $0xb0] sm:$0xff]  }
  0xf6   : > { %3088 = vmatprep.subr.bf16.mxu1 %v4573_v4  ;;  %v1867_v4 = vrot.slane %v1836_v2, %v3865_v41  ;;  %v1874_v43 = vrot.slane %v1860_v42, %v3865_v41 }
  0xf8   : > { %3067 = vmatpush3.bf16.msra.mxu0 %v4579_v0  ;;  %v1875_v0 = vcombine.high %v1867_v4, %v1867_v4  ;;  %v1876_v10 = vcombine.high %v1874_v43, %v1874_v43 }
  0xf9   : > { %3089 = vmatpush3.bf16.msra.mxu1 %v4585_v6  ;;  %3068 = vmatprep.subr.bf16.mxu0 %v3824_v29 }
  0xfa   : > { %3090 = vmatprep.subr.bf16.mxu1 %v3830_v30 }
  0xfc   : > { %3069 = vmatpush3.bf16.msra.mxu0 %v3842_v31 }
  0xfd   : > { %3091 = vmatpush3.bf16.msra.mxu1 %v3848_v32  ;;  %3098 = vmatprep.subr.bf16.mxu0 %v3855_v35 }
  0xfe   : > { %3120 = vmatprep.subr.bf16.mxu1 %v3862_v38 }
  0xff   : > { %1949 = vmatmul.mubr.bf16.vlgmr.msra.gmra.mrb[28].mxu0 %v4406_v7 }
 0x100   : > { %1989 = vmatmul.mubr.bf16.vlgmr.msra.gmra.mrb[28].mxu1 %v4409_v16  ;;  %3099 = vmatpush3.bf16.msra.mxu0 %v3872_v44 }
 0x101   : > { %3121 = vmatpush3.bf16.msra.mxu1 %v3877_v45  ;;  %3100 = vmatprep.subr.bf16.mxu0 %v3882_v48 }
 0x102   : > { %3122 = vmatprep.subr.bf16.mxu1 %v3887_v49  ;;  %v2796_v29 = vpop.f32.mrb[0].mxu0  ;;  %2028 = vmatprep.mubr.bf16.mxu0 %v1875_v0  ;;  %v1837_v49 = vld [vmem:[%s4390_s25 + $0x10] sm:$0xff] }
 0x103   : > { %v2818_v30 = vpop.f32.mrb[0].mxu1  ;;  %2068 = vmatprep.mubr.bf16.mxu1 %v1876_v10  ;;  %v2797_v31 = vpop.f32.mrb[1].mxu0  ;;  %v5229_v10 = vld [vmem:[#allocation2_spill] sm:$0xff] }
 0x104   : > { %v2819_v32 = vpop.f32.mrb[1].mxu1  ;;  %v2798_v35 = vadd.f32 %v2797_v31, %v2796_v29  ;;  %v2799_v42 = vpop.f32.mrb[2].mxu0  ;;  %3101 = vmatpush3.bf16.msra.mxu0 %v3892_v50  ;;  %v1877_v50 = vcombine.high %v1837_v49, %v1837_v49  ;;  %v5235_v31 = vld [vmem:[#allocation17_spill] sm:$0xff] }
 0x105   : > { %v2820_v38 = vadd.f32 %v2819_v32, %v2818_v30  ;;  %3123 = vmatpush3.bf16.msra.mxu1 %v3897_v51  ;;  %v2821_v44 = vpop.f32.mrb[2].mxu1  ;;  %v2800_v7 = vpop.f32.mrb[3].mxu0  ;;  %3102 = vmatprep.subr.bf16.mxu0 %v3904_v52  ;;  %v1884_v51 = vrot.slane %v1837_v49, %v3865_v41  ;;  %v5236_v42 = vld [vmem:[#allocation47_spill] sm:$0xff]  ;;  %v5239_v49 = vld [vmem:[#allocation48_spill] sm:$0xff] }
 0x106   : > { %3124 = vmatprep.subr.bf16.mxu1 %v3911_v53  ;;  %v2822_v45 = vpop.f32.mrb[3].mxu1  ;;  %v1891_v52 = vrot.slane %v1877_v50, %v3865_v41  ;;  %v5237_v44 = vld [vmem:[#allocation19_spill] sm:$0xff] }
 0x107   : > { %v1268_v48 = vadd.f32 %v2820_v38, %v2798_v35  ;;  %v1892_v53 = vcombine.high %v1884_v51, %v1884_v51  ;;  %v5238_v45 = vld [vmem:[#allocation21_spill] sm:$0xff]  ;;  %v5240_v50 = vld [vmem:[#allocation23_spill] sm:$0xff] }
 0x108   : > { %3103 = vmatpush3.bf16.msra.mxu0 %v3916_v54  ;;  %v1893_v54 = vcombine.high %v1891_v52, %v1891_v52 }
 0x109   : > { %3125 = vmatpush3.bf16.msra.mxu1 %v5144_v13  ;;  %3104 = vmatprep.subr.bf16.mxu0 %v3928_v56 }
 0x10a   : > { %3126 = vmatprep.subr.bf16.mxu1 %v5146_v15 }
 0x10c   : > { %3105 = vmatpush3.bf16.msra.mxu0 %v3940_v58 }
 0x10d   : > { %3127 = vmatpush3.bf16.msra.mxu1 %v5148_v18  ;;  %3106 = vmatprep.subr.bf16.mxu0 %v3952_v60  ;;  %v5215_v18 = vld [vmem:[#allocation27_spill] sm:$0xff] }
 0x10e   : > { %3128 = vmatprep.subr.bf16.mxu1 %v5149_v19  ;;  %v5217_v19 = vld [vmem:[#allocation31_spill] sm:$0xff] }
 0x110   : > { %3107 = vmatpush3.bf16.msra.mxu0 %v3964_v62 }
 0x111   : > { %3129 = vmatpush3.bf16.msra.mxu1 %v5151_v22  ;;  %3108 = vmatprep.subr.bf16.mxu0 %v3976_v28  ;;  %v5219_v22 = vld [vmem:[#allocation34_spill] sm:$0xff] }
 0x112   : > { %3130 = vmatprep.subr.bf16.mxu1 %v5153_v24  ;;  %v5221_v24 = vld [vmem:[#allocation36_spill] sm:$0xff] }
 0x114   : > { %3109 = vmatpush3.bf16.msra.mxu0 %v3988_v34 }
 0x115   : > { %3131 = vmatpush3.bf16.msra.mxu1 %v5155_v26  ;;  %3110 = vmatprep.subr.bf16.mxu0 %v4000_v37  ;;  %v5223_v26 = vld [vmem:[#allocation38_spill] sm:$0xff] }
 0x116   : > { %3132 = vmatprep.subr.bf16.mxu1 %v5157_v63  ;;  %v2197_v63 = vld [vmem:[%s4659_s18] sm:$0xff] }
 0x117   : > { %v2205_v38 = vcombine.high %v2197_v63, %v2197_v63 }
 0x118   : > { %3111 = vmatpush3.bf16.msra.mxu0 %v4012_v40 }
 0x119   : > { %3133 = vmatpush3.bf16.msra.mxu1 %v5159_v61  ;;  %3112 = vmatprep.subr.bf16.mxu0 %v5145_v14  ;;  %v5226_v61 = vld [vmem:[#allocation42_spill] sm:$0xff] }
 0x11a   : > { %3134 = vmatprep.subr.bf16.mxu1 %v5161_v57  ;;  %v4669_v57 = vrot.slane %v2197_v63, %v3865_v41  ;;  %v3530_v63 = vld [vmem:[%s4971_s4 + $0x140] sm:$0xff]  }
 0x11c   : > { %3113 = vmatpush3.bf16.msra.mxu0 %v5147_v17  ;;  %v5214_v17 = vld [vmem:[#allocation25_spill] sm:$0xff] }
 0x11d   : > { %3135 = vmatpush3.bf16.msra.mxu1 %v5163_v8  ;;  %3142 = vmatprep.subr.bf16.mxu0 %v5150_v20  ;;  %v5218_v20 = vld [vmem:[#allocation33_spill] sm:$0xff]  ;;  %v5228_v8 = vld [vmem:[#allocation44_spill] sm:$0xff] }
 0x11e   : > { %3164 = vmatprep.subr.bf16.mxu1 %v5166_v3  ;;  %v5231_v3 = vld [vmem:[#allocation3_spill] sm:$0xff] }
 0x11f   : > { %2029 = vmatmul.mubr.bf16.vlgmr.msra.gmra.mrb[32].mxu0 %v1867_v4  ;;  %v5234_v4 = vld [vmem:[#allocation15_spill] sm:$0xff] }
 0x120   : > { %2069 = vmatmul.mubr.bf16.vlgmr.msra.gmra.mrb[32].mxu1 %v1874_v43  ;;  %3143 = vmatpush3.bf16.msra.mxu0 %v5152_v23  ;;  %v5220_v23 = vld [vmem:[#allocation35_spill] sm:$0xff]  ;;  %v5233_v43 = vld [vmem:[#allocation46_spill] sm:$0xff] }
 0x121   : > { %3165 = vmatpush3.bf16.msra.mxu1 %v5168_v11  ;;  %3144 = vmatprep.subr.bf16.mxu0 %v5154_v25  ;;  %v5222_v25 = vld [vmem:[#allocation37_spill] sm:$0xff] }
 0x122   : > { %3166 = vmatprep.subr.bf16.mxu1 %v5170_v21  ;;  %v2840_v56 = vpop.f32.mrb[4].mxu0  ;;  %2108 = vmatprep.mubr.bf16.mxu0 %v1892_v53  ;;  %v5242_v53 = vld [vmem:[#allocation11_spill] sm:$0xff] }
 0x123   : > { %v2862_v58 = vpop.f32.mrb[4].mxu1  ;;  %2148 = vmatprep.mubr.bf16.mxu1 %v1893_v54  ;;  %v2841_v60 = vpop.f32.mrb[5].mxu0 }
 0x124   : > { %v2863_v62 = vpop.f32.mrb[5].mxu1  ;;  %v2842_v28 = vadd.f32 %v2841_v60, %v2840_v56  ;;  %v2843_v34 = vpop.f32.mrb[6].mxu0  ;;  %3145 = vmatpush3.bf16.msra.mxu0 %v5156_v27  ;;  %v5224_v27 = vld [vmem:[#allocation39_spill] sm:$0xff]  ;;  %v5243_v56 = vld [vmem:[#allocation16_spill] sm:$0xff] }
 0x125   : > { %3167 = vmatpush3.bf16.msra.mxu1 %v5172_v47  ;;  %v2864_v37 = vadd.f32 %v2863_v62, %v2862_v58  ;;  %v2865_v40 = vpop.f32.mrb[6].mxu1  ;;  %v2844_v0 = vpop.f32.mrb[7].mxu0  ;;  %3146 = vmatprep.subr.bf16.mxu0 %v5158_v46  ;;  %v5216_v47 = vld [vmem:[#allocation29_spill] sm:$0xff]  ;;  %v5245_v60 = vld [vmem:[#allocation20_spill] sm:$0xff] }
 0x126   : > { %3168 = vmatprep.subr.bf16.mxu1 %v5174_v1  ;;  %v2866_v13 = vpop.f32.mrb[7].mxu1  ;;  %v1308_v14 = vadd.f32 %v2842_v28, %v1268_v48  ;;  %v5225_v46 = vld [vmem:[#allocation41_spill] sm:$0xff]  ;;  %v4692_v48 = vrot.slane %v2205_v38, %v3865_v41  ;;  %v5247_v0 = vld [vmem:[#allocation24_spill] sm:$0xff] }
 0x127   : > { %v5230_v1 = vld [vmem:[#allocation45_spill] sm:$0xff]  ;;  %v5248_v13 = vld [vmem:[#allocation6_spill] sm:$0xff] }
 0x128   : > { %v1348_v15 = vadd.f32 %v2864_v37, %v1308_v14  ;;  %3147 = vmatpush3.bf16.msra.mxu0 %v5214_v17  ;;  %v2221_v54 = vcombine.high %v4692_v48, %v4692_v48  ;;  %v5244_v58 = vld [vmem:[#allocation13_spill] sm:$0xff]  ;;  %v5250_v17 = vld [vmem:[#allocation7_spill] sm:$0xff] }
 0x129   : > { %3169 = vmatpush3.bf16.msra.mxu1 %v5176_v9  ;;  %3148 = vmatprep.subr.bf16.mxu0 %v5215_v18  ;;  %v5246_v62 = vld [vmem:[#allocation5_spill] sm:$0xff]  ;;  %v2198_v18 = vld [vmem:[%s4659_s18 + $0x8] sm:$0xff] }
 0x12a   : > { %3170 = vmatprep.subr.bf16.mxu1 %v5178_v39  ;;  %v5227_v39 = vld [vmem:[#allocation43_spill] sm:$0xff]  ;;  %v3539_v38 = vld [vmem:[%s4971_s4 + $0x118] sm:$0xff]  }
 0x12c   : > { %3149 = vmatpush3.bf16.msra.mxu0 %v5216_v47  ;;  %v5251_v47 = vld [vmem:[#allocation32_spill] sm:$0xff] }
 0x12d   : > { %3171 = vmatpush3.bf16.msra.mxu1 %v5179_v5  ;;  %3150 = vmatprep.subr.bf16.mxu0 %v5217_v19  ;;  %v5252_v19 = vld [vmem:[#allocation8_spill] sm:$0xff] }
 0x12e   : > { %3172 = vmatprep.subr.bf16.mxu1 %v5180_v12 }
 0x130   : > { %3151 = vmatpush3.bf16.msra.mxu0 %v5218_v20  ;;  %v3528_v20 = vld [vmem:[%s4971_s4 + $0x78] sm:$0xff]  }
 0x131   : > { %3173 = vmatpush3.bf16.msra.mxu1 %v5219_v22  ;;  %3152 = vmatprep.subr.bf16.mxu0 %v5220_v23  ;;  %v5253_v22 = vld [vmem:[#allocation9_spill] sm:$0xff]  ;;  %v4720_v23 = vrot.slane %v2198_v18, %v3865_v41 }
 0x132   : > { %3174 = vmatprep.subr.bf16.mxu1 %v5221_v24  ;;  %v3529_v24 = vld [vmem:[%s4971_s4 + $0x38] sm:$0xff]  }
 0x134   : > { %3153 = vmatpush3.bf16.msra.mxu0 %v5222_v25  ;;  %v5254_v25 = vld [vmem:[#allocation10_spill] sm:$0xff] }
 0x135   : > { %3175 = vmatpush3.bf16.msra.mxu1 %v5223_v26  ;;  %3154 = vmatprep.subr.bf16.mxu0 %v5224_v27  ;;  %v5255_v26 = vld [vmem:[#allocation14_spill] sm:$0xff] }
 0x136   : > { %3176 = vmatprep.subr.bf16.mxu1 %v5185_v55  ;;  %v2220_v55 = vcombine.high %v4669_v57, %v4669_v57 }
 0x138   : > { %3155 = vmatpush3.bf16.msra.mxu0 %v5225_v46 }
 0x139   : > { %3177 = vmatpush3.bf16.msra.mxu1 %v5226_v61  ;;  %3156 = vmatprep.subr.bf16.mxu0 %v5227_v39  ;;  %v2237_v61 = vcombine.high %v4720_v23, %v4720_v23 }
 0x13a   : > { %3178 = vmatprep.subr.bf16.mxu1 %v4228_v36  ;;  %v5232_v36 = vld [vmem:[#allocation4_spill] sm:$0xff] }
 0x13c   : > { %3157 = vmatpush3.bf16.msra.mxu0 %v5228_v8 }
 0x13d   : > { %3179 = vmatpush3.bf16.msra.mxu1 %v4247_v59  ;;  %3352 = vmatprep.subr.bf16.mxu0 %v5181_v33 }
 0x13e   : > { %3191 = vmatprep.subr.bf16.mxu1 %v5229_v10  ;;  %v5256_v10 = vld [vmem:[#allocation18_spill] sm:$0xff] }
 0x13f   : > { %2109 = vmatmul.mubr.bf16.vlgmr.msra.gmra.mrb[36].mxu0 %v1884_v51  ;;  %v2773_v51 = vld.sshfl [vmem:[%s4390_s25 + $0x18] sm:$0x3 pattern:$0x76325410]  ;;  %s2668_s25 = sshll.u32 %s5261_s22, 1 }
 0x140   : > { %2149 = vmatmul.mubr.bf16.vlgmr.msra.gmra.mrb[36].mxu1 %v1891_v52  ;;  %3353 = vmatpush3.bf16.msra.mxu0 %v5230_v1  ;;  %v5241_v52 = vld [vmem:[#allocation12_spill] sm:$0xff]  ;;  %s309_s27 = scalar_lea.vmem %s4973_s6, %s2668_s25 }
 0x141   : > { %3192 = vmatpush3.bf16.msra.mxu1 %v5231_v3  ;;  %3354 = vmatprep.subr.bf16.mxu0 %v5181_v33  ;;  %v5257_v3 = vld [vmem:[#allocation22_spill] sm:$0xff] }
 0x142   : > { %3193 = vmatprep.subr.bf16.mxu1 %v5232_v36  ;;  %v2884_v11 = vpop.f32.mrb[8].mxu0  ;;  %3360 = vmatprep.mubr.msk.bf16.mxu0 %vm3601_vm0, %v5181_v33  ;;  %v3532_v36 = vld [vmem:[%s4971_s4 + $0x148] sm:$0xff]  }
 0x143   : > { %v2906_v12 = vpop.f32.mrb[8].mxu1  ;;  %2310 = vmatprep.mubr.bf16.mxu1 %v2220_v55  ;;  %v2885_v21 = vpop.f32.mrb[9].mxu0  ;;  %v3531_v55 = vld [vmem:[%s4971_s4 + $0x100] sm:$0xff]  }
 0x144   : > { %v2907_v9 = vpop.f32.mrb[9].mxu1  ;;  %v2886_v5 = vadd.f32 %v2885_v21, %v2884_v11  ;;  %v2887_v16 = vpop.f32.mrb[10].mxu0  ;;  %3355 = vmatpush3.bf16.msra.mxu0 %v5233_v43  ;;  %v5258_v21 = vld [vmem:[#allocation26_spill] sm:$0xff] }
 0x145   : > { %3194 = vmatpush3.bf16.msra.mxu1 %v5234_v4  ;;  %v2908_v2 = vadd.f32 %v2907_v9, %v2906_v12  ;;  %v2909_v29 = vpop.f32.mrb[10].mxu1  ;;  %v2888_v30 = vpop.f32.mrb[11].mxu0  ;;  %3356 = vmatprep.subr.bf16.mxu0 %v5181_v33  ;;  %v5259_v16 = vld [vmem:[#allocation30_spill] sm:$0xff]  ;;  %v3534_v4 = vld [vmem:[%s4971_s4 + $0x150] sm:$0xff]  }
 0x146   : > { %3195 = vmatprep.subr.bf16.mxu1 %v5235_v31  ;;  %v2910_v32 = vpop.f32.mrb[11].mxu1  ;;  %v1388_v35 = vadd.f32 %v2886_v5, %v1348_v15  ;;  %v5249_v15 = vld [vmem:[#allocation28_spill] sm:$0xff]  ;;  %v2222_v29 = vcombine.high %v2198_v18, %v2198_v18  ;;  %v3536_v31 = vld [vmem:[%s4971_s4 + $0xf8] sm:$0xff]  }
 0x147   : > { %v3535_v30 = vld [vmem:[%s4971_s4 + $0x110] sm:$0xff]   ;;  %v3537_v32 = vld [vmem:[%s4971_s4 + $0x158] sm:$0xff]  }
 0x148   : > { %3357 = vmatpush3.bf16.msra.mxu0 %v5236_v42  ;;  %v1428_v7 = vadd.f32 %v2908_v2, %v1388_v35  ;;  %v4760_v35 = vrot.slane %v2222_v29, %v3865_v41  ;;  %v3553_v18 = vld [vmem:[%s4971_s4 + $0x1d8] sm:$0xff]  }
 0x149   : > { %3196 = vmatpush3.bf16.msra.mxu1 %v5237_v44  ;;  %3358 = vmatprep.subr.bf16.mxu0 %v5181_v33  ;;  %v3540_v44 = vld [vmem:[%s4971_s4 + $0x160] sm:$0xff]   ;;  %v3568_v29 = vld [vmem:[%s4971_s4 + $0x1f8] sm:$0xff]  }
 0x14a   : > { %3197 = vmatprep.subr.bf16.mxu1 %v5238_v45  ;;  %v2238_v45 = vcombine.high %v4760_v35, %v4760_v35 }
 0x14c   : > { %3359 = vmatpush3.bf16.msra.mxu0 %v5239_v49 }
 0x14d   : > { %3198 = vmatpush3.bf16.msra.mxu1 %v5240_v50  ;;  %3213 = vmatprep.subr.bf16.mxu0 %v5242_v53  ;;  %v3542_v50 = vld [vmem:[%s4971_s4 + $0x120] sm:$0xff]   ;;  %v3545_v53 = vld [vmem:[%s4971_s4 + $0x1c8] sm:$0xff]  }
 0x14e   : > { %3199 = vmatprep.subr.bf16.mxu1 %v5241_v52  ;;  %v3544_v52 = vld [vmem:[%s4971_s4 + $0x168] sm:$0xff]  }
 0x14f   : > { %3361 = vmatmul.mubr.msk.bf16.vlgmr.msra.gmra.mrb[40].mxu0 %vm1189_vm1, %v2773_v51  ;;  %v3543_v51 = vld [vmem:[%s4971_s4 + $0x180] sm:$0xff]  }
 0x150   : > { %3214 = vmatpush3.bf16.msra.mxu0 %v5244_v58  ;;  %2350 = vmatprep.mubr.bf16.mxu0 %v2221_v54 }
 0x151   : > { %3200 = vmatpush3.bf16.msra.mxu1 %v5243_v56  ;;  %3215 = vmatprep.subr.bf16.mxu0 %v5246_v62  ;;  %v3547_v62 = vld [vmem:[%s4971_s4 + $0x188] sm:$0xff]  }
 0x152   : > { %3201 = vmatprep.subr.bf16.mxu1 %v5245_v60  ;;  %v1467_v28 = vpop.f32.mrb[12].mxu0  ;;  %v3546_v60 = vld [vmem:[%s4971_s4 + $0x128] sm:$0xff]  }
 0x153   : > { %v4706_v34 = vadd.f32 %v1467_v28, %v1428_v7  ;;  %v3338_v37 = vpop.f32.mrb[13].mxu0  ;;  %v3541_v7 = vld [vmem:[%s4971_s4 + $0x1c0] sm:$0xff]  }
 0x154   : > { %v1470_v40 = vpop.f32.mrb[14].mxu0  ;;  %3216 = vmatpush3.bf16.msra.mxu0 %v5248_v13  ;;  %v3548_v37 = vld [vmem:[%s4971_s4 + $0x170] sm:$0xff]  }
 0x155   : > { %3202 = vmatpush3.bf16.msra.mxu1 %v5247_v0  ;;  %v3339_v14 = vpop.f32.mrb[15].mxu0  ;;  %3217 = vmatprep.subr.bf16.mxu0 %v5250_v17  ;;  %v3549_v40 = vld [vmem:[%s4971_s4 + $0x1d0] sm:$0xff]   ;;  %v3552_v17 = vld [vmem:[%s4971_s4 + $0x178] sm:$0xff]  }
 0x156   : > { %3203 = vmatprep.subr.bf16.mxu1 %v5249_v15  ;;  %v2199_v13 = vld [vmem:[%s4659_s18 + $0x10] sm:$0xff] }
 0x157   : > { %v3550_v14 = vld [vmem:[%s4971_s4 + $0x130] sm:$0xff]  }
 0x158   : > { %3218 = vmatpush3.bf16.msra.mxu0 %v5252_v19  ;;  %v3551_v15 = vld [vmem:[%s4971_s4 + $0x190] sm:$0xff]   ;;  %v3554_v19 = vld [vmem:[%s4971_s4 + $0x138] sm:$0xff]  }
 0x159   : > { %3204 = vmatpush3.bf16.msra.mxu1 %v5251_v47  ;;  %3219 = vmatprep.subr.bf16.mxu0 %v5253_v22  ;;  %v4815_v47 = vrot.slane %v2199_v13, %v3865_v41  ;;  %v3556_v22 = vld [vmem:[%s4971_s4 + $0x1e0] sm:$0xff]  }
 0x15a   : > { %3205 = vmatprep.subr.bf16.mxu1 %v3528_v20  ;;  %v3555_v20 = vld [vmem:[%s4971_s4 + $0x198] sm:$0xff]  }
 0x15c   : > { %3220 = vmatpush3.bf16.msra.mxu0 %v5254_v25  ;;  %v2254_v25 = vcombine.high %v4815_v47, %v4815_v47 }
 0x15d   : > { %3206 = vmatpush3.bf16.msra.mxu1 %v3529_v24  ;;  %3221 = vmatprep.subr.bf16.mxu0 %v5255_v26  ;;  %v3557_v24 = vld [vmem:[%s4971_s4 + $0x240] sm:$0xff]  }
 0x15e   : > { %3235 = vmatprep.subr.bf16.mxu1 %v3530_v63  ;;  %v3558_v26 = vld [vmem:[%s4971_s4 + $0x1a0] sm:$0xff]  }
 0x15f   : > { %v3559_v63 = vld [vmem:[%s4971_s4 + $0x200] sm:$0xff]  }
 0x160   : > { %2311 = vmatmul.mubr.bf16.vlgmr.msra.gmra.mrb[40].mxu1 %v4669_v57  ;;  %3222 = vmatpush3.bf16.msra.mxu0 %v5256_v10  ;;  %v3533_v57 = vld [vmem:[%s4971_s4 + $0x108] sm:$0xff]  }
 0x161   : > { %3236 = vmatpush3.bf16.msra.mxu1 %v3531_v55  ;;  %3223 = vmatprep.subr.bf16.mxu0 %v5257_v3  ;;  %v3561_v10 = vld [vmem:[%s4971_s4 + $0x248] sm:$0xff]  }
 0x162   : > { %3237 = vmatprep.subr.bf16.mxu1 %v3532_v36  ;;  %2390 = vmatprep.mubr.bf16.mxu1 %v2237_v61  ;;  %v3560_v61 = vld [vmem:[%s4971_s4 + $0x1e8] sm:$0xff]  }
 0x163   : > { %v2933_v11 = vpop.f32.mrb[12].mxu1  ;;  %v3562_v36 = vld [vmem:[%s4971_s4 + $0x1a8] sm:$0xff]  }
 0x164   : > { %v2934_v12 = vpop.f32.mrb[13].mxu1  ;;  %3224 = vmatpush3.bf16.msra.mxu0 %v5258_v21  ;;  %v3564_v21 = vld [vmem:[%s4971_s4 + $0x1f0] sm:$0xff]  }
 0x165   : > { %3238 = vmatpush3.bf16.msra.mxu1 %v3533_v57  ;;  %v2935_v9 = vadd.f32 %v2934_v12, %v2933_v11  ;;  %v2936_v5 = vpop.f32.mrb[14].mxu1  ;;  %3225 = vmatprep.subr.bf16.mxu0 %v5259_v16  ;;  %v3563_v11 = vld [vmem:[%s4971_s4 + $0x208] sm:$0xff]   ;;  %v3565_v57 = vld [vmem:[%s4971_s4 + $0x250] sm:$0xff]   ;;  %v2239_v16 = vcombine.high %v2199_v13, %v2199_v13 }
 0x166   : > { %3239 = vmatprep.subr.bf16.mxu1 %v3534_v4  ;;  %v2937_v2 = vpop.f32.mrb[15].mxu1  ;;  %v3566_v4 = vld [vmem:[%s4971_s4 + $0x1b0] sm:$0xff]  }
 0x167   : > { %v3567_v2 = vld [vmem:[%s4971_s4 + $0x210] sm:$0xff]  }
 0x168   : > { %3226 = vmatpush3.bf16.msra.mxu0 %v4585_v6  ;;  %v3538_v6 = vld [vmem:[%s4971_s4 + $0xb8] sm:$0xff]  }
 0x169   : > { %3240 = vmatpush3.bf16.msra.mxu1 %v3535_v30  ;;  %3227 = vmatprep.subr.bf16.mxu0 %v3536_v31  ;;  %v3569_v30 = vld [vmem:[%s4971_s4 + $0x258] sm:$0xff]   ;;  %v4869_v31 = vrot.slane %v2239_v16, %v3865_v41  ;;  %v3573_v41 = vld [vmem:[%s4971_s4 + $0x2c0] sm:$0xff]  }
 0x16a   : > { %3241 = vmatprep.subr.bf16.mxu1 %v3537_v32  ;;  %v3570_v32 = vld [vmem:[%s4971_s4 + $0x1b8] sm:$0xff]  }
 0x16c   : > { %3228 = vmatpush3.bf16.msra.mxu0 %v3538_v6  ;;  %v3571_v6 = vld [vmem:[%s4971_s4 + $0x218] sm:$0xff]  }
 0x16d   : > { %3242 = vmatpush3.bf16.msra.mxu1 %v3539_v38  ;;  %3257 = vmatprep.subr.bf16.mxu0 %v3541_v7  ;;  %v3572_v38 = vld [vmem:[%s4971_s4 + $0x260] sm:$0xff]  }
 0x16e   : > { %3243 = vmatprep.subr.bf16.mxu1 %v3540_v44  ;;  %v2255_v44 = vcombine.high %v4869_v31, %v4869_v31  ;;  %v3574_v7 = vld [vmem:[%s4971_s4 + $0x220] sm:$0xff]  }
 0x16f   : > { %2351 = vmatmul.mubr.bf16.vlgmr.msra.gmra.mrb[44].mxu0 %v4692_v48 }
 0x170   : > { %3258 = vmatpush3.bf16.msra.mxu0 %v3543_v51  ;;  %2430 = vmatprep.mubr.bf16.mxu0 %v2238_v45  ;;  %v3575_v45 = vld [vmem:[%s4971_s4 + $0x280] sm:$0xff]   ;;  %v3577_v51 = vld [vmem:[%s4971_s4 + $0x2c8] sm:$0xff]  }
 0x171   : > { %3244 = vmatpush3.bf16.msra.mxu1 %v3542_v50  ;;  %3259 = vmatprep.subr.bf16.mxu0 %v3545_v53  ;;  %v3576_v50 = vld [vmem:[%s4971_s4 + $0x268] sm:$0xff]  }
 0x172   : > { %3245 = vmatprep.subr.bf16.mxu1 %v3544_v52  ;;  %v2955_v48 = vpop.f32.mrb[16].mxu0 }
 0x173   : > { %v2956_v54 = vpop.f32.mrb[17].mxu0 }
 0x174   : > { %v2957_v56 = vadd.f32 %v2956_v54, %v2955_v48  ;;  %v2958_v58 = vpop.f32.mrb[18].mxu0  ;;  %3260 = vmatpush3.bf16.msra.mxu0 %v3547_v62  ;;  %v3578_v54 = vld [vmem:[%s4971_s4 + $0x228] sm:$0xff]  }
 0x175   : > { %3246 = vmatpush3.bf16.msra.mxu1 %v3546_v60  ;;  %v2959_v28 = vpop.f32.mrb[19].mxu0  ;;  %3261 = vmatprep.subr.bf16.mxu0 %v3549_v40  ;;  %v3580_v60 = vld [vmem:[%s4971_s4 + $0x2d0] sm:$0xff]  }
 0x176   : > { %3247 = vmatprep.subr.bf16.mxu1 %v3548_v37  ;;  %v1629_v0 = vadd.f32 %v2957_v56, %v2935_v9  ;;  %v3579_v56 = vld [vmem:[%s4971_s4 + $0x288] sm:$0xff]   ;;  %v3581_v28 = vld [vmem:[%s4971_s4 + $0x290] sm:$0xff]   ;;  %v3582_v37 = vld [vmem:[%s4971_s4 + $0x2d8] sm:$0xff]  }
 0x178   : > { %3262 = vmatpush3.bf16.msra.mxu0 %v3551_v15  ;;  %v3588_v15 = vld [vmem:[%s4971_s4 + $0x2f0] sm:$0xff]  }
 0x179   : > { %3248 = vmatpush3.bf16.msra.mxu1 %v3550_v14  ;;  %3263 = vmatprep.subr.bf16.mxu0 %v3553_v18  ;;  %v3587_v14 = vld [vmem:[%s4971_s4 + $0x2a8] sm:$0xff]  }
 0x17a   : > { %3249 = vmatprep.subr.bf16.mxu1 %v3552_v17 }
 0x17c   : > { %3264 = vmatpush3.bf16.msra.mxu0 %v3555_v20 }
 0x17d   : > { %3250 = vmatpush3.bf16.msra.mxu1 %v3554_v19  ;;  %3265 = vmatprep.subr.bf16.mxu0 %v3556_v22  ;;  %v2775_v19 = vld.sshfl [vmem:[%s4659_s18 + $0x18] sm:$0x3 pattern:$0x76325410] }
 0x17e   : > { %3279 = vmatprep.subr.bf16.mxu1 %v3557_v24 }
 0x180   : > { %2391 = vmatmul.mubr.bf16.vlgmr.msra.gmra.mrb[44].mxu1 %v4720_v23  ;;  %3266 = vmatpush3.bf16.msra.mxu0 %v3558_v26 }
 0x181   : > { %3280 = vmatpush3.bf16.msra.mxu1 %v3559_v63  ;;  %3267 = vmatprep.subr.bf16.mxu0 %v3560_v61 }
 0x182   : > { %3281 = vmatprep.subr.bf16.mxu1 %v3561_v10  ;;  %2470 = vmatprep.mubr.bf16.mxu1 %v2254_v25 }
 0x183   : > { %v2977_v23 = vpop.f32.mrb[16].mxu1 }
 0x184   : > { %v2978_v55 = vpop.f32.mrb[17].mxu1  ;;  %3268 = vmatpush3.bf16.msra.mxu0 %v3562_v36 }
 0x185   : > { %v2979_v3 = vadd.f32 %v2978_v55, %v2977_v23  ;;  %3282 = vmatpush3.bf16.msra.mxu1 %v3563_v11  ;;  %v2980_v12 = vpop.f32.mrb[18].mxu1  ;;  %3269 = vmatprep.subr.bf16.mxu0 %v3564_v21 }
 0x186   : > { %3283 = vmatprep.subr.bf16.mxu1 %v3565_v57  ;;  %v2981_v9 = vpop.f32.mrb[19].mxu1 }
 0x187   : > { %v1669_v5 = vadd.f32 %v2979_v3, %v1629_v0 }
 0x188   : > { %3270 = vmatpush3.bf16.msra.mxu0 %v3566_v4 }
 0x189   : > { %3284 = vmatpush3.bf16.msra.mxu1 %v3567_v2  ;;  %3271 = vmatprep.subr.bf16.mxu0 %v3568_v29 }
 0x18a   : > { %3285 = vmatprep.subr.bf16.mxu1 %v3569_v30 }
 0x18c   : > { %3272 = vmatpush3.bf16.msra.mxu0 %v3570_v32 }
 0x18d   : > { %3286 = vmatpush3.bf16.msra.mxu1 %v3571_v6  ;;  %3301 = vmatprep.subr.bf16.mxu0 %v3573_v41 }
 0x18e   : > { %3287 = vmatprep.subr.bf16.mxu1 %v3572_v38 }
 0x18f   : > { %2431 = vmatmul.mubr.bf16.vlgmr.msra.gmra.mrb[48].mxu0 %v4760_v35 }
 0x190   : > { %3302 = vmatpush3.bf16.msra.mxu0 %v3575_v45  ;;  %2510 = vmatprep.mubr.bf16.mxu0 %v2255_v44 }
 0x191   : > { %3288 = vmatpush3.bf16.msra.mxu1 %v3574_v7  ;;  %3303 = vmatprep.subr.bf16.mxu0 %v3577_v51 }
 0x192   : > { %3289 = vmatprep.subr.bf16.mxu1 %v3576_v50  ;;  %v2999_v35 = vpop.f32.mrb[20].mxu0 }
 0x193   : > { %v3000_v52 = vpop.f32.mrb[21].mxu0 }
 0x194   : > { %v3001_v53 = vadd.f32 %v3000_v52, %v2999_v35  ;;  %v3002_v48 = vpop.f32.mrb[22].mxu0  ;;  %3304 = vmatpush3.bf16.msra.mxu0 %v3579_v56 }
 0x195   : > { %3290 = vmatpush3.bf16.msra.mxu1 %v3578_v54  ;;  %v3003_v58 = vpop.f32.mrb[23].mxu0  ;;  %3305 = vmatprep.subr.bf16.mxu0 %v3580_v60 }
 0x196   : > { %3291 = vmatprep.subr.bf16.mxu1 %v5224_v27  ;;  %v1709_v62 = vadd.f32 %v3001_v53, %v1669_v5  ;;  %v3583_v27 = vld [vmem:[%s4971_s4 + $0x298] sm:$0xff]  }
 0x198   : > { %3306 = vmatpush3.bf16.msra.mxu0 %v3581_v28 }
 0x199   : > { %3292 = vmatpush3.bf16.msra.mxu1 %v5225_v46  ;;  %3307 = vmatprep.subr.bf16.mxu0 %v3582_v37  ;;  %v3584_v46 = vld [vmem:[%s4971_s4 + $0x2e0] sm:$0xff]  }
 0x19a   : > { %3293 = vmatprep.subr.bf16.mxu1 %v5227_v39  ;;  %v3585_v39 = vld [vmem:[%s4971_s4 + $0x2a0] sm:$0xff]  }
 0x19c   : > { %3308 = vmatpush3.bf16.msra.mxu0 %v3583_v27 }
 0x19d   : > { %3294 = vmatpush3.bf16.msra.mxu1 %v5228_v8  ;;  %3309 = vmatprep.subr.bf16.mxu0 %v3584_v46  ;;  %v3586_v8 = vld [vmem:[%s4971_s4 + $0x2e8] sm:$0xff]  }
 0x19e   : > { %3364 = vmatprep.subr.bf16.mxu1 %v5181_v33 }
 0x1a0   : > { %2471 = vmatmul.mubr.bf16.vlgmr.msra.gmra.mrb[48].mxu1 %v4815_v47  ;;  %3310 = vmatpush3.bf16.msra.mxu0 %v3585_v39  ;;  %v3589_v47 = vld [vmem:[%s4971_s4 + $0x2b0] sm:$0xff]  }
 0x1a1   : > { %3365 = vmatpush3.bf16.msra.mxu1 %v5230_v1  ;;  %3311 = vmatprep.subr.bf16.mxu0 %v3586_v8 }
 0x1a2   : > { %3366 = vmatprep.subr.bf16.mxu1 %v5181_v33  ;;  %3372 = vmatprep.mubr.msk.bf16.mxu1 %vm3601_vm0, %v5181_v33 }
 0x1a3   : > { %v3021_v40 = vpop.f32.mrb[20].mxu1 }
 0x1a4   : > { %v3022_v0 = vpop.f32.mrb[21].mxu1  ;;  %3312 = vmatpush3.bf16.msra.mxu0 %v3587_v14 }
 0x1a5   : > { %v3023_v13 = vadd.f32 %v3022_v0, %v3021_v40  ;;  %3367 = vmatpush3.bf16.msra.mxu1 %v5233_v43  ;;  %v3024_v1 = vpop.f32.mrb[22].mxu1  ;;  %3313 = vmatprep.subr.bf16.mxu0 %v3588_v15  ;;  %v3590_v43 = vld [vmem:[%s4971_s4 + $0x2f8] sm:$0xff]  }
 0x1a6   : > { %v3025_v17 = vpop.f32.mrb[23].mxu1  ;;  %3368 = vmatprep.subr.bf16.mxu1 %v5181_v33 }
 0x1a7   : > { %v1749_v18 = vadd.f32 %v3023_v13, %v1709_v62 }
 0x1a8   : > { %3314 = vmatpush3.bf16.msra.mxu0 %v3589_v47 }
 0x1a9   : > { %3369 = vmatpush3.bf16.msra.mxu1 %v5236_v42  ;;  %3315 = vmatprep.subr.bf16.mxu0 %v3590_v43 }
 0x1aa   : > { %3370 = vmatprep.subr.bf16.mxu1 %v5181_v33 }
 0x1ac   : > { %3316 = vmatpush3.bf16.msra.mxu0 %v4247_v59 }
 0x1ad   : > { %3371 = vmatpush3.bf16.msra.mxu1 %v5239_v49 }
 0x1af   : > { %2511 = vmatmul.mubr.bf16.vlgmr.msra.gmra.mrb[52].mxu0 %v4869_v31 }
 0x1b0   : > { %3373 = vmatmul.mubr.msk.bf16.vlgmr.msra.gmra.mrb[52].mxu1 %vm1189_vm1, %v2775_v19 }
 0x1b2   : > { %v3043_v20 = vpop.f32.mrb[24].mxu0 }
 0x1b3   : > { %v1828_v22 = vpop.f32.mrb[24].mxu1  ;;  %v3044_v24 = vpop.f32.mrb[25].mxu0 }
 0x1b4   : > { %v3350_v42 = vpop.f32.mrb[25].mxu1  ;;  %v3045_v25 = vadd.f32 %v3044_v24, %v3043_v20  ;;  %v3046_v26 = vpop.f32.mrb[26].mxu0 }
 0x1b5   : > { %v1831_v63 = vpop.f32.mrb[26].mxu1  ;;  %v3047_v61 = vpop.f32.mrb[27].mxu0 }
 0x1b6   : > { %v3351_v10 = vpop.f32.mrb[27].mxu1  ;;  %v1789_v23 = vadd.f32 %v3045_v25, %v1749_v18 }
 0x1b8   : > { %v1829_v33 = vadd.f32 %v1828_v22, %v1789_v23 }
 0x1ba   : > { %v1834_v59 = vmax.f32 %v4706_v34, %v1829_v33 }
 0x1d2   : > { %v3070_v55 = vpop.f32.mrb[28].mxu0 }
 0x1d3   : > { %v3092_v49 = vpop.f32.mrb[28].mxu1  ;;  %v3071_v3 = vpop.f32.mrb[29].mxu0 }
 0x1d4   : > { %v3093_v36 = vpop.f32.mrb[29].mxu1  ;;  %v3072_v11 = vadd.f32 %v3071_v3, %v3070_v55  ;;  %v3073_v21 = vpop.f32.mrb[30].mxu0 }
 0x1d5   : > { %v3094_v12 = vadd.f32 %v3093_v36, %v3092_v49  ;;  %v3095_v57 = vpop.f32.mrb[30].mxu1  ;;  %v3074_v9 = vpop.f32.mrb[31].mxu0 }
 0x1d6   : > { %v3096_v5 = vpop.f32.mrb[31].mxu1 }
 0x1d7   : > { %v1991_v16 = vadd.f32 %v3094_v12, %v3072_v11 }
 0x1f2   : > { %v3114_v4 = vpop.f32.mrb[32].mxu0 }
 0x1f3   : > { %v3136_v2 = vpop.f32.mrb[32].mxu1  ;;  %v3115_v29 = vpop.f32.mrb[33].mxu0 }
 0x1f4   : > { %v3137_v30 = vpop.f32.mrb[33].mxu1  ;;  %v3116_v31 = vadd.f32 %v3115_v29, %v3114_v4  ;;  %v3117_v32 = vpop.f32.mrb[34].mxu0 }
 0x1f5   : > { %v3138_v6 = vadd.f32 %v3137_v30, %v3136_v2  ;;  %v3139_v38 = vpop.f32.mrb[34].mxu1  ;;  %v3118_v34 = vpop.f32.mrb[35].mxu0 }
 0x1f6   : > { %v3140_v41 = vpop.f32.mrb[35].mxu1  ;;  %v2031_v44 = vadd.f32 %v3116_v31, %v1991_v16 }
 0x1f8   : > { %v2071_v7 = vadd.f32 %v3138_v6, %v2031_v44  ;;  %v2777_v6 = vld [vmem:[%s4972_s5] ss:$0 sm:$0xff] }
 0x212   : > { %v3158_v45 = vpop.f32.mrb[36].mxu0 }
 0x213   : > { %v3180_v50 = vpop.f32.mrb[36].mxu1  ;;  %v3159_v51 = vpop.f32.mrb[37].mxu0 }
 0x214   : > { %v3181_v35 = vpop.f32.mrb[37].mxu1  ;;  %v3160_v52 = vadd.f32 %v3159_v51, %v3158_v45  ;;  %v3161_v53 = vpop.f32.mrb[38].mxu0 }
 0x215   : > { %v3182_v48 = vadd.f32 %v3181_v35, %v3180_v50  ;;  %v3183_v54 = vpop.f32.mrb[38].mxu1  ;;  %v3162_v56 = vpop.f32.mrb[39].mxu0 }
 0x216   : > { %v3184_v58 = vpop.f32.mrb[39].mxu1  ;;  %v2111_v60 = vadd.f32 %v3160_v52, %v2071_v7 }
 0x218   : > { %v2151_v62 = vadd.f32 %v3182_v48, %v2111_v60 }
 0x222   : > { %v2190_v28 = vpop.f32.mrb[40].mxu0 }
 0x223   : > { %v2191_v37 = vadd.f32 %v2190_v28, %v2151_v62  ;;  %v3362_v27 = vpop.f32.mrb[41].mxu0 }
 0x224   : > { %v2193_v46 = vpop.f32.mrb[42].mxu0 }
 0x225   : > { %v2196_v39 = vmax.f32 %v1834_v59, %v2191_v37  ;;  %v3363_v8 = vpop.f32.mrb[43].mxu0 }
 0x233   : > { %v3207_v40 = vpop.f32.mrb[40].mxu1 }
 0x234   : > { %v3208_v0 = vpop.f32.mrb[41].mxu1 }
 0x235   : > { %v3209_v13 = vadd.f32 %v3208_v0, %v3207_v40  ;;  %v3210_v14 = vpop.f32.mrb[42].mxu1 }
 0x236   : > { %v3211_v1 = vpop.f32.mrb[43].mxu1 }
 0x242   : > { %v3229_v15 = vpop.f32.mrb[44].mxu0 }
 0x243   : > { %v3230_v17 = vpop.f32.mrb[45].mxu0 }
 0x244   : > { %v3231_v18 = vadd.f32 %v3230_v17, %v3229_v15  ;;  %v3232_v47 = vpop.f32.mrb[46].mxu0 }
 0x245   : > { %v3233_v43 = vpop.f32.mrb[47].mxu0 }
 0x246   : > { %v2353_v19 = vadd.f32 %v3231_v18, %v3209_v13 }
 0x253   : > { %v3251_v20 = vpop.f32.mrb[44].mxu1 }
 0x254   : > { %v3252_v22 = vpop.f32.mrb[45].mxu1 }
 0x255   : > { %v3253_v24 = vadd.f32 %v3252_v22, %v3251_v20  ;;  %v3254_v42 = vpop.f32.mrb[46].mxu1 }
 0x256   : > { %v3255_v25 = vpop.f32.mrb[47].mxu1 }
 0x257   : > { %v2393_v26 = vadd.f32 %v3253_v24, %v2353_v19 }
 0x262   : > { %v3273_v63 = vpop.f32.mrb[48].mxu0 }
 0x263   : > { %v3274_v61 = vpop.f32.mrb[49].mxu0 }
 0x264   : > { %v3275_v10 = vadd.f32 %v3274_v61, %v3273_v63  ;;  %v3276_v23 = vpop.f32.mrb[50].mxu0 }
 0x265   : > { %v3277_v33 = vpop.f32.mrb[51].mxu0 }
 0x266   : > { %v2433_v59 = vadd.f32 %v3275_v10, %v2393_v26 }
 0x273   : > { %v3295_v55 = vpop.f32.mrb[48].mxu1 }
 0x274   : > { %v3296_v49 = vpop.f32.mrb[49].mxu1 }
 0x275   : > { %v3297_v3 = vadd.f32 %v3296_v49, %v3295_v55  ;;  %v3298_v36 = vpop.f32.mrb[50].mxu1 }
 0x276   : > { %v3299_v11 = vpop.f32.mrb[51].mxu1 }
 0x277   : > { %v2473_v12 = vadd.f32 %v3297_v3, %v2433_v59 }
 0x282   : > { %v3317_v21 = vpop.f32.mrb[52].mxu0 }
 0x283   : > { %v2552_v57 = vpop.f32.mrb[52].mxu1  ;;  %v3318_v9 = vpop.f32.mrb[53].mxu0 }
 0x284   : > { %v3374_v5 = vpop.f32.mrb[53].mxu1  ;;  %v3319_v16 = vadd.f32 %v3318_v9, %v3317_v21  ;;  %v3320_v4 = vpop.f32.mrb[54].mxu0 }
 0x285   : > { %v2555_v2 = vpop.f32.mrb[54].mxu1  ;;  %v3321_v29 = vpop.f32.mrb[55].mxu0 }
 0x286   : > { %v3375_v30 = vpop.f32.mrb[55].mxu1  ;;  %v2513_v31 = vadd.f32 %v3319_v16, %v2473_v12 }
 0x288   : > { %v2553_v32 = vadd.f32 %v2552_v57, %v2513_v31 }
 0x28a   : > { %v2558_v38 = vmax.f32 %v2196_v39, %v2553_v32 }
 0x28c   : > { %v2566_v34 = vadd.f32 %v2777_v6, %v2558_v38 }
 0x28e   : > { %v2567_v41 = vmax.f32 %v2566_v34, 0.0 }
 0x290   : > { %v2568_v44 = vpack.c.bf16 %v2567_v41, %v2567_v41 }
 0x292   : > { %2569 = vst [vmem:[%s309_s27] sm:$0x3] %v2568_v44 }
 0x293 PF: > { %s16_s21 = sadd.s32 1, %s3597_s21  }
 0x294   : > { %p13_p4 = scmp.ge.s32.totalorder %s16_s21, 4  }
 0x296   :  { %15 = sbr.rel (!%p13_p4) target bundleno = 1 (0x1), region = 83 }

// kernel: net_forward.7
= control target key start
LH: loop header
LB: loop body
LE: loop exit
PB: predicated region body
PF: predicated region fallthrough
CT: control target
= control target key end

     0   :  { %v153_v38 = vlaneseq  ;;  %v1856_v39 = vmov 1966171168   ;;  %s2405_s0 = inlined_call_operand.vmem [shape: bf16[2,512], index: 0, kind: input, shape index: {}]   ;;  %s2406_s1 = inlined_call_operand.vmem [shape: bf16[512,512], index: 1, kind: input, shape index: {}]   ;;  %s2407_s2 = inlined_call_operand.vmem [shape: f32[1,512], index: 2, kind: input, shape index: {}]   ;;  %s2408_s3 = inlined_call_operand.vmem [shape: bf16[512,2], index: 3, kind: input, shape index: {}]   ;;  %s2409_s4 = inlined_call_operand.vmem [shape: f32[1,2], index: 4, kind: input, shape index: {}]   ;;  %s2410_s5 = inlined_call_operand.hbm [shape: f32[2,2], index: 5, kind: output, shape index: {}]  }
   0x1   :  { %v1604_v0 = vld [vmem:[%s2406_s1 + $0x4] ss:$16 sps:$4 sm:$0xff]   ;;  %v1606_v1 = vld [vmem:[%s2406_s1 + $0xc] ss:$16 sps:$4 sm:$0xff]   ;;  %v1608_v2 = vld [vmem:[%s2406_s1] ss:$16 sps:$4 sm:$0xff]   ;;  %v183_v40 = vunpack.c.l.s4 %v1856_v39 }
   0x2   :  { %842 = vmatprep.subr.bf16.mxu0 %v1604_v0  ;;  %v1609_v3 = vld [vmem:[%s2406_s1 + $0x8] ss:$16 sps:$4 sm:$0xff]   ;;  %924 = vmatprep.subr.bf16.mxu1 %v1606_v1  ;;  %v1610_v4 = vld [vmem:[%s2406_s1 + $0x24] ss:$16 sps:$4 sm:$0xff]   ;;  %v1612_v5 = vld [vmem:[%s2406_s1 + $0x2c] ss:$16 sps:$4 sm:$0xff]  }
   0x3   :  { %843 = vmatpush1.bf16.msra.mxu0 %v1608_v2  ;;  %925 = vmatpush1.bf16.msra.mxu1 %v1609_v3  ;;  %v1614_v6 = vld [vmem:[%s2406_s1 + $0x20] ss:$16 sps:$4 sm:$0xff]   ;;  %v1615_v7 = vld [vmem:[%s2406_s1 + $0x28] ss:$16 sps:$4 sm:$0xff]   ;;  %v1616_v8 = vld [vmem:[%s2406_s1 + $0x44] ss:$16 sps:$4 sm:$0xff]   ;;  %v184_v46 = vunpack.c.0.s8 %v183_v40 }
   0x4   :  { %844 = vmatprep.subr.bf16.mxu0 %v1610_v4  ;;  %926 = vmatprep.subr.bf16.mxu1 %v1612_v5  ;;  %v1618_v9 = vld [vmem:[%s2406_s1 + $0x4c] ss:$16 sps:$4 sm:$0xff]   ;;  %v1620_v10 = vld [vmem:[%s2406_s1 + $0x40] ss:$16 sps:$4 sm:$0xff]   ;;  %v1621_v11 = vld [vmem:[%s2406_s1 + $0x48] ss:$16 sps:$4 sm:$0xff]  }
   0x5   :  { %v1622_v12 = vld [vmem:[%s2406_s1 + $0x64] ss:$16 sps:$4 sm:$0xff]   ;;  %v1624_v13 = vld [vmem:[%s2406_s1 + $0x6c] ss:$16 sps:$4 sm:$0xff]   ;;  %v1626_v14 = vld [vmem:[%s2406_s1 + $0x60] ss:$16 sps:$4 sm:$0xff]  }
   0x6   :  { %v1627_v15 = vld [vmem:[%s2406_s1 + $0x68] ss:$16 sps:$4 sm:$0xff]   ;;  %v1628_v16 = vld [vmem:[%s2406_s1 + $0x84] ss:$16 sps:$4 sm:$0xff]   ;;  %v1630_v17 = vld [vmem:[%s2406_s1 + $0x8c] ss:$16 sps:$4 sm:$0xff]  }
   0x7   :  { %845 = vmatpush1.bf16.msra.mxu0 %v1614_v6  ;;  %927 = vmatpush1.bf16.msra.mxu1 %v1615_v7  ;;  %v1632_v18 = vld [vmem:[%s2406_s1 + $0x80] ss:$16 sps:$4 sm:$0xff]   ;;  %v1633_v19 = vld [vmem:[%s2406_s1 + $0x88] ss:$16 sps:$4 sm:$0xff]   ;;  %v1634_v20 = vld [vmem:[%s2406_s1 + $0xa4] ss:$16 sps:$4 sm:$0xff]  }
   0x8   :  { %846 = vmatprep.subr.bf16.mxu0 %v1616_v8  ;;  %928 = vmatprep.subr.bf16.mxu1 %v1618_v9  ;;  %v1636_v21 = vld [vmem:[%s2406_s1 + $0xac] ss:$16 sps:$4 sm:$0xff]   ;;  %v1638_v22 = vld [vmem:[%s2406_s1 + $0xa0] ss:$16 sps:$4 sm:$0xff]   ;;  %v1639_v23 = vld [vmem:[%s2406_s1 + $0xa8] ss:$16 sps:$4 sm:$0xff]  }
   0x9   :  { %v1640_v24 = vld [vmem:[%s2406_s1 + $0xc4] ss:$16 sps:$4 sm:$0xff]   ;;  %v1642_v25 = vld [vmem:[%s2406_s1 + $0xcc] ss:$16 sps:$4 sm:$0xff]   ;;  %v1644_v26 = vld [vmem:[%s2406_s1 + $0xc0] ss:$16 sps:$4 sm:$0xff]  }
   0xa   :  { %v1645_v27 = vld [vmem:[%s2406_s1 + $0xc8] ss:$16 sps:$4 sm:$0xff]   ;;  %v1646_v28 = vld [vmem:[%s2406_s1 + $0xe4] ss:$16 sps:$4 sm:$0xff]   ;;  %v1648_v29 = vld [vmem:[%s2406_s1 + $0xec] ss:$16 sps:$4 sm:$0xff]  }
   0xb   :  { %847 = vmatpush1.bf16.msra.mxu0 %v1620_v10  ;;  %929 = vmatpush1.bf16.msra.mxu1 %v1621_v11  ;;  %v1650_v30 = vld [vmem:[%s2406_s1 + $0xe0] ss:$16 sps:$4 sm:$0xff]   ;;  %v1651_v31 = vld [vmem:[%s2406_s1 + $0xe8] ss:$16 sps:$4 sm:$0xff]   ;;  %v1652_v32 = vld [vmem:[%s2406_s1 + $0x104] ss:$16 sps:$4 sm:$0xff]  }
   0xc   :  { %848 = vmatprep.subr.bf16.mxu0 %v1622_v12  ;;  %930 = vmatprep.subr.bf16.mxu1 %v1624_v13  ;;  %v1654_v33 = vld [vmem:[%s2406_s1 + $0x10c] ss:$16 sps:$4 sm:$0xff]   ;;  %v1656_v34 = vld [vmem:[%s2406_s1 + $0x100] ss:$16 sps:$4 sm:$0xff]   ;;  %v1657_v35 = vld [vmem:[%s2406_s1 + $0x108] ss:$16 sps:$4 sm:$0xff]  }
   0xd   :  { %v1658_v36 = vld [vmem:[%s2406_s1 + $0x124] ss:$16 sps:$4 sm:$0xff]   ;;  %v1660_v37 = vld [vmem:[%s2406_s1 + $0x12c] ss:$16 sps:$4 sm:$0xff]   ;;  %v1662_v41 = vld [vmem:[%s2406_s1 + $0x120] ss:$16 sps:$4 sm:$0xff]  }
   0xe   :  { %v1663_v42 = vld [vmem:[%s2406_s1 + $0x128] ss:$16 sps:$4 sm:$0xff]   ;;  %v1664_v43 = vld [vmem:[%s2406_s1 + $0x144] ss:$16 sps:$4 sm:$0xff]   ;;  %v1666_v44 = vld [vmem:[%s2406_s1 + $0x14c] ss:$16 sps:$4 sm:$0xff]  }
   0xf   :  { %849 = vmatpush1.bf16.msra.mxu0 %v1626_v14  ;;  %931 = vmatpush1.bf16.msra.mxu1 %v1627_v15  ;;  %v2014_v45 = vshrl.u32 %v153_v38, 7  ;;  %v1668_v47 = vld [vmem:[%s2406_s1 + $0x140] ss:$16 sps:$4 sm:$0xff]   ;;  %v1669_v48 = vld [vmem:[%s2406_s1 + $0x148] ss:$16 sps:$4 sm:$0xff]  }
  0x10   :  { %850 = vmatprep.subr.bf16.mxu0 %v1628_v16  ;;  %932 = vmatprep.subr.bf16.mxu1 %v1630_v17  ;;  %v1670_v49 = vld [vmem:[%s2406_s1 + $0x164] ss:$16 sps:$4 sm:$0xff]   ;;  %v1672_v50 = vld [vmem:[%s2406_s1 + $0x16c] ss:$16 sps:$4 sm:$0xff]   ;;  %v1674_v53 = vld [vmem:[%s2406_s1 + $0x160] ss:$16 sps:$4 sm:$0xff]  }
  0x11   :  { %v187_v51 = vsub.s32 %v184_v46, %v2014_v45  ;;  %v1384_v52 = vld.sshfl [vmem:[%s2405_s0] sm:$0x33 pattern:$0x75316420]  ;;  %v1675_v54 = vld [vmem:[%s2406_s1 + $0x168] ss:$16 sps:$4 sm:$0xff]  }
  0x12   :  { %v181_v55 = vcombine.high %v1384_v52, %v1384_v52  ;;  %v1676_v56 = vld [vmem:[%s2406_s1 + $0x184] ss:$16 sps:$4 sm:$0xff]   ;;  %v1678_v57 = vld [vmem:[%s2406_s1 + $0x18c] ss:$16 sps:$4 sm:$0xff]   ;;  %v1680_v59 = vld [vmem:[%s2406_s1 + $0x180] ss:$16 sps:$4 sm:$0xff]  }
  0x13   :  { %851 = vmatpush1.bf16.msra.mxu0 %v1632_v18  ;;  %933 = vmatpush1.bf16.msra.mxu1 %v1633_v19  ;;  %v1681_v60 = vld [vmem:[%s2406_s1 + $0x188] ss:$16 sps:$4 sm:$0xff]   ;;  %v1682_v61 = vld [vmem:[%s2406_s1 + $0x1a4] ss:$16 sps:$4 sm:$0xff]   ;;  %v1684_v62 = vld [vmem:[%s2406_s1 + $0x1ac] ss:$16 sps:$4 sm:$0xff]   ;;  %v2095_v12 = vrot.slane %v1384_v52, %v187_v51 }
  0x14   :  { %852 = vmatprep.subr.bf16.mxu0 %v1634_v20  ;;  %934 = vmatprep.subr.bf16.mxu1 %v1636_v21  ;;  %v195_v58 = vrot.slane %v181_v55, %v187_v51  ;;  %v1686_v63 = vld [vmem:[%s2406_s1 + $0x1a0] ss:$16 sps:$4 sm:$0xff]   ;;  %v1687_v0 = vld [vmem:[%s2406_s1 + $0x1a8] ss:$16 sps:$4 sm:$0xff]   ;;  %v1688_v1 = vld [vmem:[%s2406_s1 + $0x1c4] ss:$16 sps:$4 sm:$0xff]  }
  0x15   :  { %v1690_v2 = vld [vmem:[%s2406_s1 + $0x1cc] ss:$16 sps:$4 sm:$0xff]   ;;  %v1692_v3 = vld [vmem:[%s2406_s1 + $0x1c0] ss:$16 sps:$4 sm:$0xff]   ;;  %v1693_v4 = vld [vmem:[%s2406_s1 + $0x1c8] ss:$16 sps:$4 sm:$0xff]  }
  0x16   :  { %874 = vmatprep.mubr.bf16.mxu0 %v195_v58  ;;  %956 = vmatprep.mubr.bf16.mxu1 %v195_v58  ;;  %v1694_v5 = vld [vmem:[%s2406_s1 + $0x1e4] ss:$16 sps:$4 sm:$0xff]   ;;  %v1696_v6 = vld [vmem:[%s2406_s1 + $0x1ec] ss:$16 sps:$4 sm:$0xff]   ;;  %v1698_v7 = vld [vmem:[%s2406_s1 + $0x1e0] ss:$16 sps:$4 sm:$0xff]   ;;  %v197_v16 = vcombine.high %v195_v58, %v195_v58 }
  0x17   :  { %853 = vmatpush1.bf16.msra.mxu0 %v1638_v22  ;;  %935 = vmatpush1.bf16.msra.mxu1 %v1639_v23  ;;  %v1699_v8 = vld [vmem:[%s2406_s1 + $0x1e8] ss:$16 sps:$4 sm:$0xff]   ;;  %v1702_v9 = vld [vmem:[%s2406_s1 + $0x204] ss:$16 sps:$4 sm:$0xff]   ;;  %v1705_v10 = vld [vmem:[%s2406_s1 + $0x20c] ss:$16 sps:$4 sm:$0xff]  }
  0x18   :  { %854 = vmatprep.subr.bf16.mxu0 %v1640_v24  ;;  %936 = vmatprep.subr.bf16.mxu1 %v1642_v25  ;;  %v1700_v11 = vld [vmem:[%s2406_s1 + $0x200] ss:$16 sps:$4 sm:$0xff]   ;;  %v1703_v13 = vld [vmem:[%s2406_s1 + $0x208] ss:$16 sps:$4 sm:$0xff]   ;;  %v1708_v14 = vld [vmem:[%s2406_s1 + $0x224] ss:$16 sps:$4 sm:$0xff]  }
  0x19   :  { %v1711_v15 = vld [vmem:[%s2406_s1 + $0x22c] ss:$16 sps:$4 sm:$0xff]   ;;  %v1706_v17 = vld [vmem:[%s2406_s1 + $0x220] ss:$16 sps:$4 sm:$0xff]   ;;  %v1709_v18 = vld [vmem:[%s2406_s1 + $0x228] ss:$16 sps:$4 sm:$0xff]  }
  0x1a   :  { %v1714_v19 = vld [vmem:[%s2406_s1 + $0x244] ss:$16 sps:$4 sm:$0xff]   ;;  %v1717_v20 = vld [vmem:[%s2406_s1 + $0x24c] ss:$16 sps:$4 sm:$0xff]   ;;  %v1712_v21 = vld [vmem:[%s2406_s1 + $0x240] ss:$16 sps:$4 sm:$0xff]  }
  0x1b   :  { %855 = vmatpush1.bf16.msra.mxu0 %v1644_v26  ;;  %937 = vmatpush1.bf16.msra.mxu1 %v1645_v27  ;;  %v1715_v22 = vld [vmem:[%s2406_s1 + $0x248] ss:$16 sps:$4 sm:$0xff]   ;;  %v1720_v23 = vld [vmem:[%s2406_s1 + $0x264] ss:$16 sps:$4 sm:$0xff]   ;;  %v1723_v24 = vld [vmem:[%s2406_s1 + $0x26c] ss:$16 sps:$4 sm:$0xff]  }
  0x1c   :  { %856 = vmatprep.subr.bf16.mxu0 %v1646_v28  ;;  %938 = vmatprep.subr.bf16.mxu1 %v1648_v29  ;;  %v1718_v25 = vld [vmem:[%s2406_s1 + $0x260] ss:$16 sps:$4 sm:$0xff]   ;;  %v1721_v26 = vld [vmem:[%s2406_s1 + $0x268] ss:$16 sps:$4 sm:$0xff]   ;;  %v1726_v27 = vld [vmem:[%s2406_s1 + $0x284] ss:$16 sps:$4 sm:$0xff]  }
  0x1d   :  { %v1729_v28 = vld [vmem:[%s2406_s1 + $0x28c] ss:$16 sps:$4 sm:$0xff]   ;;  %v1724_v29 = vld [vmem:[%s2406_s1 + $0x280] ss:$16 sps:$4 sm:$0xff]   ;;  %v1739_v38 = vld [vmem:[%s2406_s1 + $0x2c8] ss:$16 sps:$4 sm:$0xff]  }
  0x1e   :  { %v1744_v39 = vld [vmem:[%s2406_s1 + $0x2e4] ss:$16 sps:$4 sm:$0xff]   ;;  %v1747_v40 = vld [vmem:[%s2406_s1 + $0x2ec] ss:$16 sps:$4 sm:$0xff]   ;;  %v1748_v46 = vld [vmem:[%s2406_s1 + $0x300] ss:$16 sps:$4 sm:$0xff]  }
  0x1f   :  { %857 = vmatpush1.bf16.msra.mxu0 %v1650_v30  ;;  %939 = vmatpush1.bf16.msra.mxu1 %v1651_v31  ;;  %v1727_v30 = vld [vmem:[%s2406_s1 + $0x288] ss:$16 sps:$4 sm:$0xff]   ;;  %v1732_v31 = vld [vmem:[%s2406_s1 + $0x2a4] ss:$16 sps:$4 sm:$0xff]   ;;  %v1766_v58 = vld [vmem:[%s2406_s1 + $0x360] ss:$16 sps:$4 sm:$0xff]  }
  0x20   :  { %858 = vmatprep.subr.bf16.mxu0 %v1652_v32  ;;  %940 = vmatprep.subr.bf16.mxu1 %v1654_v33  ;;  %v1735_v32 = vld [vmem:[%s2406_s1 + $0x2ac] ss:$16 sps:$4 sm:$0xff]   ;;  %v1730_v33 = vld [vmem:[%s2406_s1 + $0x2a0] ss:$16 sps:$4 sm:$0xff]   ;;  %v1757_v51 = vld [vmem:[%s2406_s1 + $0x328] ss:$16 sps:$4 sm:$0xff]  }
  0x21   :  { %v1762_v52 = vld [vmem:[%s2406_s1 + $0x344] ss:$16 sps:$4 sm:$0xff]   ;;  %v1763_v55 = vld [vmem:[%s2406_s1 + $0x348] ss:$16 sps:$4 sm:$0xff]  }
  0x23   :  { %859 = vmatpush1.bf16.msra.mxu0 %v1656_v34  ;;  %941 = vmatpush1.bf16.msra.mxu1 %v1657_v35  ;;  %v1733_v34 = vld [vmem:[%s2406_s1 + $0x2a8] ss:$16 sps:$4 sm:$0xff]   ;;  %v1738_v35 = vld [vmem:[%s2406_s1 + $0x2c4] ss:$16 sps:$4 sm:$0xff]  }
  0x24   :  { %860 = vmatprep.subr.bf16.mxu0 %v1658_v36  ;;  %942 = vmatprep.subr.bf16.mxu1 %v1660_v37  ;;  %v1741_v36 = vld [vmem:[%s2406_s1 + $0x2cc] ss:$16 sps:$4 sm:$0xff]   ;;  %v1736_v37 = vld [vmem:[%s2406_s1 + $0x2c0] ss:$16 sps:$4 sm:$0xff]  }
  0x27   :  { %861 = vmatpush1.bf16.msra.mxu0 %v1662_v41  ;;  %943 = vmatpush1.bf16.msra.mxu1 %v1663_v42  ;;  %v1742_v41 = vld [vmem:[%s2406_s1 + $0x2e0] ss:$16 sps:$4 sm:$0xff]   ;;  %v1745_v42 = vld [vmem:[%s2406_s1 + $0x2e8] ss:$16 sps:$4 sm:$0xff]  }
  0x28   :  { %862 = vmatprep.subr.bf16.mxu0 %v1664_v43  ;;  %944 = vmatprep.subr.bf16.mxu1 %v1666_v44  ;;  %v1750_v43 = vld [vmem:[%s2406_s1 + $0x304] ss:$16 sps:$4 sm:$0xff]   ;;  %v1753_v44 = vld [vmem:[%s2406_s1 + $0x30c] ss:$16 sps:$4 sm:$0xff]  }
  0x2b   :  { %863 = vmatpush1.bf16.msra.mxu0 %v1668_v47  ;;  %945 = vmatpush1.bf16.msra.mxu1 %v1669_v48  ;;  %v1751_v47 = vld [vmem:[%s2406_s1 + $0x308] ss:$16 sps:$4 sm:$0xff]   ;;  %v1756_v48 = vld [vmem:[%s2406_s1 + $0x324] ss:$16 sps:$4 sm:$0xff]  }
  0x2c   :  { %864 = vmatprep.subr.bf16.mxu0 %v1670_v49  ;;  %946 = vmatprep.subr.bf16.mxu1 %v1672_v50  ;;  %v1759_v49 = vld [vmem:[%s2406_s1 + $0x32c] ss:$16 sps:$4 sm:$0xff]   ;;  %v1754_v50 = vld [vmem:[%s2406_s1 + $0x320] ss:$16 sps:$4 sm:$0xff]  }
  0x2f   :  { %865 = vmatpush1.bf16.msra.mxu0 %v1674_v53  ;;  %947 = vmatpush1.bf16.msra.mxu1 %v1675_v54  ;;  %v1765_v53 = vld [vmem:[%s2406_s1 + $0x34c] ss:$16 sps:$4 sm:$0xff]   ;;  %v1760_v54 = vld [vmem:[%s2406_s1 + $0x340] ss:$16 sps:$4 sm:$0xff]  }
  0x30   :  { %866 = vmatprep.subr.bf16.mxu0 %v1676_v56  ;;  %948 = vmatprep.subr.bf16.mxu1 %v1678_v57  ;;  %v1768_v56 = vld [vmem:[%s2406_s1 + $0x364] ss:$16 sps:$4 sm:$0xff]   ;;  %v1771_v57 = vld [vmem:[%s2406_s1 + $0x36c] ss:$16 sps:$4 sm:$0xff]  }
  0x33   :  { %867 = vmatpush1.bf16.msra.mxu0 %v1680_v59  ;;  %949 = vmatpush1.bf16.msra.mxu1 %v1681_v60  ;;  %v1769_v59 = vld [vmem:[%s2406_s1 + $0x368] ss:$16 sps:$4 sm:$0xff]   ;;  %v1774_v60 = vld [vmem:[%s2406_s1 + $0x384] ss:$16 sps:$4 sm:$0xff]  }
  0x34   :  { %868 = vmatprep.subr.bf16.mxu0 %v1682_v61  ;;  %950 = vmatprep.subr.bf16.mxu1 %v1684_v62  ;;  %v1777_v61 = vld [vmem:[%s2406_s1 + $0x38c] ss:$16 sps:$4 sm:$0xff]   ;;  %v1772_v62 = vld [vmem:[%s2406_s1 + $0x380] ss:$16 sps:$4 sm:$0xff]  }
  0x37   :  { %869 = vmatpush1.bf16.msra.mxu0 %v1686_v63  ;;  %951 = vmatpush1.bf16.msra.mxu1 %v1687_v0  ;;  %v1775_v63 = vld [vmem:[%s2406_s1 + $0x388] ss:$16 sps:$4 sm:$0xff]   ;;  %v1780_v0 = vld [vmem:[%s2406_s1 + $0x3a4] ss:$16 sps:$4 sm:$0xff]  }
  0x38   :  { %870 = vmatprep.subr.bf16.mxu0 %v1688_v1  ;;  %952 = vmatprep.subr.bf16.mxu1 %v1690_v2  ;;  %v1783_v1 = vld [vmem:[%s2406_s1 + $0x3ac] ss:$16 sps:$4 sm:$0xff]  }
  0x3b   :  { %871 = vmatpush1.bf16.msra.mxu0 %v1692_v3  ;;  %953 = vmatpush1.bf16.msra.mxu1 %v1693_v4 }
  0x3c   :  { %872 = vmatprep.subr.bf16.mxu0 %v1694_v5  ;;  %954 = vmatprep.subr.bf16.mxu1 %v1696_v6 }
  0x3f   :  { %873 = vmatpush1.bf16.msra.mxu0 %v1698_v7  ;;  %955 = vmatpush1.bf16.msra.mxu1 %v1699_v8 }
  0x40   :  { %883 = vmatprep.subr.bf16.mxu0 %v1702_v9  ;;  %965 = vmatprep.subr.bf16.mxu1 %v1705_v10 }
  0x42   :  { %875 = vmatmul.mubr.bf16.vlgmr.msra.gmra.mrb[0].mxu0 %v2095_v12  ;;  %957 = vmatmul.mubr.bf16.vlgmr.msra.gmra.mrb[0].mxu1 %v2095_v12 }
  0x43   :  { %884 = vmatpush1.bf16.msra.mxu0 %v1700_v11  ;;  %966 = vmatpush1.bf16.msra.mxu1 %v1703_v13 }
  0x44   :  { %885 = vmatprep.subr.bf16.mxu0 %v1708_v14  ;;  %967 = vmatprep.subr.bf16.mxu1 %v1711_v15 }
  0x45   :  { %915 = vmatprep.mubr.bf16.mxu0 %v197_v16  ;;  %997 = vmatprep.mubr.bf16.mxu1 %v197_v16 }
  0x47   :  { %886 = vmatpush1.bf16.msra.mxu0 %v1706_v17  ;;  %968 = vmatpush1.bf16.msra.mxu1 %v1709_v18 }
  0x48   :  { %887 = vmatprep.subr.bf16.mxu0 %v1714_v19  ;;  %969 = vmatprep.subr.bf16.mxu1 %v1717_v20 }
  0x4b   :  { %888 = vmatpush1.bf16.msra.mxu0 %v1712_v21  ;;  %970 = vmatpush1.bf16.msra.mxu1 %v1715_v22 }
  0x4c   :  { %889 = vmatprep.subr.bf16.mxu0 %v1720_v23  ;;  %971 = vmatprep.subr.bf16.mxu1 %v1723_v24 }
  0x4f   :  { %890 = vmatpush1.bf16.msra.mxu0 %v1718_v25  ;;  %972 = vmatpush1.bf16.msra.mxu1 %v1721_v26 }
  0x50   :  { %891 = vmatprep.subr.bf16.mxu0 %v1726_v27  ;;  %973 = vmatprep.subr.bf16.mxu1 %v1729_v28 }
  0x53   :  { %892 = vmatpush1.bf16.msra.mxu0 %v1724_v29  ;;  %974 = vmatpush1.bf16.msra.mxu1 %v1727_v30 }
  0x54   :  { %893 = vmatprep.subr.bf16.mxu0 %v1732_v31  ;;  %975 = vmatprep.subr.bf16.mxu1 %v1735_v32 }
  0x57   :  { %894 = vmatpush1.bf16.msra.mxu0 %v1730_v33  ;;  %976 = vmatpush1.bf16.msra.mxu1 %v1733_v34 }
  0x58   :  { %895 = vmatprep.subr.bf16.mxu0 %v1738_v35  ;;  %977 = vmatprep.subr.bf16.mxu1 %v1741_v36 }
  0x5b   :  { %896 = vmatpush1.bf16.msra.mxu0 %v1736_v37  ;;  %978 = vmatpush1.bf16.msra.mxu1 %v1739_v38 }
  0x5c   :  { %897 = vmatprep.subr.bf16.mxu0 %v1744_v39  ;;  %979 = vmatprep.subr.bf16.mxu1 %v1747_v40 }
  0x5f   :  { %898 = vmatpush1.bf16.msra.mxu0 %v1742_v41  ;;  %980 = vmatpush1.bf16.msra.mxu1 %v1745_v42 }
  0x60   :  { %899 = vmatprep.subr.bf16.mxu0 %v1750_v43  ;;  %981 = vmatprep.subr.bf16.mxu1 %v1753_v44 }
  0x63   :  { %900 = vmatpush1.bf16.msra.mxu0 %v1748_v46  ;;  %982 = vmatpush1.bf16.msra.mxu1 %v1751_v47 }
  0x64   :  { %901 = vmatprep.subr.bf16.mxu0 %v1756_v48  ;;  %983 = vmatprep.subr.bf16.mxu1 %v1759_v49 }
  0x67   :  { %902 = vmatpush1.bf16.msra.mxu0 %v1754_v50  ;;  %984 = vmatpush1.bf16.msra.mxu1 %v1757_v51 }
  0x68   :  { %903 = vmatprep.subr.bf16.mxu0 %v1762_v52  ;;  %985 = vmatprep.subr.bf16.mxu1 %v1765_v53 }
  0x6b   :  { %904 = vmatpush1.bf16.msra.mxu0 %v1760_v54  ;;  %986 = vmatpush1.bf16.msra.mxu1 %v1763_v55 }
  0x6c   :  { %905 = vmatprep.subr.bf16.mxu0 %v1768_v56  ;;  %987 = vmatprep.subr.bf16.mxu1 %v1771_v57 }
  0x6f   :  { %906 = vmatpush1.bf16.msra.mxu0 %v1766_v58  ;;  %988 = vmatpush1.bf16.msra.mxu1 %v1769_v59 }
  0x70   :  { %907 = vmatprep.subr.bf16.mxu0 %v1774_v60  ;;  %989 = vmatprep.subr.bf16.mxu1 %v1777_v61 }
  0x71   :  { %10 = vsyncpa [#allocation3], 0  ;;  %v1778_v2 = vld [vmem:[%s2406_s1 + $0x3a0] ss:$16 sps:$4 sm:$0xff]   ;;  %v1781_v3 = vld [vmem:[%s2406_s1 + $0x3a8] ss:$16 sps:$4 sm:$0xff]   ;;  %v196_v15 = vcombine.high %v2095_v12, %v2095_v12 }
  0x72   :  { %v1786_v4 = vld [vmem:[%s2406_s1 + $0x3c4] ss:$16 sps:$4 sm:$0xff]   ;;  %v1789_v5 = vld [vmem:[%s2406_s1 + $0x3cc] ss:$16 sps:$4 sm:$0xff]   ;;  %v1784_v6 = vld [vmem:[%s2406_s1 + $0x3c0] ss:$16 sps:$4 sm:$0xff]  }
  0x73   :  { %908 = vmatpush1.bf16.msra.mxu0 %v1772_v62  ;;  %990 = vmatpush1.bf16.msra.mxu1 %v1775_v63  ;;  %v1787_v7 = vld [vmem:[%s2406_s1 + $0x3c8] ss:$16 sps:$4 sm:$0xff]   ;;  %v1792_v8 = vld [vmem:[%s2406_s1 + $0x3e4] ss:$16 sps:$4 sm:$0xff]   ;;  %v1795_v9 = vld [vmem:[%s2406_s1 + $0x3ec] ss:$16 sps:$4 sm:$0xff]  }
  0x74   :  { %909 = vmatprep.subr.bf16.mxu0 %v1780_v0  ;;  %991 = vmatprep.subr.bf16.mxu1 %v1783_v1  ;;  %v1790_v10 = vld [vmem:[%s2406_s1 + $0x3e0] ss:$16 sps:$4 sm:$0xff]   ;;  %v1793_v11 = vld [vmem:[%s2406_s1 + $0x3e8] ss:$16 sps:$4 sm:$0xff]   ;;  %v155_v46 = vsub.s32 0, %v2014_v45  ;;  %v163_v47 = vsub.s32 2, %v2014_v45 }
  0x75   :  { %v1796_v13 = vld [vmem:[%s2408_s3 + $0x40] sm:$0xff]   ;;  %v1800_v18 = vld [vmem:[%s2408_s3 + $0x48] sm:$0xff]   ;;  %v1804_v21 = vld [vmem:[%s2408_s3 + $0x50] sm:$0xff]   ;;  %v159_v49 = vsub.s32 1, %v2014_v45  ;;  %v167_v50 = vsub.s32 3, %v2014_v45  ;;  %vm1357_vm0 = vcmask 9216  }
  0x76   :  { %v1797_v14 = vld [vmem:[%s2408_s3 + $0xc0] sm:$0xff]   ;;  %v1801_v12 = vld [vmem:[%s2408_s3 + $0xc8] sm:$0xff]   ;;  %v1805_v22 = vld [vmem:[%s2408_s3 + $0xd0] sm:$0xff]  }
  0x77   :  { %910 = vmatpush1.bf16.msra.mxu0 %v1778_v2  ;;  %992 = vmatpush1.bf16.msra.mxu1 %v1781_v3  ;;  %v1798_v16 = vld [vmem:[%s2408_s3] sm:$0xff]   ;;  %v1802_v19 = vld [vmem:[%s2408_s3 + $0x8] sm:$0xff]   ;;  %v1806_v23 = vld [vmem:[%s2408_s3 + $0x10] sm:$0xff]  }
  0x78   :  { %911 = vmatprep.subr.bf16.mxu0 %v1786_v4  ;;  %993 = vmatprep.subr.bf16.mxu1 %v1789_v5  ;;  %v1799_v17 = vld [vmem:[%s2408_s3 + $0x80] sm:$0xff]   ;;  %v1803_v20 = vld [vmem:[%s2408_s3 + $0x88] sm:$0xff]   ;;  %v1807_v24 = vld [vmem:[%s2408_s3 + $0x90] sm:$0xff]  }
  0x79   :  { %v1808_v25 = vld [vmem:[%s2408_s3 + $0x58] sm:$0xff]   ;;  %v1812_v29 = vld [vmem:[%s2408_s3 + $0x60] sm:$0xff]   ;;  %v1816_v33 = vld [vmem:[%s2408_s3 + $0x68] sm:$0xff]  }
  0x7a   :  { %v1809_v26 = vld [vmem:[%s2408_s3 + $0xd8] sm:$0xff]   ;;  %v1813_v30 = vld [vmem:[%s2408_s3 + $0xe0] sm:$0xff]   ;;  %v1817_v34 = vld [vmem:[%s2408_s3 + $0xe8] sm:$0xff]  }
  0x7b   :  { %912 = vmatpush1.bf16.msra.mxu0 %v1784_v6  ;;  %994 = vmatpush1.bf16.msra.mxu1 %v1787_v7  ;;  %v1810_v27 = vld [vmem:[%s2408_s3 + $0x18] sm:$0xff]   ;;  %v1814_v31 = vld [vmem:[%s2408_s3 + $0x20] sm:$0xff]   ;;  %v1818_v35 = vld [vmem:[%s2408_s3 + $0x28] sm:$0xff]  }
  0x7c   :  { %913 = vmatprep.subr.bf16.mxu0 %v1792_v8  ;;  %995 = vmatprep.subr.bf16.mxu1 %v1795_v9  ;;  %v1811_v28 = vld [vmem:[%s2408_s3 + $0x98] sm:$0xff]   ;;  %v1815_v32 = vld [vmem:[%s2408_s3 + $0xa0] sm:$0xff]   ;;  %v1819_v36 = vld [vmem:[%s2408_s3 + $0xa8] sm:$0xff]  }
  0x7d   :  { %v1820_v37 = vld [vmem:[%s2408_s3 + $0x70] sm:$0xff]   ;;  %v1824_v41 = vld [vmem:[%s2408_s3 + $0x78] sm:$0xff]   ;;  %v151_v48 = vld [vmem:[%s2407_s2] sm:$0xf] }
  0x7e   :  { %v1821_v38 = vld [vmem:[%s2408_s3 + $0xf0] sm:$0xff]   ;;  %v1825_v42 = vld [vmem:[%s2408_s3 + $0xf8] sm:$0xff]   ;;  %v156_v51 = vrot.slane %v151_v48, %v155_v46  ;;  %v164_v52 = vrot.slane %v151_v48, %v163_v47  ;;  %v160_v53 = vrot.slane %v151_v48, %v159_v49  ;;  %v168_v54 = vrot.slane %v151_v48, %v167_v50 }
  0x7f   :  { %914 = vmatpush1.bf16.msra.mxu0 %v1790_v10  ;;  %996 = vmatpush1.bf16.msra.mxu1 %v1793_v11  ;;  %v1822_v39 = vld [vmem:[%s2408_s3 + $0x30] sm:$0xff]   ;;  %v1826_v43 = vld [vmem:[%s2408_s3 + $0x38] sm:$0xff]  }
  0x80   :  { %1546 = vmatprep.subr.bf16.mxu0 %v1796_v13  ;;  %1568 = vmatprep.subr.bf16.mxu1 %v1797_v14  ;;  %v1823_v40 = vld [vmem:[%s2408_s3 + $0xb0] sm:$0xff]   ;;  %v1827_v44 = vld [vmem:[%s2408_s3 + $0xb8] sm:$0xff]   ;;  %v1513_v13 = vld [vmem:[%s2409_s4] ss:$0 sm:$0xff]  ;;  %s1857_s4 = smov [#allocation2]  }
  0x81   :  { %s1376_s30 = sshll.u32 %s1857_s4, 4  ;;  %s1377_s30 = int_to_ptr.vmem [resolvable:$true] %s1376_s30 }
  0x82   :  { %916 = vmatmul.mubr.bf16.vlgmr.msra.gmra.mrb[0].mxu0 %v196_v15  ;;  %998 = vmatmul.mubr.bf16.vlgmr.msra.gmra.mrb[0].mxu1 %v196_v15  ;;  %s1832_s6 = scalar_lea.vmem %s1377_s30, 32  ;;  %p1837_p1 = scmp.lt.s32.totalorder %s1377_s30, %s1377_s30 }
  0x83   :  { %1547 = vmatpush3.bf16.msra.mxu0 %v1798_v16  ;;  %1569 = vmatpush3.bf16.msra.mxu1 %v1799_v17  ;;  %p1833_p0 = scmp.ne.s32.totalorder %s1377_s30, %s1832_s6  ;;  %p1838_p2 = scmp.lt.s32.totalorder %s1832_s6, %s1832_s6 }
  0x84   :  { %1548 = vmatprep.subr.bf16.mxu0 %v1800_v18  ;;  %1570 = vmatprep.subr.bf16.mxu1 %v1801_v12 }
  0x85   :  { %p1839_p3 = por %p1838_p2, %p1837_p1 }
  0x87   :  { %1549 = vmatpush3.bf16.msra.mxu0 %v1802_v19  ;;  %1571 = vmatpush3.bf16.msra.mxu1 %v1803_v20  ;;  %p1840_p4 = pnand %p1839_p3, %p1833_p0 }
  0x88   :  { %1550 = vmatprep.subr.bf16.mxu0 %v1804_v21  ;;  %1572 = vmatprep.subr.bf16.mxu1 %v1805_v22 }
  0x8b   :  { %1551 = vmatpush3.bf16.msra.mxu0 %v1806_v23  ;;  %1573 = vmatpush3.bf16.msra.mxu1 %v1807_v24 }
  0x8c   :  { %1552 = vmatprep.subr.bf16.mxu0 %v1808_v25  ;;  %1574 = vmatprep.subr.bf16.mxu1 %v1809_v26 }
  0x8f   :  { %1553 = vmatpush3.bf16.msra.mxu0 %v1810_v27  ;;  %1575 = vmatpush3.bf16.msra.mxu1 %v1811_v28 }
  0x90   :  { %1554 = vmatprep.subr.bf16.mxu0 %v1812_v29  ;;  %1576 = vmatprep.subr.bf16.mxu1 %v1813_v30 }
  0x93   :  { %1555 = vmatpush3.bf16.msra.mxu0 %v1814_v31  ;;  %1577 = vmatpush3.bf16.msra.mxu1 %v1815_v32 }
  0x94   :  { %1556 = vmatprep.subr.bf16.mxu0 %v1816_v33  ;;  %1578 = vmatprep.subr.bf16.mxu1 %v1817_v34 }
  0x97   :  { %1557 = vmatpush3.bf16.msra.mxu0 %v1818_v35  ;;  %1579 = vmatpush3.bf16.msra.mxu1 %v1819_v36 }
  0x98   :  { %1558 = vmatprep.subr.bf16.mxu0 %v1820_v37  ;;  %1580 = vmatprep.subr.bf16.mxu1 %v1821_v38 }
  0x9b   :  { %1559 = vmatpush3.bf16.msra.mxu0 %v1822_v39  ;;  %1581 = vmatpush3.bf16.msra.mxu1 %v1823_v40 }
  0x9c   :  { %1560 = vmatprep.subr.bf16.mxu0 %v1824_v41  ;;  %1582 = vmatprep.subr.bf16.mxu1 %v1825_v42 }
  0x9f   :  { %1561 = vmatpush3.bf16.msra.mxu0 %v1826_v43  ;;  %1583 = vmatpush3.bf16.msra.mxu1 %v1827_v44 }
 0x155   :  { %v917_v55 = vpop.f32.mrb[0].mxu0  ;;  %v999_v56 = vpop.f32.mrb[0].mxu1 }
 0x156   :  { %v1590_v57 = vadd.f32 %v917_v55, %v156_v51  ;;  %v1592_v58 = vadd.f32 %v999_v56, %v164_v52  ;;  %v919_v59 = vpop.f32.mrb[1].mxu0  ;;  %v1001_v60 = vpop.f32.mrb[1].mxu1 }
 0x157   :  { %v1591_v61 = vadd.f32 %v919_v59, %v160_v53  ;;  %v1593_v62 = vadd.f32 %v1001_v60, %v168_v54  ;;  %v921_v63 = vpop.f32.mrb[2].mxu0  ;;  %v1003_v0 = vpop.f32.mrb[2].mxu1 }
 0x158   :  { %v1006_v1 = vmax.f32 %v1590_v57, 0.0  ;;  %v1008_v2 = vmax.f32 %v1592_v58, 0.0  ;;  %v922_v3 = vpop.f32.mrb[3].mxu0  ;;  %v1004_v4 = vpop.f32.mrb[3].mxu1 }
 0x159   :  { %v1007_v5 = vmax.f32 %v1591_v61, 0.0  ;;  %v1009_v45 = vmax.f32 %v1593_v62, 0.0 }
 0x15a   :  { %v1010_v8 = vpack.c.bf16 %v1006_v1, %v1006_v1  ;;  %v1012_v9 = vpack.c.bf16 %v1008_v2, %v1008_v2 }
 0x15b   :  { %v1011_v6 = vpack.c.bf16 %v1007_v5, %v1007_v5  ;;  %v1013_v7 = vpack.c.bf16 %v1009_v45, %v1009_v45 }
 0x15d   :  { %1309 = vmatprep.mubr.bf16.mxu0 %v1011_v6  ;;  %1349 = vmatprep.mubr.bf16.mxu1 %v1013_v7 }
 0x15e   :  { %1310 = vmatmul.mubr.bf16.vlgmr.msra.gmra.mrb[4].mxu0 %v1010_v8  ;;  %1350 = vmatmul.mubr.bf16.vlgmr.msra.gmra.mrb[4].mxu1 %v1012_v9 }
 0x231   :  { %v1562_v10 = vpop.f32.mrb[4].mxu0  ;;  %v1584_v11 = vpop.f32.mrb[4].mxu1 }
 0x232   :  { %v1563_v14 = vpop.f32.mrb[5].mxu0  ;;  %v1585_v15 = vpop.f32.mrb[5].mxu1 }
 0x233   :  { %v1564_v16 = vadd.f32 %v1563_v14, %v1562_v10  ;;  %v1586_v17 = vadd.f32 %v1585_v15, %v1584_v11  ;;  %v1565_v18 = vpop.f32.mrb[6].mxu0  ;;  %v1587_v12 = vpop.f32.mrb[6].mxu1 }
 0x234   :  { %v1566_v19 = vpop.f32.mrb[7].mxu0  ;;  %v1588_v20 = vpop.f32.mrb[7].mxu1 }
 0x235   :  { %v1312_v21 = vadd.f32 %v1564_v16, %v1513_v13 }
 0x237   :  { %v1352_v22 = vadd.f32 %v1586_v17, %v1312_v21 }
 0x239   :  { %v1358_v23 = vsel %vm1357_vm0, %v1352_v22, -inf }
 0x23a   :  { %1359 = vmax.xlane.f32.xlu0 %v1358_v23 }
 0x2c7   :  { %v1360_v24 = vpop.xlane.xlu0 %1359 }
 0x2c8   :  { %v1361_v25 = vsub.f32 %v1352_v22, %v1360_v24 }
 0x2ca   :  { %v1362_v26 = vmul.f32 1.442695, %v1361_v25 }
 0x2cc   :  { %1828 = vpow2.f32 %v1362_v26 }
 0x2d6   :  { %v1829_v27 = vpop.eup %1828 }
 0x2d7   :  { %v1364_v28 = vsel %vm1357_vm0, %v1829_v27, 0.0 }
 0x2d8   :  { %1365 = vadd.xlane.f32.xlu0 %v1364_v28 }
 0x365   :  { %v1366_v29 = vpop.xlane.xlu0 %1365 }
 0x366   :  { %1830 = vrcp.f32 %v1366_v29 }
 0x370   :  { %v1831_v30 = vpop.eup %1830 }
 0x371   :  { %v1368_v31 = vmul.f32 %v1831_v30, %v1829_v27 }
 0x373   :  { %1369 = vst.msk [vmem:[#allocation2] sm:$0x3] %vm1357_vm0, %v1368_v31 }
 0x374   :  { %1843 = shalt.err (!%p1840_p4)
}
 0x375   :  { %s1844_s9 = scalar_lea.hbm %s2410_s5, 32 }
 0x376   :  { %p1845_p5 = scmp.ne.s32.totalorder %s2410_s5, %s1844_s9  ;;  %p1848_p6 = scmp.lt.u32.totalorder %s1844_s9, %s2410_s5 }
 0x378   :  { %p1850_p7 = pnand %p1848_p6, %p1845_p5 }
 0x37a   :  { %1853 = shalt.err (!%p1850_p7)
}
 0x37b   :  { %1379 = dma.vmem_to_hbm [thread:$0]  %s1377_s30, 32, %s2410_s5, [#allocation3]  }
 0x37c   :  { %1854 = dma.done.wait [#allocation3], 32  }
 0x37d   :  { %1855 = vsyncadd [#allocation3], 4294967264 }
 0x37e   :  { %1383 = vsyncpa [#allocation3], 1 }

// kernel: net_forward.5
= control target key start
LH: loop header
LB: loop body
LE: loop exit
PB: predicated region body
PF: predicated region fallthrough
CT: control target
= control target key end

     0   :  { %s12511_s21 = smov 0   ;;  %s14485_s0 = inlined_call_operand.vmem [shape: f32[2,10,10,32], index: 0, kind: input, shape index: {}]   ;;  %s14486_s1 = inlined_call_operand.vmem [shape: f32[2,10,10,32], index: 1, kind: input, shape index: {}]   ;;  %s14487_s2 = inlined_call_operand.vmem [shape: f32[2,10,10,32], index: 2, kind: input, shape index: {}]   ;;  %s14488_s3 = inlined_call_operand.vmem [shape: f32[2,10,10,32], index: 3, kind: input, shape index: {}]   ;;  %s14489_s4 = inlined_call_operand.vmem [shape: bf16[25,32,64], index: 4, kind: input, shape index: {}]   ;;  %s14490_s5 = inlined_call_operand.vmem [shape: f32[1,64], index: 5, kind: input, shape index: {}]   ;;  %s14491_s6 = inlined_call_operand.vmem [shape: bf16[2,64,64], index: 6, kind: output, shape index: {}]  }
   0x1 LB: > { %s9025_s22 = sadd.s32 4294967295, %s12474_s21   ;;  %p9029_p0 = scmp.ge.s32.totalorder %s12474_s21, 1  ;;  %s12474_s21 = sphi %s12511_s21, %s16_s21  }
   0x2   : > { %p242_p1 = scmp.lt.s32.totalorder %s12474_s21, 3 }
   0x4   : > { %p243_p2 = pnand %p9029_p0, %p242_p1 }
   0x6   : > { %246 = sbr.rel (%p243_p2) target bundleno = 1042 (0x412), region = 44 }
   0xd   : > { %v12371_v0 = vld [vmem:[%s14489_s4 + $0x10] sm:$0xff]   ;;  %p287_p3 = scmp.lt.s32.totalorder %s9025_s22, 1  ;;  %v12372_v1 = vld [vmem:[%s14489_s4 + $0x18] sm:$0xff]   ;;  %v12373_v2 = vld [vmem:[%s14489_s4] sm:$0xff]   ;;  %vm358_vm0 = vcmask 261120   ;;  %vm8925_vm1 = vcmask 519168  }
   0xe   : > { %10394 = vmatprep.subr.bf16.mxu0 %v12371_v0  ;;  %10694 = vmatprep.subr.bf16.mxu1 %v12371_v0  ;;  %v12374_v10 = vld [vmem:[%s14489_s4 + $0x8] sm:$0xff]   ;;  %v12375_v22 = vld [vmem:[%s14489_s4 + $0x20] sm:$0xff]   ;;  %v12377_v42 = vld [vmem:[%s14489_s4 + $0x30] sm:$0xff]  }
   0xf   : > { %s14732_s22 = smov (!%p287_p3, %s9025_s22), 1  ;;  %10395 = vmatpush3.bf16.msra.mxu0 %v12371_v0  ;;  %10695 = vmatpush3.bf16.msra.mxu1 %v12371_v0  ;;  %v12376_v38 = vld [vmem:[%s14489_s4 + $0x28] sm:$0xff]   ;;  %v12378_v55 = vld [vmem:[%s14489_s4 + $0x38] sm:$0xff]   ;;  %v12379_v59 = vld [vmem:[%s14489_s4 + $0x40] sm:$0xff]  }
  0x10   : > { %10396 = vmatprep.subr.bf16.mxu0 %v12372_v1  ;;  %10696 = vmatprep.subr.bf16.mxu1 %v12372_v1  ;;  %s12528_s27 = smul.u32 160, %s14732_s22 }
  0x12   : > { %s12537_s8 = scalar_lea.vmem %s14486_s1, %s12528_s27  ;;  %s12543_s11 = scalar_lea.vmem %s14485_s0, %s12528_s27 }
  0x13   : > { %10397 = vmatpush3.bf16.msra.mxu0 %v12372_v1  ;;  %10697 = vmatpush3.bf16.msra.mxu1 %v12372_v1  ;;  %v329_v3 = vld [vmem:[%s12537_s8] sm:$0xff]  ;;  %v12547_v4 = vld [vmem:[%s12537_s8 + $0x10] sm:$0xff]  ;;  %s12808_s13 = scalar_lea.vmem %s14487_s2, %s12528_s27  ;;  %s12819_s16 = scalar_lea.vmem %s14488_s3, %s12528_s27 }
  0x14   : > { %v525_v5 = vld [vmem:[%s12543_s11 + $0x1] sm:$0xff]  ;;  %v337_v6 = vpack.c.bf16 %v12547_v4, %v329_v3  ;;  %v12552_v7 = vld [vmem:[%s12543_s11 + $0x11] sm:$0xff]  ;;  %10406 = vmatprep.subr.bf16.mxu0 %v12373_v2  ;;  %10706 = vmatprep.subr.bf16.mxu1 %v12373_v2 }
  0x15   : > { %v12555_v8 = vld [vmem:[%s12537_s8 + $0x20] sm:$0xff]  ;;  %v12558_v9 = vld [vmem:[%s12537_s8 + $0x30] sm:$0xff]  ;;  %v12564_v11 = vpack.c.bf16 %v12552_v7, %v525_v5 }
  0x16   : > { %v338_v12 = vpack.c.bf16 %v12558_v9, %v12555_v8  ;;  %v12569_v13 = vld [vmem:[%s12543_s11 + $0x21] sm:$0xff]  ;;  %v12572_v14 = vld [vmem:[%s12543_s11 + $0x31] sm:$0xff]  ;;  %10398 = vmatprep.mubr.msk.bf16.mxu0 %vm358_vm0, %v337_v6  ;;  %v12672_v49 = vpack.c.bf16 %v12555_v8, %v12547_v4 }
  0x17   : > { %v12575_v15 = vld [vmem:[%s12537_s8 + $0x40] sm:$0xff]  ;;  %v12580_v16 = vpack.c.bf16 %v12572_v14, %v12569_v13  ;;  %v12583_v17 = vld [vmem:[%s12537_s8 + $0x50] sm:$0xff]  ;;  %10698 = vmatprep.mubr.msk.bf16.mxu1 %vm358_vm0, %v12564_v11 }
  0x18   : > { %v12586_v18 = vld [vmem:[%s12543_s11 + $0x41] sm:$0xff]  ;;  %v12589_v19 = vld [vmem:[%s12543_s11 + $0x51] sm:$0xff]  ;;  %10399 = vmatmul.mubr.msk.bf16.vlgmr.msra.gmra.mrb[0].mxu0 %vm358_vm0, %v338_v12  ;;  %v339_v20 = vpack.c.bf16 %v12583_v17, %v12575_v15  ;;  %v12691_v56 = vpack.c.bf16 %v12575_v15, %v12558_v9 }
  0x19   : > { %v12598_v21 = vpack.c.bf16 %v12589_v19, %v12586_v18  ;;  %10699 = vmatmul.mubr.msk.bf16.vlgmr.msra.gmra.mrb[0].mxu1 %vm358_vm0, %v12580_v16  ;;  %10407 = vmatpush3.bf16.msra.mxu0 %v12373_v2  ;;  %v12606_v23 = vld [vmem:[%s12537_s8 + $0x60] sm:$0xff]  ;;  %v12609_v24 = vld [vmem:[%s12537_s8 + $0x70] sm:$0xff] }
  0x1a   : > { %v12612_v25 = vld [vmem:[%s12543_s11 + $0x61] sm:$0xff]  ;;  %10707 = vmatpush3.bf16.msra.mxu1 %v12373_v2  ;;  %10402 = vmatprep.mubr.msk.bf16.mxu0 %vm358_vm0, %v339_v20  ;;  %v12616_v26 = vld [vmem:[%s12543_s11 + $0x71] sm:$0xff]  ;;  %v340_v29 = vpack.c.bf16 %v12609_v24, %v12606_v23  ;;  %v12711_v61 = vpack.c.bf16 %v12606_v23, %v12583_v17  ;;  %v12727_v2 = vpack.c.bf16 %v12569_v13, %v12552_v7 }
  0x1b   : > { %v313_v27 = vld [vmem:[%s12543_s11] sm:$0xff]  ;;  %v314_v28 = vld [vmem:[%s12543_s11 + $0x10] sm:$0xff]  ;;  %10702 = vmatprep.mubr.msk.bf16.mxu1 %vm358_vm0, %v12598_v21  ;;  %10408 = vmatprep.subr.bf16.mxu0 %v12374_v10  ;;  %v12626_v30 = vpack.c.bf16 %v12616_v26, %v12612_v25  ;;  %v12380_v7 = vld [vmem:[%s14489_s4 + $0x48] sm:$0xff]  }
  0x1c   : > { %10708 = vmatprep.subr.bf16.mxu1 %v12374_v10  ;;  %v321_v31 = vpack.c.bf16 %v314_v28, %v313_v27  ;;  %v315_v32 = vld [vmem:[%s12543_s11 + $0x20] sm:$0xff]  ;;  %v316_v33 = vld [vmem:[%s12543_s11 + $0x30] sm:$0xff]  ;;  %v12382_v27 = vld [vmem:[%s14489_s4 + $0x58] sm:$0xff]  }
  0x1d   : > { %10409 = vmatpush3.bf16.msra.mxu0 %v12374_v10  ;;  %v317_v34 = vld [vmem:[%s12543_s11 + $0x40] sm:$0xff]  ;;  %v318_v35 = vld [vmem:[%s12543_s11 + $0x50] sm:$0xff]  ;;  %v322_v36 = vpack.c.bf16 %v316_v33, %v315_v32  ;;  %v12661_v46 = vpack.c.bf16 %v315_v32, %v314_v28 }
  0x1e   : > { %10709 = vmatpush3.bf16.msra.mxu1 %v12374_v10  ;;  %10418 = vmatprep.subr.bf16.mxu0 %v12375_v22  ;;  %v323_v37 = vpack.c.bf16 %v318_v35, %v317_v34  ;;  %v319_v39 = vld [vmem:[%s12543_s11 + $0x60] sm:$0xff]  ;;  %v12644_v40 = vld [vmem:[%s12543_s11 + $0x70] sm:$0xff]  ;;  %v12674_v50 = vpack.c.bf16 %v317_v34, %v316_v33  ;;  %v12751_v10 = vpack.c.bf16 %v12586_v18, %v12572_v14 }
  0x1f   : > { %10718 = vmatprep.subr.bf16.mxu1 %v12375_v22  ;;  %v639_v41 = vld [vmem:[%s12537_s8 + $0x1] sm:$0xff]  ;;  %v12653_v43 = vld [vmem:[%s12537_s8 + $0x11] sm:$0xff]  ;;  %v324_v44 = vpack.c.bf16 %v12644_v40, %v319_v39  ;;  %14593 = vst [vmem:[#allocation2_spill] sm:$0xff] %v12661_v46  ;;  %v12707_v60 = vpack.c.bf16 %v319_v39, %v318_v35  ;;  %v12771_v14 = vpack.c.bf16 %v12612_v25, %v12589_v19 }
  0x20   : > { %10403 = vmatmul.mubr.msk.bf16.gmra.mrb[4].mxu0 %vm358_vm0, %v340_v29  ;;  %v647_v45 = vpack.c.bf16 %v12653_v43, %v639_v41  ;;  %v12665_v47 = vld [vmem:[%s12537_s8 + $0x21] sm:$0xff]  ;;  %v12668_v48 = vld [vmem:[%s12537_s8 + $0x31] sm:$0xff]  ;;  %14594 = vst [vmem:[#allocation3_spill] sm:$0xff] %v12674_v50  ;;  %14595 = vst [vmem:[#allocation4_spill] sm:$0xff] %v12751_v10 }
  0x21   : > { %10703 = vmatmul.mubr.msk.bf16.gmra.mrb[4].mxu1 %vm358_vm0, %v12626_v30  ;;  %10410 = vmatprep.mubr.msk.bf16.mxu0 %vm358_vm0, %v321_v31  ;;  %v12677_v51 = vld [vmem:[%s12537_s8 + $0x41] sm:$0xff]  ;;  %v12680_v52 = vld [vmem:[%s12537_s8 + $0x51] sm:$0xff]  ;;  %v648_v53 = vpack.c.bf16 %v12668_v48, %v12665_v47 }
  0x22   : > { %10710 = vmatprep.mubr.msk.bf16.mxu1 %vm358_vm0, %v337_v6  ;;  %v649_v54 = vpack.c.bf16 %v12680_v52, %v12677_v51  ;;  %v12697_v57 = vld [vmem:[%s12537_s8 + $0x61] sm:$0xff]  ;;  %v12700_v58 = vld [vmem:[%s12537_s8 + $0x71] sm:$0xff] }
  0x23   : > { %v753_v62 = vld [vmem:[%s12543_s11 + $0x2] sm:$0xff]  ;;  %v12716_v63 = vld [vmem:[%s12543_s11 + $0x12] sm:$0xff]  ;;  %v650_v0 = vpack.c.bf16 %v12700_v58, %v12697_v57  ;;  %v12838_v35 = vpack.c.bf16 %v12697_v57, %v12680_v52 }
  0x24   : > { %v761_v1 = vpack.c.bf16 %v12716_v63, %v753_v62  ;;  %v12731_v3 = vld [vmem:[%s12543_s11 + $0x22] sm:$0xff]  ;;  %v12734_v4 = vld [vmem:[%s12543_s11 + $0x32] sm:$0xff] }
  0x25   : > { %v12737_v5 = vld [vmem:[%s12543_s11 + $0x42] sm:$0xff]  ;;  %v12740_v6 = vld [vmem:[%s12543_s11 + $0x52] sm:$0xff]  ;;  %v762_v8 = vpack.c.bf16 %v12734_v4, %v12731_v3 }
  0x26   : > { %v763_v9 = vpack.c.bf16 %v12740_v6, %v12737_v5  ;;  %v12381_v13 = vld [vmem:[%s14489_s4 + $0x50] sm:$0xff]   ;;  %v3429_v15 = vld [vmem:[%s12537_s8 + $0x2] sm:$0xff] }
  0x27   : > { %v12779_v19 = vld [vmem:[%s12537_s8 + $0x22] sm:$0xff]  ;;  %v12795_v23 = vld [vmem:[%s12537_s8 + $0x52] sm:$0xff] }
  0x28   : > { %10411 = vmatmul.mubr.msk.bf16.vlgmr.msra.gmra.mrb[0].mxu0 %vm358_vm0, %v322_v36  ;;  %v12826_v31 = vld [vmem:[%s12537_s8 + $0x72] sm:$0xff]  ;;  %v867_v32 = vld [vmem:[%s12808_s13] sm:$0xff]  ;;  %v12384_v62 = vld [vmem:[%s14489_s4 + $0x68] sm:$0xff]  }
  0x29   : > { %10711 = vmatmul.mubr.msk.bf16.vlgmr.msra.gmra.mrb[0].mxu1 %vm358_vm0, %v338_v12  ;;  %10419 = vmatpush3.bf16.msra.mxu0 %v12375_v22  ;;  %v12758_v12 = vld [vmem:[%s12543_s11 + $0x72] sm:$0xff]  ;;  %v12383_v34 = vld [vmem:[%s14489_s4 + $0x60] sm:$0xff]  }
  0x2a   : > { %10719 = vmatpush3.bf16.msra.mxu1 %v12375_v22  ;;  %10414 = vmatprep.mubr.msk.bf16.mxu0 %vm358_vm0, %v323_v37  ;;  %v12792_v22 = vld [vmem:[%s12537_s8 + $0x42] sm:$0xff]  ;;  %v12831_v33 = vld [vmem:[%s12808_s13 + $0x10] sm:$0xff] }
  0x2b   : > { %10714 = vmatprep.mubr.msk.bf16.mxu1 %vm358_vm0, %v339_v20  ;;  %10420 = vmatprep.subr.bf16.mxu0 %v12376_v38  ;;  %v12782_v20 = vld [vmem:[%s12537_s8 + $0x32] sm:$0xff]  ;;  %v3439_v28 = vpack.c.bf16 %v12795_v23, %v12792_v22  ;;  %v981_v36 = vld [vmem:[%s12819_s16] sm:$0xff]  ;;  %v12848_v39 = vpack.c.bf16 %v12831_v33, %v867_v32 }
  0x2c   : > { %10720 = vmatprep.subr.bf16.mxu1 %v12376_v38  ;;  %v3438_v25 = vpack.c.bf16 %v12782_v20, %v12779_v19  ;;  %v12843_v37 = vld [vmem:[%s12819_s16 + $0x10] sm:$0xff] }
  0x2d   : > { %10421 = vmatpush3.bf16.msra.mxu0 %v12376_v38  ;;  %14596 = vst [vmem:[#allocation5_spill] sm:$0xff] %v12848_v39  ;;  %v12851_v41 = vpack.c.bf16 %v12843_v37, %v981_v36  ;;  %v12386_v36 = vld [vmem:[%s14489_s4 + $0x78] sm:$0xff]  }
  0x2e   : > { %10721 = vmatpush3.bf16.msra.mxu1 %v12376_v38  ;;  %10430 = vmatprep.subr.bf16.mxu0 %v12377_v42 }
  0x2f   : > { %10730 = vmatprep.subr.bf16.mxu1 %v12377_v42  ;;  %14597 = vst [vmem:[#allocation6_spill] sm:$0xff] %v12851_v41 }
  0x30   : > { %10415 = vmatmul.mubr.msk.bf16.gmra.mrb[4].mxu0 %vm358_vm0, %v324_v44  ;;  %v12865_v44 = vpack.c.bf16 %v12731_v3, %v12716_v63  ;;  %v12911_v63 = vld [vmem:[%s12808_s13 + $0x60] sm:$0xff]  ;;  %v12922_v3 = vld [vmem:[%s12819_s16 + $0x70] sm:$0xff] }
  0x31   : > { %10715 = vmatmul.mubr.msk.bf16.gmra.mrb[4].mxu1 %vm358_vm0, %v340_v29  ;;  %10422 = vmatprep.mubr.msk.bf16.mxu0 %vm358_vm0, %v12564_v11  ;;  %v12755_v11 = vld [vmem:[%s12543_s11 + $0x62] sm:$0xff]  ;;  %v12812_v29 = vpack.c.bf16 %v12677_v51, %v12668_v48  ;;  %v12879_v51 = vld [vmem:[%s12808_s13 + $0x50] sm:$0xff] }
  0x32   : > { %10722 = vmatprep.mubr.msk.bf16.mxu1 %vm358_vm0, %v647_v45  ;;  %v764_v17 = vpack.c.bf16 %v12758_v12, %v12755_v11  ;;  %v12876_v48 = vld [vmem:[%s12808_s13 + $0x40] sm:$0xff] }
  0x33   : > { %v12897_v57 = vpack.c.bf16 %v12879_v51, %v12876_v48 }
  0x35   : > { %14600 = vst [vmem:[#allocation9_spill] sm:$0xff] %v12897_v57 }
  0x38   : > { %10423 = vmatmul.mubr.msk.bf16.vlgmr.msra.gmra.mrb[0].mxu0 %vm358_vm0, %v12580_v16  ;;  %v12766_v16 = vld [vmem:[%s12537_s8 + $0x12] sm:$0xff] }
  0x39   : > { %10723 = vmatmul.mubr.msk.bf16.vlgmr.msra.gmra.mrb[0].mxu1 %vm358_vm0, %v648_v53  ;;  %10431 = vmatpush3.bf16.msra.mxu0 %v12377_v42  ;;  %v3437_v18 = vpack.c.bf16 %v12766_v16, %v3429_v15 }
  0x3a   : > { %10731 = vmatpush3.bf16.msra.mxu1 %v12377_v42  ;;  %10426 = vmatprep.mubr.msk.bf16.mxu0 %vm358_vm0, %v12598_v21  ;;  %v12788_v21 = vpack.c.bf16 %v12665_v47, %v12653_v43  ;;  %v12858_v42 = vld [vmem:[%s12808_s13 + $0x20] sm:$0xff]  ;;  %v12861_v43 = vld [vmem:[%s12808_s13 + $0x30] sm:$0xff] }
  0x3b   : > { %10726 = vmatprep.mubr.msk.bf16.mxu1 %vm358_vm0, %v649_v54  ;;  %10432 = vmatprep.subr.bf16.mxu0 %v12378_v55  ;;  %v12873_v47 = vld [vmem:[%s12819_s16 + $0x30] sm:$0xff]  ;;  %v12883_v52 = vpack.c.bf16 %v12861_v43, %v12858_v42 }
  0x3c   : > { %10732 = vmatprep.subr.bf16.mxu1 %v12378_v55 }
  0x3d   : > { %10433 = vmatpush3.bf16.msra.mxu0 %v12378_v55  ;;  %14598 = vst [vmem:[#allocation7_spill] sm:$0xff] %v12883_v52 }
  0x3e   : > { %10733 = vmatpush3.bf16.msra.mxu1 %v12378_v55  ;;  %10442 = vmatprep.subr.bf16.mxu0 %v12379_v59 }
  0x3f   : > { %10742 = vmatprep.subr.bf16.mxu1 %v12379_v59 }
  0x40   : > { %10427 = vmatmul.mubr.msk.bf16.gmra.mrb[4].mxu0 %vm358_vm0, %v12626_v30  ;;  %v12823_v30 = vld [vmem:[%s12537_s8 + $0x62] sm:$0xff] }
  0x41   : > { %10727 = vmatmul.mubr.msk.bf16.gmra.mrb[4].mxu1 %vm358_vm0, %v650_v0  ;;  %10434 = vmatprep.mubr.msk.bf16.mxu0 %vm358_vm0, %v647_v45  ;;  %v3440_v38 = vpack.c.bf16 %v12826_v31, %v12823_v30  ;;  %v12870_v45 = vld [vmem:[%s12819_s16 + $0x20] sm:$0xff] }
  0x42   : > { %10734 = vmatprep.mubr.msk.bf16.mxu1 %vm358_vm0, %v761_v1  ;;  %v12893_v55 = vpack.c.bf16 %v12873_v47, %v12870_v45 }
  0x44   : > { %14599 = vst [vmem:[#allocation8_spill] sm:$0xff] %v12893_v55 }
  0x48   : > { %10435 = vmatmul.mubr.msk.bf16.vlgmr.msra.gmra.mrb[0].mxu0 %vm358_vm0, %v648_v53  ;;  %v12886_v53 = vld [vmem:[%s12819_s16 + $0x40] sm:$0xff] }
  0x49   : > { %10735 = vmatmul.mubr.msk.bf16.vlgmr.msra.gmra.mrb[0].mxu1 %vm358_vm0, %v762_v8  ;;  %10443 = vmatpush3.bf16.msra.mxu0 %v12379_v59 }
  0x4a   : > { %10743 = vmatpush3.bf16.msra.mxu1 %v12379_v59  ;;  %10438 = vmatprep.mubr.msk.bf16.mxu0 %vm358_vm0, %v649_v54  ;;  %v12889_v54 = vld [vmem:[%s12819_s16 + $0x50] sm:$0xff] }
  0x4b   : > { %10738 = vmatprep.mubr.msk.bf16.mxu1 %vm358_vm0, %v763_v9  ;;  %10444 = vmatprep.subr.bf16.mxu0 %v12380_v7  ;;  %v12901_v59 = vpack.c.bf16 %v12889_v54, %v12886_v53 }
  0x4c   : > { %10744 = vmatprep.subr.bf16.mxu1 %v12380_v7 }
  0x4d   : > { %10445 = vmatpush3.bf16.msra.mxu0 %v12380_v7  ;;  %14601 = vst [vmem:[#allocation10_spill] sm:$0xff] %v12901_v59 }
  0x4e   : > { %10745 = vmatpush3.bf16.msra.mxu1 %v12380_v7  ;;  %10454 = vmatprep.subr.bf16.mxu0 %v12381_v13  ;;  %v1095_v7 = vld [vmem:[%s12808_s13 + $0x1] sm:$0xff] }
  0x4f   : > { %10754 = vmatprep.subr.bf16.mxu1 %v12381_v13 }
  0x50   : > { %10439 = vmatmul.mubr.msk.bf16.gmra.mrb[4].mxu0 %vm358_vm0, %v650_v0  ;;  %v12914_v0 = vld [vmem:[%s12808_s13 + $0x70] sm:$0xff] }
  0x51   : > { %10739 = vmatmul.mubr.msk.bf16.gmra.mrb[4].mxu1 %vm358_vm0, %v764_v17  ;;  %10446 = vmatprep.mubr.msk.bf16.mxu0 %vm358_vm0, %v761_v1  ;;  %v12919_v1 = vld [vmem:[%s12819_s16 + $0x60] sm:$0xff] }
  0x52   : > { %10746 = vmatprep.mubr.msk.bf16.mxu1 %vm358_vm0, %v3437_v18  ;;  %v12939_v15 = vpack.c.bf16 %v12922_v3, %v12919_v1  ;;  %v12953_v18 = vld [vmem:[%s12808_s13 + $0x21] sm:$0xff] }
  0x54   : > { %14603 = vst [vmem:[#allocation12_spill] sm:$0xff] %v12939_v15 }
  0x58   : > { %10447 = vmatmul.mubr.msk.bf16.vlgmr.msra.gmra.mrb[0].mxu0 %vm358_vm0, %v762_v8  ;;  %v12385_v8 = vld [vmem:[%s14489_s4 + $0x70] sm:$0xff]  }
  0x59   : > { %10747 = vmatmul.mubr.msk.bf16.vlgmr.msra.gmra.mrb[0].mxu1 %vm358_vm0, %v3438_v25  ;;  %10455 = vmatpush3.bf16.msra.mxu0 %v12381_v13  ;;  %v12956_v25 = vld [vmem:[%s12808_s13 + $0x31] sm:$0xff] }
  0x5a   : > { %10755 = vmatpush3.bf16.msra.mxu1 %v12381_v13  ;;  %10450 = vmatprep.mubr.msk.bf16.mxu0 %vm358_vm0, %v763_v9  ;;  %v12931_v9 = vld [vmem:[%s12808_s13 + $0x11] sm:$0xff]  ;;  %v12935_v13 = vpack.c.bf16 %v12914_v0, %v12911_v63  ;;  %v12966_v32 = vpack.c.bf16 %v12956_v25, %v12953_v18 }
  0x5b   : > { %10750 = vmatprep.mubr.msk.bf16.mxu1 %vm358_vm0, %v3439_v28  ;;  %10456 = vmatprep.subr.bf16.mxu0 %v12382_v27  ;;  %v12962_v28 = vld [vmem:[%s12808_s13 + $0x51] sm:$0xff] }
  0x5c   : > { %10756 = vmatprep.subr.bf16.mxu1 %v12382_v27  ;;  %14602 = vst [vmem:[#allocation11_spill] sm:$0xff] %v12935_v13  ;;  %14605 = vst [vmem:[#allocation14_spill] sm:$0xff] %v12966_v32 }
  0x5d   : > { %10457 = vmatpush3.bf16.msra.mxu0 %v12382_v27 }
  0x5e   : > { %10757 = vmatpush3.bf16.msra.mxu1 %v12382_v27  ;;  %10466 = vmatprep.subr.bf16.mxu0 %v12383_v34  ;;  %v12959_v27 = vld [vmem:[%s12808_s13 + $0x41] sm:$0xff] }
  0x5f   : > { %10766 = vmatprep.subr.bf16.mxu1 %v12383_v34 }
  0x60   : > { %10451 = vmatmul.mubr.msk.bf16.gmra.mrb[4].mxu0 %vm358_vm0, %v764_v17  ;;  %v12942_v17 = vpack.c.bf16 %v12931_v9, %v1095_v7  ;;  %v12387_v7 = vld [vmem:[%s14489_s4 + $0x80] sm:$0xff]  }
  0x61   : > { %10751 = vmatmul.mubr.msk.bf16.gmra.mrb[4].mxu1 %vm358_vm0, %v3440_v38  ;;  %10458 = vmatprep.mubr.msk.bf16.mxu0 %vm358_vm0, %v12848_v39  ;;  %v12982_v38 = vld [vmem:[%s12808_s13 + $0x61] sm:$0xff] }
  0x62   : > { %10758 = vmatprep.mubr.msk.bf16.mxu1 %vm358_vm0, %v12851_v41  ;;  %14604 = vst [vmem:[#allocation13_spill] sm:$0xff] %v12942_v17  ;;  %v13018_v39 = vld [vmem:[%s12819_s16 + $0x41] sm:$0xff] }
  0x63   : > { %14610 = vst [vmem:[#allocation19_spill] sm:$0xff] %v13018_v39 }
  0x68   : > { %10459 = vmatmul.mubr.msk.bf16.vlgmr.msra.gmra.mrb[0].mxu0 %vm358_vm0, %v12883_v52 }
  0x69   : > { %10759 = vmatmul.mubr.msk.bf16.vlgmr.msra.gmra.mrb[0].mxu1 %vm358_vm0, %v12893_v55  ;;  %10467 = vmatpush3.bf16.msra.mxu0 %v12383_v34 }
  0x6a   : > { %10767 = vmatpush3.bf16.msra.mxu1 %v12383_v34  ;;  %10462 = vmatprep.mubr.msk.bf16.mxu0 %vm358_vm0, %v12897_v57  ;;  %v12970_v34 = vpack.c.bf16 %v12962_v28, %v12959_v27 }
  0x6b   : > { %10762 = vmatprep.mubr.msk.bf16.mxu1 %vm358_vm0, %v12901_v59  ;;  %10468 = vmatprep.subr.bf16.mxu0 %v12384_v62 }
  0x6c   : > { %10768 = vmatprep.subr.bf16.mxu1 %v12384_v62  ;;  %14606 = vst [vmem:[#allocation15_spill] sm:$0xff] %v12970_v34 }
  0x6d   : > { %10469 = vmatpush3.bf16.msra.mxu0 %v12384_v62 }
  0x6e   : > { %10769 = vmatpush3.bf16.msra.mxu1 %v12384_v62  ;;  %10478 = vmatprep.subr.bf16.mxu0 %v12385_v8  ;;  %v12985_v62 = vld [vmem:[%s12808_s13 + $0x71] sm:$0xff] }
  0x6f   : > { %10778 = vmatprep.subr.bf16.mxu1 %v12385_v8  ;;  %v12998_v57 = vpack.c.bf16 %v12985_v62, %v12982_v38 }
  0x70   : > { %10463 = vmatmul.mubr.msk.bf16.gmra.mrb[4].mxu0 %vm358_vm0, %v12935_v13  ;;  %v1209_v13 = vld [vmem:[%s12819_s16 + $0x1] sm:$0xff] }
  0x71   : > { %10763 = vmatmul.mubr.msk.bf16.gmra.mrb[4].mxu1 %vm358_vm0, %v12939_v15  ;;  %10470 = vmatprep.mubr.msk.bf16.mxu0 %vm358_vm0, %v12851_v41  ;;  %14607 = vst [vmem:[#allocation16_spill] sm:$0xff] %v12998_v57  ;;  %v13041_v41 = vld [vmem:[%s12819_s16 + $0x61] sm:$0xff] }
  0x72   : > { %10770 = vmatprep.mubr.msk.bf16.mxu1 %vm358_vm0, %v12942_v17  ;;  %14614 = vst [vmem:[#allocation23_spill] sm:$0xff] %v13041_v41 }
  0x78   : > { %10471 = vmatmul.mubr.msk.bf16.vlgmr.msra.gmra.mrb[0].mxu0 %vm358_vm0, %v12893_v55 }
  0x79   : > { %10771 = vmatmul.mubr.msk.bf16.vlgmr.msra.gmra.mrb[0].mxu1 %vm358_vm0, %v12966_v32  ;;  %10479 = vmatpush3.bf16.msra.mxu0 %v12385_v8 }
  0x7a   : > { %10779 = vmatpush3.bf16.msra.mxu1 %v12385_v8  ;;  %10474 = vmatprep.mubr.msk.bf16.mxu0 %vm358_vm0, %v12901_v59  ;;  %v12994_v8 = vld [vmem:[%s12819_s16 + $0x11] sm:$0xff] }
  0x7b   : > { %10774 = vmatprep.mubr.msk.bf16.mxu1 %vm358_vm0, %v12970_v34  ;;  %10480 = vmatprep.subr.bf16.mxu0 %v12386_v36  ;;  %v13001_v52 = vpack.c.bf16 %v12994_v8, %v1209_v13  ;;  %v13015_v13 = vld [vmem:[%s12819_s16 + $0x31] sm:$0xff] }
  0x7c   : > { %10780 = vmatprep.subr.bf16.mxu1 %v12386_v36  ;;  %14609 = vst [vmem:[#allocation18_spill] sm:$0xff] %v13015_v13 }
  0x7d   : > { %10481 = vmatpush3.bf16.msra.mxu0 %v12386_v36  ;;  %14608 = vst [vmem:[#allocation17_spill] sm:$0xff] %v13001_v52 }
  0x7e   : > { %10781 = vmatpush3.bf16.msra.mxu1 %v12386_v36  ;;  %10490 = vmatprep.subr.bf16.mxu0 %v12387_v7  ;;  %v13012_v36 = vld [vmem:[%s12819_s16 + $0x21] sm:$0xff] }
  0x7f   : > { %10790 = vmatprep.subr.bf16.mxu1 %v12387_v7  ;;  %v13025_v59 = vpack.c.bf16 %v13015_v13, %v13012_v36  ;;  %v13044_v13 = vld [vmem:[%s12819_s16 + $0x71] sm:$0xff] }
  0x80   : > { %10475 = vmatmul.mubr.msk.bf16.gmra.mrb[4].mxu0 %vm358_vm0, %v12939_v15  ;;  %v13021_v15 = vld [vmem:[%s12819_s16 + $0x51] sm:$0xff]  ;;  %14615 = vst [vmem:[#allocation24_spill] sm:$0xff] %v13044_v13 }
  0x81   : > { %10775 = vmatmul.mubr.msk.bf16.gmra.mrb[4].mxu1 %vm358_vm0, %v12998_v57  ;;  %10482 = vmatprep.mubr.msk.bf16.mxu0 %vm358_vm0, %v12942_v17  ;;  %14611 = vst [vmem:[#allocation20_spill] sm:$0xff] %v13021_v15  ;;  %14612 = vst [vmem:[#allocation21_spill] sm:$0xff] %v13025_v59  ;;  %v13029_v55 = vpack.c.bf16 %v13021_v15, %v13018_v39  ;;  %v12388_v17 = vld [vmem:[%s14489_s4 + $0x88] sm:$0xff]   ;;  %v12389_v15 = vld [vmem:[%s14489_s4 + $0x90] sm:$0xff]  }
  0x82   : > { %10782 = vmatprep.mubr.msk.bf16.mxu1 %vm358_vm0, %v13001_v52 }
  0x83   : > { %14613 = vst [vmem:[#allocation22_spill] sm:$0xff] %v13029_v55 }
  0x88   : > { %10483 = vmatmul.mubr.msk.bf16.vlgmr.msra.gmra.mrb[0].mxu0 %vm358_vm0, %v12966_v32  ;;  %v1323_v32 = vld [vmem:[%s12808_s13 + $0x2] sm:$0xff] }
  0x89   : > { %10783 = vmatmul.mubr.msk.bf16.vlgmr.msra.gmra.mrb[0].mxu1 %vm358_vm0, %v13025_v59  ;;  %10491 = vmatpush3.bf16.msra.mxu0 %v12387_v7 }
  0x8a   : > { %10791 = vmatpush3.bf16.msra.mxu1 %v12387_v7  ;;  %10486 = vmatprep.mubr.msk.bf16.mxu0 %vm358_vm0, %v12970_v34  ;;  %v13053_v7 = vld [vmem:[%s12808_s13 + $0x12] sm:$0xff]  ;;  %v13057_v34 = vpack.c.bf16 %v13044_v13, %v13041_v41 }
  0x8b   : > { %10786 = vmatprep.mubr.msk.bf16.mxu1 %vm358_vm0, %v13029_v55  ;;  %10492 = vmatprep.subr.bf16.mxu0 %v12388_v17  ;;  %14616 = vst [vmem:[#allocation25_spill] sm:$0xff] %v13053_v7  ;;  %v13060_v39 = vpack.c.bf16 %v13053_v7, %v1323_v32  ;;  %v13074_v32 = vld [vmem:[%s12808_s13 + $0x32] sm:$0xff]  ;;  %v13077_v7 = vld [vmem:[%s12808_s13 + $0x42] sm:$0xff] }
  0x8c   : > { %10792 = vmatprep.subr.bf16.mxu1 %v12388_v17  ;;  %14617 = vst [vmem:[#allocation26_spill] sm:$0xff] %v13057_v34  ;;  %14620 = vst [vmem:[#allocation29_spill] sm:$0xff] %v13074_v32  ;;  %v12390_v41 = vld [vmem:[%s14489_s4 + $0x98] sm:$0xff]  }
  0x8d   : > { %10493 = vmatpush3.bf16.msra.mxu0 %v12388_v17  ;;  %14618 = vst [vmem:[#allocation27_spill] sm:$0xff] %v13060_v39  ;;  %14621 = vst [vmem:[#allocation30_spill] sm:$0xff] %v13077_v7 }
  0x8e   : > { %10793 = vmatpush3.bf16.msra.mxu1 %v12388_v17  ;;  %10502 = vmatprep.subr.bf16.mxu0 %v12389_v15  ;;  %v13071_v17 = vld [vmem:[%s12808_s13 + $0x22] sm:$0xff] }
  0x8f   : > { %10802 = vmatprep.subr.bf16.mxu1 %v12389_v15  ;;  %14619 = vst [vmem:[#allocation28_spill] sm:$0xff] %v13071_v17  ;;  %v13084_v13 = vpack.c.bf16 %v13074_v32, %v13071_v17  ;;  %v13100_v32 = vld [vmem:[%s12808_s13 + $0x62] sm:$0xff]  ;;  %v13103_v17 = vld [vmem:[%s12808_s13 + $0x72] sm:$0xff] }
  0x90   : > { %10487 = vmatmul.mubr.msk.bf16.gmra.mrb[4].mxu0 %vm358_vm0, %v12998_v57  ;;  %v13080_v57 = vld [vmem:[%s12808_s13 + $0x52] sm:$0xff]  ;;  %14623 = vst [vmem:[#allocation32_spill] sm:$0xff] %v13100_v32  ;;  %14624 = vst [vmem:[#allocation33_spill] sm:$0xff] %v13103_v17 }
  0x91   : > { %10787 = vmatmul.mubr.msk.bf16.gmra.mrb[4].mxu1 %vm358_vm0, %v13057_v34  ;;  %10494 = vmatprep.mubr.msk.bf16.mxu0 %vm358_vm0, %v13001_v52  ;;  %14622 = vst [vmem:[#allocation31_spill] sm:$0xff] %v13080_v57  ;;  %v13088_v52 = vpack.c.bf16 %v13080_v57, %v13077_v7  ;;  %v12391_v57 = vld [vmem:[%s14489_s4 + $0xa0] sm:$0xff]  }
  0x92   : > { %10794 = vmatprep.mubr.msk.bf16.mxu1 %vm358_vm0, %v13060_v39 }
  0x98   : > { %10495 = vmatmul.mubr.msk.bf16.vlgmr.msra.gmra.mrb[0].mxu0 %vm358_vm0, %v13025_v59  ;;  %v3818_v59 = vld [vmem:[%s12819_s16 + $0x2] sm:$0xff] }
  0x99   : > { %10795 = vmatmul.mubr.msk.bf16.vlgmr.msra.gmra.mrb[0].mxu1 %vm358_vm0, %v13084_v13  ;;  %10503 = vmatpush3.bf16.msra.mxu0 %v12389_v15 }
  0x9a   : > { %10803 = vmatpush3.bf16.msra.mxu1 %v12389_v15  ;;  %10498 = vmatprep.mubr.msk.bf16.mxu0 %vm358_vm0, %v13029_v55  ;;  %v13112_v15 = vld [vmem:[%s12819_s16 + $0x12] sm:$0xff]  ;;  %v13116_v55 = vpack.c.bf16 %v13103_v17, %v13100_v32 }
  0x9b   : > { %10798 = vmatprep.mubr.msk.bf16.mxu1 %vm358_vm0, %v13088_v52  ;;  %10504 = vmatprep.subr.bf16.mxu0 %v12390_v41  ;;  %14625 = vst [vmem:[#allocation34_spill] sm:$0xff] %v13112_v15  ;;  %v13119_v7 = vpack.c.bf16 %v13112_v15, %v3818_v59  ;;  %v13133_v59 = vld [vmem:[%s12819_s16 + $0x32] sm:$0xff]  ;;  %v13136_v15 = vld [vmem:[%s12819_s16 + $0x42] sm:$0xff] }
  0x9c   : > { %10804 = vmatprep.subr.bf16.mxu1 %v12390_v41  ;;  %14627 = vst [vmem:[#allocation36_spill] sm:$0xff] %v13133_v59  ;;  %v13139_v17 = vld [vmem:[%s12819_s16 + $0x52] sm:$0xff] }
  0x9d   : > { %10505 = vmatpush3.bf16.msra.mxu0 %v12390_v41  ;;  %14626 = vst [vmem:[#allocation35_spill] sm:$0xff] %v13119_v7  ;;  %14628 = vst [vmem:[#allocation37_spill] sm:$0xff] %v13139_v17  ;;  %v13147_v32 = vpack.c.bf16 %v13139_v17, %v13136_v15  ;;  %v12393_v17 = vld [vmem:[%s14489_s4 + $0xb0] sm:$0xff]  }
  0x9e   : > { %10805 = vmatpush3.bf16.msra.mxu1 %v12390_v41  ;;  %10514 = vmatprep.subr.bf16.mxu0 %v12391_v57  ;;  %v13130_v41 = vld [vmem:[%s12819_s16 + $0x22] sm:$0xff] }
  0x9f   : > { %10814 = vmatprep.subr.bf16.mxu1 %v12391_v57  ;;  %14629 = vst [vmem:[#allocation38_spill] sm:$0xff] %v13147_v32 }
  0xa0   : > { %10499 = vmatmul.mubr.msk.bf16.gmra.mrb[4].mxu0 %vm358_vm0, %v13057_v34  ;;  %v13143_v34 = vpack.c.bf16 %v13133_v59, %v13130_v41  ;;  %v13162_v59 = vld [vmem:[%s12819_s16 + $0x72] sm:$0xff] }
  0xa1   : > { %10799 = vmatmul.mubr.msk.bf16.gmra.mrb[4].mxu1 %vm358_vm0, %v13116_v55  ;;  %10506 = vmatprep.mubr.msk.bf16.mxu0 %vm358_vm0, %v13060_v39  ;;  %v13159_v39 = vld [vmem:[%s12819_s16 + $0x62] sm:$0xff] }
  0xa2   : > { %10806 = vmatprep.mubr.msk.bf16.mxu1 %vm358_vm0, %v13119_v7  ;;  %v12392_v7 = vld [vmem:[%s14489_s4 + $0xa8] sm:$0xff]  }
  0xa8   : > { %10507 = vmatmul.mubr.msk.bf16.vlgmr.msra.gmra.mrb[0].mxu0 %vm358_vm0, %v13084_v13 }
  0xa9   : > { %10807 = vmatmul.mubr.msk.bf16.vlgmr.msra.gmra.mrb[0].mxu1 %vm358_vm0, %v13143_v34  ;;  %10515 = vmatpush3.bf16.msra.mxu0 %v12391_v57 }
  0xaa   : > { %10815 = vmatpush3.bf16.msra.mxu1 %v12391_v57  ;;  %10510 = vmatprep.mubr.msk.bf16.mxu0 %vm358_vm0, %v13088_v52  ;;  %v13171_v57 = vpack.c.bf16 %v13162_v59, %v13159_v39 }
  0xab   : > { %10810 = vmatprep.mubr.msk.bf16.mxu1 %vm358_vm0, %v13147_v32  ;;  %10516 = vmatprep.subr.bf16.mxu0 %v12392_v7  ;;  %v12394_v32 = vld [vmem:[%s14489_s4 + $0xb8] sm:$0xff]  }
  0xac   : > { %10816 = vmatprep.subr.bf16.mxu1 %v12392_v7  ;;  %14630 = vst [vmem:[#allocation39_spill] sm:$0xff] %v13171_v57 }
  0xad   : > { %10517 = vmatpush3.bf16.msra.mxu0 %v12392_v7 }
  0xae   : > { %10817 = vmatpush3.bf16.msra.mxu1 %v12392_v7  ;;  %10526 = vmatprep.subr.bf16.mxu0 %v12393_v17  ;;  %v13189_v7 = vld [vmem:[%s12543_s11 + $0x80] sm:$0xff] }
  0xaf   : > { %10826 = vmatprep.subr.bf16.mxu1 %v12393_v17 }
  0xb0   : > { %10511 = vmatmul.mubr.msk.bf16.gmra.mrb[4].mxu0 %vm358_vm0, %v13116_v55 }
  0xb1   : > { %10811 = vmatmul.mubr.msk.bf16.gmra.mrb[4].mxu1 %vm358_vm0, %v13171_v57  ;;  %10518 = vmatprep.mubr.msk.bf16.mxu0 %vm358_vm0, %v12661_v46  ;;  %v13194_v46 = vld [vmem:[%s12537_s8 + $0x80] sm:$0xff] }
  0xb2   : > { %10818 = vmatprep.mubr.msk.bf16.mxu1 %vm358_vm0, %v12672_v49  ;;  %v12395_v57 = vld [vmem:[%s14489_s4 + $0xc0] sm:$0xff]  }
  0xb8   : > { %10519 = vmatmul.mubr.msk.bf16.vlgmr.msra.gmra.mrb[0].mxu0 %vm358_vm0, %v12674_v50  ;;  %v13203_v50 = vpack.c.bf16 %v13189_v7, %v12644_v40  ;;  %v13227_v40 = vld [vmem:[%s12543_s11 + $0x81] sm:$0xff] }
  0xb9   : > { %10819 = vmatmul.mubr.msk.bf16.vlgmr.msra.gmra.mrb[0].mxu1 %vm358_vm0, %v12691_v56  ;;  %10527 = vmatpush3.bf16.msra.mxu0 %v12393_v17 }
  0xba   : > { %10827 = vmatpush3.bf16.msra.mxu1 %v12393_v17  ;;  %10522 = vmatprep.mubr.msk.bf16.mxu0 %vm358_vm0, %v12707_v60  ;;  %14631 = vst [vmem:[#allocation40_spill] sm:$0xff] %v13203_v50  ;;  %v13207_v17 = vpack.c.bf16 %v13194_v46, %v12609_v24  ;;  %v12396_v24 = vld [vmem:[%s14489_s4 + $0xc8] sm:$0xff]  }
  0xbb   : > { %10822 = vmatprep.mubr.msk.bf16.mxu1 %vm358_vm0, %v12711_v61  ;;  %10528 = vmatprep.subr.bf16.mxu0 %v12394_v32 }
  0xbc   : > { %10828 = vmatprep.subr.bf16.mxu1 %v12394_v32 }
  0xbd   : > { %10529 = vmatpush3.bf16.msra.mxu0 %v12394_v32 }
  0xbe   : > { %10829 = vmatpush3.bf16.msra.mxu1 %v12394_v32  ;;  %10538 = vmatprep.subr.bf16.mxu0 %v12395_v57  ;;  %v12397_v32 = vld [vmem:[%s14489_s4 + $0xd0] sm:$0xff]  }
  0xbf   : > { %10838 = vmatprep.subr.bf16.mxu1 %v12395_v57 }
  0xc0   : > { %10523 = vmatmul.mubr.msk.bf16.gmra.mrb[4].mxu0 %vm358_vm0, %v13203_v50  ;;  %v13236_v50 = vpack.c.bf16 %v13227_v40, %v12616_v26  ;;  %v12398_v26 = vld [vmem:[%s14489_s4 + $0xd8] sm:$0xff]  }
  0xc1   : > { %10823 = vmatmul.mubr.msk.bf16.gmra.mrb[4].mxu1 %vm358_vm0, %v13207_v17  ;;  %10530 = vmatprep.mubr.msk.bf16.mxu0 %vm358_vm0, %v12672_v49 }
  0xc2   : > { %10830 = vmatprep.mubr.msk.bf16.mxu1 %vm358_vm0, %v12727_v2 }
  0xc8   : > { %10531 = vmatmul.mubr.msk.bf16.vlgmr.msra.gmra.mrb[0].mxu0 %vm358_vm0, %v12691_v56 }
  0xc9   : > { %10831 = vmatmul.mubr.msk.bf16.vlgmr.msra.gmra.mrb[0].mxu1 %vm358_vm0, %v12751_v10  ;;  %10539 = vmatpush3.bf16.msra.mxu0 %v12395_v57 }
  0xca   : > { %10839 = vmatpush3.bf16.msra.mxu1 %v12395_v57  ;;  %10534 = vmatprep.mubr.msk.bf16.mxu0 %vm358_vm0, %v12711_v61  ;;  %v13256_v57 = vld [vmem:[%s12537_s8 + $0x81] sm:$0xff] }
  0xcb   : > { %10834 = vmatprep.mubr.msk.bf16.mxu1 %vm358_vm0, %v12771_v14  ;;  %10540 = vmatprep.subr.bf16.mxu0 %v12396_v24 }
  0xcc   : > { %10840 = vmatprep.subr.bf16.mxu1 %v12396_v24 }
  0xcd   : > { %10541 = vmatpush3.bf16.msra.mxu0 %v12396_v24 }
  0xce   : > { %10841 = vmatpush3.bf16.msra.mxu1 %v12396_v24  ;;  %10550 = vmatprep.subr.bf16.mxu0 %v12397_v32  ;;  %v12399_v24 = vld [vmem:[%s14489_s4 + $0xe0] sm:$0xff]  }
  0xcf   : > { %10850 = vmatprep.subr.bf16.mxu1 %v12397_v32 }
  0xd0   : > { %10535 = vmatmul.mubr.msk.bf16.gmra.mrb[4].mxu0 %vm358_vm0, %v13207_v17 }
  0xd1   : > { %10835 = vmatmul.mubr.msk.bf16.gmra.mrb[4].mxu1 %vm358_vm0, %v13236_v50  ;;  %10542 = vmatprep.mubr.msk.bf16.mxu0 %vm358_vm0, %v12727_v2 }
  0xd2   : > { %10842 = vmatprep.mubr.msk.bf16.mxu1 %vm358_vm0, %v12788_v21 }
  0xd8   : > { %10543 = vmatmul.mubr.msk.bf16.vlgmr.msra.gmra.mrb[0].mxu0 %vm358_vm0, %v12751_v10  ;;  %v13265_v10 = vpack.c.bf16 %v13256_v57, %v12700_v58  ;;  %v13277_v58 = vpack.c.bf16 %v12737_v5, %v12734_v4  ;;  %v13293_v4 = vld [vmem:[%s12543_s11 + $0x82] sm:$0xff]  ;;  %v12401_v5 = vld [vmem:[%s14489_s4 + $0xf0] sm:$0xff]  }
  0xd9   : > { %10843 = vmatmul.mubr.msk.bf16.vlgmr.msra.gmra.mrb[0].mxu1 %vm358_vm0, %v12812_v29  ;;  %10551 = vmatpush3.bf16.msra.mxu0 %v12397_v32 }
  0xda   : > { %10851 = vmatpush3.bf16.msra.mxu1 %v12397_v32  ;;  %10546 = vmatprep.mubr.msk.bf16.mxu0 %vm358_vm0, %v12771_v14  ;;  %v13281_v32 = vpack.c.bf16 %v12755_v11, %v12740_v6  ;;  %v13302_v6 = vpack.c.bf16 %v13293_v4, %v12758_v12  ;;  %v13306_v11 = vpack.c.bf16 %v12779_v19, %v12766_v16  ;;  %v12402_v19 = vld [vmem:[%s14489_s4 + $0xf8] sm:$0xff]  }
  0xdb   : > { %10846 = vmatprep.mubr.msk.bf16.mxu1 %vm358_vm0, %v12838_v35  ;;  %10552 = vmatprep.subr.bf16.mxu0 %v12398_v26  ;;  %v13318_v12 = vpack.c.bf16 %v12792_v22, %v12782_v20  ;;  %v13322_v16 = vpack.c.bf16 %v12823_v30, %v12795_v23  ;;  %v13334_v20 = vld [vmem:[%s12537_s8 + $0x82] sm:$0xff]  ;;  %v13347_v30 = vpack.c.bf16 %v12858_v42, %v12831_v33 }
  0xdc   : > { %10852 = vmatprep.subr.bf16.mxu1 %v12398_v26  ;;  %v12403_v22 = vld [vmem:[%s14489_s4 + $0x100] sm:$0xff]   ;;  %v13343_v23 = vpack.c.bf16 %v13334_v20, %v12826_v31  ;;  %v13363_v31 = vpack.c.bf16 %v12876_v48, %v12861_v43  ;;  %v13367_v33 = vpack.c.bf16 %v12886_v53, %v12873_v47  ;;  %v13375_v42 = vpack.c.bf16 %v12919_v1, %v12889_v54  ;;  %v12405_v48 = vld [vmem:[%s14489_s4 + $0x110] sm:$0xff]   ;;  %v12406_v1 = vld [vmem:[%s14489_s4 + $0x118] sm:$0xff]  }
  0xdd   : > { %10553 = vmatpush3.bf16.msra.mxu0 %v12398_v26  ;;  %v9229_v43 = vld [vmem:[%s12808_s13 + $0x80] sm:$0xff]  ;;  %v13401_v54 = vpack.c.bf16 %v12953_v18, %v12931_v9 }
  0xde   : > { %10853 = vmatpush3.bf16.msra.mxu1 %v12398_v26  ;;  %10562 = vmatprep.subr.bf16.mxu0 %v12399_v24  ;;  %v12400_v26 = vld [vmem:[%s14489_s4 + $0xe8] sm:$0xff]   ;;  %v9247_v47 = vld [vmem:[%s12819_s16 + $0x80] sm:$0xff] }
  0xdf   : > { %10862 = vmatprep.subr.bf16.mxu1 %v12399_v24  ;;  %v13397_v53 = vpack.c.bf16 %v9247_v47, %v12922_v3  ;;  %v9265_v3 = vld [vmem:[%s12808_s13 + $0x81] sm:$0xff]  ;;  %v14638_v47 = vld [vmem:[#allocation28_spill] sm:$0xff] }
  0xe0   : > { %10547 = vmatmul.mubr.msk.bf16.gmra.mrb[4].mxu0 %vm358_vm0, %v13236_v50  ;;  %v12407_v9 = vld [vmem:[%s14489_s4 + $0x120] sm:$0xff]   ;;  %v13435_v18 = vpack.c.bf16 %v9265_v3, %v12985_v62  ;;  %v14634_v62 = vld [vmem:[#allocation20_spill] sm:$0xff] }
  0xe1   : > { %10847 = vmatmul.mubr.msk.bf16.gmra.mrb[4].mxu1 %vm358_vm0, %v13265_v10  ;;  %10554 = vmatprep.mubr.msk.bf16.mxu0 %vm358_vm0, %v12788_v21  ;;  %v14640_v3 = vld [vmem:[#allocation30_spill] sm:$0xff] }
  0xe2   : > { %10854 = vmatprep.mubr.msk.bf16.mxu1 %vm358_vm0, %v12865_v44 }
  0xe8   : > { %10555 = vmatmul.mubr.msk.bf16.vlgmr.msra.gmra.mrb[0].mxu0 %vm358_vm0, %v12812_v29 }
  0xe9   : > { %10855 = vmatmul.mubr.msk.bf16.vlgmr.msra.gmra.mrb[0].mxu1 %vm358_vm0, %v13277_v58  ;;  %10563 = vmatpush3.bf16.msra.mxu0 %v12399_v24 }
  0xea   : > { %10863 = vmatpush3.bf16.msra.mxu1 %v12399_v24  ;;  %10558 = vmatprep.mubr.msk.bf16.mxu0 %vm358_vm0, %v12838_v35  ;;  %v13351_v24 = vpack.c.bf16 %v12870_v45, %v12843_v37  ;;  %v13371_v37 = vpack.c.bf16 %v12911_v63, %v12879_v51  ;;  %v12404_v45 = vld [vmem:[%s14489_s4 + $0x108] sm:$0xff]   ;;  %v13394_v51 = vpack.c.bf16 %v9229_v43, %v12914_v0  ;;  %v14637_v43 = vld [vmem:[#allocation25_spill] sm:$0xff] }
  0xeb   : > { %10858 = vmatprep.mubr.msk.bf16.mxu1 %vm358_vm0, %v13281_v32  ;;  %10564 = vmatprep.subr.bf16.mxu0 %v12400_v26  ;;  %v13413_v63 = vpack.c.bf16 %v12959_v27, %v12956_v25  ;;  %v13417_v0 = vpack.c.bf16 %v12982_v38, %v12962_v28  ;;  %v13439_v25 = vpack.c.bf16 %v13012_v36, %v12994_v8  ;;  %v14632_v27 = vld [vmem:[#allocation18_spill] sm:$0xff]  ;;  %v14633_v28 = vld [vmem:[#allocation19_spill] sm:$0xff] }
  0xec   : > { %10864 = vmatprep.subr.bf16.mxu1 %v12400_v26  ;;  %v13451_v38 = vpack.c.bf16 %v14633_v28, %v14632_v27  ;;  %v14635_v8 = vld [vmem:[#allocation23_spill] sm:$0xff]  ;;  %v14642_v28 = vld [vmem:[#allocation32_spill] sm:$0xff] }
  0xed   : > { %10565 = vmatpush3.bf16.msra.mxu0 %v12400_v26  ;;  %v13455_v36 = vpack.c.bf16 %v14635_v8, %v14634_v62  ;;  %v14641_v27 = vld [vmem:[#allocation31_spill] sm:$0xff]  ;;  %v12410_v8 = vld [vmem:[%s14489_s4 + $0x138] sm:$0xff]  }
  0xee   : > { %10865 = vmatpush3.bf16.msra.mxu1 %v12400_v26  ;;  %10574 = vmatprep.subr.bf16.mxu0 %v12401_v5  ;;  %v12408_v26 = vld [vmem:[%s14489_s4 + $0x128] sm:$0xff]   ;;  %v13493_v62 = vpack.c.bf16 %v14642_v28, %v14641_v27 }
  0xef   : > { %10874 = vmatprep.subr.bf16.mxu1 %v12401_v5  ;;  %v13540_v28 = vld [vmem:[%s14489_s4 + $0x148] sm:$0xff]  }
  0xf0   : > { %10559 = vmatmul.mubr.msk.bf16.gmra.mrb[4].mxu0 %vm358_vm0, %v13265_v10  ;;  %14652 = vst [vmem:[#allocation25_spill] sm:$0xff] %v13540_v28 }
  0xf1   : > { %10859 = vmatmul.mubr.msk.bf16.gmra.mrb[4].mxu1 %vm358_vm0, %v13302_v6  ;;  %10566 = vmatprep.mubr.msk.bf16.mxu0 %vm358_vm0, %v12865_v44 }
  0xf2   : > { %10866 = vmatprep.mubr.msk.bf16.mxu1 %vm358_vm0, %v13306_v11 }
  0xf8   : > { %10567 = vmatmul.mubr.msk.bf16.vlgmr.msra.gmra.mrb[0].mxu0 %vm358_vm0, %v13277_v58 }
  0xf9   : > { %10867 = vmatmul.mubr.msk.bf16.vlgmr.msra.gmra.mrb[0].mxu1 %vm358_vm0, %v13318_v12  ;;  %10575 = vmatpush3.bf16.msra.mxu0 %v12401_v5 }
  0xfa   : > { %10875 = vmatpush3.bf16.msra.mxu1 %v12401_v5  ;;  %10570 = vmatprep.mubr.msk.bf16.mxu0 %vm358_vm0, %v13281_v32  ;;  %v9283_v5 = vld [vmem:[%s12819_s16 + $0x81] sm:$0xff] }
  0xfb   : > { %10870 = vmatprep.mubr.msk.bf16.mxu1 %vm358_vm0, %v13322_v16  ;;  %10576 = vmatprep.subr.bf16.mxu0 %v12402_v19 }
  0xfc   : > { %10876 = vmatprep.subr.bf16.mxu1 %v12402_v19 }
  0xfd   : > { %10577 = vmatpush3.bf16.msra.mxu0 %v12402_v19 }
  0xfe   : > { %10877 = vmatpush3.bf16.msra.mxu1 %v12402_v19  ;;  %10586 = vmatprep.subr.bf16.mxu0 %v12403_v22  ;;  %v12409_v19 = vld [vmem:[%s14489_s4 + $0x130] sm:$0xff]  }
  0xff   : > { %10886 = vmatprep.subr.bf16.mxu1 %v12403_v22 }
 0x100   : > { %10571 = vmatmul.mubr.msk.bf16.gmra.mrb[4].mxu0 %vm358_vm0, %v13302_v6 }
 0x101   : > { %10871 = vmatmul.mubr.msk.bf16.gmra.mrb[4].mxu1 %vm358_vm0, %v13343_v23  ;;  %10578 = vmatprep.mubr.msk.bf16.mxu0 %vm358_vm0, %v13347_v30 }
 0x102   : > { %10878 = vmatprep.mubr.msk.bf16.mxu1 %vm358_vm0, %v13351_v24 }
 0x108   : > { %10579 = vmatmul.mubr.msk.bf16.vlgmr.msra.gmra.mrb[0].mxu0 %vm358_vm0, %v13363_v31 }
 0x109   : > { %10879 = vmatmul.mubr.msk.bf16.vlgmr.msra.gmra.mrb[0].mxu1 %vm358_vm0, %v13367_v33  ;;  %10587 = vmatpush3.bf16.msra.mxu0 %v12403_v22 }
 0x10a   : > { %10887 = vmatpush3.bf16.msra.mxu1 %v12403_v22  ;;  %10582 = vmatprep.mubr.msk.bf16.mxu0 %vm358_vm0, %v13371_v37  ;;  %v14636_v22 = vld [vmem:[#allocation24_spill] sm:$0xff] }
 0x10b   : > { %10882 = vmatprep.mubr.msk.bf16.mxu1 %vm358_vm0, %v13375_v42  ;;  %10588 = vmatprep.subr.bf16.mxu0 %v12404_v45 }
 0x10c   : > { %10888 = vmatprep.subr.bf16.mxu1 %v12404_v45 }
 0x10d   : > { %10589 = vmatpush3.bf16.msra.mxu0 %v12404_v45 }
 0x10e   : > { %10889 = vmatpush3.bf16.msra.mxu1 %v12404_v45  ;;  %10598 = vmatprep.subr.bf16.mxu0 %v12405_v48  ;;  %v13473_v45 = vpack.c.bf16 %v9283_v5, %v14636_v22  ;;  %v13508_v5 = vld [vmem:[%s14489_s4 + $0x140] sm:$0xff]   ;;  %v14644_v22 = vld [vmem:[#allocation33_spill] sm:$0xff] }
 0x10f   : > { %10898 = vmatprep.subr.bf16.mxu1 %v12405_v48  ;;  %14643 = vst [vmem:[#allocation18_spill] sm:$0xff] %v13508_v5 }
 0x110   : > { %10583 = vmatmul.mubr.msk.bf16.gmra.mrb[4].mxu0 %vm358_vm0, %v13394_v51 }
 0x111   : > { %10883 = vmatmul.mubr.msk.bf16.gmra.mrb[4].mxu1 %vm358_vm0, %v13397_v53  ;;  %10590 = vmatprep.mubr.msk.bf16.mxu0 %vm358_vm0, %v13351_v24 }
 0x112   : > { %10890 = vmatprep.mubr.msk.bf16.mxu1 %vm358_vm0, %v13401_v54 }
 0x118   : > { %10591 = vmatmul.mubr.msk.bf16.vlgmr.msra.gmra.mrb[0].mxu0 %vm358_vm0, %v13367_v33 }
 0x119   : > { %10891 = vmatmul.mubr.msk.bf16.vlgmr.msra.gmra.mrb[0].mxu1 %vm358_vm0, %v13413_v63  ;;  %10599 = vmatpush3.bf16.msra.mxu0 %v12405_v48 }
 0x11a   : > { %10899 = vmatpush3.bf16.msra.mxu1 %v12405_v48  ;;  %10594 = vmatprep.mubr.msk.bf16.mxu0 %vm358_vm0, %v13375_v42  ;;  %v13477_v48 = vpack.c.bf16 %v14638_v47, %v14637_v43 }
 0x11b   : > { %10894 = vmatprep.mubr.msk.bf16.mxu1 %vm358_vm0, %v13417_v0  ;;  %10600 = vmatprep.subr.bf16.mxu0 %v12406_v1 }
 0x11c   : > { %10900 = vmatprep.subr.bf16.mxu1 %v12406_v1 }
 0x11d   : > { %10601 = vmatpush3.bf16.msra.mxu0 %v12406_v1 }
 0x11e   : > { %10901 = vmatpush3.bf16.msra.mxu1 %v12406_v1  ;;  %10610 = vmatprep.subr.bf16.mxu0 %v12407_v9  ;;  %v14639_v1 = vld [vmem:[#allocation29_spill] sm:$0xff] }
 0x11f   : > { %10910 = vmatprep.subr.bf16.mxu1 %v12407_v9 }
 0x120   : > { %10595 = vmatmul.mubr.msk.bf16.gmra.mrb[4].mxu0 %vm358_vm0, %v13397_v53 }
 0x121   : > { %10895 = vmatmul.mubr.msk.bf16.gmra.mrb[4].mxu1 %vm358_vm0, %v13435_v18  ;;  %10602 = vmatprep.mubr.msk.bf16.mxu0 %vm358_vm0, %v13401_v54 }
 0x122   : > { %10902 = vmatprep.mubr.msk.bf16.mxu1 %vm358_vm0, %v13439_v25 }
 0x128   : > { %10603 = vmatmul.mubr.msk.bf16.vlgmr.msra.gmra.mrb[0].mxu0 %vm358_vm0, %v13413_v63 }
 0x129   : > { %10903 = vmatmul.mubr.msk.bf16.vlgmr.msra.gmra.mrb[0].mxu1 %vm358_vm0, %v13451_v38  ;;  %10611 = vmatpush3.bf16.msra.mxu0 %v12407_v9 }
 0x12a   : > { %10911 = vmatpush3.bf16.msra.mxu1 %v12407_v9  ;;  %10606 = vmatprep.mubr.msk.bf16.mxu0 %vm358_vm0, %v13417_v0  ;;  %v13489_v9 = vpack.c.bf16 %v14640_v3, %v14639_v1  ;;  %v14650_v3 = vld [vmem:[#allocation37_spill] sm:$0xff] }
 0x12b   : > { %10906 = vmatprep.mubr.msk.bf16.mxu1 %vm358_vm0, %v13455_v36  ;;  %10612 = vmatprep.subr.bf16.mxu0 %v12408_v26  ;;  %v13535_v27 = vpack.c.bf16 %v13159_v39, %v14650_v3  ;;  %v9312_v39 = vld [vmem:[%s12543_s11 + $0x20] sm:$0xff] }
 0x12c   : > { %10912 = vmatprep.subr.bf16.mxu1 %v12408_v26 }
 0x12d   : > { %10613 = vmatpush3.bf16.msra.mxu0 %v12408_v26  ;;  %14651 = vst [vmem:[#allocation24_spill] sm:$0xff] %v13535_v27 }
 0x12e   : > { %10913 = vmatpush3.bf16.msra.mxu1 %v12408_v26  ;;  %10622 = vmatprep.subr.bf16.mxu0 %v12409_v19  ;;  %v9301_v26 = vld [vmem:[%s12808_s13 + $0x82] sm:$0xff] }
 0x12f   : > { %10922 = vmatprep.subr.bf16.mxu1 %v12409_v19  ;;  %v13513_v43 = vpack.c.bf16 %v9301_v26, %v14644_v22  ;;  %v13556_v26 = vld [vmem:[%s14489_s4 + $0x150] sm:$0xff]   ;;  %v9330_v22 = vld [vmem:[%s12537_s8 + $0x20] sm:$0xff] }
 0x130   : > { %10607 = vmatmul.mubr.msk.bf16.gmra.mrb[4].mxu0 %vm358_vm0, %v13435_v18  ;;  %14653 = vst [vmem:[#allocation28_spill] sm:$0xff] %v13556_v26 }
 0x131   : > { %10907 = vmatmul.mubr.msk.bf16.gmra.mrb[4].mxu1 %vm358_vm0, %v13473_v45  ;;  %10614 = vmatprep.mubr.msk.bf16.mxu0 %vm358_vm0, %v13439_v25  ;;  %14645 = vst [vmem:[#allocation19_spill] sm:$0xff] %v13513_v43 }
 0x132   : > { %10914 = vmatprep.mubr.msk.bf16.mxu1 %vm358_vm0, %v13477_v48 }
 0x138   : > { %10615 = vmatmul.mubr.msk.bf16.vlgmr.msra.gmra.mrb[0].mxu0 %vm358_vm0, %v13451_v38 }
 0x139   : > { %10915 = vmatmul.mubr.msk.bf16.vlgmr.msra.gmra.mrb[0].mxu1 %vm358_vm0, %v13489_v9  ;;  %10623 = vmatpush3.bf16.msra.mxu0 %v12409_v19 }
 0x13a   : > { %10923 = vmatpush3.bf16.msra.mxu1 %v12409_v19  ;;  %10618 = vmatprep.mubr.msk.bf16.mxu0 %vm358_vm0, %v13455_v36  ;;  %v14646_v19 = vld [vmem:[#allocation34_spill] sm:$0xff] }
 0x13b   : > { %10918 = vmatprep.mubr.msk.bf16.mxu1 %vm358_vm0, %v13493_v62  ;;  %10624 = vmatprep.subr.bf16.mxu0 %v12410_v8  ;;  %v13517_v47 = vpack.c.bf16 %v13130_v41, %v14646_v19  ;;  %v14648_v41 = vld [vmem:[#allocation36_spill] sm:$0xff] }
 0x13c   : > { %10924 = vmatprep.subr.bf16.mxu1 %v12410_v8  ;;  %v13531_v1 = vpack.c.bf16 %v13136_v15, %v14648_v41  ;;  %v9313_v15 = vld [vmem:[%s12543_s11 + $0x30] sm:$0xff] }
 0x13d   : > { %10625 = vmatpush3.bf16.msra.mxu0 %v12410_v8  ;;  %14647 = vst [vmem:[#allocation20_spill] sm:$0xff] %v13517_v47  ;;  %v9331_v19 = vld [vmem:[%s12537_s8 + $0x30] sm:$0xff]  ;;  %v13568_v3 = vpack.c.bf16 %v9313_v15, %v9312_v39  ;;  %v9332_v39 = vld [vmem:[%s12537_s8 + $0x40] sm:$0xff] }
 0x13e   : > { %10925 = vmatpush3.bf16.msra.mxu1 %v12410_v8  ;;  %10634 = vmatprep.subr.bf16.mxu0 %v13508_v5  ;;  %14649 = vst [vmem:[#allocation23_spill] sm:$0xff] %v13531_v1  ;;  %v9493_v8 = vld [vmem:[%s12819_s16 + $0x82] sm:$0xff]  ;;  %v9333_v15 = vld [vmem:[%s12537_s8 + $0x50] sm:$0xff] }
 0x13f   : > { %10934 = vmatprep.subr.bf16.mxu1 %v13508_v5  ;;  %v13565_v41 = vpack.c.bf16 %v9493_v8, %v13162_v59  ;;  %14655 = vst [vmem:[#allocation30_spill] sm:$0xff] %v13568_v3  ;;  %v9314_v59 = vld [vmem:[%s12543_s11 + $0x40] sm:$0xff]  ;;  %v9315_v8 = vld [vmem:[%s12543_s11 + $0x50] sm:$0xff] }
 0x140   : > { %10619 = vmatmul.mubr.msk.bf16.gmra.mrb[4].mxu0 %vm358_vm0, %v13473_v45 }
 0x141   : > { %10919 = vmatmul.mubr.msk.bf16.gmra.mrb[4].mxu1 %vm358_vm0, %v13513_v43  ;;  %10626 = vmatprep.mubr.msk.bf16.mxu0 %vm358_vm0, %v13477_v48  ;;  %14654 = vst [vmem:[#allocation29_spill] sm:$0xff] %v13565_v41 }
 0x142   : > { %10926 = vmatprep.mubr.msk.bf16.mxu1 %vm358_vm0, %v13517_v47 }
 0x148   : > { %10627 = vmatmul.mubr.msk.bf16.vlgmr.msra.gmra.mrb[0].mxu0 %vm358_vm0, %v13489_v9 }
 0x149   : > { %10927 = vmatmul.mubr.msk.bf16.vlgmr.msra.gmra.mrb[0].mxu1 %vm358_vm0, %v13531_v1  ;;  %10635 = vmatpush3.bf16.msra.mxu0 %v13508_v5  ;;  %v9335_v1 = vld [vmem:[%s12537_s8 + $0x70] sm:$0xff] }
 0x14a   : > { %10935 = vmatpush3.bf16.msra.mxu1 %v13508_v5  ;;  %10630 = vmatprep.mubr.msk.bf16.mxu0 %vm358_vm0, %v13493_v62  ;;  %v13571_v5 = vpack.c.bf16 %v9331_v19, %v9330_v22  ;;  %v9316_v22 = vld [vmem:[%s12543_s11 + $0x60] sm:$0xff]  ;;  %v9317_v19 = vld [vmem:[%s12543_s11 + $0x70] sm:$0xff] }
 0x14b   : > { %10930 = vmatprep.mubr.msk.bf16.mxu1 %vm358_vm0, %v13535_v27  ;;  %10636 = vmatprep.subr.bf16.mxu0 %v13540_v28  ;;  %v9334_v27 = vld [vmem:[%s12537_s8 + $0x60] sm:$0xff] }
 0x14c   : > { %10936 = vmatprep.subr.bf16.mxu1 %v13540_v28  ;;  %v13597_v47 = vpack.c.bf16 %v9335_v1, %v9334_v27  ;;  %v9337_v1 = vld [vmem:[%s12537_s8 + $0x90] sm:$0xff]  ;;  %v13617_v27 = vld [vmem:[%s14489_s4 + $0x160] sm:$0xff]  }
 0x14d   : > { %10637 = vmatpush3.bf16.msra.mxu0 %v13540_v28  ;;  %14657 = vst [vmem:[#allocation32_spill] sm:$0xff] %v13617_v27 }
 0x14e   : > { %10937 = vmatpush3.bf16.msra.mxu1 %v13540_v28  ;;  %10646 = vmatprep.subr.bf16.mxu0 %v13556_v26  ;;  %v13589_v28 = vpack.c.bf16 %v9315_v8, %v9314_v59  ;;  %v9319_v59 = vld [vmem:[%s12543_s11 + $0x90] sm:$0xff]  ;;  %v9348_v8 = vld [vmem:[%s12543_s11 + $0x21] sm:$0xff] }
 0x14f   : > { %10946 = vmatprep.subr.bf16.mxu1 %v13556_v26 }
 0x150   : > { %10631 = vmatmul.mubr.msk.bf16.gmra.mrb[4].mxu0 %vm358_vm0, %v13513_v43  ;;  %v13602_v43 = vld [vmem:[%s14489_s4 + $0x158] sm:$0xff]  }
 0x151   : > { %10931 = vmatmul.mubr.msk.bf16.gmra.mrb[4].mxu1 %vm358_vm0, %v13565_v41  ;;  %10638 = vmatprep.mubr.msk.bf16.mxu0 %vm358_vm0, %v13568_v3  ;;  %v13593_v41 = vpack.c.bf16 %v9333_v15, %v9332_v39  ;;  %v13595_v3 = vpack.c.bf16 %v9317_v19, %v9316_v22  ;;  %14656 = vst [vmem:[#allocation31_spill] sm:$0xff] %v13602_v43  ;;  %v9349_v39 = vld [vmem:[%s12543_s11 + $0x31] sm:$0xff] }
 0x152   : > { %10938 = vmatprep.mubr.msk.bf16.mxu1 %vm358_vm0, %v13571_v5  ;;  %v13625_v15 = vpack.c.bf16 %v9319_v59, %v13189_v7  ;;  %v13629_v22 = vpack.c.bf16 %v9337_v1, %v13194_v46  ;;  %v13633_v19 = vpack.c.bf16 %v9349_v39, %v9348_v8  ;;  %v9350_v46 = vld [vmem:[%s12543_s11 + $0x41] sm:$0xff]  ;;  %v9351_v7 = vld [vmem:[%s12543_s11 + $0x51] sm:$0xff] }
 0x153   : > { %v9352_v59 = vld [vmem:[%s12543_s11 + $0x61] sm:$0xff]  ;;  %v9353_v1 = vld [vmem:[%s12543_s11 + $0x71] sm:$0xff]  ;;  %v13649_v8 = vpack.c.bf16 %v9351_v7, %v9350_v46 }
 0x154   : > { %14658 = vst [vmem:[#allocation33_spill] sm:$0xff] %v13625_v15  ;;  %14659 = vst [vmem:[#allocation34_spill] sm:$0xff] %v13629_v22  ;;  %v13651_v39 = vpack.c.bf16 %v9353_v1, %v9352_v59  ;;  %v9355_v46 = vld [vmem:[%s12543_s11 + $0x91] sm:$0xff]  ;;  %v9366_v59 = vld [vmem:[%s12537_s8 + $0x21] sm:$0xff] }
 0x155   : > { %14660 = vst [vmem:[#allocation36_spill] sm:$0xff] %v13649_v8  ;;  %v13670_v7 = vld [vmem:[%s14489_s4 + $0x170] sm:$0xff]  }
 0x156   : > { %14661 = vst [vmem:[#allocation37_spill] sm:$0xff] %v13651_v39  ;;  %14663 = vst [vmem:[#allocation42_spill] sm:$0xff] %v13670_v7  ;;  %v9367_v1 = vld [vmem:[%s12537_s8 + $0x31] sm:$0xff] }
 0x158   : > { %10639 = vmatmul.mubr.msk.bf16.vlgmr.msra.gmra.mrb[0].mxu0 %vm358_vm0, %v13589_v28 }
 0x159   : > { %10939 = vmatmul.mubr.msk.bf16.vlgmr.msra.gmra.mrb[0].mxu1 %vm358_vm0, %v13593_v41  ;;  %10647 = vmatpush3.bf16.msra.mxu0 %v13556_v26 }
 0x15a   : > { %10947 = vmatpush3.bf16.msra.mxu1 %v13556_v26  ;;  %10642 = vmatprep.mubr.msk.bf16.mxu0 %vm358_vm0, %v13595_v3  ;;  %v13683_v26 = vpack.c.bf16 %v9367_v1, %v9366_v59  ;;  %v9370_v59 = vld [vmem:[%s12537_s8 + $0x61] sm:$0xff]  ;;  %v9371_v1 = vld [vmem:[%s12537_s8 + $0x71] sm:$0xff] }
 0x15b   : > { %10942 = vmatprep.mubr.msk.bf16.mxu1 %vm358_vm0, %v13597_v47  ;;  %10648 = vmatprep.subr.bf16.mxu0 %v13602_v43 }
 0x15c   : > { %10948 = vmatprep.subr.bf16.mxu1 %v13602_v43 }
 0x15d   : > { %10649 = vmatpush3.bf16.msra.mxu0 %v13602_v43 }
 0x15e   : > { %10949 = vmatpush3.bf16.msra.mxu1 %v13602_v43  ;;  %10658 = vmatprep.subr.bf16.mxu0 %v13617_v27  ;;  %v13656_v43 = vld [vmem:[%s14489_s4 + $0x168] sm:$0xff]  }
 0x15f   : > { %10958 = vmatprep.subr.bf16.mxu1 %v13617_v27  ;;  %14662 = vst [vmem:[#allocation41_spill] sm:$0xff] %v13656_v43 }
 0x160   : > { %10643 = vmatmul.mubr.msk.bf16.gmra.mrb[4].mxu0 %vm358_vm0, %v13625_v15  ;;  %v13701_v15 = vpack.c.bf16 %v9371_v1, %v9370_v59  ;;  %v9384_v59 = vld [vmem:[%s12543_s11 + $0x22] sm:$0xff]  ;;  %v9385_v1 = vld [vmem:[%s12543_s11 + $0x32] sm:$0xff] }
 0x161   : > { %10943 = vmatmul.mubr.msk.bf16.gmra.mrb[4].mxu1 %vm358_vm0, %v13629_v22  ;;  %10650 = vmatprep.mubr.msk.bf16.mxu0 %vm358_vm0, %v13571_v5 }
 0x162   : > { %10950 = vmatprep.mubr.msk.bf16.mxu1 %vm358_vm0, %v13633_v19  ;;  %14666 = vst [vmem:[#allocation45_spill] sm:$0xff] %v13701_v15 }
 0x168   : > { %10651 = vmatmul.mubr.msk.bf16.vlgmr.msra.gmra.mrb[0].mxu0 %vm358_vm0, %v13593_v41 }
 0x169   : > { %10951 = vmatmul.mubr.msk.bf16.vlgmr.msra.gmra.mrb[0].mxu1 %vm358_vm0, %v13649_v8  ;;  %10659 = vmatpush3.bf16.msra.mxu0 %v13617_v27 }
 0x16a   : > { %10959 = vmatpush3.bf16.msra.mxu1 %v13617_v27  ;;  %10654 = vmatprep.mubr.msk.bf16.mxu0 %vm358_vm0, %v13597_v47  ;;  %v13679_v27 = vpack.c.bf16 %v9355_v46, %v13227_v40  ;;  %v9368_v40 = vld [vmem:[%s12537_s8 + $0x41] sm:$0xff]  ;;  %v9369_v46 = vld [vmem:[%s12537_s8 + $0x51] sm:$0xff] }
 0x16b   : > { %10954 = vmatprep.mubr.msk.bf16.mxu1 %vm358_vm0, %v13651_v39  ;;  %10660 = vmatprep.subr.bf16.mxu0 %v13656_v43 }
 0x16c   : > { %10960 = vmatprep.subr.bf16.mxu1 %v13656_v43  ;;  %14664 = vst [vmem:[#allocation43_spill] sm:$0xff] %v13679_v27 }
 0x16d   : > { %10661 = vmatpush3.bf16.msra.mxu0 %v13656_v43 }
 0x16e   : > { %10961 = vmatpush3.bf16.msra.mxu1 %v13656_v43  ;;  %10670 = vmatprep.subr.bf16.mxu0 %v13670_v7  ;;  %v13699_v43 = vpack.c.bf16 %v9369_v46, %v9368_v40  ;;  %v9373_v40 = vld [vmem:[%s12537_s8 + $0x91] sm:$0xff]  ;;  %v13720_v46 = vld [vmem:[%s14489_s4 + $0x180] sm:$0xff]  }
 0x16f   : > { %10970 = vmatprep.subr.bf16.mxu1 %v13670_v7  ;;  %14668 = vst [vmem:[#allocation47_spill] sm:$0xff] %v13720_v46 }
 0x170   : > { %10655 = vmatmul.mubr.msk.bf16.gmra.mrb[4].mxu0 %vm358_vm0, %v13629_v22  ;;  %14665 = vst [vmem:[#allocation44_spill] sm:$0xff] %v13699_v43  ;;  %v13706_v22 = vld [vmem:[%s14489_s4 + $0x178] sm:$0xff]  }
 0x171   : > { %10955 = vmatmul.mubr.msk.bf16.gmra.mrb[4].mxu1 %vm358_vm0, %v13679_v27  ;;  %10662 = vmatprep.mubr.msk.bf16.mxu0 %vm358_vm0, %v13633_v19  ;;  %14667 = vst [vmem:[#allocation46_spill] sm:$0xff] %v13706_v22 }
 0x172   : > { %10962 = vmatprep.mubr.msk.bf16.mxu1 %vm358_vm0, %v13683_v26 }
 0x178   : > { %10663 = vmatmul.mubr.msk.bf16.vlgmr.msra.gmra.mrb[0].mxu0 %vm358_vm0, %v13649_v8 }
 0x179   : > { %10963 = vmatmul.mubr.msk.bf16.vlgmr.msra.gmra.mrb[0].mxu1 %vm358_vm0, %v13699_v43  ;;  %10671 = vmatpush3.bf16.msra.mxu0 %v13670_v7 }
 0x17a   : > { %10971 = vmatpush3.bf16.msra.mxu1 %v13670_v7  ;;  %10666 = vmatprep.mubr.msk.bf16.mxu0 %vm358_vm0, %v13651_v39  ;;  %v13729_v7 = vpack.c.bf16 %v9373_v40, %v13256_v57  ;;  %v13733_v39 = vpack.c.bf16 %v9385_v1, %v9384_v59  ;;  %v9386_v57 = vld [vmem:[%s12543_s11 + $0x42] sm:$0xff]  ;;  %v9387_v40 = vld [vmem:[%s12543_s11 + $0x52] sm:$0xff] }
 0x17b   : > { %10966 = vmatprep.mubr.msk.bf16.mxu1 %vm358_vm0, %v13701_v15  ;;  %10672 = vmatprep.subr.bf16.mxu0 %v13706_v22  ;;  %v9388_v59 = vld [vmem:[%s12543_s11 + $0x62] sm:$0xff]  ;;  %v9389_v1 = vld [vmem:[%s12543_s11 + $0x72] sm:$0xff] }
 0x17c   : > { %10972 = vmatprep.subr.bf16.mxu1 %v13706_v22  ;;  %v13751_v8 = vpack.c.bf16 %v9389_v1, %v9388_v59  ;;  %v9515_v59 = vld [vmem:[%s12537_s8 + $0x32] sm:$0xff] }
 0x17d   : > { %10673 = vmatpush3.bf16.msra.mxu0 %v13706_v22 }
 0x17e   : > { %10973 = vmatpush3.bf16.msra.mxu1 %v13706_v22  ;;  %10682 = vmatprep.subr.bf16.mxu0 %v13720_v46  ;;  %v13749_v22 = vpack.c.bf16 %v9387_v40, %v9386_v57  ;;  %14670 = vst [vmem:[#allocation49_spill] sm:$0xff] %v13751_v8  ;;  %v9391_v57 = vld [vmem:[%s12543_s11 + $0x92] sm:$0xff]  ;;  %v9514_v40 = vld [vmem:[%s12537_s8 + $0x22] sm:$0xff] }
 0x17f   : > { %10982 = vmatprep.subr.bf16.mxu1 %v13720_v46  ;;  %v13774_v1 = vpack.c.bf16 %v9391_v57, %v13293_v4  ;;  %v9516_v4 = vld [vmem:[%s12537_s8 + $0x42] sm:$0xff]  ;;  %v9517_v57 = vld [vmem:[%s12537_s8 + $0x52] sm:$0xff] }
 0x180   : > { %10667 = vmatmul.mubr.msk.bf16.gmra.mrb[4].mxu0 %vm358_vm0, %v13679_v27  ;;  %14669 = vst [vmem:[#allocation48_spill] sm:$0xff] %v13749_v22  ;;  %v13756_v27 = vld [vmem:[%s14489_s4 + $0x188] sm:$0xff]  }
 0x181   : > { %10967 = vmatmul.mubr.msk.bf16.gmra.mrb[4].mxu1 %vm358_vm0, %v13729_v7  ;;  %10674 = vmatprep.mubr.msk.bf16.mxu0 %vm358_vm0, %v13683_v26  ;;  %14671 = vst [vmem:[#allocation50_spill] sm:$0xff] %v13756_v27  ;;  %14672 = vst [vmem:[#allocation51_spill] sm:$0xff] %v13774_v1 }
 0x182   : > { %10974 = vmatprep.mubr.msk.bf16.mxu1 %vm358_vm0, %v13733_v39 }
 0x188   : > { %10675 = vmatmul.mubr.msk.bf16.vlgmr.msra.gmra.mrb[0].mxu0 %vm358_vm0, %v13699_v43 }
 0x189   : > { %10975 = vmatmul.mubr.msk.bf16.vlgmr.msra.gmra.mrb[0].mxu1 %vm358_vm0, %v13749_v22  ;;  %10683 = vmatpush3.bf16.msra.mxu0 %v13720_v46 }
 0x18a   : > { %10983 = vmatpush3.bf16.msra.mxu1 %v13720_v46  ;;  %10678 = vmatprep.mubr.msk.bf16.mxu0 %vm358_vm0, %v13701_v15  ;;  %v13778_v46 = vpack.c.bf16 %v9515_v59, %v9514_v40  ;;  %v12421_v15 = vld [vmem:[%s14489_s4 + $0x10] sm:$0xff]   ;;  %v9518_v40 = vld [vmem:[%s12537_s8 + $0x62] sm:$0xff] }
 0x18b   : > { %10978 = vmatprep.mubr.msk.bf16.mxu1 %vm358_vm0, %v13751_v8  ;;  %10684 = vmatprep.subr.bf16.mxu0 %v13756_v27  ;;  %v9519_v59 = vld [vmem:[%s12537_s8 + $0x72] sm:$0xff] }
 0x18c   : > { %10984 = vmatprep.subr.bf16.mxu1 %v13756_v27  ;;  %14673 = vst [vmem:[#allocation52_spill] sm:$0xff] %v13778_v46  ;;  %v13797_v43 = vpack.c.bf16 %v9519_v59, %v9518_v40  ;;  %v14677_v40 = vld [vmem:[#allocation6_spill] sm:$0xff]  ;;  %v14678_v59 = vld [vmem:[#allocation13_spill] sm:$0xff] }
 0x18d   : > { %10685 = vmatpush3.bf16.msra.mxu0 %v13756_v27 }
 0x18e   : > { %10985 = vmatpush3.bf16.msra.mxu1 %v13756_v27  ;;  %10994 = vmatprep.subr.bf16.mxu0 %v12421_v15  ;;  %v13795_v27 = vpack.c.bf16 %v9517_v57, %v9516_v4  ;;  %14675 = vst [vmem:[#allocation54_spill] sm:$0xff] %v13797_v43  ;;  %v12422_v4 = vld [vmem:[%s14489_s4 + $0x18] sm:$0xff]  }
 0x18f   : > { %11294 = vmatprep.subr.bf16.mxu1 %v12421_v15 }
 0x190   : > { %10679 = vmatmul.mubr.msk.bf16.gmra.mrb[4].mxu0 %vm358_vm0, %v13729_v7  ;;  %14674 = vst [vmem:[#allocation53_spill] sm:$0xff] %v13795_v27 }
 0x191   : > { %10979 = vmatmul.mubr.msk.bf16.gmra.mrb[4].mxu1 %vm358_vm0, %v13774_v1  ;;  %10686 = vmatprep.mubr.msk.bf16.mxu0 %vm358_vm0, %v13733_v39 }
 0x192   : > { %10986 = vmatprep.mubr.msk.bf16.mxu1 %vm358_vm0, %v13778_v46  ;;  %v9521_v46 = vld [vmem:[%s12537_s8 + $0x92] sm:$0xff] }
 0x193   : > { %v13812_v57 = vpack.c.bf16 %v9521_v46, %v13334_v20  ;;  %v14679_v20 = vld [vmem:[#allocation8_spill] sm:$0xff]  ;;  %v14680_v46 = vld [vmem:[#allocation14_spill] sm:$0xff] }
 0x195   : > { %14676 = vst [vmem:[#allocation55_spill] sm:$0xff] %v13812_v57 }
 0x198   : > { %10687 = vmatmul.mubr.msk.bf16.vlgmr.msra.gmra.mrb[0].mxu0 %vm358_vm0, %v13749_v22  ;;  %v14686_v22 = vld [vmem:[#allocation7_spill] sm:$0xff] }
 0x199   : > { %10987 = vmatmul.mubr.msk.bf16.vlgmr.msra.gmra.mrb[0].mxu1 %vm358_vm0, %v13795_v27  ;;  %10995 = vmatpush3.bf16.msra.mxu0 %v12421_v15  ;;  %v12425_v27 = vld [vmem:[%s14489_s4 + $0x20] sm:$0xff]  }
 0x19a   : > { %11295 = vmatpush3.bf16.msra.mxu1 %v12421_v15  ;;  %10690 = vmatprep.mubr.msk.bf16.mxu0 %vm358_vm0, %v13751_v8  ;;  %v12423_v15 = vld [vmem:[%s14489_s4] sm:$0xff]   ;;  %v14685_v8 = vld [vmem:[#allocation5_spill] sm:$0xff] }
 0x19b   : > { %10990 = vmatprep.mubr.msk.bf16.mxu1 %vm358_vm0, %v13797_v43  ;;  %10996 = vmatprep.subr.bf16.mxu0 %v12422_v4  ;;  %v14682_v43 = vld [vmem:[#allocation15_spill] sm:$0xff] }
 0x19c   : > { %11296 = vmatprep.subr.bf16.mxu1 %v12422_v4 }
 0x19d   : > { %10997 = vmatpush3.bf16.msra.mxu0 %v12422_v4 }
 0x19e   : > { %11297 = vmatpush3.bf16.msra.mxu1 %v12422_v4  ;;  %11006 = vmatprep.subr.bf16.mxu0 %v12423_v15  ;;  %v14681_v4 = vld [vmem:[#allocation10_spill] sm:$0xff] }
 0x19f   : > { %11306 = vmatprep.subr.bf16.mxu1 %v12423_v15 }
 0x1a0   : > { %10691 = vmatmul.mubr.msk.bf16.gmra.mrb[4].mxu0 %vm358_vm0, %v13774_v1  ;;  %v14684_v1 = vld [vmem:[#allocation16_spill] sm:$0xff] }
 0x1a1   : > { %10991 = vmatmul.mubr.msk.bf16.gmra.mrb[4].mxu1 %vm358_vm0, %v13812_v57  ;;  %10998 = vmatprep.mubr.msk.bf16.mxu0 %vm358_vm0, %v14677_v40  ;;  %v12424_v57 = vld [vmem:[%s14489_s4 + $0x8] sm:$0xff]  }
 0x1a2   : > { %11298 = vmatprep.mubr.msk.bf16.mxu1 %vm358_vm0, %v14678_v59 }
 0x1a8   : > { %10999 = vmatmul.mubr.msk.bf16.vlgmr.msra.gmra.mrb[8].mxu0 %vm358_vm0, %v14679_v20 }
 0x1a9   : > { %11299 = vmatmul.mubr.msk.bf16.vlgmr.msra.gmra.mrb[8].mxu1 %vm358_vm0, %v14680_v46  ;;  %11007 = vmatpush3.bf16.msra.mxu0 %v12423_v15 }
 0x1aa   : > { %11307 = vmatpush3.bf16.msra.mxu1 %v12423_v15  ;;  %11002 = vmatprep.mubr.msk.bf16.mxu0 %vm358_vm0, %v14681_v4  ;;  %v14683_v15 = vld [vmem:[#allocation12_spill] sm:$0xff] }
 0x1ab   : > { %11302 = vmatprep.mubr.msk.bf16.mxu1 %vm358_vm0, %v14682_v43  ;;  %11008 = vmatprep.subr.bf16.mxu0 %v12424_v57 }
 0x1ac   : > { %11308 = vmatprep.subr.bf16.mxu1 %v12424_v57 }
 0x1ad   : > { %11009 = vmatpush3.bf16.msra.mxu0 %v12424_v57 }
 0x1ae   : > { %11309 = vmatpush3.bf16.msra.mxu1 %v12424_v57  ;;  %11018 = vmatprep.subr.bf16.mxu0 %v12425_v27  ;;  %v14687_v57 = vld [vmem:[#allocation9_spill] sm:$0xff] }
 0x1af   : > { %11318 = vmatprep.subr.bf16.mxu1 %v12425_v27 }
 0x1b0   : > { %11003 = vmatmul.mubr.msk.bf16.gmra.mrb[12].mxu0 %vm358_vm0, %v14683_v15 }
 0x1b1   : > { %11303 = vmatmul.mubr.msk.bf16.gmra.mrb[12].mxu1 %vm358_vm0, %v14684_v1  ;;  %11010 = vmatprep.mubr.msk.bf16.mxu0 %vm358_vm0, %v14685_v8  ;;  %v12426_v8 = vld [vmem:[%s14489_s4 + $0x28] sm:$0xff]  }
 0x1b2   : > { %11310 = vmatprep.mubr.msk.bf16.mxu1 %vm358_vm0, %v14677_v40  ;;  %v14689_v40 = vld [vmem:[#allocation17_spill] sm:$0xff] }
 0x1b8   : > { %11011 = vmatmul.mubr.msk.bf16.vlgmr.msra.gmra.mrb[8].mxu0 %vm358_vm0, %v14686_v22  ;;  %v12427_v22 = vld [vmem:[%s14489_s4 + $0x30] sm:$0xff]  }
 0x1b9   : > { %11311 = vmatmul.mubr.msk.bf16.vlgmr.msra.gmra.mrb[8].mxu1 %vm358_vm0, %v14679_v20  ;;  %11019 = vmatpush3.bf16.msra.mxu0 %v12425_v27  ;;  %v14690_v20 = vld [vmem:[#allocation21_spill] sm:$0xff] }
 0x1ba   : > { %11319 = vmatpush3.bf16.msra.mxu1 %v12425_v27  ;;  %11014 = vmatprep.mubr.msk.bf16.mxu0 %vm358_vm0, %v14687_v57  ;;  %v14688_v27 = vld [vmem:[#allocation11_spill] sm:$0xff]  ;;  %v12431_v57 = vld [vmem:[%s14489_s4 + $0x50] sm:$0xff]  }
 0x1bb   : > { %11314 = vmatprep.mubr.msk.bf16.mxu1 %vm358_vm0, %v14681_v4  ;;  %11020 = vmatprep.subr.bf16.mxu0 %v12426_v8  ;;  %v14691_v4 = vld [vmem:[#allocation22_spill] sm:$0xff] }
 0x1bc   : > { %11320 = vmatprep.subr.bf16.mxu1 %v12426_v8 }
 0x1bd   : > { %11021 = vmatpush3.bf16.msra.mxu0 %v12426_v8 }
 0x1be   : > { %11321 = vmatpush3.bf16.msra.mxu1 %v12426_v8  ;;  %11030 = vmatprep.subr.bf16.mxu0 %v12427_v22  ;;  %v14694_v8 = vld [vmem:[#allocation35_spill] sm:$0xff] }
 0x1bf   : > { %11330 = vmatprep.subr.bf16.mxu1 %v12427_v22 }
 0x1c0   : > { %11015 = vmatmul.mubr.msk.bf16.gmra.mrb[12].mxu0 %vm358_vm0, %v14688_v27  ;;  %v12432_v27 = vld [vmem:[%s14489_s4 + $0x58] sm:$0xff]  }
 0x1c1   : > { %11315 = vmatmul.mubr.msk.bf16.gmra.mrb[12].mxu1 %vm358_vm0, %v14683_v15  ;;  %11022 = vmatprep.mubr.msk.bf16.mxu0 %vm358_vm0, %v14678_v59  ;;  %v12428_v59 = vld [vmem:[%s14489_s4 + $0x38] sm:$0xff]   ;;  %v14693_v15 = vld [vmem:[#allocation27_spill] sm:$0xff] }
 0x1c2   : > { %11322 = vmatprep.mubr.msk.bf16.mxu1 %vm358_vm0, %v14689_v40 }
 0x1c8   : > { %11023 = vmatmul.mubr.msk.bf16.vlgmr.msra.gmra.mrb[8].mxu0 %vm358_vm0, %v14680_v46  ;;  %v12429_v46 = vld [vmem:[%s14489_s4 + $0x40] sm:$0xff]  }
 0x1c9   : > { %11323 = vmatmul.mubr.msk.bf16.vlgmr.msra.gmra.mrb[8].mxu1 %vm358_vm0, %v14690_v20  ;;  %11031 = vmatpush3.bf16.msra.mxu0 %v12427_v22 }
 0x1ca   : > { %11331 = vmatpush3.bf16.msra.mxu1 %v12427_v22  ;;  %11026 = vmatprep.mubr.msk.bf16.mxu0 %vm358_vm0, %v14682_v43  ;;  %v14692_v43 = vld [vmem:[#allocation26_spill] sm:$0xff] }
 0x1cb   : > { %11326 = vmatprep.mubr.msk.bf16.mxu1 %vm358_vm0, %v14691_v4  ;;  %11032 = vmatprep.subr.bf16.mxu0 %v12428_v59  ;;  %v14695_v22 = vld [vmem:[#allocation38_spill] sm:$0xff] }
 0x1cc   : > { %11332 = vmatprep.subr.bf16.mxu1 %v12428_v59 }
 0x1cd   : > { %11033 = vmatpush3.bf16.msra.mxu0 %v12428_v59 }
 0x1ce   : > { %11333 = vmatpush3.bf16.msra.mxu1 %v12428_v59  ;;  %11042 = vmatprep.subr.bf16.mxu0 %v12429_v46 }
 0x1cf   : > { %11342 = vmatprep.subr.bf16.mxu1 %v12429_v46 }
 0x1d0   : > { %11027 = vmatmul.mubr.msk.bf16.gmra.mrb[12].mxu0 %vm358_vm0, %v14684_v1  ;;  %v12430_v1 = vld [vmem:[%s14489_s4 + $0x48] sm:$0xff]  }
 0x1d1   : > { %11327 = vmatmul.mubr.msk.bf16.gmra.mrb[12].mxu1 %vm358_vm0, %v14692_v43  ;;  %11034 = vmatprep.mubr.msk.bf16.mxu0 %vm358_vm0, %v14689_v40  ;;  %v14698_v40 = vld [vmem:[#allocation3_spill] sm:$0xff] }
 0x1d2   : > { %11334 = vmatprep.mubr.msk.bf16.mxu1 %vm358_vm0, %v14693_v15 }
 0x1d8   : > { %11035 = vmatmul.mubr.msk.bf16.vlgmr.msra.gmra.mrb[8].mxu0 %vm358_vm0, %v14690_v20  ;;  %v12435_v20 = vld [vmem:[%s14489_s4 + $0x70] sm:$0xff]  }
 0x1d9   : > { %11335 = vmatmul.mubr.msk.bf16.vlgmr.msra.gmra.mrb[8].mxu1 %vm358_vm0, %v13084_v13  ;;  %11043 = vmatpush3.bf16.msra.mxu0 %v12429_v46 }
 0x1da   : > { %11343 = vmatpush3.bf16.msra.mxu1 %v12429_v46  ;;  %11038 = vmatprep.mubr.msk.bf16.mxu0 %vm358_vm0, %v14691_v4  ;;  %v14699_v4 = vld [vmem:[#allocation40_spill] sm:$0xff] }
 0x1db   : > { %11338 = vmatprep.mubr.msk.bf16.mxu1 %vm358_vm0, %v13088_v52  ;;  %11044 = vmatprep.subr.bf16.mxu0 %v12430_v1 }
 0x1dc   : > { %11344 = vmatprep.subr.bf16.mxu1 %v12430_v1 }
 0x1dd   : > { %11045 = vmatpush3.bf16.msra.mxu0 %v12430_v1 }
 0x1de   : > { %11345 = vmatpush3.bf16.msra.mxu1 %v12430_v1  ;;  %11054 = vmatprep.subr.bf16.mxu0 %v12431_v57 }
 0x1df   : > { %11354 = vmatprep.subr.bf16.mxu1 %v12431_v57 }
 0x1e0   : > { %11039 = vmatmul.mubr.msk.bf16.gmra.mrb[12].mxu0 %vm358_vm0, %v14692_v43 }
 0x1e1   : > { %11339 = vmatmul.mubr.msk.bf16.gmra.mrb[12].mxu1 %vm358_vm0, %v13116_v55  ;;  %11046 = vmatprep.mubr.msk.bf16.mxu0 %vm358_vm0, %v14693_v15 }
 0x1e2   : > { %11346 = vmatprep.mubr.msk.bf16.mxu1 %vm358_vm0, %v14694_v8  ;;  %v12450_v8 = vld [vmem:[%s14489_s4 + $0xe8] sm:$0xff]  }
 0x1e8   : > { %11047 = vmatmul.mubr.msk.bf16.vlgmr.msra.gmra.mrb[8].mxu0 %vm358_vm0, %v13084_v13  ;;  %v14697_v13 = vld [vmem:[#allocation2_spill] sm:$0xff] }
 0x1e9   : > { %11347 = vmatmul.mubr.msk.bf16.vlgmr.msra.gmra.mrb[8].mxu1 %vm358_vm0, %v13143_v34  ;;  %11055 = vmatpush3.bf16.msra.mxu0 %v12431_v57  ;;  %v12433_v34 = vld [vmem:[%s14489_s4 + $0x60] sm:$0xff]  }
 0x1ea   : > { %11355 = vmatpush3.bf16.msra.mxu1 %v12431_v57  ;;  %11050 = vmatprep.mubr.msk.bf16.mxu0 %vm358_vm0, %v13088_v52  ;;  %v14696_v52 = vld [vmem:[#allocation39_spill] sm:$0xff] }
 0x1eb   : > { %11350 = vmatprep.mubr.msk.bf16.mxu1 %vm358_vm0, %v14695_v22  ;;  %11056 = vmatprep.subr.bf16.mxu0 %v12432_v27  ;;  %v14702_v22 = vld [vmem:[#allocation20_spill] sm:$0xff] }
 0x1ec   : > { %11356 = vmatprep.subr.bf16.mxu1 %v12432_v27 }
 0x1ed   : > { %11057 = vmatpush3.bf16.msra.mxu0 %v12432_v27 }
 0x1ee   : > { %11357 = vmatpush3.bf16.msra.mxu1 %v12432_v27  ;;  %11066 = vmatprep.subr.bf16.mxu0 %v12433_v34  ;;  %v14703_v27 = vld [vmem:[#allocation23_spill] sm:$0xff] }
 0x1ef   : > { %11366 = vmatprep.subr.bf16.mxu1 %v12433_v34 }
 0x1f0   : > { %11051 = vmatmul.mubr.msk.bf16.gmra.mrb[12].mxu0 %vm358_vm0, %v13116_v55  ;;  %v12434_v55 = vld [vmem:[%s14489_s4 + $0x68] sm:$0xff]  }
 0x1f1   : > { %11351 = vmatmul.mubr.msk.bf16.gmra.mrb[12].mxu1 %vm358_vm0, %v14696_v52  ;;  %11058 = vmatprep.mubr.msk.bf16.mxu0 %vm358_vm0, %v14697_v13  ;;  %v12454_v52 = vld [vmem:[%s14489_s4 + $0x108] sm:$0xff]   ;;  %v14707_v13 = vld [vmem:[#allocation33_spill] sm:$0xff] }
 0x1f2   : > { %11358 = vmatprep.mubr.msk.bf16.mxu1 %vm358_vm0, %v12672_v49 }
 0x1f8   : > { %11059 = vmatmul.mubr.msk.bf16.vlgmr.msra.gmra.mrb[8].mxu0 %vm358_vm0, %v14698_v40  ;;  %v14709_v40 = vld [vmem:[#allocation36_spill] sm:$0xff] }
 0x1f9   : > { %11359 = vmatmul.mubr.msk.bf16.vlgmr.msra.gmra.mrb[8].mxu1 %vm358_vm0, %v12691_v56  ;;  %11067 = vmatpush3.bf16.msra.mxu0 %v12433_v34 }
 0x1fa   : > { %11367 = vmatpush3.bf16.msra.mxu1 %v12433_v34  ;;  %11062 = vmatprep.mubr.msk.bf16.mxu0 %vm358_vm0, %v12707_v60  ;;  %v14700_v60 = vld [vmem:[#allocation4_spill] sm:$0xff]  ;;  %v14706_v34 = vld [vmem:[#allocation30_spill] sm:$0xff] }
 0x1fb   : > { %11362 = vmatprep.mubr.msk.bf16.mxu1 %vm358_vm0, %v12711_v61  ;;  %11068 = vmatprep.subr.bf16.mxu0 %v12434_v55 }
 0x1fc   : > { %11368 = vmatprep.subr.bf16.mxu1 %v12434_v55 }
 0x1fd   : > { %11069 = vmatpush3.bf16.msra.mxu0 %v12434_v55 }
 0x1fe   : > { %11369 = vmatpush3.bf16.msra.mxu1 %v12434_v55  ;;  %11078 = vmatprep.subr.bf16.mxu0 %v12435_v20  ;;  %v14710_v55 = vld [vmem:[#allocation37_spill] sm:$0xff] }
 0x1ff   : > { %11378 = vmatprep.subr.bf16.mxu1 %v12435_v20 }
 0x200   : > { %11063 = vmatmul.mubr.msk.bf16.gmra.mrb[12].mxu0 %vm358_vm0, %v14699_v4  ;;  %v14713_v4 = vld [vmem:[#allocation45_spill] sm:$0xff] }
 0x201   : > { %11363 = vmatmul.mubr.msk.bf16.gmra.mrb[12].mxu1 %vm358_vm0, %v13207_v17  ;;  %11070 = vmatprep.mubr.msk.bf16.mxu0 %vm358_vm0, %v12672_v49  ;;  %v12436_v49 = vld [vmem:[%s14489_s4 + $0x78] sm:$0xff]  }
 0x202   : > { %11370 = vmatprep.mubr.msk.bf16.mxu1 %vm358_vm0, %v12727_v2 }
 0x208   : > { %11071 = vmatmul.mubr.msk.bf16.vlgmr.msra.gmra.mrb[8].mxu0 %vm358_vm0, %v12691_v56  ;;  %v12437_v56 = vld [vmem:[%s14489_s4 + $0x80] sm:$0xff]  }
 0x209   : > { %11371 = vmatmul.mubr.msk.bf16.vlgmr.msra.gmra.mrb[8].mxu1 %vm358_vm0, %v14700_v60  ;;  %11079 = vmatpush3.bf16.msra.mxu0 %v12435_v20 }
 0x20a   : > { %11379 = vmatpush3.bf16.msra.mxu1 %v12435_v20  ;;  %11074 = vmatprep.mubr.msk.bf16.mxu0 %vm358_vm0, %v12711_v61  ;;  %v12438_v61 = vld [vmem:[%s14489_s4 + $0x88] sm:$0xff]   ;;  %v14712_v20 = vld [vmem:[#allocation44_spill] sm:$0xff] }
 0x20b   : > { %11374 = vmatprep.mubr.msk.bf16.mxu1 %vm358_vm0, %v12771_v14  ;;  %11080 = vmatprep.subr.bf16.mxu0 %v12436_v49 }
 0x20c   : > { %11380 = vmatprep.subr.bf16.mxu1 %v12436_v49 }
 0x20d   : > { %11081 = vmatpush3.bf16.msra.mxu0 %v12436_v49 }
 0x20e   : > { %11381 = vmatpush3.bf16.msra.mxu1 %v12436_v49  ;;  %11090 = vmatprep.subr.bf16.mxu0 %v12437_v56  ;;  %v14714_v49 = vld [vmem:[#allocation48_spill] sm:$0xff] }
 0x20f   : > { %11390 = vmatprep.subr.bf16.mxu1 %v12437_v56 }
 0x210   : > { %11075 = vmatmul.mubr.msk.bf16.gmra.mrb[12].mxu0 %vm358_vm0, %v13207_v17  ;;  %v12447_v17 = vld [vmem:[%s14489_s4 + $0xd0] sm:$0xff]  }
 0x211   : > { %11375 = vmatmul.mubr.msk.bf16.gmra.mrb[12].mxu1 %vm358_vm0, %v13236_v50  ;;  %11082 = vmatprep.mubr.msk.bf16.mxu0 %vm358_vm0, %v12727_v2  ;;  %v12439_v2 = vld [vmem:[%s14489_s4 + $0x90] sm:$0xff]  }
 0x212   : > { %11382 = vmatprep.mubr.msk.bf16.mxu1 %vm358_vm0, %v12788_v21 }
 0x218   : > { %11083 = vmatmul.mubr.msk.bf16.vlgmr.msra.gmra.mrb[8].mxu0 %vm358_vm0, %v14700_v60  ;;  %v12459_v60 = vld [vmem:[%s14489_s4 + $0x130] sm:$0xff]  }
 0x219   : > { %11383 = vmatmul.mubr.msk.bf16.vlgmr.msra.gmra.mrb[8].mxu1 %vm358_vm0, %v12812_v29  ;;  %11091 = vmatpush3.bf16.msra.mxu0 %v12437_v56 }
 0x21a   : > { %11391 = vmatpush3.bf16.msra.mxu1 %v12437_v56  ;;  %11086 = vmatprep.mubr.msk.bf16.mxu0 %vm358_vm0, %v12771_v14  ;;  %v12441_v14 = vld [vmem:[%s14489_s4 + $0xa0] sm:$0xff]   ;;  %v14715_v56 = vld [vmem:[#allocation49_spill] sm:$0xff] }
 0x21b   : > { %11386 = vmatprep.mubr.msk.bf16.mxu1 %vm358_vm0, %v12838_v35  ;;  %11092 = vmatprep.subr.bf16.mxu0 %v12438_v61 }
 0x21c   : > { %11392 = vmatprep.subr.bf16.mxu1 %v12438_v61 }
 0x21d   : > { %11093 = vmatpush3.bf16.msra.mxu0 %v12438_v61 }
 0x21e   : > { %11393 = vmatpush3.bf16.msra.mxu1 %v12438_v61  ;;  %11102 = vmatprep.subr.bf16.mxu0 %v12439_v2  ;;  %v14716_v61 = vld [vmem:[#allocation18_spill] sm:$0xff] }
 0x21f   : > { %11402 = vmatprep.subr.bf16.mxu1 %v12439_v2 }
 0x220   : > { %11087 = vmatmul.mubr.msk.bf16.gmra.mrb[12].mxu0 %vm358_vm0, %v13236_v50  ;;  %v12440_v50 = vld [vmem:[%s14489_s4 + $0x98] sm:$0xff]  }
 0x221   : > { %11387 = vmatmul.mubr.msk.bf16.gmra.mrb[12].mxu1 %vm358_vm0, %v13265_v10  ;;  %11094 = vmatprep.mubr.msk.bf16.mxu0 %vm358_vm0, %v12788_v21  ;;  %v12443_v21 = vld [vmem:[%s14489_s4 + $0xb0] sm:$0xff]  }
 0x222   : > { %11394 = vmatprep.mubr.msk.bf16.mxu1 %vm358_vm0, %v12865_v44 }
 0x228   : > { %11095 = vmatmul.mubr.msk.bf16.vlgmr.msra.gmra.mrb[8].mxu0 %vm358_vm0, %v12812_v29  ;;  %v12444_v29 = vld [vmem:[%s14489_s4 + $0xb8] sm:$0xff]  }
 0x229   : > { %11395 = vmatmul.mubr.msk.bf16.vlgmr.msra.gmra.mrb[8].mxu1 %vm358_vm0, %v13277_v58  ;;  %11103 = vmatpush3.bf16.msra.mxu0 %v12439_v2 }
 0x22a   : > { %11403 = vmatpush3.bf16.msra.mxu1 %v12439_v2  ;;  %11098 = vmatprep.mubr.msk.bf16.mxu0 %vm358_vm0, %v12838_v35  ;;  %v12445_v35 = vld [vmem:[%s14489_s4 + $0xc0] sm:$0xff]  }
 0x22b   : > { %11398 = vmatprep.mubr.msk.bf16.mxu1 %vm358_vm0, %v13281_v32  ;;  %11104 = vmatprep.subr.bf16.mxu0 %v12440_v50  ;;  %v12461_v2 = vld [vmem:[%s14489_s4 + $0x140] sm:$0xff]  }
 0x22c   : > { %11404 = vmatprep.subr.bf16.mxu1 %v12440_v50 }
 0x22d   : > { %11105 = vmatpush3.bf16.msra.mxu0 %v12440_v50 }
 0x22e   : > { %11405 = vmatpush3.bf16.msra.mxu1 %v12440_v50  ;;  %11114 = vmatprep.subr.bf16.mxu0 %v12441_v14  ;;  %v14717_v50 = vld [vmem:[#allocation51_spill] sm:$0xff] }
 0x22f   : > { %11414 = vmatprep.subr.bf16.mxu1 %v12441_v14 }
 0x230   : > { %11099 = vmatmul.mubr.msk.bf16.gmra.mrb[12].mxu0 %vm358_vm0, %v13265_v10  ;;  %v12442_v10 = vld [vmem:[%s14489_s4 + $0xa8] sm:$0xff]  }
 0x231   : > { %11399 = vmatmul.mubr.msk.bf16.gmra.mrb[12].mxu1 %vm358_vm0, %v13302_v6  ;;  %11106 = vmatprep.mubr.msk.bf16.mxu0 %vm358_vm0, %v12865_v44  ;;  %v12446_v44 = vld [vmem:[%s14489_s4 + $0xc8] sm:$0xff]  }
 0x232   : > { %11406 = vmatprep.mubr.msk.bf16.mxu1 %vm358_vm0, %v13306_v11 }
 0x238   : > { %11107 = vmatmul.mubr.msk.bf16.vlgmr.msra.gmra.mrb[8].mxu0 %vm358_vm0, %v13277_v58 }
 0x239   : > { %11407 = vmatmul.mubr.msk.bf16.vlgmr.msra.gmra.mrb[8].mxu1 %vm358_vm0, %v13318_v12  ;;  %11115 = vmatpush3.bf16.msra.mxu0 %v12441_v14 }
 0x23a   : > { %11415 = vmatpush3.bf16.msra.mxu1 %v12441_v14  ;;  %11110 = vmatprep.mubr.msk.bf16.mxu0 %vm358_vm0, %v13281_v32  ;;  %v12448_v32 = vld [vmem:[%s14489_s4 + $0xd8] sm:$0xff]   ;;  %v14718_v14 = vld [vmem:[#allocation52_spill] sm:$0xff] }
 0x23b   : > { %11410 = vmatprep.mubr.msk.bf16.mxu1 %vm358_vm0, %v13322_v16  ;;  %11116 = vmatprep.subr.bf16.mxu0 %v12442_v10 }
 0x23c   : > { %11416 = vmatprep.subr.bf16.mxu1 %v12442_v10 }
 0x23d   : > { %11117 = vmatpush3.bf16.msra.mxu0 %v12442_v10 }
 0x23e   : > { %11417 = vmatpush3.bf16.msra.mxu1 %v12442_v10  ;;  %11126 = vmatprep.subr.bf16.mxu0 %v12443_v21  ;;  %v14719_v10 = vld [vmem:[#allocation53_spill] sm:$0xff] }
 0x23f   : > { %11426 = vmatprep.subr.bf16.mxu1 %v12443_v21 }
 0x240   : > { %11111 = vmatmul.mubr.msk.bf16.gmra.mrb[12].mxu0 %vm358_vm0, %v13302_v6 }
 0x241   : > { %11411 = vmatmul.mubr.msk.bf16.gmra.mrb[12].mxu1 %vm358_vm0, %v13343_v23  ;;  %11118 = vmatprep.mubr.msk.bf16.mxu0 %vm358_vm0, %v13347_v30 }
 0x242   : > { %11418 = vmatprep.mubr.msk.bf16.mxu1 %vm358_vm0, %v13351_v24 }
 0x248   : > { %11119 = vmatmul.mubr.msk.bf16.vlgmr.msra.gmra.mrb[8].mxu0 %vm358_vm0, %v13363_v31 }
 0x249   : > { %11419 = vmatmul.mubr.msk.bf16.vlgmr.msra.gmra.mrb[8].mxu1 %vm358_vm0, %v13367_v33  ;;  %11127 = vmatpush3.bf16.msra.mxu0 %v12443_v21 }
 0x24a   : > { %11427 = vmatpush3.bf16.msra.mxu1 %v12443_v21  ;;  %11122 = vmatprep.mubr.msk.bf16.mxu0 %vm358_vm0, %v13371_v37  ;;  %v9607_v21 = vld [vmem:[%s12808_s13 + $0x30] sm:$0xff] }
 0x24b   : > { %11422 = vmatprep.mubr.msk.bf16.mxu1 %vm358_vm0, %v13375_v42  ;;  %11128 = vmatprep.subr.bf16.mxu0 %v12444_v29 }
 0x24c   : > { %11428 = vmatprep.subr.bf16.mxu1 %v12444_v29 }
 0x24d   : > { %11129 = vmatpush3.bf16.msra.mxu0 %v12444_v29 }
 0x24e   : > { %11429 = vmatpush3.bf16.msra.mxu1 %v12444_v29  ;;  %11138 = vmatprep.subr.bf16.mxu0 %v12445_v35  ;;  %v14720_v29 = vld [vmem:[#allocation54_spill] sm:$0xff] }
 0x24f   : > { %11438 = vmatprep.subr.bf16.mxu1 %v12445_v35 }
 0x250   : > { %11123 = vmatmul.mubr.msk.bf16.gmra.mrb[12].mxu0 %vm358_vm0, %v13394_v51 }
 0x251   : > { %11423 = vmatmul.mubr.msk.bf16.gmra.mrb[12].mxu1 %vm358_vm0, %v13397_v53  ;;  %11130 = vmatprep.mubr.msk.bf16.mxu0 %vm358_vm0, %v13351_v24 }
 0x252   : > { %11430 = vmatprep.mubr.msk.bf16.mxu1 %vm358_vm0, %v13401_v54 }
 0x258   : > { %11131 = vmatmul.mubr.msk.bf16.vlgmr.msra.gmra.mrb[8].mxu0 %vm358_vm0, %v13367_v33  ;;  %v12449_v33 = vld [vmem:[%s14489_s4 + $0xe0] sm:$0xff]  }
 0x259   : > { %11431 = vmatmul.mubr.msk.bf16.vlgmr.msra.gmra.mrb[8].mxu1 %vm358_vm0, %v13413_v63  ;;  %11139 = vmatpush3.bf16.msra.mxu0 %v12445_v35 }
 0x25a   : > { %11439 = vmatpush3.bf16.msra.mxu1 %v12445_v35  ;;  %11134 = vmatprep.mubr.msk.bf16.mxu0 %vm358_vm0, %v13375_v42  ;;  %v9618_v35 = vld [vmem:[%s12819_s16 + $0x20] sm:$0xff] }
 0x25b   : > { %11434 = vmatprep.mubr.msk.bf16.mxu1 %vm358_vm0, %v13417_v0  ;;  %11140 = vmatprep.subr.bf16.mxu0 %v12446_v44 }
 0x25c   : > { %11440 = vmatprep.subr.bf16.mxu1 %v12446_v44 }
 0x25d   : > { %11141 = vmatpush3.bf16.msra.mxu0 %v12446_v44 }
 0x25e   : > { %11441 = vmatpush3.bf16.msra.mxu1 %v12446_v44  ;;  %11150 = vmatprep.subr.bf16.mxu0 %v12447_v17  ;;  %v9619_v44 = vld [vmem:[%s12819_s16 + $0x30] sm:$0xff] }
 0x25f   : > { %11450 = vmatprep.subr.bf16.mxu1 %v12447_v17 }
 0x260   : > { %11135 = vmatmul.mubr.msk.bf16.gmra.mrb[12].mxu0 %vm358_vm0, %v13397_v53 }
 0x261   : > { %11435 = vmatmul.mubr.msk.bf16.gmra.mrb[12].mxu1 %vm358_vm0, %v13435_v18  ;;  %11142 = vmatprep.mubr.msk.bf16.mxu0 %vm358_vm0, %v13401_v54 }
 0x262   : > { %11442 = vmatprep.mubr.msk.bf16.mxu1 %vm358_vm0, %v13439_v25 }
 0x268   : > { %11143 = vmatmul.mubr.msk.bf16.vlgmr.msra.gmra.mrb[8].mxu0 %vm358_vm0, %v13413_v63 }
 0x269   : > { %11443 = vmatmul.mubr.msk.bf16.vlgmr.msra.gmra.mrb[8].mxu1 %vm358_vm0, %v13451_v38  ;;  %11151 = vmatpush3.bf16.msra.mxu0 %v12447_v17 }
 0x26a   : > { %11451 = vmatpush3.bf16.msra.mxu1 %v12447_v17  ;;  %11146 = vmatprep.mubr.msk.bf16.mxu0 %vm358_vm0, %v13417_v0  ;;  %v12462_v17 = vld [vmem:[%s14489_s4 + $0x148] sm:$0xff]  }
 0x26b   : > { %v14095_v58 = vpop.f32.mrb[0].mxu0  ;;  %11446 = vmatprep.mubr.msk.bf16.mxu1 %vm358_vm0, %v13455_v36  ;;  %11152 = vmatprep.subr.bf16.mxu0 %v12448_v32 }
 0x26c   : > { %v14102_v6 = vpop.f32.mrb[0].mxu1  ;;  %v14104_v11 = vpop.f32.mrb[1].mxu0  ;;  %11452 = vmatprep.subr.bf16.mxu1 %v12448_v32 }
 0x26d   : > { %v5084_v12 = vmax.f32 %v14095_v58, %v14102_v6  ;;  %v14108_v16 = vpop.f32.mrb[1].mxu1  ;;  %v14110_v23 = vpop.f32.mrb[2].mxu0  ;;  %11153 = vmatpush3.bf16.msra.mxu0 %v12448_v32 }
 0x26e   : > { %v5082_v30 = vmax.f32 %v14104_v11, %v14108_v16  ;;  %v14114_v24 = vpop.f32.mrb[2].mxu1  ;;  %v14116_v31 = vpop.f32.mrb[3].mxu0  ;;  %11453 = vmatpush3.bf16.msra.mxu1 %v12448_v32  ;;  %11162 = vmatprep.subr.bf16.mxu0 %v12449_v33 }
 0x26f   : > { %v5085_v37 = vmax.f32 %v14110_v23, %v14114_v24  ;;  %v14123_v42 = vpop.f32.mrb[3].mxu1  ;;  %11462 = vmatprep.subr.bf16.mxu1 %v12449_v33 }
 0x270   : > { %v5083_v51 = vmax.f32 %v14116_v31, %v14123_v42  ;;  %11147 = vmatmul.mubr.msk.bf16.gmra.mrb[12].mxu0 %vm358_vm0, %v13435_v18 }
 0x271   : > { %11447 = vmatmul.mubr.msk.bf16.gmra.mrb[12].mxu1 %vm358_vm0, %v13473_v45  ;;  %11154 = vmatprep.mubr.msk.bf16.mxu0 %vm358_vm0, %v13439_v25 }
 0x272   : > { %11454 = vmatprep.mubr.msk.bf16.mxu1 %vm358_vm0, %v13477_v48 }
 0x273   : > { %v14135_v53 = vpop.f32.mrb[4].mxu0 }
 0x274   : > { %v14137_v54 = vpop.f32.mrb[4].mxu1  ;;  %v14139_v63 = vpop.f32.mrb[5].mxu0 }
 0x275   : > { %v5088_v0 = vmax.f32 %v14135_v53, %v14137_v54  ;;  %v14143_v59 = vpop.f32.mrb[5].mxu1  ;;  %v14145_v18 = vpop.f32.mrb[6].mxu0 }
 0x276   : > { %v5086_v46 = vmax.f32 %v14139_v63, %v14143_v59  ;;  %v14149_v25 = vpop.f32.mrb[6].mxu1  ;;  %v14151_v43 = vpop.f32.mrb[7].mxu0 }
 0x277   : > { %v5089_v15 = vmax.f32 %v14145_v18, %v14149_v25  ;;  %v14155_v1 = vpop.f32.mrb[7].mxu1 }
 0x278   : > { %v5087_v57 = vmax.f32 %v14151_v43, %v14155_v1  ;;  %11155 = vmatmul.mubr.msk.bf16.vlgmr.msra.gmra.mrb[8].mxu0 %vm358_vm0, %v13451_v38  ;;  %v12451_v38 = vld [vmem:[%s14489_s4 + $0xf0] sm:$0xff]  }
 0x279   : > { %11455 = vmatmul.mubr.msk.bf16.vlgmr.msra.gmra.mrb[8].mxu1 %vm358_vm0, %v13489_v9  ;;  %11163 = vmatpush3.bf16.msra.mxu0 %v12449_v33 }
 0x27a   : > { %11463 = vmatpush3.bf16.msra.mxu1 %v12449_v33  ;;  %11158 = vmatprep.mubr.msk.bf16.mxu0 %vm358_vm0, %v13455_v36  ;;  %v14701_v36 = vld [vmem:[#allocation19_spill] sm:$0xff]  ;;  %v6641_v33 = vpack.c.bf16 %v9619_v44, %v9618_v35  ;;  %v9637_v35 = vld [vmem:[%s12808_s13 + $0x91] sm:$0xff] }
 0x27b   : > { %11458 = vmatprep.mubr.msk.bf16.mxu1 %vm358_vm0, %v13493_v62  ;;  %11164 = vmatprep.subr.bf16.mxu0 %v12450_v8  ;;  %v14726_v44 = vld [vmem:[#allocation41_spill] sm:$0xff] }
 0x27c   : > { %11464 = vmatprep.subr.bf16.mxu1 %v12450_v8 }
 0x27d   : > { %11165 = vmatpush3.bf16.msra.mxu0 %v12450_v8 }
 0x27e   : > { %11465 = vmatpush3.bf16.msra.mxu1 %v12450_v8  ;;  %11174 = vmatprep.subr.bf16.mxu0 %v12451_v38  ;;  %v14722_v8 = vld [vmem:[#allocation28_spill] sm:$0xff] }
 0x27f   : > { %11474 = vmatprep.subr.bf16.mxu1 %v12451_v38 }
 0x280   : > { %11159 = vmatmul.mubr.msk.bf16.gmra.mrb[12].mxu0 %vm358_vm0, %v13473_v45  ;;  %v14704_v45 = vld [vmem:[#allocation24_spill] sm:$0xff] }
 0x281   : > { %11459 = vmatmul.mubr.msk.bf16.gmra.mrb[12].mxu1 %vm358_vm0, %v14701_v36  ;;  %11166 = vmatprep.mubr.msk.bf16.mxu0 %vm358_vm0, %v13477_v48  ;;  %v12452_v48 = vld [vmem:[%s14489_s4 + $0xf8] sm:$0xff]  }
 0x282   : > { %11466 = vmatprep.mubr.msk.bf16.mxu1 %vm358_vm0, %v14702_v22  ;;  %v9609_v22 = vld [vmem:[%s12808_s13 + $0x50] sm:$0xff] }
 0x288   : > { %11167 = vmatmul.mubr.msk.bf16.vlgmr.msra.gmra.mrb[8].mxu0 %vm358_vm0, %v13489_v9  ;;  %v12453_v9 = vld [vmem:[%s14489_s4 + $0x100] sm:$0xff]  }
 0x289   : > { %11467 = vmatmul.mubr.msk.bf16.vlgmr.msra.gmra.mrb[8].mxu1 %vm358_vm0, %v14703_v27  ;;  %11175 = vmatpush3.bf16.msra.mxu0 %v12451_v38  ;;  %v9620_v27 = vld [vmem:[%s12819_s16 + $0x40] sm:$0xff] }
 0x28a   : > { %11475 = vmatpush3.bf16.msra.mxu1 %v12451_v38  ;;  %11170 = vmatprep.mubr.msk.bf16.mxu0 %vm358_vm0, %v13493_v62  ;;  %v14705_v62 = vld [vmem:[#allocation29_spill] sm:$0xff]  ;;  %v14723_v38 = vld [vmem:[#allocation55_spill] sm:$0xff] }
 0x28b   : > { %11470 = vmatprep.mubr.msk.bf16.mxu1 %vm358_vm0, %v14704_v45  ;;  %11176 = vmatprep.subr.bf16.mxu0 %v12452_v48  ;;  %v9621_v45 = vld [vmem:[%s12819_s16 + $0x50] sm:$0xff] }
 0x28c   : > { %11476 = vmatprep.subr.bf16.mxu1 %v12452_v48 }
 0x28d   : > { %11177 = vmatpush3.bf16.msra.mxu0 %v12452_v48 }
 0x28e   : > { %11477 = vmatpush3.bf16.msra.mxu1 %v12452_v48  ;;  %11186 = vmatprep.subr.bf16.mxu0 %v12453_v9  ;;  %v9610_v48 = vld [vmem:[%s12808_s13 + $0x60] sm:$0xff] }
 0x28f   : > { %11486 = vmatprep.subr.bf16.mxu1 %v12453_v9 }
 0x290   : > { %11171 = vmatmul.mubr.msk.bf16.gmra.mrb[12].mxu0 %vm358_vm0, %v14701_v36  ;;  %v9608_v36 = vld [vmem:[%s12808_s13 + $0x40] sm:$0xff] }
 0x291   : > { %11471 = vmatmul.mubr.msk.bf16.gmra.mrb[12].mxu1 %vm358_vm0, %v14705_v62  ;;  %11178 = vmatprep.mubr.msk.bf16.mxu0 %vm358_vm0, %v14706_v34  ;;  %v6544_v62 = vpack.c.bf16 %v9609_v22, %v9608_v36  ;;  %v9622_v34 = vld [vmem:[%s12819_s16 + $0x60] sm:$0xff]  ;;  %v9645_v22 = vld [vmem:[%s12819_s16 + $0x51] sm:$0xff] }
 0x292   : > { %11478 = vmatprep.mubr.msk.bf16.mxu1 %vm358_vm0, %v13571_v5  ;;  %v9644_v36 = vld [vmem:[%s12819_s16 + $0x41] sm:$0xff] }
 0x298   : > { %11179 = vmatmul.mubr.msk.bf16.vlgmr.msra.gmra.mrb[8].mxu0 %vm358_vm0, %v13589_v28  ;;  %v12455_v28 = vld [vmem:[%s14489_s4 + $0x110] sm:$0xff]  }
 0x299   : > { %11479 = vmatmul.mubr.msk.bf16.vlgmr.msra.gmra.mrb[8].mxu1 %vm358_vm0, %v13593_v41  ;;  %11187 = vmatpush3.bf16.msra.mxu0 %v12453_v9 }
 0x29a   : > { %11487 = vmatpush3.bf16.msra.mxu1 %v12453_v9  ;;  %11182 = vmatprep.mubr.msk.bf16.mxu0 %vm358_vm0, %v13595_v3  ;;  %v14708_v3 = vld [vmem:[#allocation34_spill] sm:$0xff]  ;;  %v9611_v9 = vld [vmem:[%s12808_s13 + $0x70] sm:$0xff] }
 0x29b   : > { %11482 = vmatprep.mubr.msk.bf16.mxu1 %vm358_vm0, %v13597_v47  ;;  %11188 = vmatprep.subr.bf16.mxu0 %v12454_v52 }
 0x29c   : > { %11488 = vmatprep.subr.bf16.mxu1 %v12454_v52 }
 0x29d   : > { %11189 = vmatpush3.bf16.msra.mxu0 %v12454_v52 }
 0x29e   : > { %11489 = vmatpush3.bf16.msra.mxu1 %v12454_v52  ;;  %11198 = vmatprep.subr.bf16.mxu0 %v12455_v28  ;;  %v9623_v52 = vld [vmem:[%s12819_s16 + $0x70] sm:$0xff] }
 0x29f   : > { %11498 = vmatprep.subr.bf16.mxu1 %v12455_v28 }
 0x2a0   : > { %11183 = vmatmul.mubr.msk.bf16.gmra.mrb[12].mxu0 %vm358_vm0, %v14707_v13  ;;  %v6545_v13 = vpack.c.bf16 %v9611_v9, %v9610_v48  ;;  %v6836_v48 = vpack.c.bf16 %v9645_v22, %v9644_v36 }
 0x2a1   : > { %11483 = vmatmul.mubr.msk.bf16.gmra.mrb[12].mxu1 %vm358_vm0, %v14708_v3  ;;  %11190 = vmatprep.mubr.msk.bf16.mxu0 %vm358_vm0, %v13571_v5  ;;  %v12456_v5 = vld [vmem:[%s14489_s4 + $0x118] sm:$0xff]  }
 0x2a2   : > { %11490 = vmatprep.mubr.msk.bf16.mxu1 %vm358_vm0, %v13633_v19 }
 0x2a8   : > { %11191 = vmatmul.mubr.msk.bf16.vlgmr.msra.gmra.mrb[8].mxu0 %vm358_vm0, %v13593_v41  ;;  %v12457_v41 = vld [vmem:[%s14489_s4 + $0x120] sm:$0xff]  }
 0x2a9   : > { %11491 = vmatmul.mubr.msk.bf16.vlgmr.msra.gmra.mrb[8].mxu1 %vm358_vm0, %v14709_v40  ;;  %11199 = vmatpush3.bf16.msra.mxu0 %v12455_v28 }
 0x2aa   : > { %11499 = vmatpush3.bf16.msra.mxu1 %v12455_v28  ;;  %11194 = vmatprep.mubr.msk.bf16.mxu0 %vm358_vm0, %v13597_v47  ;;  %v14711_v47 = vld [vmem:[#allocation43_spill] sm:$0xff]  ;;  %v6642_v28 = vpack.c.bf16 %v9621_v45, %v9620_v27  ;;  %v9647_v45 = vld [vmem:[%s12819_s16 + $0x71] sm:$0xff] }
 0x2ab   : > { %11494 = vmatprep.mubr.msk.bf16.mxu1 %vm358_vm0, %v14710_v55  ;;  %11200 = vmatprep.subr.bf16.mxu0 %v12456_v5  ;;  %v9646_v27 = vld [vmem:[%s12819_s16 + $0x61] sm:$0xff] }
 0x2ac   : > { %11500 = vmatprep.subr.bf16.mxu1 %v12456_v5  ;;  %v6837_v9 = vpack.c.bf16 %v9647_v45, %v9646_v27  ;;  %v9774_v27 = vld [vmem:[%s14490_s5] ss:$0 sm:$0xff] }
 0x2ad   : > { %11201 = vmatpush3.bf16.msra.mxu0 %v12456_v5 }
 0x2ae   : > { %11501 = vmatpush3.bf16.msra.mxu1 %v12456_v5  ;;  %11210 = vmatprep.subr.bf16.mxu0 %v12457_v41  ;;  %v9613_v5 = vld [vmem:[%s12808_s13 + $0x90] sm:$0xff] }
 0x2af   : > { %11510 = vmatprep.subr.bf16.mxu1 %v12457_v41 }
 0x2b0   : > { %11195 = vmatmul.mubr.msk.bf16.gmra.mrb[12].mxu0 %vm358_vm0, %v14708_v3  ;;  %v6643_v3 = vpack.c.bf16 %v9623_v52, %v9622_v34  ;;  %v9648_v34 = vld [vmem:[%s12819_s16 + $0x81] sm:$0xff]  ;;  %v9649_v52 = vld [vmem:[%s12819_s16 + $0x91] sm:$0xff] }
 0x2b1   : > { %11495 = vmatmul.mubr.msk.bf16.gmra.mrb[12].mxu1 %vm358_vm0, %v14711_v47  ;;  %11202 = vmatprep.mubr.msk.bf16.mxu0 %vm358_vm0, %v13633_v19  ;;  %v12458_v19 = vld [vmem:[%s14489_s4 + $0x128] sm:$0xff]  }
 0x2b2   : > { %11502 = vmatprep.mubr.msk.bf16.mxu1 %vm358_vm0, %v13683_v26 }
 0x2b8   : > { %11203 = vmatmul.mubr.msk.bf16.vlgmr.msra.gmra.mrb[8].mxu0 %vm358_vm0, %v14709_v40  ;;  %v12463_v40 = vld [vmem:[%s14489_s4 + $0x150] sm:$0xff]  }
 0x2b9   : > { %11503 = vmatmul.mubr.msk.bf16.vlgmr.msra.gmra.mrb[8].mxu1 %vm358_vm0, %v14712_v20  ;;  %11211 = vmatpush3.bf16.msra.mxu0 %v12457_v41 }
 0x2ba   : > { %11511 = vmatpush3.bf16.msra.mxu1 %v12457_v41  ;;  %11206 = vmatprep.mubr.msk.bf16.mxu0 %vm358_vm0, %v14710_v55  ;;  %v9612_v55 = vld [vmem:[%s12808_s13 + $0x80] sm:$0xff] }
 0x2bb   : > { %11506 = vmatprep.mubr.msk.bf16.mxu1 %vm358_vm0, %v14713_v4  ;;  %11212 = vmatprep.subr.bf16.mxu0 %v12458_v19  ;;  %v9624_v41 = vld [vmem:[%s12819_s16 + $0x80] sm:$0xff] }
 0x2bc   : > { %11512 = vmatprep.subr.bf16.mxu1 %v12458_v19 }
 0x2bd   : > { %11213 = vmatpush3.bf16.msra.mxu0 %v12458_v19 }
 0x2be   : > { %11513 = vmatpush3.bf16.msra.mxu1 %v12458_v19  ;;  %11222 = vmatprep.subr.bf16.mxu0 %v12459_v60  ;;  %v9631_v19 = vld [vmem:[%s12808_s13 + $0x31] sm:$0xff] }
 0x2bf   : > { %11522 = vmatprep.subr.bf16.mxu1 %v12459_v60 }
 0x2c0   : > { %11207 = vmatmul.mubr.msk.bf16.gmra.mrb[12].mxu0 %vm358_vm0, %v14711_v47  ;;  %v9625_v47 = vld [vmem:[%s12819_s16 + $0x90] sm:$0xff] }
 0x2c1   : > { %11507 = vmatmul.mubr.msk.bf16.gmra.mrb[12].mxu1 %vm358_vm0, %v13729_v7  ;;  %11214 = vmatprep.mubr.msk.bf16.mxu0 %vm358_vm0, %v13683_v26  ;;  %v12460_v26 = vld [vmem:[%s14489_s4 + $0x138] sm:$0xff]  }
 0x2c2   : > { %11514 = vmatprep.mubr.msk.bf16.mxu1 %vm358_vm0, %v13733_v39 }
 0x2c8   : > { %11215 = vmatmul.mubr.msk.bf16.vlgmr.msra.gmra.mrb[8].mxu0 %vm358_vm0, %v14712_v20  ;;  %v14724_v20 = vld [vmem:[#allocation31_spill] sm:$0xff] }
 0x2c9   : > { %11515 = vmatmul.mubr.msk.bf16.vlgmr.msra.gmra.mrb[8].mxu1 %vm358_vm0, %v14714_v49  ;;  %11223 = vmatpush3.bf16.msra.mxu0 %v12459_v60 }
 0x2ca   : > { %11523 = vmatpush3.bf16.msra.mxu1 %v12459_v60  ;;  %11218 = vmatprep.mubr.msk.bf16.mxu0 %vm358_vm0, %v14713_v4  ;;  %v9630_v4 = vld [vmem:[%s12808_s13 + $0x21] sm:$0xff]  ;;  %v6546_v60 = vpack.c.bf16 %v9613_v5, %v9612_v55 }
 0x2cb   : > { %11518 = vmatprep.mubr.msk.bf16.mxu1 %vm358_vm0, %v14715_v56  ;;  %11224 = vmatprep.subr.bf16.mxu0 %v12460_v26  ;;  %v14729_v5 = vld [vmem:[#allocation47_spill] sm:$0xff] }
 0x2cc   : > { %11524 = vmatprep.subr.bf16.mxu1 %v12460_v26 }
 0x2cd   : > { %11225 = vmatpush3.bf16.msra.mxu0 %v12460_v26 }
 0x2ce   : > { %11525 = vmatpush3.bf16.msra.mxu1 %v12460_v26  ;;  %11234 = vmatprep.subr.bf16.mxu0 %v14716_v61  ;;  %v6738_v26 = vpack.c.bf16 %v9631_v19, %v9630_v4  ;;  %v14725_v61 = vld [vmem:[#allocation32_spill] sm:$0xff] }
 0x2cf   : > { %11534 = vmatprep.subr.bf16.mxu1 %v12461_v2  ;;  %v9659_v4 = vld [vmem:[%s12808_s13 + $0x72] sm:$0xff] }
 0x2d0   : > { %11219 = vmatmul.mubr.msk.bf16.gmra.mrb[12].mxu0 %vm358_vm0, %v13729_v7  ;;  %v9606_v7 = vld [vmem:[%s12808_s13 + $0x20] sm:$0xff] }
 0x2d1   : > { %11519 = vmatmul.mubr.msk.bf16.gmra.mrb[12].mxu1 %vm358_vm0, %v14717_v50  ;;  %11226 = vmatprep.mubr.msk.bf16.mxu0 %vm358_vm0, %v13733_v39  ;;  %v14721_v39 = vld [vmem:[#allocation25_spill] sm:$0xff]  ;;  %v6543_v32 = vpack.c.bf16 %v9607_v21, %v9606_v7 }
 0x2d2   : > { %11526 = vmatprep.mubr.msk.bf16.mxu1 %vm358_vm0, %v14718_v14  ;;  %v9634_v14 = vld [vmem:[%s12808_s13 + $0x61] sm:$0xff] }
 0x2d8   : > { %11227 = vmatmul.mubr.msk.bf16.vlgmr.msra.gmra.mrb[8].mxu0 %vm358_vm0, %v14714_v49  ;;  %v6644_v49 = vpack.c.bf16 %v9625_v47, %v9624_v41  ;;  %v9656_v41 = vld [vmem:[%s12808_s13 + $0x42] sm:$0xff]  ;;  %v9657_v47 = vld [vmem:[%s12808_s13 + $0x52] sm:$0xff] }
 0x2d9   : > { %11527 = vmatmul.mubr.msk.bf16.vlgmr.msra.gmra.mrb[8].mxu1 %vm358_vm0, %v14719_v10  ;;  %11235 = vmatpush3.bf16.msra.mxu0 %v12461_v2  ;;  %v9635_v10 = vld [vmem:[%s12808_s13 + $0x71] sm:$0xff]  ;;  %v6933_v19 = vpack.c.bf16 %v9657_v47, %v9656_v41 }
 0x2da   : > { %11535 = vmatpush3.bf16.msra.mxu1 %v12461_v2  ;;  %11230 = vmatprep.mubr.msk.bf16.mxu0 %vm358_vm0, %v14715_v56  ;;  %v12464_v56 = vld [vmem:[%s14489_s4 + $0x158] sm:$0xff]   ;;  %v9632_v2 = vld [vmem:[%s12808_s13 + $0x41] sm:$0xff]  ;;  %v6740_v21 = vpack.c.bf16 %v9635_v10, %v9634_v14 }
 0x2db   : > { %11530 = vmatprep.mubr.msk.bf16.mxu1 %vm358_vm0, %v14720_v29  ;;  %11236 = vmatprep.subr.bf16.mxu0 %v14721_v39  ;;  %v12465_v29 = vld [vmem:[%s14489_s4 + $0x160] sm:$0xff]  }
 0x2dc   : > { %11536 = vmatprep.subr.bf16.mxu1 %v12462_v17  ;;  %v9636_v39 = vld [vmem:[%s12808_s13 + $0x81] sm:$0xff] }
 0x2dd   : > { %11237 = vmatpush3.bf16.msra.mxu0 %v12462_v17 }
 0x2de   : > { %11537 = vmatpush3.bf16.msra.mxu1 %v12462_v17  ;;  %11246 = vmatprep.subr.bf16.mxu0 %v14722_v8  ;;  %v9642_v17 = vld [vmem:[%s12819_s16 + $0x21] sm:$0xff] }
 0x2df   : > { %11546 = vmatprep.subr.bf16.mxu1 %v14722_v8 }
 0x2e0   : > { %11231 = vmatmul.mubr.msk.bf16.gmra.mrb[12].mxu0 %vm358_vm0, %v14717_v50  ;;  %v9633_v50 = vld [vmem:[%s12808_s13 + $0x51] sm:$0xff] }
 0x2e1   : > { %11531 = vmatmul.mubr.msk.bf16.gmra.mrb[12].mxu1 %vm358_vm0, %v14723_v38  ;;  %11238 = vmatprep.mubr.msk.bf16.mxu0 %vm358_vm0, %v6543_v32  ;;  %v6739_v7 = vpack.c.bf16 %v9633_v50, %v9632_v2  ;;  %v9643_v32 = vld [vmem:[%s12819_s16 + $0x31] sm:$0xff]  ;;  %v14727_v38 = vld [vmem:[#allocation42_spill] sm:$0xff] }
 0x2e2   : > { %11538 = vmatprep.mubr.msk.bf16.mxu1 %vm358_vm0, %v6641_v33  ;;  %v6835_v8 = vpack.c.bf16 %v9643_v32, %v9642_v17  ;;  %v9762_v2 = vld [vmem:[%s12819_s16 + $0x22] sm:$0xff]  ;;  %v9763_v50 = vld [vmem:[%s12819_s16 + $0x32] sm:$0xff] }
 0x2e3   : > { %v8773_v10 = vpack.c.bf16 %v9763_v50, %v9762_v2  ;;  %v9768_v17 = vld [vmem:[%s12819_s16 + $0x82] sm:$0xff]  ;;  %v9769_v32 = vld [vmem:[%s12819_s16 + $0x92] sm:$0xff] }
 0x2e8   : > { %11239 = vmatmul.mubr.msk.bf16.vlgmr.msra.gmra.mrb[8].mxu0 %vm358_vm0, %v6544_v62  ;;  %v12466_v62 = vld [vmem:[%s14489_s4 + $0x170] sm:$0xff]  }
 0x2e9   : > { %11539 = vmatmul.mubr.msk.bf16.vlgmr.msra.gmra.mrb[8].mxu1 %vm358_vm0, %v6642_v28  ;;  %11247 = vmatpush3.bf16.msra.mxu0 %v12463_v40 }
 0x2ea   : > { %11547 = vmatpush3.bf16.msra.mxu1 %v12463_v40  ;;  %11242 = vmatprep.mubr.msk.bf16.mxu0 %vm358_vm0, %v6545_v13  ;;  %v9654_v13 = vld [vmem:[%s12808_s13 + $0x22] sm:$0xff]  ;;  %v6838_v40 = vpack.c.bf16 %v9649_v52, %v9648_v34 }
 0x2eb   : > { %11542 = vmatprep.mubr.msk.bf16.mxu1 %vm358_vm0, %v6643_v3  ;;  %11248 = vmatprep.subr.bf16.mxu0 %v14724_v20 }
 0x2ec   : > { %11548 = vmatprep.subr.bf16.mxu1 %v14724_v20  ;;  %v9658_v20 = vld [vmem:[%s12808_s13 + $0x62] sm:$0xff] }
 0x2ed   : > { %11249 = vmatpush3.bf16.msra.mxu0 %v12464_v56 }
 0x2ee   : > { %11549 = vmatpush3.bf16.msra.mxu1 %v12464_v56  ;;  %11258 = vmatprep.subr.bf16.mxu0 %v14725_v61  ;;  %v9660_v56 = vld [vmem:[%s12808_s13 + $0x82] sm:$0xff] }
 0x2ef   : > { %11558 = vmatprep.subr.bf16.mxu1 %v14725_v61  ;;  %v14730_v61 = vld [vmem:[#allocation50_spill] sm:$0xff] }
 0x2f0   : > { %11243 = vmatmul.mubr.msk.bf16.gmra.mrb[12].mxu0 %vm358_vm0, %v6546_v60  ;;  %v6934_v60 = vpack.c.bf16 %v9659_v4, %v9658_v20 }
 0x2f1   : > { %11543 = vmatmul.mubr.msk.bf16.gmra.mrb[12].mxu1 %vm358_vm0, %v6644_v49  ;;  %11250 = vmatprep.mubr.msk.bf16.mxu0 %vm358_vm0, %v6641_v33  ;;  %v6741_v33 = vpack.c.bf16 %v9637_v35, %v9636_v39  ;;  %v9767_v39 = vld [vmem:[%s12819_s16 + $0x72] sm:$0xff] }
 0x2f2   : > { %11550 = vmatprep.mubr.msk.bf16.mxu1 %vm358_vm0, %v6738_v26 }
 0x2f8   : > { %11251 = vmatmul.mubr.msk.bf16.vlgmr.msra.gmra.mrb[8].mxu0 %vm358_vm0, %v6642_v28  ;;  %v14728_v28 = vld [vmem:[#allocation46_spill] sm:$0xff] }
 0x2f9   : > { %11551 = vmatmul.mubr.msk.bf16.vlgmr.msra.gmra.mrb[8].mxu1 %vm358_vm0, %v6739_v7  ;;  %11259 = vmatpush3.bf16.msra.mxu0 %v12465_v29 }
 0x2fa   : > { %11559 = vmatpush3.bf16.msra.mxu1 %v12465_v29  ;;  %11254 = vmatprep.mubr.msk.bf16.mxu0 %vm358_vm0, %v6643_v3  ;;  %v9655_v3 = vld [vmem:[%s12808_s13 + $0x32] sm:$0xff]  ;;  %v9766_v29 = vld [vmem:[%s12819_s16 + $0x62] sm:$0xff] }
 0x2fb   : > { %11554 = vmatprep.mubr.msk.bf16.mxu1 %vm358_vm0, %v6740_v21  ;;  %11260 = vmatprep.subr.bf16.mxu0 %v14726_v44  ;;  %v6932_v55 = vpack.c.bf16 %v9655_v3, %v9654_v13 }
 0x2fc   : > { %11560 = vmatprep.subr.bf16.mxu1 %v14726_v44 }
 0x2fd   : > { %11261 = vmatpush3.bf16.msra.mxu0 %v14726_v44 }
 0x2fe   : > { %11561 = vmatpush3.bf16.msra.mxu1 %v14726_v44  ;;  %11270 = vmatprep.subr.bf16.mxu0 %v14727_v38  ;;  %v8775_v44 = vpack.c.bf16 %v9767_v39, %v9766_v29 }
 0x2ff   : > { %11570 = vmatprep.subr.bf16.mxu1 %v14727_v38 }
 0x300   : > { %11255 = vmatmul.mubr.msk.bf16.gmra.mrb[12].mxu0 %vm358_vm0, %v6644_v49  ;;  %v12467_v49 = vld [vmem:[%s14489_s4 + $0x180] sm:$0xff]  }
 0x301   : > { %11555 = vmatmul.mubr.msk.bf16.gmra.mrb[12].mxu1 %vm358_vm0, %v6741_v33  ;;  %11262 = vmatprep.mubr.msk.bf16.mxu0 %vm358_vm0, %v6738_v26  ;;  %v9661_v26 = vld [vmem:[%s12808_s13 + $0x92] sm:$0xff] }
 0x302   : > { %11562 = vmatprep.mubr.msk.bf16.mxu1 %vm358_vm0, %v6835_v8  ;;  %v6935_v14 = vpack.c.bf16 %v9661_v26, %v9660_v56 }
 0x308   : > { %11263 = vmatmul.mubr.msk.bf16.vlgmr.msra.gmra.mrb[8].mxu0 %vm358_vm0, %v6739_v7  ;;  %v9764_v7 = vld [vmem:[%s12819_s16 + $0x42] sm:$0xff] }
 0x309   : > { %11563 = vmatmul.mubr.msk.bf16.vlgmr.msra.gmra.mrb[8].mxu1 %vm358_vm0, %v6836_v48  ;;  %11271 = vmatpush3.bf16.msra.mxu0 %v12466_v62 }
 0x30a   : > { %11571 = vmatpush3.bf16.msra.mxu1 %v12466_v62  ;;  %11266 = vmatprep.mubr.msk.bf16.mxu0 %vm358_vm0, %v6740_v21  ;;  %v9765_v21 = vld [vmem:[%s12819_s16 + $0x52] sm:$0xff]  ;;  %s9785_s16 = sshll.u32 %s14732_s22, 5 }
 0x30b   : > { %11566 = vmatprep.mubr.msk.bf16.mxu1 %vm358_vm0, %v6837_v9  ;;  %11272 = vmatprep.subr.bf16.mxu0 %v14728_v28  ;;  %v8774_v35 = vpack.c.bf16 %v9765_v21, %v9764_v7  ;;  %s14452_s18 = scalar_lea.vmem %s14491_s6, %s9785_s16 }
 0x30c   : > { %11572 = vmatprep.subr.bf16.mxu1 %v14728_v28 }
 0x30d   : > { %11273 = vmatpush3.bf16.msra.mxu0 %v14728_v28 }
 0x30e   : > { %11573 = vmatpush3.bf16.msra.mxu1 %v14728_v28  ;;  %11282 = vmatprep.subr.bf16.mxu0 %v14729_v5 }
 0x30f   : > { %11582 = vmatprep.subr.bf16.mxu1 %v14729_v5 }
 0x310   : > { %11267 = vmatmul.mubr.msk.bf16.gmra.mrb[12].mxu0 %vm358_vm0, %v6741_v33  ;;  %v8776_v33 = vpack.c.bf16 %v9769_v32, %v9768_v17 }
 0x311   : > { %11567 = vmatmul.mubr.msk.bf16.gmra.mrb[12].mxu1 %vm358_vm0, %v6838_v40  ;;  %11274 = vmatprep.mubr.msk.bf16.mxu0 %vm358_vm0, %v6835_v8 }
 0x312   : > { %11574 = vmatprep.mubr.msk.bf16.mxu1 %vm358_vm0, %v6932_v55 }
 0x318   : > { %11275 = vmatmul.mubr.msk.bf16.vlgmr.msra.gmra.mrb[8].mxu0 %vm358_vm0, %v6836_v48 }
 0x319   : > { %11575 = vmatmul.mubr.msk.bf16.vlgmr.msra.gmra.mrb[8].mxu1 %vm358_vm0, %v6933_v19  ;;  %11283 = vmatpush3.bf16.msra.mxu0 %v12467_v49 }
 0x31a   : > { %11583 = vmatpush3.bf16.msra.mxu1 %v12467_v49  ;;  %11278 = vmatprep.mubr.msk.bf16.mxu0 %vm358_vm0, %v6837_v9 }
 0x31b   : > { %11578 = vmatprep.mubr.msk.bf16.mxu1 %vm358_vm0, %v6934_v60  ;;  %11284 = vmatprep.subr.bf16.mxu0 %v14730_v61 }
 0x31c   : > { %11584 = vmatprep.subr.bf16.mxu1 %v14730_v61 }
 0x31d   : > { %11285 = vmatpush3.bf16.msra.mxu0 %v14730_v61 }
 0x31e   : > { %11585 = vmatpush3.bf16.msra.mxu1 %v14730_v61 }
 0x320   : > { %11279 = vmatmul.mubr.msk.bf16.gmra.mrb[12].mxu0 %vm358_vm0, %v6838_v40 }
 0x321   : > { %11579 = vmatmul.mubr.msk.bf16.gmra.mrb[12].mxu1 %vm358_vm0, %v6935_v14  ;;  %11286 = vmatprep.mubr.msk.bf16.mxu0 %vm358_vm0, %v6932_v55 }
 0x322   : > { %11586 = vmatprep.mubr.msk.bf16.mxu1 %vm358_vm0, %v8773_v10 }
 0x328   : > { %11287 = vmatmul.mubr.msk.bf16.vlgmr.msra.gmra.mrb[8].mxu0 %vm358_vm0, %v6933_v19 }
 0x329   : > { %11587 = vmatmul.mubr.msk.bf16.vlgmr.msra.gmra.mrb[8].mxu1 %vm358_vm0, %v8774_v35  ;;  %11290 = vmatprep.mubr.msk.bf16.mxu0 %vm358_vm0, %v6934_v60 }
 0x32a   : > { %11590 = vmatprep.mubr.msk.bf16.mxu1 %vm358_vm0, %v8775_v44 }
 0x330   : > { %11291 = vmatmul.mubr.msk.bf16.gmra.mrb[12].mxu0 %vm358_vm0, %v6935_v14 }
 0x331   : > { %11591 = vmatmul.mubr.msk.bf16.gmra.mrb[12].mxu1 %vm358_vm0, %v8776_v33 }
 0x3fb   : > { %v11288_v8 = vpop.f32.mrb[8].mxu0 }
 0x3fc   : > { %v7023_v38 = vmax.f32 %v5084_v12, %v11288_v8  ;;  %v11588_v36 = vpop.f32.mrb[8].mxu1  ;;  %v6982_v22 = vpop.f32.mrb[9].mxu0 }
 0x3fd   : > { %v7021_v45 = vmax.f32 %v5082_v30, %v6982_v22  ;;  %v8823_v48 = vpop.f32.mrb[9].mxu1  ;;  %v11289_v9 = vpop.f32.mrb[10].mxu0 }
 0x3fe   : > { %v8864_v62 = vmax.f32 %v7023_v38, %v11588_v36  ;;  %v7024_v34 = vmax.f32 %v5085_v37, %v11289_v9  ;;  %v11589_v52 = vpop.f32.mrb[10].mxu1  ;;  %v6985_v58 = vpop.f32.mrb[11].mxu0 }
 0x3ff   : > { %v8862_v6 = vmax.f32 %v7021_v45, %v8823_v48  ;;  %v7022_v12 = vmax.f32 %v5083_v51, %v6985_v58  ;;  %v8826_v28 = vpop.f32.mrb[11].mxu1 }
 0x400   : > { %v8879_v13 = vadd.f32 %v9774_v27, %v8864_v62  ;;  %v8865_v3 = vmax.f32 %v7024_v34, %v11589_v52 }
 0x401   : > { %v8877_v11 = vadd.f32 %v9774_v27, %v8862_v6  ;;  %v8863_v16 = vmax.f32 %v7022_v12, %v8826_v28 }
 0x402   : > { %v8887_v30 = vmax.f32 %v8879_v13, 0.0  ;;  %v8880_v40 = vadd.f32 %v9774_v27, %v8865_v3 }
 0x403   : > { %v8885_v23 = vmax.f32 %v8877_v11, 0.0  ;;  %v8878_v24 = vadd.f32 %v9774_v27, %v8863_v16  ;;  %v11292_v37 = vpop.f32.mrb[12].mxu0 }
 0x404   : > { %v9788_v31 = vpack.c.bf16 %v8887_v30, %v8887_v30  ;;  %v8888_v42 = vmax.f32 %v8880_v40, 0.0  ;;  %v7027_v51 = vmax.f32 %v5088_v0, %v11292_v37  ;;  %v11592_v55 = vpop.f32.mrb[12].mxu1  ;;  %v6998_v5 = vpop.f32.mrb[13].mxu0 }
 0x405   : > { %v9786_v41 = vpack.c.bf16 %v8885_v23, %v8885_v23  ;;  %v8886_v47 = vmax.f32 %v8878_v24, 0.0  ;;  %v7025_v20 = vmax.f32 %v5086_v46, %v6998_v5  ;;  %v8839_v4 = vpop.f32.mrb[13].mxu1  ;;  %v11293_v19 = vpop.f32.mrb[14].mxu0 }
 0x406   : > { %8928 = vst.msk [vmem:[%s14452_s18 + $0x8] sm:$0xf] %vm8925_vm1, %v9788_v31  ;;  %v9789_v60 = vpack.c.bf16 %v8888_v42, %v8888_v42  ;;  %v8868_v49 = vmax.f32 %v7027_v51, %v11592_v55  ;;  %v7028_v53 = vmax.f32 %v5089_v15, %v11293_v19  ;;  %v11593_v54 = vpop.f32.mrb[14].mxu1  ;;  %v7001_v0 = vpop.f32.mrb[15].mxu0 }
 0x407   : > { %8926 = vst.msk [vmem:[%s14452_s18] sm:$0xf] %vm8925_vm1, %v9786_v41  ;;  %v9787_v56 = vpack.c.bf16 %v8886_v47, %v8886_v47  ;;  %v8866_v26 = vmax.f32 %v7025_v20, %v8839_v4  ;;  %v7026_v63 = vmax.f32 %v5087_v57, %v7001_v0  ;;  %v8842_v59 = vpop.f32.mrb[15].mxu1 }
 0x408   : > { %8929 = vst.msk [vmem:[%s14452_s18 + $0xc] sm:$0xf] %vm8925_vm1, %v9789_v60  ;;  %v8883_v46 = vadd.f32 %v9774_v27, %v8868_v49  ;;  %v8869_v61 = vmax.f32 %v7028_v53, %v11593_v54 }
 0x409   : > { %8927 = vst.msk [vmem:[%s14452_s18 + $0x4] sm:$0xf] %vm8925_vm1, %v9787_v56  ;;  %v8881_v18 = vadd.f32 %v9774_v27, %v8866_v26  ;;  %v8867_v25 = vmax.f32 %v7026_v63, %v8842_v59 }
 0x40a   : > { %v8891_v15 = vmax.f32 %v8883_v46, 0.0  ;;  %v8884_v2 = vadd.f32 %v9774_v27, %v8869_v61 }
 0x40b   : > { %v8889_v50 = vmax.f32 %v8881_v18, 0.0  ;;  %v8882_v14 = vadd.f32 %v9774_v27, %v8867_v25 }
 0x40c   : > { %v9792_v10 = vpack.c.bf16 %v8891_v15, %v8891_v15  ;;  %v8892_v43 = vmax.f32 %v8884_v2, 0.0 }
 0x40d   : > { %v9790_v1 = vpack.c.bf16 %v8889_v50, %v8889_v50  ;;  %v8890_v57 = vmax.f32 %v8882_v14, 0.0 }
 0x40e   : > { %8932 = vst.msk [vmem:[%s14452_s18 + $0x18] sm:$0xf] %vm8925_vm1, %v9792_v10  ;;  %v9793_v7 = vpack.c.bf16 %v8892_v43, %v8892_v43 }
 0x40f   : > { %8930 = vst.msk [vmem:[%s14452_s18 + $0x10] sm:$0xf] %vm8925_vm1, %v9790_v1  ;;  %v9791_v21 = vpack.c.bf16 %v8890_v57, %v8890_v57 }
 0x410   : > { %8933 = vst.msk [vmem:[%s14452_s18 + $0x1c] sm:$0xf] %vm8925_vm1, %v9793_v7 }
 0x411   : > { %8931 = vst.msk [vmem:[%s14452_s18 + $0x14] sm:$0xf] %vm8925_vm1, %v9791_v21 }
 0x412 PF: > { %s16_s21 = sadd.s32 1, %s12474_s21  }
 0x413   : > { %p13_p4 = scmp.ge.s32.totalorder %s16_s21, 4  }
 0x415   :  { %15 = sbr.rel (!%p13_p4) target bundleno = 1 (0x1), region = 115 }

</bundles_post_ra>
